<compile_context>
chip_gen: v5e
topology: v5e:2x2
jax: 0.10.0
libtpu: 0.0.40
codegen_flags: <defaults>
</compile_context>

<pallas_src>
import functools

import jax
import jax.numpy as jnp
from jax import lax
from jax.experimental import pallas as pl
from jax.experimental.pallas import tpu as pltpu

_NEG_SLOPE = 0.01   # nn.LeakyReLU default negative_slope
_BN_EPS = 1e-5      # nn.BatchNorm2d default eps


# ----------------------------- kernel helpers -----------------------------

def _pad_hw_1(x):
    """Zero-pad a (C, H, W) tile by 1 on each spatial side (concat-based)."""
    c, h, w = x.shape
    zw = jnp.zeros((c, h, 1), x.dtype)
    x = jnp.concatenate([zw, x, zw], axis=2)
    zh = jnp.zeros((c, 1, w + 2), x.dtype)
    return jnp.concatenate([zh, x, zh], axis=1)


def _conv3x3_bias_lrelu(x, w_ref, bias):
    """3x3 conv (padding=1) + folded-BN bias + LeakyReLU on a (C_in, H, W) tile.

    w_ref : (3, 3, C_out, C_in) ref, BN scale already folded into the weights.
    bias  : (C_out, 1) array, conv bias + BN shift folded.
    """
    c_in, h, w = x.shape
    c_out = w_ref.shape[2]
    xp = _pad_hw_1(x)                                        # (C_in, H+2, W+2)
    acc = jnp.zeros((c_out, h * w), jnp.float32)
    for dy in range(3):
        for dx in range(3):
            win = xp[:, dy:dy + h, dx:dx + w].reshape(c_in, h * w)
            tap = w_ref[dy, dx].astype(jnp.float32)          # (C_out, C_in)
            acc = acc + jnp.dot(tap, win, preferred_element_type=jnp.float32)
    acc = acc + bias                                         # (C_out, 1) broadcast
    acc = jnp.where(acc >= 0, acc, _NEG_SLOPE * acc)         # LeakyReLU
    return acc.reshape(c_out, h, w)


def _maxpool2x2(x):
    """2x2 / stride-2 max pool on a (C, H, W) tile."""
    return jnp.maximum(jnp.maximum(x[:, 0::2, 0::2], x[:, 0::2, 1::2]),
                       jnp.maximum(x[:, 1::2, 0::2], x[:, 1::2, 1::2]))


def _conv_block_kernel(x_ref, w1_ref, b1_ref, w2_ref, b2_ref, o_ref, *, pool):
    x = x_ref[0].astype(jnp.float32)                         # (C_in, H, W)
    if pool:
        x = _maxpool2x2(x)
    y = _conv3x3_bias_lrelu(x, w1_ref, b1_ref[...])
    # TODO(synk): nn.Dropout between the convs is identity here (eval-mode forward).
    y = _conv3x3_bias_lrelu(y, w2_ref, b2_ref[...])
    o_ref[0] = y.astype(o_ref.dtype)


# --------------------------- pallas_call wrappers --------------------------

def _conv_block(x, params, *, pool):
    """Fused (maxpool?) + Conv/BN/LeakyReLU x2 for one encoder stage."""
    w1, b1, w2, b2 = params
    n, c_in, h, w = x.shape
    h_o, w_o = (h // 2, w // 2) if pool else (h, w)
    c_out = w1.shape[2]
    kernel = functools.partial(_conv_block_kernel, pool=pool)
    # NOTE: for UNet-scale feature maps, add a grid axis over H (block
    # (1, C, h_tile, W)) so double-buffered blocks fit the 16/32 MiB scoped
    # VMEM budgets; at these demo shapes the full per-batch block is tiny.
    return pl.pallas_call(
        kernel,
        out_shape=jax.ShapeDtypeStruct((n, c_out, h_o, w_o), x.dtype),
        grid_spec=pltpu.PrefetchScalarGridSpec(
            num_scalar_prefetch=0,
            grid=(n,),
            in_specs=[
                pl.BlockSpec((1, c_in, h, w), lambda b: (b, 0, 0, 0)),
                pl.BlockSpec((3, 3, c_out, c_in), lambda b: (0, 0, 0, 0)),
                pl.BlockSpec((c_out, 1), lambda b: (0, 0)),
                pl.BlockSpec((3, 3, c_out, c_out), lambda b: (0, 0, 0, 0)),
                pl.BlockSpec((c_out, 1), lambda b: (0, 0)),
            ],
            out_specs=pl.BlockSpec((1, c_out, h_o, w_o), lambda b: (b, 0, 0, 0)),
        ),
        compiler_params=pltpu.CompilerParams(
            dimension_semantics=("parallel",),   # batch axis -> megacore sharding
        ),
    )(x, w1, b1, w2, b2)


def encoder_forward(x, params):
    """Pallas Encoder.forward: returns [x0, x1, x2, x3, x4]."""
    x0 = _conv_block(x, params["in_conv"], pool=False)
    x1 = _conv_block(x0, params["down1"], pool=True)
    x2 = _conv_block(x1, params["down2"], pool=True)
    x3 = _conv_block(x2, params["down3"], pool=True)
    x4 = _conv_block(x3, params["down4"], pool=True)
    return [x0, x1, x2, x3, x4]


# ------------------------ parameter init + BN folding ----------------------

def _init_conv_bn(key, c_in, c_out):
    kw, kb, kg, kbt, km, kv = jax.random.split(key, 6)
    w = 0.1 * jax.random.normal(kw, (c_out, c_in, 3, 3), jnp.float32)   # OIHW
    b = 0.1 * jax.random.normal(kb, (c_out,), jnp.float32)
    gamma = 1.0 + 0.1 * jax.random.normal(kg, (c_out,), jnp.float32)
    beta = 0.1 * jax.random.normal(kbt, (c_out,), jnp.float32)
    mean = 0.1 * jax.random.normal(km, (c_out,), jnp.float32)
    var = 1.0 + 0.1 * jax.random.uniform(kv, (c_out,), jnp.float32)
    # TODO(synk): BatchNorm uses folded running statistics (eval mode);
    # train-mode batch statistics are not implemented.
    s = gamma / jnp.sqrt(var + _BN_EPS)
    w_f = w * s[:, None, None, None]
    b_f = (b - mean) * s + beta
    # Kernel layout: weights (kh, kw, C_out, C_in), bias (C_out, 1).
    return jnp.transpose(w_f, (2, 3, 0, 1)), b_f.reshape(c_out, 1)


def _init_block(key, c_in, c_out):
    k1, k2 = jax.random.split(key)
    w1, b1 = _init_conv_bn(k1, c_in, c_out)
    w2, b2 = _init_conv_bn(k2, c_out, c_out)
    return (w1, b1, w2, b2)


def init_encoder_params(key, in_chns, ft_chns):
    assert len(ft_chns) == 5
    keys = jax.random.split(key, 5)
    return {
        "in_conv": _init_block(keys[0], in_chns, ft_chns[0]),
        "down1": _init_block(keys[1], ft_chns[0], ft_chns[1]),
        "down2": _init_block(keys[2], ft_chns[1], ft_chns[2]),
        "down3": _init_block(keys[3], ft_chns[2], ft_chns[3]),
        "down4": _init_block(keys[4], ft_chns[3], ft_chns[4]),
    }


# ------------------------------ pure-JAX reference -------------------------

def _ref_conv_bias_lrelu(x, w, b):
    w_oihw = jnp.transpose(w, (2, 3, 0, 1))
    y = lax.conv_general_dilated(
        x, w_oihw, window_strides=(1, 1), padding=((1, 1), (1, 1)),
        dimension_numbers=("NCHW", "OIHW", "NCHW"))
    y = y + b.reshape(1, -1, 1, 1)
    return jnp.where(y >= 0, y, _NEG_SLOPE * y)


def _ref_conv_block(x, params, pool):
    w1, b1, w2, b2 = params
    if pool:
        x = lax.reduce_window(x, -jnp.inf, lax.max,
                              (1, 1, 2, 2), (1, 1, 2, 2), "VALID")
    x = _ref_conv_bias_lrelu(x, w1, b1)
    return _ref_conv_bias_lrelu(x, w2, b2)


def _ref_encoder(x, params):
    names = ["in_conv", "down1", "down2", "down3", "down4"]
    outs, cur = [], x
    for i, nm in enumerate(names):
        cur = _ref_conv_block(cur, params[nm], pool=(i > 0))
        outs.append(cur)
    return outs


# ----------------------------------- main -----------------------------------

if __name__ == "__main__":
    key = jax.random.PRNGKey(0)
    kx, kp = jax.random.split(key)

    in_chns = 4
    ft_chns = [8, 16, 16, 32, 32]
    x = jax.random.normal(kx, (2, in_chns, 16, 16), dtype=jnp.float32)
    params = init_encoder_params(kp, in_chns, ft_chns)

    outs = encoder_forward(x, params)
    outs = jax.block_until_ready(outs)

    refs = _ref_encoder(x, params)
    expected_shapes = [
        (2, ft_chns[0], 16, 16),
        (2, ft_chns[1], 8, 8),
        (2, ft_chns[2], 4, 4),
        (2, ft_chns[3], 2, 2),
        (2, ft_chns[4], 1, 1),
    ]
    for o, r, s in zip(outs, refs, expected_shapes):
        assert o.shape == s, (o.shape, s)
        assert o.dtype == x.dtype
        assert bool(jnp.allclose(o, r, atol=1e-3, rtol=1e-3)), \
            float(jnp.max(jnp.abs(o - r)))

    print("KERNEL_OK")
</pallas_src>

<mosaic_0001>
module attributes {stable_mosaic.version = 11 : i64} {
  func.func @_conv_block_kernel(%arg0: i32, %arg1: memref<1x4x16x16xf32, #tpu.memory_space<vmem>>, %arg2: memref<3x3x8x4xf32, #tpu.memory_space<vmem>>, %arg3: memref<8x1xf32, #tpu.memory_space<vmem>>, %arg4: memref<3x3x8x8xf32, #tpu.memory_space<vmem>>, %arg5: memref<8x1xf32, #tpu.memory_space<vmem>>, %arg6: memref<1x8x16x16xf32, #tpu.memory_space<vmem>>) attributes {dimension_semantics = [#tpu.dimension_semantics<parallel>], iteration_bounds = array<i64: 2>, scalar_prefetch = 0 : i64, scratch_operands = 0 : i64, tpu.core_type = #tpu.core_type<tc>, window_params = [{transform_indices = @transform_0, window_bounds = array<i64: 1, 4, 16, 16>}, {pipeline_mode = #tpu.pipeline_mode<synchronous>, transform_indices = @transform_1, window_bounds = array<i64: 3, 3, 8, 4>}, {pipeline_mode = #tpu.pipeline_mode<synchronous>, transform_indices = @transform_2, window_bounds = array<i64: 8, 1>}, {pipeline_mode = #tpu.pipeline_mode<synchronous>, transform_indices = @transform_3, window_bounds = array<i64: 3, 3, 8, 8>}, {pipeline_mode = #tpu.pipeline_mode<synchronous>, transform_indices = @transform_4, window_bounds = array<i64: 8, 1>}, {transform_indices = @transform_5, window_bounds = array<i64: 1, 8, 16, 16>}]} {
    %c0 = arith.constant 0 : index
    %c0_0 = arith.constant 0 : index
    %c0_1 = arith.constant 0 : index
    %c0_2 = arith.constant 0 : index
    %0 = vector.load %arg1[%c0, %c0_0, %c0_1, %c0_2] : memref<1x4x16x16xf32, #tpu.memory_space<vmem>>, vector<1x4x16x16xf32>
    %1 = vector.shape_cast %0 : vector<1x4x16x16xf32> to vector<4x16x16xf32>
    %c0_3 = arith.constant 0 : index
    %c0_4 = arith.constant 0 : index
    %2 = vector.load %arg3[%c0_3, %c0_4] : memref<8x1xf32, #tpu.memory_space<vmem>>, vector<8x1xf32>
    %cst = arith.constant 0.000000e+00 : f32
    %3 = vector.broadcast %cst : f32 to vector<4x16x1xf32>
    %4 = tpu.concatenate %3, %1, %3 in 2 : vector<4x16x1xf32>, vector<4x16x16xf32>, vector<4x16x1xf32> -> vector<4x16x18xf32>
    %cst_5 = arith.constant 0.000000e+00 : f32
    %5 = vector.broadcast %cst_5 : f32 to vector<4x1x18xf32>
    %6 = tpu.concatenate %5, %4, %5 in 1 : vector<4x1x18xf32>, vector<4x16x18xf32>, vector<4x1x18xf32> -> vector<4x18x18xf32>
    %cst_6 = arith.constant 0.000000e+00 : f32
    %7 = vector.broadcast %cst_6 : f32 to vector<8x256xf32>
    %8 = vector.extract_strided_slice %6 {offsets = [0, 0, 0], sizes = [4, 16, 16], strides = [1, 1, 1]} : vector<4x18x18xf32> to vector<4x16x16xf32>
    %9 = vector.shape_cast %8 : vector<4x16x16xf32> to vector<4x256xf32>
    %c0_7 = arith.constant 0 : index
    %c0_8 = arith.constant 0 : index
    %c0_9 = arith.constant 0 : index
    %c0_10 = arith.constant 0 : index
    %10 = vector.load %arg2[%c0_7, %c0_8, %c0_9, %c0_10] : memref<3x3x8x4xf32, #tpu.memory_space<vmem>>, vector<1x1x8x4xf32>
    %11 = vector.shape_cast %10 : vector<1x1x8x4xf32> to vector<8x4xf32>
    %cst_11 = arith.constant dense<0.000000e+00> : vector<8x256xf32>
    %12 = tpu.matmul %11, %9, %cst_11 {dimension_numbers = #tpu.dot_dimension_numbers<[1], [0], [0], [1], [0, 0, 1, 1], [], []>} : vector<8x4xf32>, vector<4x256xf32>, vector<8x256xf32> -> vector<8x256xf32>
    %13 = arith.addf %7, %12 : vector<8x256xf32>
    %14 = vector.extract_strided_slice %6 {offsets = [0, 0, 1], sizes = [4, 16, 16], strides = [1, 1, 1]} : vector<4x18x18xf32> to vector<4x16x16xf32>
    %15 = vector.shape_cast %14 : vector<4x16x16xf32> to vector<4x256xf32>
    %c0_12 = arith.constant 0 : index
    %c1 = arith.constant 1 : index
    %c0_13 = arith.constant 0 : index
    %c0_14 = arith.constant 0 : index
    %16 = vector.load %arg2[%c0_12, %c1, %c0_13, %c0_14] : memref<3x3x8x4xf32, #tpu.memory_space<vmem>>, vector<1x1x8x4xf32>
    %17 = vector.shape_cast %16 : vector<1x1x8x4xf32> to vector<8x4xf32>
    %cst_15 = arith.constant dense<0.000000e+00> : vector<8x256xf32>
    %18 = tpu.matmul %17, %15, %cst_15 {dimension_numbers = #tpu.dot_dimension_numbers<[1], [0], [0], [1], [0, 0, 1, 1], [], []>} : vector<8x4xf32>, vector<4x256xf32>, vector<8x256xf32> -> vector<8x256xf32>
    %19 = arith.addf %13, %18 : vector<8x256xf32>
    %20 = vector.extract_strided_slice %6 {offsets = [0, 0, 2], sizes = [4, 16, 16], strides = [1, 1, 1]} : vector<4x18x18xf32> to vector<4x16x16xf32>
    %21 = vector.shape_cast %20 : vector<4x16x16xf32> to vector<4x256xf32>
    %c0_16 = arith.constant 0 : index
    %c2 = arith.constant 2 : index
    %c0_17 = arith.constant 0 : index
    %c0_18 = arith.constant 0 : index
    %22 = vector.load %arg2[%c0_16, %c2, %c0_17, %c0_18] : memref<3x3x8x4xf32, #tpu.memory_space<vmem>>, vector<1x1x8x4xf32>
    %23 = vector.shape_cast %22 : vector<1x1x8x4xf32> to vector<8x4xf32>
    %cst_19 = arith.constant dense<0.000000e+00> : vector<8x256xf32>
    %24 = tpu.matmul %23, %21, %cst_19 {dimension_numbers = #tpu.dot_dimension_numbers<[1], [0], [0], [1], [0, 0, 1, 1], [], []>} : vector<8x4xf32>, vector<4x256xf32>, vector<8x256xf32> -> vector<8x256xf32>
    %25 = arith.addf %19, %24 : vector<8x256xf32>
    %26 = vector.extract_strided_slice %6 {offsets = [0, 1, 0], sizes = [4, 16, 16], strides = [1, 1, 1]} : vector<4x18x18xf32> to vector<4x16x16xf32>
    %27 = vector.shape_cast %26 : vector<4x16x16xf32> to vector<4x256xf32>
    %c1_20 = arith.constant 1 : index
    %c0_21 = arith.constant 0 : index
    %c0_22 = arith.constant 0 : index
    %c0_23 = arith.constant 0 : index
    %28 = vector.load %arg2[%c1_20, %c0_21, %c0_22, %c0_23] : memref<3x3x8x4xf32, #tpu.memory_space<vmem>>, vector<1x1x8x4xf32>
    %29 = vector.shape_cast %28 : vector<1x1x8x4xf32> to vector<8x4xf32>
    %cst_24 = arith.constant dense<0.000000e+00> : vector<8x256xf32>
    %30 = tpu.matmul %29, %27, %cst_24 {dimension_numbers = #tpu.dot_dimension_numbers<[1], [0], [0], [1], [0, 0, 1, 1], [], []>} : vector<8x4xf32>, vector<4x256xf32>, vector<8x256xf32> -> vector<8x256xf32>
    %31 = arith.addf %25, %30 : vector<8x256xf32>
    %32 = vector.extract_strided_slice %6 {offsets = [0, 1, 1], sizes = [4, 16, 16], strides = [1, 1, 1]} : vector<4x18x18xf32> to vector<4x16x16xf32>
    %33 = vector.shape_cast %32 : vector<4x16x16xf32> to vector<4x256xf32>
    %c1_25 = arith.constant 1 : index
    %c1_26 = arith.constant 1 : index
    %c0_27 = arith.constant 0 : index
    %c0_28 = arith.constant 0 : index
    %34 = vector.load %arg2[%c1_25, %c1_26, %c0_27, %c0_28] : memref<3x3x8x4xf32, #tpu.memory_space<vmem>>, vector<1x1x8x4xf32>
    %35 = vector.shape_cast %34 : vector<1x1x8x4xf32> to vector<8x4xf32>
    %cst_29 = arith.constant dense<0.000000e+00> : vector<8x256xf32>
    %36 = tpu.matmul %35, %33, %cst_29 {dimension_numbers = #tpu.dot_dimension_numbers<[1], [0], [0], [1], [0, 0, 1, 1], [], []>} : vector<8x4xf32>, vector<4x256xf32>, vector<8x256xf32> -> vector<8x256xf32>
    %37 = arith.addf %31, %36 : vector<8x256xf32>
    %38 = vector.extract_strided_slice %6 {offsets = [0, 1, 2], sizes = [4, 16, 16], strides = [1, 1, 1]} : vector<4x18x18xf32> to vector<4x16x16xf32>
    %39 = vector.shape_cast %38 : vector<4x16x16xf32> to vector<4x256xf32>
    %c1_30 = arith.constant 1 : index
    %c2_31 = arith.constant 2 : index
    %c0_32 = arith.constant 0 : index
    %c0_33 = arith.constant 0 : index
    %40 = vector.load %arg2[%c1_30, %c2_31, %c0_32, %c0_33] : memref<3x3x8x4xf32, #tpu.memory_space<vmem>>, vector<1x1x8x4xf32>
    %41 = vector.shape_cast %40 : vector<1x1x8x4xf32> to vector<8x4xf32>
    %cst_34 = arith.constant dense<0.000000e+00> : vector<8x256xf32>
    %42 = tpu.matmul %41, %39, %cst_34 {dimension_numbers = #tpu.dot_dimension_numbers<[1], [0], [0], [1], [0, 0, 1, 1], [], []>} : vector<8x4xf32>, vector<4x256xf32>, vector<8x256xf32> -> vector<8x256xf32>
    %43 = arith.addf %37, %42 : vector<8x256xf32>
    %44 = vector.extract_strided_slice %6 {offsets = [0, 2, 0], sizes = [4, 16, 16], strides = [1, 1, 1]} : vector<4x18x18xf32> to vector<4x16x16xf32>
    %45 = vector.shape_cast %44 : vector<4x16x16xf32> to vector<4x256xf32>
    %c2_35 = arith.constant 2 : index
    %c0_36 = arith.constant 0 : index
    %c0_37 = arith.constant 0 : index
    %c0_38 = arith.constant 0 : index
    %46 = vector.load %arg2[%c2_35, %c0_36, %c0_37, %c0_38] : memref<3x3x8x4xf32, #tpu.memory_space<vmem>>, vector<1x1x8x4xf32>
    %47 = vector.shape_cast %46 : vector<1x1x8x4xf32> to vector<8x4xf32>
    %cst_39 = arith.constant dense<0.000000e+00> : vector<8x256xf32>
    %48 = tpu.matmul %47, %45, %cst_39 {dimension_numbers = #tpu.dot_dimension_numbers<[1], [0], [0], [1], [0, 0, 1, 1], [], []>} : vector<8x4xf32>, vector<4x256xf32>, vector<8x256xf32> -> vector<8x256xf32>
    %49 = arith.addf %43, %48 : vector<8x256xf32>
    %50 = vector.extract_strided_slice %6 {offsets = [0, 2, 1], sizes = [4, 16, 16], strides = [1, 1, 1]} : vector<4x18x18xf32> to vector<4x16x16xf32>
    %51 = vector.shape_cast %50 : vector<4x16x16xf32> to vector<4x256xf32>
    %c2_40 = arith.constant 2 : index
    %c1_41 = arith.constant 1 : index
    %c0_42 = arith.constant 0 : index
    %c0_43 = arith.constant 0 : index
    %52 = vector.load %arg2[%c2_40, %c1_41, %c0_42, %c0_43] : memref<3x3x8x4xf32, #tpu.memory_space<vmem>>, vector<1x1x8x4xf32>
    %53 = vector.shape_cast %52 : vector<1x1x8x4xf32> to vector<8x4xf32>
    %cst_44 = arith.constant dense<0.000000e+00> : vector<8x256xf32>
    %54 = tpu.matmul %53, %51, %cst_44 {dimension_numbers = #tpu.dot_dimension_numbers<[1], [0], [0], [1], [0, 0, 1, 1], [], []>} : vector<8x4xf32>, vector<4x256xf32>, vector<8x256xf32> -> vector<8x256xf32>
    %55 = arith.addf %49, %54 : vector<8x256xf32>
    %56 = vector.extract_strided_slice %6 {offsets = [0, 2, 2], sizes = [4, 16, 16], strides = [1, 1, 1]} : vector<4x18x18xf32> to vector<4x16x16xf32>
    %57 = vector.shape_cast %56 : vector<4x16x16xf32> to vector<4x256xf32>
    %c2_45 = arith.constant 2 : index
    %c2_46 = arith.constant 2 : index
    %c0_47 = arith.constant 0 : index
    %c0_48 = arith.constant 0 : index
    %58 = vector.load %arg2[%c2_45, %c2_46, %c0_47, %c0_48] : memref<3x3x8x4xf32, #tpu.memory_space<vmem>>, vector<1x1x8x4xf32>
    %59 = vector.shape_cast %58 : vector<1x1x8x4xf32> to vector<8x4xf32>
    %cst_49 = arith.constant dense<0.000000e+00> : vector<8x256xf32>
    %60 = tpu.matmul %59, %57, %cst_49 {dimension_numbers = #tpu.dot_dimension_numbers<[1], [0], [0], [1], [0, 0, 1, 1], [], []>} : vector<8x4xf32>, vector<4x256xf32>, vector<8x256xf32> -> vector<8x256xf32>
    %61 = arith.addf %55, %60 : vector<8x256xf32>
    %62 = vector.broadcast %2 : vector<8x1xf32> to vector<8x256xf32>
    %63 = arith.addf %61, %62 : vector<8x256xf32>
    %cst_50 = arith.constant 0.000000e+00 : f32
    %64 = vector.broadcast %cst_50 : f32 to vector<8x256xf32>
    %65 = arith.cmpf oge, %63, %64 : vector<8x256xf32>
    %cst_51 = arith.constant 0.00999999977 : f32
    %66 = vector.broadcast %cst_51 : f32 to vector<8x256xf32>
    %67 = arith.mulf %66, %63 : vector<8x256xf32>
    %68 = arith.select %65, %63, %67 : vector<8x256xi1>, vector<8x256xf32>
    %69 = vector.shape_cast %68 : vector<8x256xf32> to vector<8x16x16xf32>
    %c0_52 = arith.constant 0 : index
    %c0_53 = arith.constant 0 : index
    %70 = vector.load %arg5[%c0_52, %c0_53] : memref<8x1xf32, #tpu.memory_space<vmem>>, vector<8x1xf32>
    %cst_54 = arith.constant 0.000000e+00 : f32
    %71 = vector.broadcast %cst_54 : f32 to vector<8x16x1xf32>
    %72 = tpu.concatenate %71, %69, %71 in 2 : vector<8x16x1xf32>, vector<8x16x16xf32>, vector<8x16x1xf32> -> vector<8x16x18xf32>
    %cst_55 = arith.constant 0.000000e+00 : f32
    %73 = vector.broadcast %cst_55 : f32 to vector<8x1x18xf32>
    %74 = tpu.concatenate %73, %72, %73 in 1 : vector<8x1x18xf32>, vector<8x16x18xf32>, vector<8x1x18xf32> -> vector<8x18x18xf32>
    %cst_56 = arith.constant 0.000000e+00 : f32
    %75 = vector.broadcast %cst_56 : f32 to vector<8x256xf32>
    %76 = vector.extract_strided_slice %74 {offsets = [0, 0, 0], sizes = [8, 16, 16], strides = [1, 1, 1]} : vector<8x18x18xf32> to vector<8x16x16xf32>
    %77 = vector.shape_cast %76 : vector<8x16x16xf32> to vector<8x256xf32>
    %c0_57 = arith.constant 0 : index
    %c0_58 = arith.constant 0 : index
    %c0_59 = arith.constant 0 : index
    %c0_60 = arith.constant 0 : index
    %78 = vector.load %arg4[%c0_57, %c0_58, %c0_59, %c0_60] : memref<3x3x8x8xf32, #tpu.memory_space<vmem>>, vector<1x1x8x8xf32>
    %79 = vector.shape_cast %78 : vector<1x1x8x8xf32> to vector<8x8xf32>
    %cst_61 = arith.constant dense<0.000000e+00> : vector<8x256xf32>
    %80 = tpu.matmul %79, %77, %cst_61 {dimension_numbers = #tpu.dot_dimension_numbers<[1], [0], [0], [1], [0, 0, 1, 1], [], []>} : vector<8x8xf32>, vector<8x256xf32>, vector<8x256xf32> -> vector<8x256xf32>
    %81 = arith.addf %75, %80 : vector<8x256xf32>
    %82 = vector.extract_strided_slice %74 {offsets = [0, 0, 1], sizes = [8, 16, 16], strides = [1, 1, 1]} : vector<8x18x18xf32> to vector<8x16x16xf32>
    %83 = vector.shape_cast %82 : vector<8x16x16xf32> to vector<8x256xf32>
    %c0_62 = arith.constant 0 : index
    %c1_63 = arith.constant 1 : index
    %c0_64 = arith.constant 0 : index
    %c0_65 = arith.constant 0 : index
    %84 = vector.load %arg4[%c0_62, %c1_63, %c0_64, %c0_65] : memref<3x3x8x8xf32, #tpu.memory_space<vmem>>, vector<1x1x8x8xf32>
    %85 = vector.shape_cast %84 : vector<1x1x8x8xf32> to vector<8x8xf32>
    %cst_66 = arith.constant dense<0.000000e+00> : vector<8x256xf32>
    %86 = tpu.matmul %85, %83, %cst_66 {dimension_numbers = #tpu.dot_dimension_numbers<[1], [0], [0], [1], [0, 0, 1, 1], [], []>} : vector<8x8xf32>, vector<8x256xf32>, vector<8x256xf32> -> vector<8x256xf32>
    %87 = arith.addf %81, %86 : vector<8x256xf32>
    %88 = vector.extract_strided_slice %74 {offsets = [0, 0, 2], sizes = [8, 16, 16], strides = [1, 1, 1]} : vector<8x18x18xf32> to vector<8x16x16xf32>
    %89 = vector.shape_cast %88 : vector<8x16x16xf32> to vector<8x256xf32>
    %c0_67 = arith.constant 0 : index
    %c2_68 = arith.constant 2 : index
    %c0_69 = arith.constant 0 : index
    %c0_70 = arith.constant 0 : index
    %90 = vector.load %arg4[%c0_67, %c2_68, %c0_69, %c0_70] : memref<3x3x8x8xf32, #tpu.memory_space<vmem>>, vector<1x1x8x8xf32>
    %91 = vector.shape_cast %90 : vector<1x1x8x8xf32> to vector<8x8xf32>
    %cst_71 = arith.constant dense<0.000000e+00> : vector<8x256xf32>
    %92 = tpu.matmul %91, %89, %cst_71 {dimension_numbers = #tpu.dot_dimension_numbers<[1], [0], [0], [1], [0, 0, 1, 1], [], []>} : vector<8x8xf32>, vector<8x256xf32>, vector<8x256xf32> -> vector<8x256xf32>
    %93 = arith.addf %87, %92 : vector<8x256xf32>
    %94 = vector.extract_strided_slice %74 {offsets = [0, 1, 0], sizes = [8, 16, 16], strides = [1, 1, 1]} : vector<8x18x18xf32> to vector<8x16x16xf32>
    %95 = vector.shape_cast %94 : vector<8x16x16xf32> to vector<8x256xf32>
    %c1_72 = arith.constant 1 : index
    %c0_73 = arith.constant 0 : index
    %c0_74 = arith.constant 0 : index
    %c0_75 = arith.constant 0 : index
    %96 = vector.load %arg4[%c1_72, %c0_73, %c0_74, %c0_75] : memref<3x3x8x8xf32, #tpu.memory_space<vmem>>, vector<1x1x8x8xf32>
    %97 = vector.shape_cast %96 : vector<1x1x8x8xf32> to vector<8x8xf32>
    %cst_76 = arith.constant dense<0.000000e+00> : vector<8x256xf32>
    %98 = tpu.matmul %97, %95, %cst_76 {dimension_numbers = #tpu.dot_dimension_numbers<[1], [0], [0], [1], [0, 0, 1, 1], [], []>} : vector<8x8xf32>, vector<8x256xf32>, vector<8x256xf32> -> vector<8x256xf32>
    %99 = arith.addf %93, %98 : vector<8x256xf32>
    %100 = vector.extract_strided_slice %74 {offsets = [0, 1, 1], sizes = [8, 16, 16], strides = [1, 1, 1]} : vector<8x18x18xf32> to vector<8x16x16xf32>
    %101 = vector.shape_cast %100 : vector<8x16x16xf32> to vector<8x256xf32>
    %c1_77 = arith.constant 1 : index
    %c1_78 = arith.constant 1 : index
    %c0_79 = arith.constant 0 : index
    %c0_80 = arith.constant 0 : index
    %102 = vector.load %arg4[%c1_77, %c1_78, %c0_79, %c0_80] : memref<3x3x8x8xf32, #tpu.memory_space<vmem>>, vector<1x1x8x8xf32>
    %103 = vector.shape_cast %102 : vector<1x1x8x8xf32> to vector<8x8xf32>
    %cst_81 = arith.constant dense<0.000000e+00> : vector<8x256xf32>
    %104 = tpu.matmul %103, %101, %cst_81 {dimension_numbers = #tpu.dot_dimension_numbers<[1], [0], [0], [1], [0, 0, 1, 1], [], []>} : vector<8x8xf32>, vector<8x256xf32>, vector<8x256xf32> -> vector<8x256xf32>
    %105 = arith.addf %99, %104 : vector<8x256xf32>
    %106 = vector.extract_strided_slice %74 {offsets = [0, 1, 2], sizes = [8, 16, 16], strides = [1, 1, 1]} : vector<8x18x18xf32> to vector<8x16x16xf32>
    %107 = vector.shape_cast %106 : vector<8x16x16xf32> to vector<8x256xf32>
    %c1_82 = arith.constant 1 : index
    %c2_83 = arith.constant 2 : index
    %c0_84 = arith.constant 0 : index
    %c0_85 = arith.constant 0 : index
    %108 = vector.load %arg4[%c1_82, %c2_83, %c0_84, %c0_85] : memref<3x3x8x8xf32, #tpu.memory_space<vmem>>, vector<1x1x8x8xf32>
    %109 = vector.shape_cast %108 : vector<1x1x8x8xf32> to vector<8x8xf32>
    %cst_86 = arith.constant dense<0.000000e+00> : vector<8x256xf32>
    %110 = tpu.matmul %109, %107, %cst_86 {dimension_numbers = #tpu.dot_dimension_numbers<[1], [0], [0], [1], [0, 0, 1, 1], [], []>} : vector<8x8xf32>, vector<8x256xf32>, vector<8x256xf32> -> vector<8x256xf32>
    %111 = arith.addf %105, %110 : vector<8x256xf32>
    %112 = vector.extract_strided_slice %74 {offsets = [0, 2, 0], sizes = [8, 16, 16], strides = [1, 1, 1]} : vector<8x18x18xf32> to vector<8x16x16xf32>
    %113 = vector.shape_cast %112 : vector<8x16x16xf32> to vector<8x256xf32>
    %c2_87 = arith.constant 2 : index
    %c0_88 = arith.constant 0 : index
    %c0_89 = arith.constant 0 : index
    %c0_90 = arith.constant 0 : index
    %114 = vector.load %arg4[%c2_87, %c0_88, %c0_89, %c0_90] : memref<3x3x8x8xf32, #tpu.memory_space<vmem>>, vector<1x1x8x8xf32>
    %115 = vector.shape_cast %114 : vector<1x1x8x8xf32> to vector<8x8xf32>
    %cst_91 = arith.constant dense<0.000000e+00> : vector<8x256xf32>
    %116 = tpu.matmul %115, %113, %cst_91 {dimension_numbers = #tpu.dot_dimension_numbers<[1], [0], [0], [1], [0, 0, 1, 1], [], []>} : vector<8x8xf32>, vector<8x256xf32>, vector<8x256xf32> -> vector<8x256xf32>
    %117 = arith.addf %111, %116 : vector<8x256xf32>
    %118 = vector.extract_strided_slice %74 {offsets = [0, 2, 1], sizes = [8, 16, 16], strides = [1, 1, 1]} : vector<8x18x18xf32> to vector<8x16x16xf32>
    %119 = vector.shape_cast %118 : vector<8x16x16xf32> to vector<8x256xf32>
    %c2_92 = arith.constant 2 : index
    %c1_93 = arith.constant 1 : index
    %c0_94 = arith.constant 0 : index
    %c0_95 = arith.constant 0 : index
    %120 = vector.load %arg4[%c2_92, %c1_93, %c0_94, %c0_95] : memref<3x3x8x8xf32, #tpu.memory_space<vmem>>, vector<1x1x8x8xf32>
    %121 = vector.shape_cast %120 : vector<1x1x8x8xf32> to vector<8x8xf32>
    %cst_96 = arith.constant dense<0.000000e+00> : vector<8x256xf32>
    %122 = tpu.matmul %121, %119, %cst_96 {dimension_numbers = #tpu.dot_dimension_numbers<[1], [0], [0], [1], [0, 0, 1, 1], [], []>} : vector<8x8xf32>, vector<8x256xf32>, vector<8x256xf32> -> vector<8x256xf32>
    %123 = arith.addf %117, %122 : vector<8x256xf32>
    %124 = vector.extract_strided_slice %74 {offsets = [0, 2, 2], sizes = [8, 16, 16], strides = [1, 1, 1]} : vector<8x18x18xf32> to vector<8x16x16xf32>
    %125 = vector.shape_cast %124 : vector<8x16x16xf32> to vector<8x256xf32>
    %c2_97 = arith.constant 2 : index
    %c2_98 = arith.constant 2 : index
    %c0_99 = arith.constant 0 : index
    %c0_100 = arith.constant 0 : index
    %126 = vector.load %arg4[%c2_97, %c2_98, %c0_99, %c0_100] : memref<3x3x8x8xf32, #tpu.memory_space<vmem>>, vector<1x1x8x8xf32>
    %127 = vector.shape_cast %126 : vector<1x1x8x8xf32> to vector<8x8xf32>
    %cst_101 = arith.constant dense<0.000000e+00> : vector<8x256xf32>
    %128 = tpu.matmul %127, %125, %cst_101 {dimension_numbers = #tpu.dot_dimension_numbers<[1], [0], [0], [1], [0, 0, 1, 1], [], []>} : vector<8x8xf32>, vector<8x256xf32>, vector<8x256xf32> -> vector<8x256xf32>
    %129 = arith.addf %123, %128 : vector<8x256xf32>
    %130 = vector.broadcast %70 : vector<8x1xf32> to vector<8x256xf32>
    %131 = arith.addf %129, %130 : vector<8x256xf32>
    %cst_102 = arith.constant 0.000000e+00 : f32
    %132 = vector.broadcast %cst_102 : f32 to vector<8x256xf32>
    %133 = arith.cmpf oge, %131, %132 : vector<8x256xf32>
    %cst_103 = arith.constant 0.00999999977 : f32
    %134 = vector.broadcast %cst_103 : f32 to vector<8x256xf32>
    %135 = arith.mulf %134, %131 : vector<8x256xf32>
    %136 = arith.select %133, %131, %135 : vector<8x256xi1>, vector<8x256xf32>
    %137 = vector.shape_cast %136 : vector<8x256xf32> to vector<8x16x16xf32>
    %c0_104 = arith.constant 0 : index
    %c0_105 = arith.constant 0 : index
    %c0_106 = arith.constant 0 : index
    %c0_107 = arith.constant 0 : index
    %138 = vector.load %arg6[%c0_104, %c0_105, %c0_106, %c0_107] : memref<1x8x16x16xf32, #tpu.memory_space<vmem>>, vector<1x8x16x16xf32>
    %139 = vector.shape_cast %138 : vector<1x8x16x16xf32> to vector<8x16x16xf32>
    %140 = vector.shape_cast %137 : vector<8x16x16xf32> to vector<1x8x16x16xf32>
    tpu.vector_store %arg6[%c0_104, %c0_105, %c0_106, %c0_107], %140 {strides = array<i32>} : memref<1x8x16x16xf32, #tpu.memory_space<vmem>>, vector<1x8x16x16xf32>,
    return
  }
  func.func @transform_0(%arg0: i32) -> (i32, i32, i32, i32) {
    %c0_i32 = arith.constant 0 : i32
    %c0_i32_0 = arith.constant 0 : i32
    %c0_i32_1 = arith.constant 0 : i32
    %c0_i32_2 = arith.constant 0 : i32
    return %arg0, %c0_i32, %c0_i32_0, %c0_i32_1 : i32, i32, i32, i32
  }
  func.func @transform_1(%arg0: i32) -> (i32, i32, i32, i32) {
    %c0_i32 = arith.constant 0 : i32
    %c0_i32_0 = arith.constant 0 : i32
    %c0_i32_1 = arith.constant 0 : i32
    %c0_i32_2 = arith.constant 0 : i32
    %c0_i32_3 = arith.constant 0 : i32
    return %c0_i32, %c0_i32_0, %c0_i32_1, %c0_i32_2 : i32, i32, i32, i32
  }
  func.func @transform_2(%arg0: i32) -> (i32, i32) {
    %c0_i32 = arith.constant 0 : i32
    %c0_i32_0 = arith.constant 0 : i32
    %c0_i32_1 = arith.constant 0 : i32
    return %c0_i32, %c0_i32_0 : i32, i32
  }
  func.func @transform_3(%arg0: i32) -> (i32, i32, i32, i32) {
    %c0_i32 = arith.constant 0 : i32
    %c0_i32_0 = arith.constant 0 : i32
    %c0_i32_1 = arith.constant 0 : i32
    %c0_i32_2 = arith.constant 0 : i32
    %c0_i32_3 = arith.constant 0 : i32
    return %c0_i32, %c0_i32_0, %c0_i32_1, %c0_i32_2 : i32, i32, i32, i32
  }
  func.func @transform_4(%arg0: i32) -> (i32, i32) {
    %c0_i32 = arith.constant 0 : i32
    %c0_i32_0 = arith.constant 0 : i32
    %c0_i32_1 = arith.constant 0 : i32
    return %c0_i32, %c0_i32_0 : i32, i32
  }
  func.func @transform_5(%arg0: i32) -> (i32, i32, i32, i32) {
    %c0_i32 = arith.constant 0 : i32
    %c0_i32_0 = arith.constant 0 : i32
    %c0_i32_1 = arith.constant 0 : i32
    %c0_i32_2 = arith.constant 0 : i32
    return %arg0, %c0_i32, %c0_i32_0, %c0_i32_1 : i32, i32, i32, i32
  }
}

</mosaic_0001>

<bundles_post_ra>
// kernel: tpu_custom_call.1
= control target key start
LH: loop header
LB: loop body
LE: loop exit
PB: predicated region body
PF: predicated region fallthrough
CT: control target
= control target key end

     0   :  { %10 = vsyncpa [#allocation3], 0  ;;  %s12558_s0 = inlined_call_operand.hbm [shape: f32[2,4,16,16], index: 0, kind: input, shape index: {}]   ;;  %s12559_s1 = inlined_call_operand.vmem [shape: f32[3,3,8,4], index: 1, kind: input, shape index: {}]   ;;  %s12560_s2 = inlined_call_operand.vmem [shape: f32[8,1], index: 2, kind: input, shape index: {}]   ;;  %s12561_s3 = inlined_call_operand.vmem [shape: f32[3,3,8,8], index: 3, kind: input, shape index: {}]   ;;  %s12562_s4 = inlined_call_operand.vmem [shape: f32[8,1], index: 4, kind: input, shape index: {}]   ;;  %s12563_s5 = inlined_call_operand.hbm [shape: f32[2,8,16,16], index: 5, kind: output, shape index: {}]  }
   0x1   :  { %12 = vsyncpa [#allocation3 + $0x1], 0 }
   0x2   :  { %13 = vsyncpa [#allocation4], 0 }
   0x3   :  { %15 = vsyncpa [#allocation4 + $0x1], 0  ;;  %s7926_s18 = smov 0   ;;  %s7928_s19 = smov 0  }
   0x4   :  { %s7930_s20 = smov 0   ;;  %s7932_s21 = smov 0  }
   0x5 LB: > { %s7947_s22 = sadd.s32 4294967295, %s7877_s21   ;;  %s7000_s23 = sadd.s32 4294967294, %s7877_s21   ;;  %s7877_s21 = sphi %s7932_s21, %s13074_s21   ;;  %s7873_s20 = sphi %s7930_s20, %s13073_s20   ;;  %s7869_s19 = sphi %s7928_s19, %s13072_s19   ;;  %s7865_s18 = sphi %s7926_s18, %s13071_s18  }
   0x6   : > { %s7951_s24 = sadd.s32 1, %s7877_s21   ;;  %s28_s25 = sadd.s32 1, %s7873_s20 }
   0x7   : > { %s25_s26 = ssub.s32 %s7877_s21, %s7951_s24  ;;  %p35_p0 = scmp.ne.s32.totalorder %s7873_s20, %s7869_s19 }
   0x8   : > { %p26_p1 = scmp.eq.s32.totalorder %s25_s26, 0  ;;  %p36_p2 = scmp.eq.s32.totalorder %s7877_s21, 0 }
   0x9   : > { %p41_p3 = scmp.ne.s32.totalorder %s7869_s19, %s7865_s18  ;;  %p42_p4 = scmp.eq.s32.totalorder %s7947_s22, 0 }
   0xa   : > { %s7963_s27 = scalar_select %p26_p1, %s7873_s20, %s28_s25  }
   0xb   : > { %p7965_p5 = por %p36_p2, %p35_p0  ;;  %p7969_p6 = por %p42_p4, %p41_p3 }
   0xc   : > { %p149_p7 = scmp.eq.s32.totalorder %s7947_s22, 1  ;;  %p155_p8 = scmp.eq.s32.totalorder %s7000_s23, 1 }
   0xd   : > { %p7098_p10 = scmp.lt.s32.totalorder %s7877_s21, 2  ;;  %s187_s7 = sand.u32 1, %s7873_s20  }
   0xe   : > { %p7976_p11 = por %p149_p7, %p35_p0  ;;  %p7980_p12 = por %p155_p8, %p41_p3 }
   0xf   : > { %s7084_s8 = sshll.u32 %s7877_s21, 6  ;;  %s7003_s9 = sshll.u32 %s187_s7, 6 }
  0x10   : > { %s196_s12 = scalar_lea.hbm %s12558_s0, %s7084_s8  ;;  %s191_s14 = scalar_lea.vmem [#allocation2], %s7003_s9 }
  0x11   : > { %s197_s13 = sshll.u32 %s196_s12, 4  ;;  %s199_s15 = sshll.u32 %s191_s14, 4  ;;  %s198_s13 = int_to_ptr.hbm [resolvable:$true] %s197_s13  ;;  %s200_s15 = int_to_ptr.vmem [resolvable:$true] %s199_s15 }
  0x12   : > { %p7991_p13 = pnand %p7098_p10, %p7965_p5  ;;  %p7006_p0 = scmp.ge.s32.totalorder %s7877_s21, 1 }
  0x13   : > { %p207_p1 = scmp.lt.s32.totalorder %s7877_s21, 3  ;;  %s188_s17 = scalar_lea.sflag [#allocation3], %s187_s7 }
  0x14   : > { %s7781_s23 = sshra.s32 %s198_s13, 4  ;;  %p7785_p3 = pneg %p7991_p13  ;;  %s7782_s23 = int_to_ptr.hbm [resolvable:$true] %s7781_s23 }
  0x15   : > { %s7783_s25 = scalar_lea.hbm %s7782_s23, 64  ;;  %s7788_s28 = scalar_lea.hbm %s12558_s0, 128 }
  0x16   : > { %p7784_p2 = scmp.ne.s32.totalorder %s7782_s23, %s7783_s25  ;;  %p7789_p5 = scmp.lt.s32.totalorder %s7782_s23, %s12558_s0 }
  0x17   : > { %p7790_p8 = scmp.lt.s32.totalorder %s7788_s28, %s7783_s25 }
  0x18   : > { %p7786_p4 = pnand %p7785_p3, %p7784_p2 }
  0x19   : > { %p7791_p10 = por %p7790_p8, %p7789_p5 }
  0x1a   : > { %p7787_p7 = pneg %p7786_p4 }
  0x1c   : > { %p7792_p9 = pnand %p7791_p10, %p7787_p7 }
  0x1e   : > { %7795 = shalt.err (!%p7792_p9)
}
  0x1f   : > { %s7879_s7 = smov 128   ;;  %s7880_s11 = smov 8  }
  0x20   : > { %7093 = dma.hbm_to_vmem [thread:$0]  (!%p7991_p13), %s198_s13, 1024, %s200_s15, %s188_s17, %s7879_s7, %s7879_s7, %s7880_s11  }
  0x21   : > { %p208_p2 = pnand %p7006_p0, %p207_p1 }
  0x23   : > { %211 = sbr.rel (%p208_p2) target bundleno = 2349 (0x92d), region = 40 }
  0x28   : > { %s8012_s12 = sand.u32 1, %s7869_s19  }
  0x29   : > { %s7007_s14 = sshll.u32 %s8012_s12, 6  ;;  %s214_s23 = scalar_lea.sflag [#allocation3], %s8012_s12 }
  0x2a   : > { %s217_s25 = scalar_lea.vmem [#allocation2], %s7007_s14 }
  0x2b   : > { %7856 = dma.done.wait (%p7969_p6), %s214_s23, 1024  }
  0x2c   : > { %7858 = vsyncadd (%p7969_p6), %s214_s23, 4294966272  ;;  %v247_v0 = vld [vmem:[%s217_s25 + $0x10] sm:$0xff]  ;;  %v245_v1 = vld [vmem:[%s217_s25] sm:$0xff]  ;;  %s12568_s13 = smov 1   ;;  %vm286_vm0 = vcmask 7168   ;;  %vm295_vm1 = vcmask 138240  }
  0x2d   : > { %266 = vrot.lane.b32.xlu1 %v247_v0, %s12568_s13  ;;  %262 = vrot.lane.b32.xlu0 %v245_v1, %s12568_s13  ;;  %v249_v2 = vld [vmem:[%s217_s25 + $0x20] sm:$0xff]  ;;  %v248_v3 = vld [vmem:[%s217_s25 + $0x18] sm:$0xff]  ;;  %vm312_vm2 = vcmask 1040384   ;;  %vm1893_vm3 = vcmask 1045504   ;;  %s12566_s29 = smov 127   ;;  %s12564_s15 = smov 126  }
  0x2e   : > { %270 = vrot.lane.b32.xlu2 %v249_v2, %s12568_s13  ;;  %v246_v4 = vld [vmem:[%s217_s25 + $0x8] sm:$0xff]  ;;  %v252_v6 = vld [vmem:[%s217_s25 + $0x38] sm:$0xff]  ;;  %v251_v7 = vld [vmem:[%s217_s25 + $0x30] sm:$0xff]  ;;  %v7884_v1 = vmov 1983009808   ;;  %vm346_vm4 = vcmask 1047556  }
  0x2f   : > { %v250_v5 = vld [vmem:[%s217_s25 + $0x28] sm:$0xff]  ;;  %v351_v2 = vunpack.c.l.s4 %v7884_v1  ;;  %vm1111_vm5 = vcmask 1046528   ;;  %s7886_s16 = smov 96   ;;  %s7887_s17 = smov 32   ;;  %vm514_vm6 = vcmask 130048   ;;  %vm516_vm7 = vcmask 261120  }
  0x30   : > { %s7888_s26 = smov 64   ;;  %s7889_s8 = smov 80   ;;  %vm518_vm8 = vcmask 392192   ;;  %vm520_vm9 = vcmask 523264   ;;  %vm522_vm10 = vcmask 654336   ;;  %vm524_vm11 = vcmask 785408  }
  0x31   : > { %s7890_s28 = smov 48   ;;  %s7891_s9 = smov 16   ;;  %vm526_vm12 = vcmask 916480   ;;  %vm752_vm13 = vcmask 1043456   ;;  %vm748_vm14 = vcmask 31744  }
  0x32   : > { %s7892_s10 = smov 112   ;;  %s12689_s25 = smov 1  }
  0x33   : > { %s12691_s7 = smov 127   ;;  %s12692_s11 = smov 126  }
  0x35   : > { %268 = vrot.lane.b32.xlu1 %v248_v3, %s12568_s13  ;;  %264 = vrot.lane.b32.xlu0 %v246_v4, %s12568_s13 }
  0x36   : > { %272 = vrot.lane.b32.xlu2 %v250_v5, %s12568_s13 }
  0x3d   : > { %276 = vrot.lane.b32.xlu1 %v252_v6, %s12568_s13  ;;  %274 = vrot.lane.b32.xlu0 %v251_v7, %s12568_s13  ;;  %v8133_v6 = vunpack.c.0.s8 %v351_v2 }
  0x3f   : > { %12687 = vst [vmem:[#allocation8_spill] sm:$0xff] %v8133_v6 }
  0x88   : > { %v271_v8 = vpop.permute.xlu2 %270 }
  0x89   : > { %v291_v9 = vsel %vm286_vm0, 0.0, %v271_v8 }
  0x8a   : > { %v300_v10 = vsel %vm295_vm1, %v291_v9, 0.0 }
  0x8b   : > { %v319_v11 = vrot.slane %v300_v10, 7 }
  0x8d   : > { %v8031_v13 = vsel %vm312_vm2, 0.0, %v319_v11 }
  0x8e   : > { %v1904_v17 = vrot.slane %v8031_v13, 2  ;;  %v345_v3 = vrot.slane %v8031_v13, 4 }
  0x90   : > { %v273_v12 = vpop.permute.xlu2 %272 }
  0x91   : > { %v292_v14 = vsel %vm286_vm0, 0.0, %v273_v12 }
  0x92   : > { %v301_v15 = vsel %vm295_vm1, %v292_v14, 0.0 }
  0x93   : > { %v320_v16 = vrot.slane %v301_v15, 7 }
  0x95   : > { %v8037_v18 = vsel %vm312_vm2, %v319_v11, %v320_v16  ;;  %v8040_v19 = vsel %vm312_vm2, %v320_v16, 0.0 }
  0x96   : > { %v1905_v20 = vrot.slane %v8037_v18, 2  ;;  %v1907_v21 = vrot.slane %v8040_v19, 2 }
  0x98   : > { %v8045_v22 = vsel %vm1893_vm3, %v1904_v17, %v1905_v20  ;;  %v8048_v23 = vsel %vm1893_vm3, %v1905_v20, %v1907_v21  ;;  %v7885_v20 = vmov 1934713408  }
  0x99   : > { %v375_v21 = vunpack.c.l.s4 %v7885_v20 }
  0x9f   : > { %v267_v24 = vpop.permute.xlu1 %266  ;;  %v263_v25 = vpop.permute.xlu0 %262 }
  0xa0   : > { %v289_v26 = vsel %vm286_vm0, 0.0, %v267_v24  ;;  %v287_v27 = vsel %vm286_vm0, 0.0, %v263_v25 }
  0xa1   : > { %v298_v28 = vsel %vm295_vm1, %v289_v26, 0.0  ;;  %v296_v29 = vsel %vm295_vm1, %v287_v27, 0.0 }
  0xa2   : > { %v316_v30 = vrot.slane %v298_v28, 7  ;;  %v313_v31 = vrot.slane %v296_v29, 7 }
  0xa4   : > { %v8055_v32 = vsel %vm312_vm2, 0.0, %v316_v30  ;;  %v8058_v33 = vsel %vm312_vm2, 0.0, %v313_v31 }
  0xa5   : > { %544 = vrot.lane.b32.xlu0 %v8055_v32, %s12566_s29  ;;  %540 = vrot.lane.b32.xlu1 %v8058_v33, %s12566_s29  ;;  %v348_v4 = vrot.slane %v8058_v33, 4  ;;  %v360_v7 = vrot.slane %v8055_v32, 4  ;;  %v347_v10 = vsel %vm346_vm4, %v345_v3, %v8058_v33  ;;  %v1117_v14 = vrot.slane %v8055_v32, 1 }
  0xa6   : > { %v8149_v24 = vperm.slane %v347_v10, %v8133_v6 }
  0xa7   : > { %v269_v34 = vpop.permute.xlu1 %268  ;;  %v265_v35 = vpop.permute.xlu0 %264  ;;  %v349_v9 = vsel %vm346_vm4, %v8031_v13, %v348_v4 }
  0xa8   : > { %v290_v36 = vsel %vm286_vm0, 0.0, %v269_v34  ;;  %v288_v37 = vsel %vm286_vm0, 0.0, %v265_v35  ;;  %v357_v17 = vperm.slane %v349_v9, %v8133_v6 }
  0xa9   : > { %v299_v38 = vsel %vm295_vm1, %v290_v36, 0.0  ;;  %v297_v39 = vsel %vm295_vm1, %v288_v37, 0.0  ;;  %v1899_v36 = vrot.slane %v8055_v32, 2  ;;  %v8178_v37 = vunpack.c.0.s8 %v375_v21 }
  0xaa   : > { %v317_v40 = vrot.slane %v299_v38, 7  ;;  %v314_v41 = vrot.slane %v297_v39, 7  ;;  %v384_v38 = vrot.slane %v357_v17, 4  ;;  %v372_v39 = vrot.slane %v8149_v24, 4 }
  0xab   : > { %12688 = vst [vmem:[#allocation9_spill] sm:$0xff] %v8178_v37 }
  0xac   : > { %v8069_v42 = vsel %vm312_vm2, %v316_v30, %v317_v40  ;;  %v8072_v43 = vsel %vm312_vm2, %v317_v40, 0.0  ;;  %v8075_v44 = vsel %vm312_vm2, %v313_v31, %v314_v41  ;;  %v341_v45 = vsel %vm312_vm2, %v314_v41, 0.0 }
  0xad   : > { %v1900_v46 = vrot.slane %v8069_v42, 2  ;;  %v1902_v47 = vrot.slane %v8072_v43, 2  ;;  %550 = vrot.lane.b32.xlu0 %v8037_v18, %s12566_s29  ;;  %546 = vrot.lane.b32.xlu1 %v8069_v42, %s12566_s29  ;;  %v1895_v48 = vrot.slane %v8075_v44, 2  ;;  %v1897_v49 = vrot.slane %v341_v45, 2 }
  0xae   : > { %542 = vrot.lane.b32.xlu2 %v8075_v44, %s12566_s29  ;;  %v1118_v8 = vrot.slane %v8069_v42, 1  ;;  %v1115_v11 = vrot.slane %v341_v45, 1  ;;  %v1113_v12 = vrot.slane %v8075_v44, 1  ;;  %v416_v25 = vrot.slane %v8069_v42, 4 }
  0xaf   : > { %v8090_v50 = vsel %vm1893_vm3, %v1900_v46, %v1902_v47  ;;  %v277_v51 = vpop.permute.xlu1 %276  ;;  %v275_v52 = vpop.permute.xlu0 %274  ;;  %v8095_v53 = vsel %vm1893_vm3, %v1895_v48, %v1897_v49  ;;  %v402_v31 = vrot.slane %v8037_v18, 4  ;;  %v1894_v40 = vrot.slane %v8058_v33, 2 }
  0xb0   : > { %v294_v54 = vsel %vm286_vm0, 0.0, %v277_v51  ;;  %v293_v55 = vsel %vm286_vm0, 0.0, %v275_v52  ;;  %v8155_v26 = vsel %vm1111_vm5, %v1117_v14, %v1118_v8  ;;  %v8161_v28 = vsel %vm1111_vm5, %v1113_v12, %v1115_v11 }
  0xb1   : > { %v303_v56 = vsel %vm295_vm1, %v294_v54, 0.0  ;;  %v302_v57 = vsel %vm295_vm1, %v293_v55, 0.0  ;;  %v404_v45 = vrot.slane %v8075_v44, 4  ;;  %v403_v47 = vsel %vm346_vm4, %v402_v31, %v8075_v44 }
  0xb2   : > { %v323_v58 = vrot.slane %v303_v56, 7  ;;  %v322_v59 = vrot.slane %v302_v57, 7  ;;  %v8195_v54 = vsel %vm1893_vm3, %v1894_v40, %v1895_v48  ;;  %v8200_v55 = vsel %vm1893_vm3, %v1899_v36, %v1900_v46 }
  0xb3   : > { %v409_v56 = vperm.slane %v403_v47, %v8133_v6  ;;  %v1120_v21 = vrot.slane %v8072_v43, 1 }
  0xb4   : > { %v8102_v60 = vsel %vm312_vm2, %v322_v59, %v323_v58  ;;  %v8105_v61 = vsel %vm312_vm2, 0.0, %v322_v59  ;;  %v8158_v27 = vsel %vm312_vm2, %v323_v58, 0.0  ;;  %v405_v59 = vsel %vm346_vm4, %v8037_v18, %v404_v45 }
  0xb5   : > { %850 = vrot.lane.b32.xlu0 %v8075_v44, %s12564_s15  ;;  %552 = vrot.lane.b32.xlu1 %v8105_v61, %s12566_s29  ;;  %v1909_v62 = vrot.slane %v8105_v61, 2  ;;  %v1910_v63 = vrot.slane %v8102_v60, 2  ;;  %v358_v5 = vrot.slane %v8105_v61, 4  ;;  %v361_v15 = vsel %vm346_vm4, %v8105_v61, %v360_v7 }
  0xb6   : > { %548 = vrot.lane.b32.xlu2 %v8031_v13, %s12566_s29  ;;  %v369_v29 = vperm.slane %v361_v15, %v8133_v6  ;;  %v417_v34 = vsel %vm346_vm4, %v8102_v60, %v416_v25  ;;  %v414_v35 = vrot.slane %v8102_v60, 4  ;;  %v1912_v41 = vrot.slane %v8158_v27, 2 }
  0xb7   : > { %v8116_v0 = vsel %vm1893_vm3, %v1909_v62, %v1910_v63  ;;  %v359_v16 = vsel %vm346_vm4, %v358_v5, %v8055_v32  ;;  %v425_v51 = vperm.slane %v417_v34, %v8133_v6  ;;  %v413_v1 = vperm.slane %v405_v59, %v8133_v6 }
  0xb8   : > { %v8165_v30 = vperm.slane %v359_v16, %v8133_v6  ;;  %v385_v49 = vsel %vm346_vm4, %v369_v29, %v384_v38  ;;  %v415_v52 = vsel %vm346_vm4, %v414_v35, %v8069_v42  ;;  %v8210_v44 = vsel %vm1893_vm3, %v1910_v63, %v1912_v41 }
  0xb9   : > { %v8204_v57 = vperm.slane %v385_v49, %v8178_v37  ;;  %v438_v48 = vrot.slane %v425_v51, 4  ;;  %v421_v62 = vperm.slane %v415_v52, %v8133_v6  ;;  %v382_v46 = vrot.slane %v369_v29, 4 }
  0xba   : > { %v428_v2 = vrot.slane %v409_v56, 4  ;;  %v1112_v5 = vrot.slane %v8058_v33, 1  ;;  %v1122_v15 = vrot.slane %v8031_v13, 1  ;;  %v1127_v16 = vrot.slane %v8105_v61, 1 }
  0xbb   : > { %v439_v63 = vsel %vm346_vm4, %v438_v48, %v413_v1  ;;  %v383_v4 = vsel %vm346_vm4, %v382_v46, %v357_v17  ;;  %v426_v14 = vrot.slane %v421_v62, 4  ;;  %v1128_v17 = vrot.slane %v8102_v60, 1 }
  0xbc   : > { %v429_v3 = vsel %vm346_vm4, %v421_v62, %v428_v2  ;;  %v445_v7 = vperm.slane %v439_v63, %v8178_v37  ;;  %v389_v10 = vperm.slane %v383_v4, %v8178_v37  ;;  %v8229_v11 = vsel %vm1111_vm5, %v1112_v5, %v1113_v12 }
  0xbd   : > { %856 = vrot.lane.b32.xlu0 %v8031_v13, %s12564_s15  ;;  %852 = vrot.lane.b32.xlu1 %v8055_v32, %s12564_s15  ;;  %v373_v32 = vsel %vm346_vm4, %v8165_v30, %v372_v39  ;;  %v8225_v9 = vperm.slane %v429_v3, %v8178_v37  ;;  %v427_v25 = vsel %vm346_vm4, %v426_v14, %v409_v56  ;;  %v1130_v35 = vrot.slane %v8158_v27, 1 }
  0xbe   : > { %554 = vrot.lane.b32.xlu2 %v8102_v60, %s12566_s29  ;;  %v381_v58 = vperm.slane %v373_v32, %v8178_v37  ;;  %v398_v12 = vrot.slane %v389_v10, 4  ;;  %v8243_v29 = vsel %vm1111_vm5, %v1127_v16, %v1128_v17  ;;  %v8258_v43 = vsel %vm1111_vm5, %v1118_v8, %v1120_v21 }
  0xbf   : > { %v1152_v31 = vrot.slane %v8243_v29, 4  ;;  %v440_v38 = vrot.slane %v413_v1, 4  ;;  %v454_v39 = vrot.slane %v445_v7, 4  ;;  %v8273_v45 = vsel %vm1111_vm5, %v1128_v17, %v1130_v35 }
  0xc0   : > { %v396_v20 = vrot.slane %v381_v58, 4  ;;  %v1154_v27 = vrot.slane %v8155_v26, 4  ;;  %v1210_v47 = vrot.slane %v8258_v43, 4  ;;  %v1125_v59 = vrot.slane %v8040_v19, 1 }
  0xc1   : > { %v1153_v8 = vsel %vm346_vm4, %v1152_v31, %v8155_v26  ;;  %v441_v40 = vsel %vm346_vm4, %v425_v51, %v440_v38  ;;  %v455_v32 = vsel %vm346_vm4, 0.0, %v454_v39  ;;  %v370_v62 = vrot.slane %v8165_v30, 4 }
  0xc2   : > { %v1159_v49 = vperm.slane %v1153_v8, %v8133_v6  ;;  %v449_v56 = vperm.slane %v441_v40, %v8178_v37  ;;  %v1155_v51 = vsel %vm346_vm4, %v8243_v29, %v1154_v27  ;;  %v1198_v46 = vrot.slane %v8161_v28, 4 }
  0xc3   : > { %v1142_v1 = vrot.slane %v8229_v11, 4  ;;  %v1163_v4 = vperm.slane %v1155_v51, %v8133_v6  ;;  %v1208_v19 = vrot.slane %v8273_v45, 4 }
  0xc4   : > { %v456_v63 = vrot.slane %v449_v56, 4  ;;  %v1164_v38 = vrot.slane %v1159_v49, 4 }
  0xc5   : > { %858 = vrot.lane.b32.xlu1 %v8037_v18, %s12564_s15  ;;  %862 = vrot.lane.b32.xlu0 %v8102_v60, %s12564_s15  ;;  %v8251_v60 = vperm.slane %v427_v25, %v8178_v37  ;;  %v1176_v17 = vrot.slane %v1163_v4, 4 }
  0xc6   : > { %848 = vrot.lane.b32.xlu2 %v8058_v33, %s12564_s15  ;;  %v1123_v33 = vrot.slane %v8037_v18, 1  ;;  %v399_v18 = vsel %vm346_vm4, 0.0, %v398_v12 }
  0xc8   : > { %v8246_v13 = vsel %vm1111_vm5, %v1122_v15, %v1123_v33  ;;  %v8296_v5 = vsel %vm1111_vm5, %v1123_v33, %v1125_v59  ;;  %v457_v15 = vsel %vm346_vm4, 0.0, %v456_v63  ;;  %v1209_v33 = vsel %vm346_vm4, %v1208_v19, %v8258_v43 }
  0xc9   : > { %v1140_v34 = vrot.slane %v8246_v13, 4  ;;  %v1143_v14 = vsel %vm346_vm4, %v8246_v13, %v1142_v1  ;;  %v1196_v31 = vrot.slane %v8296_v5, 4  ;;  %v452_v1 = vrot.slane %v8225_v9, 4 }
  0xcb   : > { %v1141_v36 = vsel %vm346_vm4, %v1140_v34, %v8229_v11 }
  0xcc   : > { %v1147_v41 = vperm.slane %v1141_v36, %v8133_v6  ;;  %v1197_v36 = vsel %vm346_vm4, %v1196_v31, %v8161_v28 }
  0xcd   : > { %1379 = vrot.lane.b32.xlu1 %v8155_v26, %s12566_s29  ;;  %1377 = vrot.lane.b32.xlu0 %v8161_v28, %s12566_s29  ;;  %v1203_v40 = vperm.slane %v1197_v36, %v8133_v6 }
  0xce   : > { %854 = vrot.lane.b32.xlu2 %v8069_v42, %s12564_s15  ;;  %v450_v42 = vrot.slane %v8251_v60, 4  ;;  %v1166_v48 = vrot.slane %v1147_v41, 4 }
  0xd0   : > { %v451_v52 = vsel %vm346_vm4, 0.0, %v450_v42  ;;  %v1167_v2 = vsel %vm346_vm4, %v1159_v49, %v1166_v48 }
  0xd1   : > { %v8302_v30 = vperm.slane %v1167_v2, %v8178_v37 }
  0xd3   : > { %v1190_v36 = vrot.slane %v8302_v30, 4 }
  0xd5   : > { %479 = vrot.lane.b32.xlu1 %v8204_v57, %s7886_s16  ;;  %463 = vrot.lane.b32.xlu0 %v381_v58, %s7887_s17  ;;  %v1211_v58 = vsel %vm346_vm4, %v8273_v45, %v1210_v47 }
  0xd6   : > { %860 = vrot.lane.b32.xlu2 %v8105_v61, %s12564_s15  ;;  %v397_v61 = vsel %vm346_vm4, 0.0, %v396_v20  ;;  %v1219_v3 = vperm.slane %v1211_v58, %v8133_v6  ;;  %v1151_v20 = vperm.slane %v1143_v14, %v8133_v6 }
  0xd8   : > { %v1232_v16 = vrot.slane %v1219_v3, 4  ;;  %v1177_v25 = vsel %vm346_vm4, %v1176_v17, %v1151_v20 }
  0xd9   : > { %v1183_v35 = vperm.slane %v1177_v25, %v8178_v37 }
  0xdb   : > { %v1192_v27 = vrot.slane %v1183_v35, 4 }
  0xdd   : > { %499 = vrot.lane.b32.xlu0 %v445_v7, %s7888_s26  ;;  %491 = vrot.lane.b32.xlu1 %v8225_v9, %s7887_s17  ;;  %v371_v7 = vsel %vm346_vm4, %v370_v62, %v8149_v24  ;;  %v1193_v51 = vsel %vm346_vm4, 0.0, %v1192_v27 }
  0xde   : > { %1375 = vrot.lane.b32.xlu2 %v8229_v11, %s12566_s29  ;;  %v8313_v24 = vperm.slane %v371_v7, %v8178_v37  ;;  %v453_v7 = vsel %vm346_vm4, 0.0, %v452_v1 }
  0xe5   : > { %475 = vrot.lane.b32.xlu0 %v399_v18, %s7889_s8  ;;  %467 = vrot.lane.b32.xlu1 %v397_v61, %s7890_s28  ;;  %v1215_v18 = vperm.slane %v1209_v33, %v8133_v6  ;;  %v394_v61 = vrot.slane %v8313_v24, 4 }
  0xe6   : > { %1381 = vrot.lane.b32.xlu2 %v8258_v43, %s12566_s29 }
  0xe7   : > { %v1220_v39 = vrot.slane %v1215_v18, 4  ;;  %v395_v42 = vsel %vm346_vm4, 0.0, %v394_v61 }
  0xe9   : > { %v1221_v49 = vsel %vm346_vm4, %v1220_v39, %v1203_v40 }
  0xea   : > { %v8344_v58 = vperm.slane %v1221_v49, %v8178_v37 }
  0xec   : > { %v1244_v62 = vrot.slane %v8344_v58, 4 }
  0xed   : > { %503 = vrot.lane.b32.xlu1 %v455_v32, %s7889_s8  ;;  %487 = vrot.lane.b32.xlu0 %v451_v52, %s7891_s9  ;;  %v400_v32 = vrot.slane %v8204_v57, 4  ;;  %v1165_v52 = vsel %vm346_vm4, %v1164_v38, %v1147_v41  ;;  %v1178_v57 = vrot.slane %v1151_v20, 4 }
  0xee   : > { %471 = vrot.lane.b32.xlu2 %v389_v10, %s7888_s26  ;;  %v1199_v10 = vsel %vm346_vm4, %v8296_v5, %v1198_v46  ;;  %v8347_v59 = vperm.slane %v1165_v52, %v8178_v37  ;;  %v1245_v63 = vsel %vm346_vm4, 0.0, %v1244_v62 }
  0xef   : > { %v1207_v12 = vperm.slane %v1199_v10, %v8133_v6  ;;  %v401_v48 = vsel %vm346_vm4, 0.0, %v400_v32  ;;  %v1179_v2 = vsel %vm346_vm4, %v1163_v4, %v1178_v57  ;;  %v1222_v10 = vrot.slane %v1203_v40, 4 }
  0xf0   : > { %v1188_v46 = vrot.slane %v8347_v59, 4  ;;  %v1187_v19 = vperm.slane %v1179_v2, %v8178_v37 }
  0xf1   : > { %v1233_v21 = vsel %vm346_vm4, %v1232_v16, %v1207_v12  ;;  %v1234_v8 = vrot.slane %v1207_v12, 4  ;;  %v1223_v9 = vsel %vm346_vm4, %v1215_v18, %v1222_v10 }
  0xf2   : > { %v8326_v34 = vperm.slane %v1233_v21, %v8178_v37  ;;  %v1231_v16 = vperm.slane %v1223_v9, %v8178_v37 }
  0xf3   : > { %v1235_v47 = vsel %vm346_vm4, %v1219_v3, %v1234_v8  ;;  %v1189_v3 = vsel %vm346_vm4, 0.0, %v1188_v46  ;;  %v1191_v8 = vsel %vm346_vm4, 0.0, %v1190_v36 }
  0xf4   : > { %v1246_v21 = vrot.slane %v1231_v16, 4  ;;  %v1248_v57 = vrot.slane %v8326_v34, 4 }
  0xf5   : > { %1257 = vrot.lane.b32.xlu1 %v8302_v30, %s7887_s17  ;;  %511 = vrot.lane.b32.xlu0 %v457_v15, %s7892_s10  ;;  %v1194_v15 = vrot.slane %v1187_v19, 4 }
  0xf6   : > { %507 = vrot.lane.b32.xlu2 %v449_v56, %s7886_s16  ;;  %v1243_v56 = vperm.slane %v1235_v47, %v8178_v37  ;;  %v1247_v18 = vsel %vm346_vm4, 0.0, %v1246_v21  ;;  %v1249_v10 = vsel %vm346_vm4, 0.0, %v1248_v57 }
  0xf7   : > { %v1195_v4 = vsel %vm346_vm4, 0.0, %v1194_v15 }
  0xf8   : > { %v1250_v20 = vrot.slane %v1243_v56, 4 }
  0xfa   : > { %v1251_v25 = vsel %vm346_vm4, 0.0, %v1250_v20 }
  0xfd   : > { %1293 = vrot.lane.b32.xlu1 %v8326_v34, %s7888_s26  ;;  %1265 = vrot.lane.b32.xlu0 %v1183_v35, %s7888_s26 }
  0xfe   : > { %459 = vrot.lane.b32.xlu2 %v395_v42, %s7891_s9 }
 0x105   : > { %1269 = vrot.lane.b32.xlu1 %v1193_v51, %s7889_s8  ;;  %1301 = vrot.lane.b32.xlu0 %v1243_v56, %s7886_s16 }
 0x106   : > { %483 = vrot.lane.b32.xlu2 %v401_v48, %s7892_s10 }
 0x108   : > { %v8353_v41 = vpop.permute.xlu2 %542 }
 0x109   : > { %v622_v62 = vrot.slane %v8353_v41, 4 }
 0x10d   : > { %1281 = vrot.lane.b32.xlu1 %v1245_v63, %s7891_s9  ;;  %1253 = vrot.lane.b32.xlu0 %v1189_v3, %s7891_s9 }
 0x10e   : > { %495 = vrot.lane.b32.xlu2 %v453_v7, %s7890_s28 }
 0x110   : > { %v549_v14 = vpop.permute.xlu2 %548 }
 0x111   : > { %v564_v38 = vrot.slane %v549_v14, 4 }
 0x115   : > { %1385 = vrot.lane.b32.xlu1 %v8296_v5, %s12566_s29  ;;  %1277 = vrot.lane.b32.xlu0 %v1195_v4, %s7892_s10 }
 0x116   : > { %1273 = vrot.lane.b32.xlu2 %v1187_v19, %s7886_s16 }
 0x117   : > { %v541_v17 = vpop.permute.xlu1 %540  ;;  %v545_v33 = vpop.permute.xlu0 %544 }
 0x118   : > { %v8373_v12 = vpop.permute.xlu2 %554  ;;  %v565_v39 = vsel %vm346_vm4, %v564_v38, %v541_v17  ;;  %v578_v40 = vrot.slane %v545_v33, 4  ;;  %v566_v27 = vrot.slane %v541_v17, 4 }
 0x119   : > { %v8392_v47 = vperm.slane %v565_v39, %v8133_v6 }
 0x11a   : > { %v567_v1 = vsel %vm346_vm4, %v549_v14, %v566_v27 }
 0x11b   : > { %v590_v2 = vrot.slane %v8392_v47, 4  ;;  %v575_v14 = vperm.slane %v567_v1, %v8133_v6 }
 0x11d   : > { %1305 = vrot.lane.b32.xlu1 %v1251_v25, %s7892_s10  ;;  %1289 = vrot.lane.b32.xlu0 %v1247_v18, %s7890_s28  ;;  %v602_v57 = vrot.slane %v575_v14, 4 }
 0x11e   : > { %1285 = vrot.lane.b32.xlu2 %v1231_v16, %s7887_s17 }
 0x11f   : > { %v8380_v61 = vpop.permute.xlu1 %546  ;;  %v551_v31 = vpop.permute.xlu0 %550 }
 0x120   : > { %v8382_v35 = vpop.permute.xlu2 %848  ;;  %v634_v42 = vrot.slane %v8380_v61, 4  ;;  %v623_v7 = vsel %vm346_vm4, %v551_v31, %v622_v62  ;;  %v620_v25 = vrot.slane %v551_v31, 4  ;;  %v632_v62 = vrot.slane %v8373_v12, 4 }
 0x121   : > { %v631_v17 = vperm.slane %v623_v7, %v8133_v6  ;;  %v874_v36 = vrot.slane %v8382_v35, 4 }
 0x122   : > { %v635_v30 = vsel %vm346_vm4, %v8373_v12, %v634_v42  ;;  %v621_v31 = vsel %vm346_vm4, %v620_v25, %v8353_v41 }
 0x123   : > { %v643_v63 = vperm.slane %v635_v30, %v8133_v6 }
 0x125   : > { %1383 = vrot.lane.b32.xlu0 %v8246_v13, %s12566_s29  ;;  %v656_v16 = vrot.slane %v643_v63, 4 }
 0x126   : > { %1261 = vrot.lane.b32.xlu2 %v1191_v8, %s7890_s28  ;;  %v658_v8 = vrot.slane %v631_v17, 4 }
 0x127   : > { %v553_v32 = vpop.permute.xlu1 %552  ;;  %v8394_v49 = vpop.permute.xlu0 %850  ;;  %v657_v42 = vsel %vm346_vm4, %v656_v16, %v631_v17  ;;  %v633_v17 = vsel %vm346_vm4, %v632_v62, %v8380_v61 }
 0x128   : > { %v576_v52 = vrot.slane %v553_v32, 4  ;;  %v579_v56 = vsel %vm346_vm4, %v553_v32, %v578_v40  ;;  %v8399_v51 = vpop.permute.xlu2 %854  ;;  %v930_v27 = vrot.slane %v8394_v49, 4  ;;  %v8445_v32 = vperm.slane %v657_v42, %v8178_v37 }
 0x129   : > { %v587_v48 = vperm.slane %v579_v56, %v8133_v6  ;;  %v659_v41 = vsel %vm346_vm4, %v643_v63, %v658_v8 }
 0x12a   : > { %v577_v46 = vsel %vm346_vm4, %v576_v52, %v545_v33  ;;  %v8461_v12 = vperm.slane %v659_v41, %v8178_v37 }
 0x12b   : > { %v8409_v3 = vperm.slane %v577_v46, %v8133_v6  ;;  %v600_v19 = vrot.slane %v587_v48, 4 }
 0x12d   : > { %1389 = vrot.lane.b32.xlu0 %v8273_v45, %s12566_s29  ;;  %v591_v34 = vsel %vm346_vm4, %v8409_v3, %v590_v2  ;;  %v601_v21 = vsel %vm346_vm4, %v600_v19, %v575_v14  ;;  %v627_v19 = vperm.slane %v621_v31, %v8133_v6 }
 0x12e   : > { %1297 = vrot.lane.b32.xlu2 %v1249_v10, %s7889_s8  ;;  %v8420_v15 = vperm.slane %v591_v34, %v8178_v37  ;;  %v8433_v39 = vperm.slane %v601_v21, %v8178_v37  ;;  %v603_v10 = vsel %vm346_vm4, %v587_v48, %v602_v57 }
 0x12f   : > { %v8422_v9 = vpop.permute.xlu1 %852  ;;  %v857_v4 = vpop.permute.xlu0 %856  ;;  %v8468_v21 = vperm.slane %v603_v10, %v8178_v37 }
 0x130   : > { %v886_v33 = vrot.slane %v8422_v9, 4  ;;  %v861_v20 = vpop.permute.xlu2 %860  ;;  %681 = vrot.lane.b32.xlu1 %v8420_v15, %s7887_s17  ;;  %v875_v40 = vsel %vm346_vm4, %v857_v4, %v874_v36  ;;  %v872_v34 = vrot.slane %v857_v4, 4  ;;  %v646_v4 = vrot.slane %v627_v19, 4 }
 0x131   : > { %v883_v46 = vperm.slane %v875_v40, %v8133_v6  ;;  %v639_v36 = vperm.slane %v633_v17, %v8133_v6  ;;  %v884_v31 = vrot.slane %v861_v20, 4 }
 0x132   : > { %v887_v18 = vsel %vm346_vm4, %v861_v20, %v886_v33  ;;  %v942_v33 = vrot.slane %v8399_v51, 4  ;;  %v873_v25 = vsel %vm346_vm4, %v872_v34, %v8382_v35 }
 0x133   : > { %v895_v38 = vperm.slane %v887_v18, %v8133_v6  ;;  %v910_v63 = vrot.slane %v883_v46, 4  ;;  %v647_v57 = vsel %vm346_vm4, %v639_v36, %v646_v4 }
 0x135   : > { %689 = vrot.lane.b32.xlu0 %v8433_v39, %s7888_s26  ;;  %v908_v30 = vrot.slane %v895_v38, 4 }
 0x136   : > { %1387 = vrot.lane.b32.xlu2 %v8243_v29, %s12566_s29 }
 0x137   : > { %v859_v52 = vpop.permute.xlu1 %858  ;;  %v863_v56 = vpop.permute.xlu0 %862  ;;  %v909_v16 = vsel %vm346_vm4, %v908_v30, %v883_v46  ;;  %v911_v30 = vsel %vm346_vm4, %v895_v38, %v910_v63  ;;  %v8510_v38 = vperm.slane %v647_v57, %v8178_v37 }
 0x138   : > { %v931_v1 = vsel %vm346_vm4, %v859_v52, %v930_v27  ;;  %v8450_v2 = vpop.permute.xlu2 %1375  ;;  %717 = vrot.lane.b32.xlu1 %v8445_v32, %s7888_s26  ;;  %v928_v7 = vrot.slane %v859_v52, 4  ;;  %v943_v18 = vsel %vm346_vm4, %v863_v56, %v942_v33  ;;  %v8480_v61 = vperm.slane %v909_v16, %v8178_v37 }
 0x139   : > { %v8458_v14 = vperm.slane %v931_v1, %v8133_v6  ;;  %v8497_v52 = vperm.slane %v873_v25, %v8133_v6  ;;  %v8504_v62 = vperm.slane %v911_v30, %v8178_v37  ;;  %v885_v1 = vsel %vm346_vm4, %v884_v31, %v8422_v9 }
 0x13a   : > { %v929_v48 = vsel %vm346_vm4, %v928_v7, %v8394_v49  ;;  %v940_v49 = vrot.slane %v863_v56, 4  ;;  %v951_v56 = vperm.slane %v943_v18, %v8133_v6  ;;  %v588_v7 = vrot.slane %v8409_v3, 4 }
 0x13b   : > { %v966_v42 = vrot.slane %v8458_v14, 4  ;;  %v8489_v35 = vperm.slane %v929_v48, %v8133_v6  ;;  %v891_v34 = vperm.slane %v885_v1, %v8133_v6  ;;  %v644_v3 = vrot.slane %v639_v36, 4 }
 0x13c   : > { %v941_v20 = vsel %vm346_vm4, %v940_v49, %v8399_v51  ;;  %v898_v51 = vrot.slane %v8497_v52, 4  ;;  %v589_v4 = vsel %vm346_vm4, %v588_v7, %v8392_v47  ;;  %v616_v18 = vrot.slane %v8433_v39, 4 }
 0x13d   : > { %725 = vrot.lane.b32.xlu0 %v8461_v12, %s7886_s16  ;;  %v967_v46 = vsel %vm346_vm4, %v951_v56, %v966_v42  ;;  %v954_v41 = vrot.slane %v8489_v35, 4  ;;  %v8518_v10 = vperm.slane %v941_v20, %v8133_v6  ;;  %v8543_v36 = vperm.slane %v589_v4, %v8178_v37 }
 0x13e   : > { %697 = vrot.lane.b32.xlu2 %v8468_v21, %s7886_s16  ;;  %v8523_v9 = vperm.slane %v967_v46, %v8178_v37  ;;  %v899_v48 = vsel %vm346_vm4, %v891_v34, %v898_v51  ;;  %v645_v49 = vsel %vm346_vm4, %v644_v3, %v627_v19  ;;  %v964_v31 = vrot.slane %v951_v56, 4 }
 0x13f   : > { %v8484_v8 = vpop.permute.xlu1 %1379  ;;  %v8486_v40 = vpop.permute.xlu0 %1377  ;;  %v955_v63 = vsel %vm346_vm4, %v8518_v10, %v954_v41  ;;  %v8540_v42 = vperm.slane %v899_v48, %v8178_v37  ;;  %v617_v39 = vsel %vm346_vm4, 0.0, %v616_v18  ;;  %v8556_v57 = vperm.slane %v645_v49, %v8178_v37 }
 0x140   : > { %v8491_v27 = vpop.permute.xlu2 %1381  ;;  %997 = vrot.lane.b32.xlu1 %v8480_v61, %s7888_s26  ;;  %v8536_v25 = vperm.slane %v955_v63, %v8178_v37  ;;  %v612_v19 = vrot.slane %v8543_v36, 4  ;;  %v965_v56 = vsel %vm346_vm4, %v964_v31, %v8458_v14  ;;  %v896_v63 = vrot.slane %v891_v34, 4 }
 0x141   : > { %v668_v46 = vrot.slane %v8556_v57, 4  ;;  %v8566_v1 = vperm.slane %v965_v56, %v8178_v37  ;;  %v618_v48 = vrot.slane %v8468_v21, 4  ;;  %v614_v18 = vrot.slane %v8420_v15, 4 }
 0x142   : > { %v613_v41 = vsel %vm346_vm4, 0.0, %v612_v19  ;;  %v897_v21 = vsel %vm346_vm4, %v896_v63, %v8497_v52 }
 0x143   : > { %v669_v3 = vsel %vm346_vm4, 0.0, %v668_v46  ;;  %v619_v19 = vsel %vm346_vm4, 0.0, %v618_v48 }
 0x145   : > { %1005 = vrot.lane.b32.xlu0 %v8504_v62, %s7886_s16 }
 0x146   : > { %709 = vrot.lane.b32.xlu2 %v8510_v38, %s7887_s17 }
 0x147   : > { %v8526_v16 = vpop.permute.xlu1 %479  ;;  %v464_v17 = vpop.permute.xlu0 %463 }
 0x148   : > { %v472_v33 = vpop.permute.xlu2 %471  ;;  %1033 = vrot.lane.b32.xlu1 %v8523_v9, %s7886_s16 }
 0x14d   : > { %1017 = vrot.lane.b32.xlu0 %v8536_v25, %s7887_s17 }
 0x14e   : > { %989 = vrot.lane.b32.xlu2 %v8540_v42, %s7887_s17 }
 0x14f   : > { %v8550_v47 = vpop.permute.xlu1 %491  ;;  %v8552_v30 = vpop.permute.xlu0 %499 }
 0x150   : > { %v8558_v20 = vpop.permute.xlu2 %507  ;;  %693 = vrot.lane.b32.xlu1 %v617_v39, %s7889_s8  ;;  %v674_v39 = vrot.slane %v8461_v12, 4 }
 0x152   : > { %v675_v12 = vsel %vm346_vm4, 0.0, %v674_v39  ;;  %v924_v39 = vrot.slane %v8480_v61, 4 }
 0x155   : > { %677 = vrot.lane.b32.xlu0 %v613_v41, %s7891_s9  ;;  %v670_v41 = vrot.slane %v8510_v38, 4 }
 0x156   : > { %1025 = vrot.lane.b32.xlu2 %v8566_v1, %s7888_s26 }
 0x157   : > { %v468_v7 = vpop.permute.xlu1 %467  ;;  %v476_v51 = vpop.permute.xlu0 %475  ;;  %v671_v63 = vsel %vm346_vm4, 0.0, %v670_v41 }
 0x158   : > { %v460_v14 = vpop.permute.xlu2 %459  ;;  %705 = vrot.lane.b32.xlu1 %v669_v3, %s7891_s9 }
 0x159   : > { %v515_v4 = vsel %vm514_vm6, %v8313_v24, %v460_v14  ;;  %v615_v24 = vsel %vm346_vm4, 0.0, %v614_v18 }
 0x15a   : > { %v517_v49 = vsel %vm516_vm7, %v515_v4, %v464_v17 }
 0x15b   : > { %v519_v31 = vsel %vm518_vm8, %v517_v49, %v468_v7 }
 0x15c   : > { %v521_v34 = vsel %vm520_vm9, %v519_v31, %v472_v33  ;;  %v8591_v33 = vperm.slane %v897_v21, %v8178_v37  ;;  %v926_v21 = vrot.slane %v8504_v62, 4 }
 0x15d   : > { %v523_v56 = vsel %vm522_vm10, %v521_v34, %v476_v51  ;;  %701 = vrot.lane.b32.xlu0 %v619_v19, %s7892_s10  ;;  %v672_v51 = vrot.slane %v8445_v32, 4 }
 0x15e   : > { %685 = vrot.lane.b32.xlu2 %v615_v24, %s7890_s28  ;;  %v525_v52 = vsel %vm524_vm11, %v523_v56, %v8526_v16  ;;  %v920_v3 = vrot.slane %v8591_v33, 4  ;;  %v952_v16 = vrot.slane %v8518_v10, 4  ;;  %v927_v24 = vsel %vm346_vm4, 0.0, %v926_v21 }
 0x15f   : > { %v504_v15 = vpop.permute.xlu1 %503  ;;  %v488_v17 = vpop.permute.xlu0 %487  ;;  %v673_v48 = vsel %vm346_vm4, 0.0, %v672_v51 }
 0x160   : > { %v484_v46 = vpop.permute.xlu2 %483  ;;  %729 = vrot.lane.b32.xlu1 %v675_v12, %s7892_s10  ;;  %v528_v14 = vsel %vm514_vm6, %v8251_v60, %v488_v17  ;;  %v921_v32 = vsel %vm346_vm4, 0.0, %v920_v3  ;;  %v922_v60 = vrot.slane %v8540_v42, 4  ;;  %v953_v34 = vsel %vm346_vm4, %v952_v16, %v8489_v35 }
 0x161   : > { %v527_v7 = vsel %vm526_vm12, %v525_v52, %v484_v46  ;;  %v529_v49 = vsel %vm516_vm7, %v528_v14, %v8550_v47  ;;  %v925_v42 = vsel %vm346_vm4, 0.0, %v924_v39  ;;  %v978_v12 = vrot.slane %v8536_v25, 4 }
 0x162   : > { %7014 = vmatpush.msk.msra.mxu2 %vm752_vm13, %v527_v7  ;;  %v923_v47 = vsel %vm346_vm4, 0.0, %v922_v60 }
 0x163   : > { %v979_v51 = vsel %vm346_vm4, 0.0, %v978_v12  ;;  %v1401_v12 = vrot.slane %v8450_v2, 4 }
 0x165   : > { %713 = vrot.lane.b32.xlu0 %v671_v63, %s7890_s28 }
 0x166   : > { %721 = vrot.lane.b32.xlu2 %v673_v48, %s7889_s8 }
 0x167   : > { %v1258_v38 = vpop.permute.xlu1 %1257  ;;  %v512_v4 = vpop.permute.xlu0 %511 }
 0x168   : > { %v496_v18 = vpop.permute.xlu2 %495  ;;  %985 = vrot.lane.b32.xlu1 %v921_v32, %s7891_s9 }
 0x169   : > { %v530_v31 = vsel %vm518_vm8, %v529_v49, %v496_v18 }
 0x16a   : > { %v531_v10 = vsel %vm520_vm9, %v530_v31, %v8552_v30  ;;  %v8628_v30 = vperm.slane %v953_v34, %v8178_v37 }
 0x16b   : > { %v532_v19 = vsel %vm522_vm10, %v531_v10, %v504_v15 }
 0x16c   : > { %v533_v56 = vsel %vm524_vm11, %v532_v19, %v8558_v20  ;;  %v980_v20 = vrot.slane %v8566_v1, 4  ;;  %v976_v17 = vrot.slane %v8628_v30, 4  ;;  %v982_v1 = vrot.slane %v8523_v9, 4 }
 0x16d   : > { %993 = vrot.lane.b32.xlu0 %v923_v47, %s7890_s28  ;;  %v534_v61 = vsel %vm526_vm12, %v533_v56, %v512_v4  ;;  %v1413_v19 = vrot.slane %v8484_v8, 4 }
 0x16e   : > { %1001 = vrot.lane.b32.xlu2 %v925_v42, %s7889_s8  ;;  %7016 = vmatpush.msk.msra.mxu3 %vm752_vm13, %v534_v61  ;;  %v981_v46 = vsel %vm346_vm4, 0.0, %v980_v20  ;;  %v977_v52 = vsel %vm346_vm4, 0.0, %v976_v17  ;;  %v983_v63 = vsel %vm346_vm4, 0.0, %v982_v1 }
 0x16f   : > { %v1294_v35 = vpop.permute.xlu1 %1293  ;;  %v1266_v62 = vpop.permute.xlu0 %1265 }
 0x170   : > { %v1274_v15 = vpop.permute.xlu2 %1273  ;;  %1009 = vrot.lane.b32.xlu1 %v927_v24, %s7892_s10 }
 0x175   : > { %1029 = vrot.lane.b32.xlu0 %v981_v46, %s7889_s8 }
 0x176   : > { %1013 = vrot.lane.b32.xlu2 %v977_v52, %s7891_s9 }
 0x177   : > { %v1270_v41 = vpop.permute.xlu1 %1269  ;;  %v1302_v7 = vpop.permute.xlu0 %1301 }
 0x178   : > { %v1286_v3 = vpop.permute.xlu2 %1285  ;;  %1021 = vrot.lane.b32.xlu1 %v979_v51, %s7890_s28 }
 0x17e   : > { %1037 = vrot.lane.b32.xlu2 %v983_v63, %s7892_s10 }
 0x17f   : > { %v1282_v25 = vpop.permute.xlu1 %1281  ;;  %v1254_v14 = vpop.permute.xlu0 %1253 }
 0x180   : > { %v1262_v48 = vpop.permute.xlu2 %1261  ;;  %v1308_v16 = vsel %vm514_vm6, %v8347_v59, %v1254_v14  ;;  %v1315_v59 = vsel %vm514_vm6, %v8344_v58, %v1282_v25 }
 0x181   : > { %v1309_v4 = vsel %vm516_vm7, %v1308_v16, %v1258_v38  ;;  %v1316_v38 = vsel %vm516_vm7, %v1315_v59, %v1286_v3 }
 0x182   : > { %v1310_v32 = vsel %vm518_vm8, %v1309_v4, %v1262_v48 }
 0x183   : > { %v1311_v18 = vsel %vm520_vm9, %v1310_v32, %v1266_v62 }
 0x184   : > { %v1312_v49 = vsel %vm522_vm10, %v1311_v18, %v1270_v41 }
 0x185   : > { %v1313_v9 = vsel %vm524_vm11, %v1312_v49, %v1274_v15  ;;  %v1469_v49 = vrot.slane %v8491_v27, 4 }
 0x187   : > { %v1278_v60 = vpop.permute.xlu0 %1277  ;;  %v1386_v10 = vpop.permute.xlu1 %1385 }
 0x188   : > { %v1298_v31 = vpop.permute.xlu2 %1297  ;;  %v1314_v39 = vsel %vm526_vm12, %v1313_v9, %v1278_v60  ;;  %v1455_v52 = vrot.slane %v1386_v10, 4 }
 0x189   : > { %7024 = vmatpush.msk.msrb.mxu2 %vm752_vm13, %v1314_v39 }
 0x18a   : > { %v1456_v48 = vsel %vm346_vm4, %v1455_v52, %v8486_v40 }
 0x18b   : > { %v1462_v39 = vperm.slane %v1456_v48, %v8133_v6 }
 0x18f   : > { %v1290_v34 = vpop.permute.xlu0 %1289  ;;  %v1306_v24 = vpop.permute.xlu1 %1305 }
 0x190   : > { %v1388_v21 = vpop.permute.xlu2 %1387  ;;  %v1317_v47 = vsel %vm518_vm8, %v1316_v38, %v1290_v34 }
 0x191   : > { %v1411_v56 = vrot.slane %v1388_v21, 4  ;;  %v1318_v42 = vsel %vm520_vm9, %v1317_v47, %v1294_v35  ;;  %v1414_v61 = vsel %vm346_vm4, %v1388_v21, %v1413_v19 }
 0x192   : > { %v1319_v62 = vsel %vm522_vm10, %v1318_v42, %v1298_v31  ;;  %v1422_v17 = vperm.slane %v1414_v61, %v8133_v6 }
 0x193   : > { %v1320_v15 = vsel %vm524_vm11, %v1319_v62, %v1302_v7  ;;  %v1412_v58 = vsel %vm346_vm4, %v1411_v56, %v8484_v8 }
 0x194   : > { %v1321_v20 = vsel %vm526_vm12, %v1320_v15, %v1306_v24  ;;  %v1418_v35 = vperm.slane %v1412_v58, %v8133_v6  ;;  %v1435_v3 = vrot.slane %v1422_v17, 4  ;;  %v1481_v15 = vrot.slane %v1462_v39, 4 }
 0x195   : > { %7026 = vmatpush.msk.msrb.mxu3 %vm752_vm13, %v1321_v20 }
 0x196   : > { %v1423_v1 = vrot.slane %v1418_v35, 4 }
 0x197   : > { %v1384_v46 = vpop.permute.xlu0 %1383 }
 0x198   : > { %v1399_v41 = vrot.slane %v1384_v46, 4  ;;  %v1402_v51 = vsel %vm346_vm4, %v1384_v46, %v1401_v12  ;;  %v8684_v60 = vpop.permute.xlu2 %697 }
 0x199   : > { %v1410_v7 = vperm.slane %v1402_v51, %v8133_v6 }
 0x19a   : > { %v1400_v8 = vsel %vm346_vm4, %v1399_v41, %v8450_v2  ;;  %v1457_v2 = vrot.slane %v8486_v40, 4 }
 0x19b   : > { %v1406_v63 = vperm.slane %v1400_v8, %v8133_v6  ;;  %v1437_v25 = vrot.slane %v1410_v7, 4  ;;  %v1436_v14 = vsel %vm346_vm4, %v1435_v3, %v1410_v7 }
 0x19c   : > { %v1442_v16 = vperm.slane %v1436_v14, %v8178_v37  ;;  %v1458_v34 = vsel %vm346_vm4, %v1386_v10, %v1457_v2 }
 0x19d   : > { %v1438_v4 = vsel %vm346_vm4, %v1422_v17, %v1437_v25  ;;  %v1425_v32 = vrot.slane %v1406_v63, 4  ;;  %v1424_v18 = vsel %vm346_vm4, %v1423_v1, %v1406_v63  ;;  %v1466_v62 = vperm.slane %v1458_v34, %v8133_v6 }
 0x19e   : > { %1524 = vrot.lane.b32.xlu1 %v1442_v16, %s7888_s26  ;;  %v1446_v9 = vperm.slane %v1438_v4, %v8178_v37  ;;  %v8689_v31 = vperm.slane %v1424_v18, %v8178_v37  ;;  %v1451_v8 = vrot.slane %v1442_v16, 4 }
 0x19f   : > { %v1390_v59 = vpop.permute.xlu0 %1389  ;;  %v1426_v38 = vsel %vm346_vm4, %v1418_v35, %v1425_v32 }
 0x1a0   : > { %v1467_v19 = vrot.slane %v1390_v59, 4  ;;  %v1470_v21 = vsel %vm346_vm4, %v1390_v59, %v1469_v49  ;;  %1532 = vrot.lane.b32.xlu0 %v1446_v9, %s7886_s16  ;;  %v1434_v40 = vperm.slane %v1426_v38, %v8178_v37  ;;  %v1447_v56 = vrot.slane %v8689_v31, 4  ;;  %v8709_v35 = vpop.permute.xlu2 %709 }
 0x1a1   : > { %v1478_v47 = vperm.slane %v1470_v21, %v8133_v6  ;;  %v1453_v52 = vrot.slane %v1446_v9, 4  ;;  %v1452_v14 = vsel %vm346_vm4, 0.0, %v1451_v8  ;;  %v1493_v49 = vrot.slane %v1466_v62, 4 }
 0x1a2   : > { %v1468_v42 = vsel %vm346_vm4, %v1467_v19, %v8491_v27  ;;  %v682_v61 = vpop.permute.xlu1 %681  ;;  %1516 = vrot.lane.b32.xlu2 %v1434_v40, %s7887_s17  ;;  %v1448_v58 = vsel %vm346_vm4, 0.0, %v1447_v56  ;;  %v1449_v3 = vrot.slane %v1434_v40, 4 }
 0x1a3   : > { %v1474_v10 = vperm.slane %v1468_v42, %v8133_v6  ;;  %v1491_v24 = vrot.slane %v1478_v47, 4  ;;  %v1454_v7 = vsel %vm346_vm4, 0.0, %v1453_v52 }
 0x1a4   : > { %v1450_v25 = vsel %vm346_vm4, 0.0, %v1449_v3 }
 0x1a5   : > { %v1482_v20 = vsel %vm346_vm4, %v1474_v10, %v1481_v15  ;;  %v1492_v17 = vsel %vm346_vm4, %v1491_v24, %v1466_v62  ;;  %v1479_v41 = vrot.slane %v1474_v10, 4 }
 0x1a6   : > { %1512 = vrot.lane.b32.xlu1 %v1448_v58, %s7891_s9  ;;  %v1490_v12 = vperm.slane %v1482_v20, %v8178_v37  ;;  %v1498_v46 = vperm.slane %v1492_v17, %v8178_v37 }
 0x1a7   : > { %v690_v27 = vpop.permute.xlu0 %689  ;;  %v1480_v1 = vsel %vm346_vm4, %v1479_v41, %v1462_v39  ;;  %v1494_v39 = vsel %vm346_vm4, %v1478_v47, %v1493_v49 }
 0x1a8   : > { %1544 = vrot.lane.b32.xlu0 %v1490_v12, %s7887_s17  ;;  %v1505_v48 = vrot.slane %v1490_v12, 4  ;;  %v8723_v4 = vperm.slane %v1480_v1, %v8178_v37  ;;  %v990_v32 = vpop.permute.xlu2 %989  ;;  %v1507_v16 = vrot.slane %v1498_v46, 4  ;;  %v1502_v19 = vperm.slane %v1494_v39, %v8178_v37 }
 0x1aa   : > { %v8713_v51 = vpop.permute.xlu1 %717  ;;  %1552 = vrot.lane.b32.xlu2 %v1498_v46, %s7888_s26  ;;  %v1506_v2 = vsel %vm346_vm4, 0.0, %v1505_v48  ;;  %v1503_v9 = vrot.slane %v8723_v4, 4  ;;  %v1508_v38 = vsel %vm346_vm4, 0.0, %v1507_v16  ;;  %v1509_v56 = vrot.slane %v1502_v19, 4 }
 0x1ac   : > { %v1504_v34 = vsel %vm346_vm4, 0.0, %v1503_v9  ;;  %v1510_v47 = vsel %vm346_vm4, 0.0, %v1509_v56 }
 0x1ae   : > { %1536 = vrot.lane.b32.xlu1 %v1454_v7, %s7892_s10 }
 0x1af   : > { %v726_v63 = vpop.permute.xlu0 %725 }
 0x1b0   : > { %1520 = vrot.lane.b32.xlu0 %v1450_v25, %s7890_s28  ;;  %v1026_v40 = vpop.permute.xlu2 %1025 }
 0x1b2   : > { %v998_v18 = vpop.permute.xlu1 %997  ;;  %1528 = vrot.lane.b32.xlu2 %v1452_v14, %s7889_s8 }
 0x1b6   : > { %1548 = vrot.lane.b32.xlu1 %v1506_v2, %s7890_s28 }
 0x1b7   : > { %v1006_v59 = vpop.permute.xlu0 %1005 }
 0x1b8   : > { %1556 = vrot.lane.b32.xlu0 %v1508_v38, %s7889_s8  ;;  %v686_v10 = vpop.permute.xlu2 %685 }
 0x1ba   : > { %v1034_v21 = vpop.permute.xlu1 %1033  ;;  %1540 = vrot.lane.b32.xlu2 %v1504_v34, %s7891_s9 }
 0x1be   : > { %1560 = vrot.lane.b32.xlu1 %v1502_v19, %s7886_s16 }
 0x1bf   : > { %v1018_v42 = vpop.permute.xlu0 %1017 }
 0x1c0   : > { %1634 = vrot.lane.b32.xlu0 %v8229_v11, %s12564_s15 }
 0x1c2   : > { %v694_v62 = vpop.permute.xlu1 %693  ;;  %1564 = vrot.lane.b32.xlu2 %v1510_v47, %s7892_s10 }
 0x1c6   : > { %1636 = vrot.lane.b32.xlu1 %v8161_v28, %s12564_s15 }
 0x1c7   : > { %v678_v24 = vpop.permute.xlu0 %677 }
 0x1c8   : > { %v732_v15 = vsel %vm514_vm6, %v8543_v36, %v678_v24  ;;  %1640 = vrot.lane.b32.xlu0 %v8258_v43, %s12564_s15  ;;  %v722_v43 = vpop.permute.xlu2 %721 }
 0x1c9   : > { %v733_v58 = vsel %vm516_vm7, %v732_v15, %v682_v61 }
 0x1ca   : > { %v734_v11 = vsel %vm518_vm8, %v733_v58, %v686_v10  ;;  %v706_v20 = vpop.permute.xlu1 %705  ;;  %1638 = vrot.lane.b32.xlu2 %v8155_v26, %s12564_s15 }
 0x1cb   : > { %v735_v17 = vsel %vm520_vm9, %v734_v11, %v690_v27  ;;  %v739_v27 = vsel %vm514_vm6, %v8556_v57, %v706_v20 }
 0x1cc   : > { %v736_v12 = vsel %vm522_vm10, %v735_v17, %v694_v62 }
 0x1cd   : > { %v737_v36 = vsel %vm524_vm11, %v736_v12, %v8684_v60 }
 0x1ce   : > { %1642 = vrot.lane.b32.xlu1 %v8246_v13, %s12564_s15  ;;  %v740_v13 = vsel %vm516_vm7, %v739_v27, %v8709_v35 }
 0x1cf   : > { %v702_v28 = vpop.permute.xlu0 %701 }
 0x1d0   : > { %1646 = vrot.lane.b32.xlu0 %v8243_v29, %s12564_s15  ;;  %v738_v61 = vsel %vm526_vm12, %v737_v36, %v702_v28  ;;  %v1002_v52 = vpop.permute.xlu2 %1001 }
 0x1d1   : > { %7010 = vmatpush.msk.msra.mxu0 %vm752_vm13, %v738_v61 }
 0x1d2   : > { %v730_v26 = vpop.permute.xlu1 %729  ;;  %1644 = vrot.lane.b32.xlu2 %v8296_v5, %s12564_s15 }
 0x1d6   : > { %1648 = vrot.lane.b32.xlu1 %v8273_v45, %s12564_s15 }
 0x1d7   : > { %v714_v60 = vpop.permute.xlu0 %713 }
 0x1d8   : > { %v741_v29 = vsel %vm518_vm8, %v740_v13, %v714_v60 }
 0x1d9   : > { %v742_v46 = vsel %vm520_vm9, %v741_v29, %v8713_v51 }
 0x1da   : > { %v986_v41 = vpop.permute.xlu1 %985  ;;  %v743_v3 = vsel %vm522_vm10, %v742_v46, %v722_v43 }
 0x1db   : > { %v744_v5 = vsel %vm524_vm11, %v743_v3, %v726_v63  ;;  %v1040_v57 = vsel %vm514_vm6, %v8591_v33, %v986_v41  ;;  %v1014_v63 = vpop.permute.xlu2 %1013 }
 0x1dc   : > { %v745_v45 = vsel %vm526_vm12, %v744_v5, %v730_v26  ;;  %v1041_v35 = vsel %vm516_vm7, %v1040_v57, %v990_v32  ;;  %v1047_v33 = vsel %vm514_vm6, %v8628_v30, %v1014_v63  ;;  %v7009_v30 = vld [vmem:[%s12559_s1 + $0x8] sm:$0xff] }
 0x1dd   : > { %7012 = vmatpush.msk.msra.mxu1 %vm752_vm13, %v745_v45  ;;  %v1048_v32 = vsel %vm516_vm7, %v1047_v33, %v1018_v42  ;;  %7011 = vmatmul.msk.f32.vlgmr.msra.gmra.mxu0 %vm748_vm14, %v7009_v30 }
 0x1de   : > { %7013 = vmatmul.msk.f32.vlgmr.msra.gmra.mxu1 %vm748_vm14, %v7009_v30 }
 0x1df   : > { %v994_v7 = vpop.permute.xlu0 %993 }
 0x1e0   : > { %v1042_v8 = vsel %vm518_vm8, %v1041_v35, %v994_v7 }
 0x1e1   : > { %v1043_v51 = vsel %vm520_vm9, %v1042_v8, %v998_v18 }
 0x1e2   : > { %v1010_v1 = vpop.permute.xlu1 %1009  ;;  %v1044_v25 = vsel %vm522_vm10, %v1043_v51, %v1002_v52 }
 0x1e3   : > { %v1045_v14 = vsel %vm524_vm11, %v1044_v25, %v1006_v59  ;;  %v1038_v39 = vpop.permute.xlu2 %1037 }
 0x1e4   : > { %v1046_v48 = vsel %vm526_vm12, %v1045_v14, %v1010_v1 }
 0x1e5   : > { %7019 = vmatpush.msk.msrb.mxu0 %vm752_vm13, %v1046_v48 }
 0x1e7   : > { %v1030_v2 = vpop.permute.xlu0 %1029 }
 0x1ea   : > { %v1022_v16 = vpop.permute.xlu1 %1021 }
 0x1eb   : > { %v1049_v49 = vsel %vm518_vm8, %v1048_v32, %v1022_v16 }
 0x1ec   : > { %v1050_v18 = vsel %vm520_vm9, %v1049_v49, %v1026_v40 }
 0x1ed   : > { %v1051_v9 = vsel %vm522_vm10, %v1050_v18, %v1030_v2 }
 0x1ee   : > { %v1052_v59 = vsel %vm524_vm11, %v1051_v9, %v1034_v21 }
 0x1ef   : > { %v1053_v38 = vsel %vm526_vm12, %v1052_v59, %v1038_v39 }
 0x1f0   : > { %7021 = vmatpush.msk.msrb.mxu1 %vm752_vm13, %v1053_v38 }
 0x1fc   : > { %v1517_v34 = vpop.permute.xlu2 %1516 }
 0x204   : > { %v1553_v40 = vpop.permute.xlu2 %1552 }
 0x20c   : > { %v1529_v21 = vpop.permute.xlu2 %1528 }
 0x210   : > { %v1525_v19 = vpop.permute.xlu1 %1524 }
 0x212   : > { %v1533_v56 = vpop.permute.xlu0 %1532 }
 0x214   : > { %v1541_v20 = vpop.permute.xlu2 %1540 }
 0x215   : > { %v1574_v36 = vsel %vm514_vm6, %v8723_v4, %v1541_v20 }
 0x218   : > { %v1513_v42 = vpop.permute.xlu1 %1512 }
 0x219   : > { %v1567_v62 = vsel %vm514_vm6, %v8689_v31, %v1513_v42 }
 0x21a   : > { %v1545_v47 = vpop.permute.xlu0 %1544  ;;  %v1568_v24 = vsel %vm516_vm7, %v1567_v62, %v1517_v34 }
 0x21b   : > { %v1575_v31 = vsel %vm516_vm7, %v1574_v36, %v1545_v47 }
 0x21c   : > { %v1565_v29 = vpop.permute.xlu2 %1564 }
 0x220   : > { %v1537_v10 = vpop.permute.xlu1 %1536 }
 0x222   : > { %v1521_v15 = vpop.permute.xlu0 %1520 }
 0x223   : > { %v1569_v58 = vsel %vm518_vm8, %v1568_v24, %v1521_v15 }
 0x224   : > { %v1570_v11 = vsel %vm520_vm9, %v1569_v58, %v1525_v19  ;;  %v1639_v5 = vpop.permute.xlu2 %1638 }
 0x225   : > { %v1571_v17 = vsel %vm522_vm10, %v1570_v11, %v1529_v21  ;;  %v1672_v45 = vrot.slane %v1639_v5, 4 }
 0x226   : > { %v1572_v12 = vsel %vm524_vm11, %v1571_v17, %v1533_v56 }
 0x227   : > { %v1573_v28 = vsel %vm526_vm12, %v1572_v12, %v1537_v10 }
 0x228   : > { %v1549_v43 = vpop.permute.xlu1 %1548  ;;  %7029 = vmatpush.msk.msra.mxu0 %vm752_vm13, %v1573_v28 }
 0x229   : > { %v1576_v61 = vsel %vm518_vm8, %v1575_v31, %v1549_v43 }
 0x22a   : > { %v1557_v26 = vpop.permute.xlu0 %1556  ;;  %v1577_v27 = vsel %vm520_vm9, %v1576_v61, %v1553_v40 }
 0x22b   : > { %v1578_v13 = vsel %vm522_vm10, %v1577_v27, %v1557_v26 }
 0x22c   : > { %v1645_v16 = vpop.permute.xlu2 %1644 }
 0x22d   : > { %v1714_v34 = vrot.slane %v1645_v16, 4 }
 0x230   : > { %v1561_v60 = vpop.permute.xlu1 %1560 }
 0x231   : > { %v1579_v46 = vsel %vm524_vm11, %v1578_v13, %v1561_v60  ;;  %v1934_v60 = vrot.slane %v8116_v0, 4 }
 0x232   : > { %v1580_v52 = vsel %vm526_vm12, %v1579_v46, %v1565_v29  ;;  %v1635_v41 = vpop.permute.xlu0 %1634 }
 0x233   : > { %7031 = vmatpush.msk.msra.mxu1 %vm752_vm13, %v1580_v52  ;;  %v1660_v35 = vrot.slane %v1635_v41, 4 }
 0x238   : > { %v1637_v4 = vpop.permute.xlu1 %1636 }
 0x239   : > { %v1715_v42 = vsel %vm346_vm4, %v1714_v34, %v1637_v4  ;;  %v1716_v31 = vrot.slane %v1637_v4, 4 }
 0x23a   : > { %v1641_v3 = vpop.permute.xlu0 %1640  ;;  %v1721_v20 = vperm.slane %v1715_v42, %v8133_v6 }
 0x23b   : > { %v1728_v24 = vrot.slane %v1641_v3, 4  ;;  %v1717_v46 = vsel %vm346_vm4, %v1645_v16, %v1716_v31 }
 0x23c   : > { %v1740_v4 = vrot.slane %v1721_v20, 4 }
 0x240   : > { %v1643_v57 = vpop.permute.xlu1 %1642 }
 0x241   : > { %v1658_v7 = vrot.slane %v1643_v57, 4  ;;  %v1661_v1 = vsel %vm346_vm4, %v1643_v57, %v1660_v35 }
 0x242   : > { %v1647_v8 = vpop.permute.xlu0 %1646  ;;  %v1669_v32 = vperm.slane %v1661_v1, %v8133_v6 }
 0x243   : > { %v1659_v51 = vsel %vm346_vm4, %v1658_v7, %v1635_v41  ;;  %v1670_v25 = vrot.slane %v1647_v8, 4  ;;  %v1673_v14 = vsel %vm346_vm4, %v1647_v8, %v1672_v45 }
 0x244   : > { %v1665_v63 = vperm.slane %v1659_v51, %v8133_v6  ;;  %v1681_v48 = vperm.slane %v1673_v14, %v8133_v6  ;;  %v1696_v15 = vrot.slane %v1669_v32, 4  ;;  %v1922_v51 = vrot.slane %v8045_v22, 4 }
 0x245   : > { %v1671_v33 = vsel %vm346_vm4, %v1670_v25, %v1639_v5  ;;  %v1725_v5 = vperm.slane %v1717_v46, %v8133_v6 }
 0x246   : > { %v1677_v49 = vperm.slane %v1671_v33, %v8133_v6  ;;  %v1694_v2 = vrot.slane %v1681_v48, 4  ;;  %v1684_v18 = vrot.slane %v1665_v63, 4  ;;  %v1697_v61 = vsel %vm346_vm4, %v1681_v48, %v1696_v15 }
 0x247   : > { %v1705_v29 = vperm.slane %v1697_v61, %v8178_v37  ;;  %v1752_v25 = vrot.slane %v1725_v5, 4 }
 0x248   : > { %v1682_v9 = vrot.slane %v1677_v49, 4  ;;  %v1649_v39 = vpop.permute.xlu1 %1648  ;;  %v1685_v59 = vsel %vm346_vm4, %v1677_v49, %v1684_v18  ;;  %v1695_v38 = vsel %vm346_vm4, %v1694_v2, %v1669_v32 }
 0x249   : > { %v1726_v30 = vrot.slane %v1649_v39, 4  ;;  %v1693_v19 = vperm.slane %v1685_v59, %v8178_v37  ;;  %v1701_v56 = vperm.slane %v1695_v38, %v8178_v37  ;;  %v1729_v28 = vsel %vm346_vm4, %v1649_v39, %v1728_v24 }
 0x24a   : > { %v1683_v40 = vsel %vm346_vm4, %v1682_v9, %v1665_v63  ;;  %v1737_v26 = vperm.slane %v1729_v28, %v8133_v6  ;;  %v1712_v8 = vrot.slane %v1705_v29, 4  ;;  %v1923_v63 = vsel %vm346_vm4, %v1922_v51, %v8195_v54 }
 0x24b   : > { %v1727_v47 = vsel %vm346_vm4, %v1726_v30, %v1641_v3  ;;  %1775 = vrot.lane.b32.xlu0 %v1693_v19, %s7887_s17  ;;  %v1708_v21 = vrot.slane %v1693_v19, 4  ;;  %v8833_v62 = vperm.slane %v1683_v40, %v8178_v37  ;;  %v1710_v12 = vrot.slane %v1701_v56, 4 }
 0x24c   : > { %v1733_v10 = vperm.slane %v1727_v47, %v8133_v6  ;;  %v1750_v52 = vrot.slane %v1737_v26, 4  ;;  %v1935_v3 = vsel %vm346_vm4, %v1934_v60, %v8200_v55  ;;  %v1713_v33 = vsel %vm346_vm4, 0.0, %v1712_v8 }
 0x24d   : > { %v1709_v58 = vsel %vm346_vm4, 0.0, %v1708_v21  ;;  %v1706_v11 = vrot.slane %v8833_v62, 4  ;;  %v1711_v27 = vsel %vm346_vm4, 0.0, %v1710_v12  ;;  %v1941_v7 = vperm.slane %v1935_v3, %v8133_v6 }
 0x24e   : > { %v1738_v17 = vrot.slane %v1733_v10, 4  ;;  %1779 = vrot.lane.b32.xlu1 %v1709_v58, %s7890_s28  ;;  %v1741_v57 = vsel %vm346_vm4, %v1733_v10, %v1740_v4  ;;  %v1751_v35 = vsel %vm346_vm4, %v1750_v52, %v1725_v5  ;;  %v1753_v16 = vsel %vm346_vm4, %v1737_v26, %v1752_v25 }
 0x24f   : > { %v1707_v36 = vsel %vm346_vm4, 0.0, %v1706_v11  ;;  %v1749_v1 = vperm.slane %v1741_v57, %v8178_v37  ;;  %v1757_v14 = vperm.slane %v1751_v35, %v8178_v37  ;;  %v1946_v48 = vrot.slane %v1941_v7, 4 }
 0x250   : > { %1771 = vrot.lane.b32.xlu2 %v1707_v36, %s7891_s9  ;;  %v1739_v43 = vsel %vm346_vm4, %v1738_v17, %v1721_v20  ;;  %v1929_v32 = vperm.slane %v1923_v63, %v8133_v6  ;;  %v1761_v2 = vperm.slane %v1753_v16, %v8178_v37  ;;  %v1936_v39 = vrot.slane %v8200_v55, 4 }
 0x251   : > { %v8848_v13 = vperm.slane %v1739_v43, %v8178_v37  ;;  %v1766_v49 = vrot.slane %v1757_v14, 4  ;;  %v1764_v9 = vrot.slane %v1749_v1, 4  ;;  %v1924_v30 = vrot.slane %v8195_v54, 4 }
 0x252   : > { %v1947_v18 = vsel %vm346_vm4, %v1946_v48, %v1929_v32  ;;  %v1948_v34 = vrot.slane %v1929_v32, 4  ;;  %v1768_v19 = vrot.slane %v1761_v2, 4  ;;  %v1937_v40 = vsel %vm346_vm4, %v8116_v0, %v1936_v39 }
 0x253   : > { %1787 = vrot.lane.b32.xlu0 %v1711_v27, %s7889_s8  ;;  %v1762_v41 = vrot.slane %v8848_v13, 4  ;;  %v1767_v59 = vsel %vm346_vm4, 0.0, %v1766_v49  ;;  %v8881_v38 = vperm.slane %v1947_v18, %v8178_v37  ;;  %v1925_v21 = vsel %vm346_vm4, %v8045_v22, %v1924_v30 }
 0x254   : > { %v1949_v42 = vsel %vm346_vm4, %v1941_v7, %v1948_v34  ;;  %v1945_v10 = vperm.slane %v1937_v40, %v8133_v6  ;;  %v1769_v24 = vsel %vm346_vm4, 0.0, %v1768_v19  ;;  %v1933_v58 = vperm.slane %v1925_v21, %v8133_v6  ;;  %v535_v21 = vld [vmem:[%s12559_s1] sm:$0xff] }
 0x255   : > { %v1763_v45 = vsel %vm346_vm4, 0.0, %v1762_v41  ;;  %v1970_v47 = vrot.slane %v8881_v38, 4  ;;  %v1957_v15 = vperm.slane %v1949_v42, %v8178_v37  ;;  %v1990_v17 = vrot.slane %v8210_v44, 4  ;;  %7015 = vmatmul.msk.f32.vlgmr.msra.gmra.mxu2 %vm748_vm14, %v535_v21  ;;  %7017 = vmatmul.msk.f32.vlgmr.msra.gmra.mxu3 %vm748_vm14, %v535_v21 }
 0x256   : > { %1791 = vrot.lane.b32.xlu1 %v1705_v29, %s7886_s16  ;;  %v1958_v20 = vrot.slane %v1945_v10, 4  ;;  %v1978_v28 = vrot.slane %v8048_v23, 4  ;;  %v1960_v36 = vrot.slane %v1933_v58, 4  ;;  %v1992_v26 = vrot.slane %v8090_v50, 4 }
 0x257   : > { %v1971_v11 = vsel %vm346_vm4, 0.0, %v1970_v47  ;;  %v1972_v12 = vrot.slane %v1957_v15, 4  ;;  %v1991_v61 = vsel %vm346_vm4, %v1990_v17, %v8090_v50  ;;  %v1980_v3 = vrot.slane %v8095_v53, 4 }
 0x258   : > { %1783 = vrot.lane.b32.xlu2 %v1701_v56, %s7888_s26  ;;  %v1765_v56 = vsel %vm346_vm4, 0.0, %v1764_v9  ;;  %v1959_v43 = vsel %vm346_vm4, %v1958_v20, %v1933_v58  ;;  %v1979_v31 = vsel %vm346_vm4, %v1978_v28, %v8095_v53  ;;  %v1961_v60 = vsel %vm346_vm4, %v1945_v10, %v1960_v36 }
 0x259   : > { %v1973_v27 = vsel %vm346_vm4, 0.0, %v1972_v12  ;;  %v1965_v29 = vperm.slane %v1959_v43, %v8178_v37  ;;  %v1985_v46 = vperm.slane %v1979_v31, %v8133_v6  ;;  %v1997_v52 = vperm.slane %v1991_v61, %v8133_v6 }
 0x25a   : > { %v1993_v41 = vsel %vm346_vm4, %v8210_v44, %v1992_v26  ;;  %v1969_v4 = vperm.slane %v1961_v60, %v8178_v37  ;;  %v1981_v8 = vsel %vm346_vm4, %v8048_v23, %v1980_v3 }
 0x25b   : > { %1799 = vrot.lane.b32.xlu0 %v1763_v45, %s7891_s9  ;;  %v2001_v5 = vperm.slane %v1993_v41, %v8133_v6  ;;  %v2004_v57 = vrot.slane %v1985_v46, 4  ;;  %v2002_v45 = vrot.slane %v1997_v52, 4  ;;  %v1974_v51 = vrot.slane %v1965_v29, 4 }
 0x25c   : > { %v1976_v35 = vrot.slane %v1969_v4, 4  ;;  %v1989_v48 = vperm.slane %v1981_v8, %v8133_v6 }
 0x25d   : > { %v2005_v7 = vsel %vm346_vm4, %v1997_v52, %v2004_v57  ;;  %v2003_v25 = vsel %vm346_vm4, %v2002_v45, %v1985_v46 }
 0x25e   : > { %1803 = vrot.lane.b32.xlu1 %v1749_v1, %s7887_s17  ;;  %v2014_v1 = vrot.slane %v2001_v5, 4  ;;  %v2013_v63 = vperm.slane %v2005_v7, %v8178_v37  ;;  %v8933_v16 = vperm.slane %v2003_v25, %v8178_v37  ;;  %v2016_v34 = vrot.slane %v1989_v48, 4 }
 0x260   : > { %1795 = vrot.lane.b32.xlu2 %v1713_v33, %s7892_s10  ;;  %v1975_v33 = vsel %vm346_vm4, 0.0, %v1974_v51  ;;  %v2015_v32 = vsel %vm346_vm4, %v2014_v1, %v1989_v48  ;;  %v2028_v49 = vrot.slane %v2013_v63, 4  ;;  %v2026_v18 = vrot.slane %v8933_v16, 4 }
 0x261   : > { %v2017_v30 = vsel %vm346_vm4, %v2001_v5, %v2016_v34 }
 0x262   : > { %v2029_v9 = vsel %vm346_vm4, 0.0, %v2028_v49  ;;  %v2025_v40 = vperm.slane %v2017_v30, %v8178_v37 }
 0x263   : > { %1811 = vrot.lane.b32.xlu0 %v1757_v14, %s7888_s26  ;;  %v1977_v14 = vsel %vm346_vm4, 0.0, %v1976_v35 }
 0x266   : > { %1815 = vrot.lane.b32.xlu1 %v1767_v59, %s7889_s8  ;;  %v2027_v59 = vsel %vm346_vm4, 0.0, %v2026_v18 }
 0x268   : > { %1807 = vrot.lane.b32.xlu2 %v1765_v56, %s7890_s28  ;;  %v2032_v56 = vrot.slane %v2025_v40, 4 }
 0x26a   : > { %v2033_v42 = vsel %vm346_vm4, 0.0, %v2032_v56 }
 0x26b   : > { %1823 = vrot.lane.b32.xlu0 %v1769_v24, %s7892_s10 }
 0x26e   : > { %2035 = vrot.lane.b32.xlu1 %v1971_v11, %s7891_s9 }
 0x270   : > { %1819 = vrot.lane.b32.xlu2 %v1761_v2, %s7886_s16  ;;  %v2021_v2 = vperm.slane %v2015_v32, %v8178_v37 }
 0x272   : > { %v2030_v39 = vrot.slane %v2021_v2, 4 }
 0x273   : > { %2043 = vrot.lane.b32.xlu0 %v1973_v27, %s7890_s28 }
 0x274   : > { %v2031_v19 = vsel %vm346_vm4, 0.0, %v2030_v39 }
 0x276   : > { %2047 = vrot.lane.b32.xlu1 %v1965_v29, %s7888_s26  ;;  %v7018_v29 = vld [vmem:[%s12559_s1 + $0x10] sm:$0xff] }
 0x277   : > { %7020 = vmatmul.msk.f32.vlgmr.msrb.gmra.mxu0 %vm748_vm14, %v7018_v29  ;;  %7022 = vmatmul.msk.f32.vlgmr.msrb.gmra.mxu1 %vm748_vm14, %v7018_v29 }
 0x278   : > { %2039 = vrot.lane.b32.xlu2 %v1957_v15, %s7887_s17 }
 0x27b   : > { %2055 = vrot.lane.b32.xlu0 %v1969_v4, %s7886_s16 }
 0x27e   : > { %2059 = vrot.lane.b32.xlu1 %v1977_v14, %s7892_s10 }
 0x280   : > { %2051 = vrot.lane.b32.xlu2 %v1975_v33, %s7889_s8 }
 0x283   : > { %2067 = vrot.lane.b32.xlu0 %v2013_v63, %s7887_s17 }
 0x286   : > { %2071 = vrot.lane.b32.xlu1 %v2029_v9, %s7890_s28 }
 0x288   : > { %2063 = vrot.lane.b32.xlu2 %v2027_v59, %s7891_s9 }
 0x28b   : > { %2079 = vrot.lane.b32.xlu0 %v2031_v19, %s7889_s8 }
 0x28e   : > { %2083 = vrot.lane.b32.xlu1 %v2025_v40, %s7886_s16 }
 0x290   : > { %2075 = vrot.lane.b32.xlu2 %v2021_v2, %s7888_s26 }
 0x293   : > { %2157 = vrot.lane.b32.xlu0 %v8195_v54, %s12566_s29 }
 0x296   : > { %2159 = vrot.lane.b32.xlu1 %v8095_v53, %s12566_s29 }
 0x298   : > { %2087 = vrot.lane.b32.xlu2 %v2033_v42, %s7892_s10 }
 0x29b   : > { %2163 = vrot.lane.b32.xlu0 %v8090_v50, %s12566_s29 }
 0x29e   : > { %2165 = vrot.lane.b32.xlu1 %v8045_v22, %s12566_s29 }
 0x2a0   : > { %2161 = vrot.lane.b32.xlu2 %v8200_v55, %s12566_s29 }
 0x2a3   : > { %2169 = vrot.lane.b32.xlu0 %v8116_v0, %s12566_s29 }
 0x2a6   : > { %2171 = vrot.lane.b32.xlu1 %v8210_v44, %s12566_s29 }
 0x2a8   : > { %2167 = vrot.lane.b32.xlu2 %v8048_v23, %s12566_s29  ;;  %s6912_s29 = scalar_lea.sflag [#allocation4], %s8012_s12 }
 0x2aa   : > { %v1772_v47 = vpop.permute.xlu2 %1771 }
 0x2ab   : > { %v1826_v11 = vsel %vm514_vm6, %v8833_v62, %v1772_v47 }
 0x2b2   : > { %v1784_v10 = vpop.permute.xlu2 %1783 }
 0x2ba   : > { %v1796_v24 = vpop.permute.xlu2 %1795 }
 0x2bd   : > { %v1776_v15 = vpop.permute.xlu0 %1775 }
 0x2be   : > { %v1827_v20 = vsel %vm516_vm7, %v1826_v11, %v1776_v15 }
 0x2c0   : > { %v1780_v58 = vpop.permute.xlu1 %1779 }
 0x2c1   : > { %v1828_v17 = vsel %vm518_vm8, %v1827_v20, %v1780_v58 }
 0x2c2   : > { %v1808_v12 = vpop.permute.xlu2 %1807  ;;  %v1829_v36 = vsel %vm520_vm9, %v1828_v17, %v1784_v10 }
 0x2c5   : > { %v1788_v28 = vpop.permute.xlu0 %1787 }
 0x2c6   : > { %v1830_v43 = vsel %vm522_vm10, %v1829_v36, %v1788_v28 }
 0x2c8   : > { %v1792_v31 = vpop.permute.xlu1 %1791 }
 0x2c9   : > { %v1831_v61 = vsel %vm524_vm11, %v1830_v43, %v1792_v31 }
 0x2ca   : > { %v1832_v26 = vsel %vm526_vm12, %v1831_v61, %v1796_v24  ;;  %v1820_v60 = vpop.permute.xlu2 %1819 }
 0x2cb   : > { %7034 = vmatpush.msk.msra.mxu2 %vm752_vm13, %v1832_v26 }
 0x2cd   : > { %v1800_v27 = vpop.permute.xlu0 %1799 }
 0x2ce   : > { %v1833_v46 = vsel %vm514_vm6, %v8848_v13, %v1800_v27 }
 0x2d0   : > { %v1804_v62 = vpop.permute.xlu1 %1803 }
 0x2d1   : > { %v1834_v52 = vsel %vm516_vm7, %v1833_v46, %v1804_v62 }
 0x2d2   : > { %v1835_v4 = vsel %vm518_vm8, %v1834_v52, %v1808_v12  ;;  %v2040_v5 = vpop.permute.xlu2 %2039 }
 0x2d5   : > { %v1812_v41 = vpop.permute.xlu0 %1811 }
 0x2d6   : > { %v1836_v57 = vsel %vm520_vm9, %v1835_v4, %v1812_v41 }
 0x2d8   : > { %v1816_v3 = vpop.permute.xlu1 %1815 }
 0x2d9   : > { %v1837_v45 = vsel %vm522_vm10, %v1836_v57, %v1816_v3 }
 0x2da   : > { %v1838_v7 = vsel %vm524_vm11, %v1837_v45, %v1820_v60  ;;  %v2052_v13 = vpop.permute.xlu2 %2051 }
 0x2dd   : > { %v1824_v35 = vpop.permute.xlu0 %1823 }
 0x2de   : > { %v1839_v8 = vsel %vm526_vm12, %v1838_v7, %v1824_v35 }
 0x2df   : > { %7036 = vmatpush.msk.msra.mxu3 %vm752_vm13, %v1839_v8 }
 0x2e0   : > { %v2036_v51 = vpop.permute.xlu1 %2035 }
 0x2e1   : > { %v2090_v25 = vsel %vm514_vm6, %v8881_v38, %v2036_v51 }
 0x2e2   : > { %v2091_v63 = vsel %vm516_vm7, %v2090_v25, %v2040_v5  ;;  %v2064_v32 = vpop.permute.xlu2 %2063 }
 0x2e3   : > { %v2097_v30 = vsel %vm514_vm6, %v8933_v16, %v2064_v32 }
 0x2e5   : > { %v2044_v1 = vpop.permute.xlu0 %2043 }
 0x2e6   : > { %v2092_v48 = vsel %vm518_vm8, %v2091_v63, %v2044_v1 }
 0x2e8   : > { %v2048_v14 = vpop.permute.xlu1 %2047 }
 0x2e9   : > { %v2093_v33 = vsel %vm520_vm9, %v2092_v48, %v2048_v14 }
 0x2ea   : > { %v2094_v2 = vsel %vm522_vm10, %v2093_v33, %v2052_v13  ;;  %v2076_v38 = vpop.permute.xlu2 %2075 }
 0x2ed   : > { %v2056_v49 = vpop.permute.xlu0 %2055 }
 0x2ee   : > { %v2095_v18 = vsel %vm524_vm11, %v2094_v2, %v2056_v49 }
 0x2f0   : > { %v2060_v9 = vpop.permute.xlu1 %2059 }
 0x2f1   : > { %v2096_v39 = vsel %vm526_vm12, %v2095_v18, %v2060_v9 }
 0x2f2   : > { %7039 = vmatpush.msk.msrb.mxu0 %vm752_vm13, %v2096_v39  ;;  %v2088_v10 = vpop.permute.xlu2 %2087 }
 0x2f5   : > { %v2068_v59 = vpop.permute.xlu0 %2067 }
 0x2f6   : > { %v2098_v19 = vsel %vm516_vm7, %v2097_v30, %v2068_v59 }
 0x2f8   : > { %v2072_v34 = vpop.permute.xlu1 %2071 }
 0x2f9   : > { %v2099_v40 = vsel %vm518_vm8, %v2098_v19, %v2072_v34 }
 0x2fa   : > { %v2100_v42 = vsel %vm520_vm9, %v2099_v40, %v2076_v38  ;;  %v2162_v16 = vpop.permute.xlu2 %2161 }
 0x2fb   : > { %v2195_v43 = vrot.slane %v2162_v16, 4 }
 0x2fd   : > { %v2080_v56 = vpop.permute.xlu0 %2079 }
 0x2fe   : > { %v2101_v47 = vsel %vm522_vm10, %v2100_v42, %v2080_v56 }
 0x300   : > { %v2084_v21 = vpop.permute.xlu1 %2083 }
 0x301   : > { %v2102_v24 = vsel %vm524_vm11, %v2101_v47, %v2084_v21 }
 0x302   : > { %v2103_v15 = vsel %vm526_vm12, %v2102_v24, %v2088_v10  ;;  %v2168_v62 = vpop.permute.xlu2 %2167 }
 0x303   : > { %7041 = vmatpush.msk.msrb.mxu1 %vm752_vm13, %v2103_v15  ;;  %v2237_v45 = vrot.slane %v2168_v62, 4 }
 0x305   : > { %v2158_v58 = vpop.permute.xlu0 %2157 }
 0x306   : > { %v2183_v28 = vrot.slane %v2158_v58, 4 }
 0x308   : > { %v2160_v11 = vpop.permute.xlu1 %2159 }
 0x309   : > { %v2238_v25 = vsel %vm346_vm4, %v2237_v45, %v2160_v11  ;;  %v2239_v19 = vrot.slane %v2160_v11, 4 }
 0x30a   : > { %v2244_v49 = vperm.slane %v2238_v25, %v8133_v6 }
 0x30b   : > { %v2240_v10 = vsel %vm346_vm4, %v2168_v62, %v2239_v19 }
 0x30c   : > { %v2248_v11 = vperm.slane %v2240_v10, %v8133_v6 }
 0x30d   : > { %v2164_v20 = vpop.permute.xlu0 %2163 }
 0x30e   : > { %v2251_v2 = vrot.slane %v2164_v20, 4 }
 0x310   : > { %v2166_v17 = vpop.permute.xlu1 %2165 }
 0x311   : > { %v2181_v12 = vrot.slane %v2166_v17, 4  ;;  %v2184_v31 = vsel %vm346_vm4, %v2166_v17, %v2183_v28 }
 0x312   : > { %v2192_v46 = vperm.slane %v2184_v31, %v8133_v6 }
 0x313   : > { %v2182_v36 = vsel %vm346_vm4, %v2181_v12, %v2158_v58  ;;  %v2263_v58 = vrot.slane %v2244_v49, 4 }
 0x314   : > { %v2188_v61 = vperm.slane %v2182_v36, %v8133_v6  ;;  %v2219_v59 = vrot.slane %v2192_v46, 4  ;;  %v2275_v36 = vrot.slane %v2248_v11, 4 }
 0x315   : > { %v2170_v26 = vpop.permute.xlu0 %2169 }
 0x316   : > { %v2193_v27 = vrot.slane %v2170_v26, 4  ;;  %v2196_v60 = vsel %vm346_vm4, %v2170_v26, %v2195_v43  ;;  %v2207_v4 = vrot.slane %v2188_v61, 4 }
 0x317   : > { %v2204_v29 = vperm.slane %v2196_v60, %v8133_v6 }
 0x318   : > { %v2194_v52 = vsel %vm346_vm4, %v2193_v27, %v2162_v16  ;;  %v2172_v41 = vpop.permute.xlu1 %2171 }
 0x319   : > { %v2200_v3 = vperm.slane %v2194_v52, %v8133_v6  ;;  %v2217_v5 = vrot.slane %v2204_v29, 4  ;;  %v2249_v57 = vrot.slane %v2172_v41, 4  ;;  %v2252_v38 = vsel %vm346_vm4, %v2172_v41, %v2251_v2 }
 0x31a   : > { %v2220_v40 = vsel %vm346_vm4, %v2204_v29, %v2219_v59  ;;  %v2260_v56 = vperm.slane %v2252_v38, %v8133_v6 }
 0x31b   : > { %v2205_v35 = vrot.slane %v2200_v3, 4  ;;  %v2250_v7 = vsel %vm346_vm4, %v2249_v57, %v2164_v20  ;;  %v2208_v8 = vsel %vm346_vm4, %v2200_v3, %v2207_v4  ;;  %v2218_v51 = vsel %vm346_vm4, %v2217_v5, %v2192_v46 }
 0x31c   : > { %v2256_v13 = vperm.slane %v2250_v7, %v8133_v6  ;;  %v2216_v1 = vperm.slane %v2208_v8, %v8178_v37  ;;  %v2224_v63 = vperm.slane %v2218_v51, %v8178_v37  ;;  %v2228_v21 = vperm.slane %v2220_v40, %v8178_v37 }
 0x31d   : > { %v2206_v14 = vsel %vm346_vm4, %v2205_v35, %v2188_v61  ;;  %v2273_v24 = vrot.slane %v2260_v56, 4  ;;  %v2276_v61 = vsel %vm346_vm4, %v2260_v56, %v2275_v36 }
 0x31e   : > { %v2261_v48 = vrot.slane %v2256_v13, 4  ;;  %2298 = vrot.lane.b32.xlu0 %v2216_v1, %s7887_s17  ;;  %v2231_v33 = vrot.slane %v2216_v1, 4  ;;  %v9032_v32 = vperm.slane %v2206_v14, %v8178_v37  ;;  %v2233_v39 = vrot.slane %v2224_v63, 4 }
 0x31f   : > { %v2264_v16 = vsel %vm346_vm4, %v2256_v13, %v2263_v58  ;;  %v2274_v17 = vsel %vm346_vm4, %v2273_v24, %v2248_v11  ;;  %v2235_v12 = vrot.slane %v2228_v21, 4  ;;  %v2284_v27 = vperm.slane %v2276_v61, %v8178_v37 }
 0x320   : > { %v2232_v18 = vsel %vm346_vm4, 0.0, %v2231_v33  ;;  %v2229_v9 = vrot.slane %v9032_v32, 4  ;;  %v2262_v30 = vsel %vm346_vm4, %v2261_v48, %v2244_v49  ;;  %v2234_v42 = vsel %vm346_vm4, 0.0, %v2233_v39 }
 0x321   : > { %2302 = vrot.lane.b32.xlu1 %v2232_v18, %s7890_s28  ;;  %v9046_v47 = vperm.slane %v2262_v30, %v8178_v37  ;;  %v2272_v28 = vperm.slane %v2264_v16, %v8178_v37  ;;  %v2280_v43 = vperm.slane %v2274_v17, %v8178_v37  ;;  %v2236_v31 = vsel %vm346_vm4, 0.0, %v2235_v12 }
 0x322   : > { %v2230_v34 = vsel %vm346_vm4, 0.0, %v2229_v9  ;;  %v2291_v29 = vrot.slane %v2284_v27, 4 }
 0x323   : > { %2294 = vrot.lane.b32.xlu2 %v2230_v34, %s7891_s9  ;;  %v2285_v15 = vrot.slane %v9046_v47, 4  ;;  %v2289_v26 = vrot.slane %v2280_v43, 4  ;;  %v2287_v60 = vrot.slane %v2272_v28, 4 }
 0x324   : > { %v2292_v52 = vsel %vm346_vm4, 0.0, %v2291_v29 }
 0x325   : > { %v2286_v20 = vsel %vm346_vm4, 0.0, %v2285_v15  ;;  %v2290_v62 = vsel %vm346_vm4, 0.0, %v2289_v26  ;;  %v2288_v46 = vsel %vm346_vm4, 0.0, %v2287_v60 }
 0x326   : > { %2310 = vrot.lane.b32.xlu0 %v2234_v42, %s7889_s8 }
 0x329   : > { %2314 = vrot.lane.b32.xlu1 %v2228_v21, %s7886_s16 }
 0x32b   : > { %2306 = vrot.lane.b32.xlu2 %v2224_v63, %s7888_s26 }
 0x32e   : > { %2322 = vrot.lane.b32.xlu0 %v2286_v20, %s7891_s9 }
 0x331   : > { %2326 = vrot.lane.b32.xlu1 %v2272_v28, %s7887_s17 }
 0x333   : > { %2318 = vrot.lane.b32.xlu2 %v2236_v31, %s7892_s10 }
 0x336   : > { %2334 = vrot.lane.b32.xlu0 %v2280_v43, %s7888_s26 }
 0x339   : > { %2338 = vrot.lane.b32.xlu1 %v2290_v62, %s7889_s8 }
 0x33b   : > { %2330 = vrot.lane.b32.xlu2 %v2288_v46, %s7890_s28 }
 0x33e   : > { %2346 = vrot.lane.b32.xlu0 %v2292_v52, %s7892_s10 }
 0x341   : > { %2416 = vrot.lane.b32.xlu1 %v8195_v54, %s12564_s15 }
 0x343   : > { %2342 = vrot.lane.b32.xlu2 %v2284_v27, %s7886_s16 }
 0x346   : > { %2420 = vrot.lane.b32.xlu0 %v8200_v55, %s12564_s15 }
 0x349   : > { %2422 = vrot.lane.b32.xlu1 %v8090_v50, %s12564_s15  ;;  %v7023_v50 = vld [vmem:[%s12559_s1 + $0x18] sm:$0xff] }
 0x34a   : > { %7025 = vmatmul.msk.f32.vlgmr.msrb.gmra.mxu2 %vm748_vm14, %v7023_v50  ;;  %7027 = vmatmul.msk.f32.vlgmr.msrb.gmra.mxu3 %vm748_vm14, %v7023_v50 }
 0x34b   : > { %2418 = vrot.lane.b32.xlu2 %v8095_v53, %s12564_s15 }
 0x34e   : > { %2426 = vrot.lane.b32.xlu0 %v8048_v23, %s12564_s15 }
 0x351   : > { %2428 = vrot.lane.b32.xlu1 %v8116_v0, %s12564_s15 }
 0x353   : > { %2424 = vrot.lane.b32.xlu2 %v8045_v22, %s12564_s15 }
 0x35b   : > { %2430 = vrot.lane.b32.xlu2 %v8210_v44, %s12564_s15  ;;  %s7831_s15 = scalar_lea.hbm %s12563_s5, 256 }
 0x37d   : > { %v2295_v54 = vpop.permute.xlu2 %2294 }
 0x37e   : > { %v2349_v0 = vsel %vm514_vm6, %v9032_v32, %v2295_v54 }
 0x385   : > { %v2307_v53 = vpop.permute.xlu2 %2306 }
 0x38d   : > { %v2319_v23 = vpop.permute.xlu2 %2318 }
 0x390   : > { %v2299_v55 = vpop.permute.xlu0 %2298 }
 0x391   : > { %v2350_v22 = vsel %vm516_vm7, %v2349_v0, %v2299_v55 }
 0x393   : > { %v2303_v41 = vpop.permute.xlu1 %2302 }
 0x394   : > { %v2351_v44 = vsel %vm518_vm8, %v2350_v22, %v2303_v41 }
 0x395   : > { %v2331_v3 = vpop.permute.xlu2 %2330  ;;  %v2352_v5 = vsel %vm520_vm9, %v2351_v44, %v2307_v53 }
 0x398   : > { %v2311_v4 = vpop.permute.xlu0 %2310 }
 0x399   : > { %v2353_v57 = vsel %vm522_vm10, %v2352_v5, %v2311_v4 }
 0x39b   : > { %v2315_v45 = vpop.permute.xlu1 %2314 }
 0x39c   : > { %v2354_v35 = vsel %vm524_vm11, %v2353_v57, %v2315_v45 }
 0x39d   : > { %v2355_v7 = vsel %vm526_vm12, %v2354_v35, %v2319_v23  ;;  %v2343_v13 = vpop.permute.xlu2 %2342 }
 0x39e   : > { %7044 = vmatpush.msk.msrb.mxu2 %vm752_vm13, %v2355_v7 }
 0x3a0   : > { %v2323_v8 = vpop.permute.xlu0 %2322 }
 0x3a1   : > { %v2356_v1 = vsel %vm514_vm6, %v9046_v47, %v2323_v8 }
 0x3a3   : > { %v2327_v51 = vpop.permute.xlu1 %2326 }
 0x3a4   : > { %v2357_v25 = vsel %vm516_vm7, %v2356_v1, %v2327_v51 }
 0x3a5   : > { %v2358_v63 = vsel %vm518_vm8, %v2357_v25, %v2331_v3  ;;  %v2419_v49 = vpop.permute.xlu2 %2418 }
 0x3a6   : > { %v2498_v57 = vrot.slane %v2419_v49, 4 }
 0x3a8   : > { %v2335_v14 = vpop.permute.xlu0 %2334 }
 0x3a9   : > { %v2359_v33 = vsel %vm520_vm9, %v2358_v63, %v2335_v14 }
 0x3ab   : > { %v2339_v48 = vpop.permute.xlu1 %2338 }
 0x3ac   : > { %v2360_v32 = vsel %vm522_vm10, %v2359_v33, %v2339_v48 }
 0x3ad   : > { %v2361_v18 = vsel %vm524_vm11, %v2360_v32, %v2343_v13  ;;  %v2425_v59 = vpop.permute.xlu2 %2424 }
 0x3ae   : > { %v2440_v30 = vrot.slane %v2425_v59, 4 }
 0x3b0   : > { %v2347_v2 = vpop.permute.xlu0 %2346 }
 0x3b1   : > { %v2362_v9 = vsel %vm526_vm12, %v2361_v18, %v2347_v2 }
 0x3b2   : > { %7046 = vmatpush.msk.msrb.mxu3 %vm752_vm13, %v2362_v9 }
 0x3b3   : > { %v2417_v39 = vpop.permute.xlu1 %2416 }
 0x3b4   : > { %v2442_v19 = vrot.slane %v2417_v39, 4  ;;  %v2441_v40 = vsel %vm346_vm4, %v2440_v30, %v2417_v39 }
 0x3b5   : > { %v2431_v56 = vpop.permute.xlu2 %2430  ;;  %v2447_v10 = vperm.slane %v2441_v40, %v8133_v6 }
 0x3b6   : > { %v2443_v21 = vsel %vm346_vm4, %v2425_v59, %v2442_v19  ;;  %v2508_v11 = vrot.slane %v2431_v56, 4 }
 0x3b7   : > { %v2451_v17 = vperm.slane %v2443_v21, %v8133_v6  ;;  %v2466_v28 = vrot.slane %v2447_v10, 4  ;;  %v7028_v21 = vld [vmem:[%s12559_s1 + $0x20] sm:$0xff] }
 0x3b8   : > { %v2421_v38 = vpop.permute.xlu0 %2420  ;;  %7030 = vmatmul.msk.f32.vlgmr.msra.gmra.mxu0 %vm748_vm14, %v7028_v21  ;;  %7032 = vmatmul.msk.f32.vlgmr.msra.gmra.mxu1 %vm748_vm14, %v7028_v21 }
 0x3b9   : > { %v2454_v42 = vrot.slane %v2421_v38, 4  ;;  %v2478_v44 = vrot.slane %v2451_v17, 4 }
 0x3bb   : > { %v2423_v34 = vpop.permute.xlu1 %2422 }
 0x3bc   : > { %v2509_v36 = vsel %vm346_vm4, %v2508_v11, %v2423_v34  ;;  %v2510_v54 = vrot.slane %v2423_v34, 4 }
 0x3bd   : > { %v2515_v62 = vperm.slane %v2509_v36, %v8133_v6 }
 0x3be   : > { %v2511_v4 = vsel %vm346_vm4, %v2431_v56, %v2510_v54 }
 0x3bf   : > { %v2520_v55 = vrot.slane %v2515_v62, 4  ;;  %v2519_v35 = vperm.slane %v2511_v4, %v8133_v6 }
 0x3c0   : > { %v2427_v47 = vpop.permute.xlu0 %2426 }
 0x3c1   : > { %v2496_v16 = vrot.slane %v2427_v47, 4  ;;  %v2499_v51 = vsel %vm346_vm4, %v2427_v47, %v2498_v57  ;;  %v2532_v25 = vrot.slane %v2519_v35, 4  ;;  %v7033_v47 = vld [vmem:[%s12559_s1 + $0x28] sm:$0xff]  ;;  %v776_v57 = vpop.f32.mrf.mxu0 }
 0x3c2   : > { %v2507_v14 = vperm.slane %v2499_v51, %v8133_v6  ;;  %7035 = vmatmul.msk.f32.vlgmr.msra.gmra.mxu2 %vm748_vm14, %v7033_v47  ;;  %7037 = vmatmul.msk.f32.vlgmr.msra.gmra.mxu3 %vm748_vm14, %v7033_v47 }
 0x3c3   : > { %v2429_v24 = vpop.permute.xlu1 %2428  ;;  %v2497_v61 = vsel %vm346_vm4, %v2496_v16, %v2419_v49 }
 0x3c4   : > { %v2452_v15 = vrot.slane %v2429_v24, 4  ;;  %v2455_v58 = vsel %vm346_vm4, %v2429_v24, %v2454_v42  ;;  %v2503_v50 = vperm.slane %v2497_v61, %v8133_v6  ;;  %v2533_v32 = vsel %vm346_vm4, %v2532_v25, %v2507_v14  ;;  %v7038_v24 = vld [vmem:[%s12559_s1 + $0x30] sm:$0xff] }
 0x3c5   : > { %v2463_v20 = vperm.slane %v2455_v58, %v8133_v6  ;;  %v2534_v49 = vrot.slane %v2507_v14, 4  ;;  %v2539_v9 = vperm.slane %v2533_v32, %v8178_v37  ;;  %7040 = vmatmul.msk.f32.vlgmr.msrb.gmra.mxu0 %vm748_vm14, %v7038_v24  ;;  %7042 = vmatmul.msk.f32.vlgmr.msrb.gmra.mxu1 %vm748_vm14, %v7038_v24 }
 0x3c6   : > { %v2453_v12 = vsel %vm346_vm4, %v2452_v15, %v2421_v38  ;;  %v2521_v5 = vsel %vm346_vm4, %v2520_v55, %v2503_v50  ;;  %v2522_v1 = vrot.slane %v2503_v50, 4 }
 0x3c7   : > { %v2459_v43 = vperm.slane %v2453_v12, %v8133_v6  ;;  %v2476_v31 = vrot.slane %v2463_v20, 4  ;;  %v2479_v45 = vsel %vm346_vm4, %v2463_v20, %v2478_v44  ;;  %v9145_v8 = vperm.slane %v2521_v5, %v8178_v37 }
 0x3c8   : > { %v2487_v13 = vperm.slane %v2479_v45, %v8178_v37  ;;  %v2523_v48 = vsel %vm346_vm4, %v2515_v62, %v2522_v1  ;;  %v2535_v59 = vsel %vm346_vm4, %v2519_v35, %v2534_v49  ;;  %v2548_v38 = vrot.slane %v2539_v9, 4  ;;  %v825_v45 = vpop.f32.mrf.mxu2  ;;  %v796_v35 = vpop.f32.mrf.mxu1 }
 0x3c9   : > { %v2464_v26 = vrot.slane %v2459_v43, 4  ;;  %v2467_v27 = vsel %vm346_vm4, %v2459_v43, %v2466_v28  ;;  %v2477_v60 = vsel %vm346_vm4, %v2476_v31, %v2451_v17  ;;  %v2544_v63 = vrot.slane %v9145_v8, 4  ;;  %v253_v17 = vld [vmem:[%s12560_s2] sm:$0xff] }
 0x3ca   : > { %v2475_v29 = vperm.slane %v2467_v27, %v8178_v37  ;;  %v2483_v52 = vperm.slane %v2477_v60, %v8178_v37  ;;  %v2494_v2 = vrot.slane %v2487_v13, 4  ;;  %v2531_v18 = vperm.slane %v2523_v48, %v8178_v37 }
 0x3cb   : > { %v2465_v46 = vsel %vm346_vm4, %v2464_v26, %v2447_v10  ;;  %v2545_v33 = vsel %vm346_vm4, 0.0, %v2544_v63  ;;  %v2543_v34 = vperm.slane %v2535_v59, %v8178_v37  ;;  %v2549_v19 = vsel %vm346_vm4, 0.0, %v2548_v38  ;;  %v7043_v10 = vld [vmem:[%s12559_s1 + $0x38] sm:$0xff] }
 0x3cc   : > { %2557 = vrot.lane.b32.xlu1 %v2475_v29, %s7887_s17  ;;  %v2490_v53 = vrot.slane %v2475_v29, 4  ;;  %v9132_v23 = vperm.slane %v2465_v46, %v8178_v37  ;;  %v2492_v22 = vrot.slane %v2483_v52, 4  ;;  %v2495_v39 = vsel %vm346_vm4, 0.0, %v2494_v2  ;;  %7045 = vmatmul.msk.f32.vlgmr.msrb.gmra.mxu2 %vm748_vm14, %v7043_v10  ;;  %v7048_v29 = vld [vmem:[%s12559_s1 + $0x40] sm:$0xff] }
 0x3cd   : > { %v2546_v30 = vrot.slane %v2531_v18, 4  ;;  %v2550_v40 = vrot.slane %v2543_v34, 4  ;;  %7047 = vmatmul.msk.f32.vlgmr.msrb.gmra.mxu3 %vm748_vm14, %v7043_v10  ;;  %v7893_v12 = vmov 0   ;;  %v826_v51 = vadd.f32 %v825_v45, %v776_v57 }
 0x3ce   : > { %v2491_v41 = vsel %vm346_vm4, 0.0, %v2490_v53  ;;  %v2488_v0 = vrot.slane %v9132_v23, 4  ;;  %v2493_v7 = vsel %vm346_vm4, 0.0, %v2492_v22  ;;  %7149 = vset.pattern.permute.xlu2 %v7893_v12  ;;  %7780 = vset.pattern.permute.xlu0 %v7893_v12 }
 0x3cf   : > { %2561 = vrot.lane.b32.xlu2 %v2491_v41, %s7890_s28  ;;  %v2547_v56 = vsel %vm346_vm4, 0.0, %v2546_v30  ;;  %v2551_v42 = vsel %vm346_vm4, 0.0, %v2550_v40 }
 0x3d0   : > { %v2489_v3 = vsel %vm346_vm4, 0.0, %v2488_v0  ;;  %v1102_v25 = vpop.f32.mrf.mxu1 }
 0x3d1   : > { %2553 = vrot.lane.b32.xlu0 %v2489_v3, %s7891_s9 }
 0x3d4   : > { %2569 = vrot.lane.b32.xlu1 %v2493_v7, %s7889_s8  ;;  %v1082_v7 = vpop.f32.mrf.mxu0 }
 0x3d5   : > { %v1105_v1 = vadd.f32 %v1082_v7, %v826_v51 }
 0x3d7   : > { %2573 = vrot.lane.b32.xlu2 %v2487_v13, %s7886_s16  ;;  %v1350_v13 = vpop.f32.mrf.mxu2 }
 0x3d8   : > { %v1373_v48 = vadd.f32 %v1350_v13, %v1105_v1 }
 0x3d9   : > { %2565 = vrot.lane.b32.xlu0 %v2483_v52, %s7888_s26 }
 0x3dc   : > { %2581 = vrot.lane.b32.xlu1 %v2545_v33, %s7891_s9 }
 0x3df   : > { %2585 = vrot.lane.b32.xlu2 %v2531_v18, %s7887_s17 }
 0x3e1   : > { %2577 = vrot.lane.b32.xlu0 %v2495_v39, %s7892_s10 }
 0x3e4   : > { %2593 = vrot.lane.b32.xlu1 %v2539_v9, %s7888_s26 }
 0x3e7   : > { %2597 = vrot.lane.b32.xlu2 %v2549_v19, %s7889_s8 }
 0x3e9   : > { %2589 = vrot.lane.b32.xlu0 %v2547_v56, %s7890_s28 }
 0x3ec   : > { %2605 = vrot.lane.b32.xlu1 %v2551_v42, %s7892_s10 }
 0x3ef   : > { %2677 = vperm.xlu2 %7149, %v253_v17  }
 0x3f1   : > { %2601 = vrot.lane.b32.xlu0 %v2543_v34, %s7886_s16 }
 0x429   : > { %v2562_v11 = vpop.permute.xlu2 %2561 }
 0x431   : > { %v2574_v61 = vpop.permute.xlu2 %2573 }
 0x435   : > { %v1609_v14 = vpop.f32.mrf.mxu0  ;;  %v1629_v18 = vpop.f32.mrf.mxu1 }
 0x436   : > { %v1632_v2 = vadd.f32 %v1609_v14, %v1373_v48 }
 0x439   : > { %v2586_v52 = vpop.permute.xlu2 %2585 }
 0x43e   : > { %v2558_v15 = vpop.permute.xlu1 %2557 }
 0x441   : > { %v2598_v0 = vpop.permute.xlu2 %2597 }
 0x442   : > { %v2132_v9 = vpop.f32.mrf.mxu0  ;;  %v2152_v42 = vpop.f32.mrf.mxu1 }
 0x443   : > { %v2554_v58 = vpop.permute.xlu0 %2553 }
 0x444   : > { %v2608_v16 = vsel %vm514_vm6, %v9132_v23, %v2554_v58 }
 0x445   : > { %v2609_v28 = vsel %vm516_vm7, %v2608_v16, %v2558_v15  ;;  %v1868_v32 = vpop.f32.mrf.mxu2 }
 0x446   : > { %v2570_v20 = vpop.permute.xlu1 %2569  ;;  %v2610_v43 = vsel %vm518_vm8, %v2609_v28, %v2562_v11  ;;  %v1891_v59 = vadd.f32 %v1868_v32, %v1632_v2 }
 0x448   : > { %v2155_v30 = vadd.f32 %v2132_v9, %v1891_v59 }
 0x449   : > { %v2678_v15 = vpop.permute.xlu2 %2677 }
 0x44b   : > { %v2566_v36 = vpop.permute.xlu0 %2565 }
 0x44c   : > { %v2611_v31 = vsel %vm520_vm9, %v2610_v43, %v2566_v36 }
 0x44d   : > { %v2612_v26 = vsel %vm522_vm10, %v2611_v31, %v2570_v20 }
 0x44e   : > { %v2582_v27 = vpop.permute.xlu1 %2581  ;;  %v2613_v62 = vsel %vm524_vm11, %v2612_v26, %v2574_v61 }
 0x44f   : > { %v2615_v54 = vsel %vm514_vm6, %v9145_v8, %v2582_v27  ;;  %v845_v8 = vpop.f32.mrf.mxu3  ;;  %v2391_v19 = vpop.f32.mrf.mxu2 }
 0x450   : > { %v2616_v23 = vsel %vm516_vm7, %v2615_v54, %v2586_v52  ;;  %v846_v63 = vadd.f32 %v845_v8, %v796_v35  ;;  %v2414_v56 = vadd.f32 %v2391_v19, %v2155_v30 }
 0x452   : > { %v1106_v49 = vadd.f32 %v1102_v25, %v846_v63 }
 0x453   : > { %v2578_v60 = vpop.permute.xlu0 %2577 }
 0x454   : > { %v2614_v46 = vsel %vm526_vm12, %v2613_v62, %v2578_v60 }
 0x455   : > { %7049 = vmatpush.msk.msra.mxu0 %vm752_vm13, %v2614_v46 }
 0x456   : > { %7050 = vmatmul.msk.f32.vlgmr.msra.gmra.mxu0 %vm748_vm14, %v7048_v29  ;;  %v2594_v50 = vpop.permute.xlu1 %2593 }
 0x457   : > { %v1370_v33 = vpop.f32.mrf.mxu3 }
 0x458   : > { %v1374_v39 = vadd.f32 %v1370_v33, %v1106_v49 }
 0x45a   : > { %v1633_v34 = vadd.f32 %v1629_v18, %v1374_v39 }
 0x45b   : > { %v2590_v53 = vpop.permute.xlu0 %2589 }
 0x45c   : > { %v2617_v55 = vsel %vm518_vm8, %v2616_v23, %v2590_v53 }
 0x45d   : > { %v2618_v41 = vsel %vm520_vm9, %v2617_v55, %v2594_v50 }
 0x45e   : > { %v2619_v44 = vsel %vm522_vm10, %v2618_v41, %v2598_v0  ;;  %v2606_v4 = vpop.permute.xlu1 %2605 }
 0x45f   : > { %v1888_v38 = vpop.f32.mrf.mxu3 }
 0x460   : > { %v1892_v40 = vadd.f32 %v1888_v38, %v1633_v34 }
 0x462   : > { %v2156_v21 = vadd.f32 %v2152_v42, %v1892_v40 }
 0x463   : > { %v2602_v22 = vpop.permute.xlu0 %2601 }
 0x464   : > { %v2620_v3 = vsel %vm524_vm11, %v2619_v44, %v2602_v22 }
 0x465   : > { %v2621_v5 = vsel %vm526_vm12, %v2620_v3, %v2606_v4 }
 0x466   : > { %7051 = vmatpush.msk.msra.mxu1 %vm752_vm13, %v2621_v5 }
 0x467   : > { %7052 = vmatmul.msk.f32.vlgmr.msra.gmra.mxu1 %vm748_vm14, %v7048_v29  ;;  %v2411_v24 = vpop.f32.mrf.mxu3 }
 0x468   : > { %v2415_v58 = vadd.f32 %v2411_v24, %v2156_v21 }
 0x4d3   : > { %v2650_v47 = vpop.f32.mrf.mxu0 }
 0x4d4   : > { %v2673_v10 = vadd.f32 %v2650_v47, %v2414_v56 }
 0x4d6   : > { %v2680_v11 = vadd.f32 %v2678_v15, %v2673_v10 }
 0x4d8   : > { %v2684_v17 = vmul.f32 0.01, %v2680_v11  ;;  %vm2682_vm15 = vcmp.ge.f32.partialorder %v2680_v11, 0.0 }
 0x4da   : > { %v2686_v36 = vsel %vm2682_vm15, %v2680_v11, %v2684_v17 }
 0x4db   : > { %v2734_v52 = vrot.slane %v2686_v36, 4 }
 0x4e4   : > { %v2670_v16 = vpop.f32.mrf.mxu1 }
 0x4e5   : > { %v2674_v20 = vadd.f32 %v2670_v16, %v2415_v58 }
 0x4e7   : > { %v2681_v12 = vadd.f32 %v2678_v15, %v2674_v20 }
 0x4e9   : > { %vm2683_vm13 = vcmp.ge.f32.partialorder %v2681_v12, 0.0  ;;  %v2685_v28 = vmul.f32 0.01, %v2681_v12 }
 0x4eb   : > { %v2687_v43 = vsel %vm2683_vm13, %v2681_v12, %v2685_v28 }
 0x4ec   : > { %v7160_v31 = vpack.i.bf16 %v2687_v43, %v2686_v36  ;;  %v2846_v62 = vrot.slane %v2687_v43, 4 }
 0x4ee   : > { %7161 = vrot.lane.b32.xlu2 %v7160_v31, %s7889_s8  ;;  %7156 = vrot.lane.b32.xlu1 %v7160_v31, %s7886_s16 }
 0x4ef   : > { %7151 = vrot.lane.b32.xlu0 %v7160_v31, %s7892_s10 }
 0x4f6   : > { %7176 = vrot.lane.b32.xlu2 %v7160_v31, %s7887_s17  ;;  %7171 = vrot.lane.b32.xlu1 %v7160_v31, %s7890_s28 }
 0x4f7   : > { %7166 = vrot.lane.b32.xlu0 %v7160_v31, %s7888_s26 }
 0x4ff   : > { %7181 = vrot.lane.b32.xlu0 %v7160_v31, %s7891_s9 }
 0x548   : > { %v7162_v61 = vpop.permute.xlu2 %7161 }
 0x549   : > { %v7164_v26 = vunpack.i.h.bf16 %v7162_v61  ;;  %v7163_v27 = vunpack.i.l.bf16 %v7162_v61 }
 0x54b   : > { %v2856_v50 = vrot.slane %v7164_v26, 4  ;;  %v2744_v53 = vrot.slane %v7163_v27, 4 }
 0x550   : > { %v7177_v4 = vpop.permute.xlu2 %7176 }
 0x551   : > { %v7179_v14 = vunpack.i.h.bf16 %v7177_v4  ;;  %v7178_v32 = vunpack.i.l.bf16 %v7177_v4 }
 0x553   : > { %v2868_v47 = vrot.slane %v7179_v14, 4  ;;  %v2756_v21 = vrot.slane %v7178_v32, 4 }
 0x560   : > { %v7157_v60 = vpop.permute.xlu1 %7156 }
 0x561   : > { %v7159_v29 = vunpack.i.h.bf16 %v7157_v60  ;;  %v7158_v46 = vunpack.i.l.bf16 %v7157_v60  ;;  %v7152_v54 = vpop.permute.xlu0 %7151 }
 0x562   : > { %v7154_v23 = vunpack.i.h.bf16 %v7152_v54  ;;  %v7153_v55 = vunpack.i.l.bf16 %v7152_v54 }
 0x563   : > { %v2844_v41 = vrot.slane %v7159_v29, 4  ;;  %v2847_v0 = vsel %vm346_vm4, %v7159_v29, %v2846_v62  ;;  %v2732_v22 = vrot.slane %v7158_v46, 4  ;;  %v2735_v44 = vsel %vm346_vm4, %v7158_v46, %v2734_v52 }
 0x564   : > { %v2855_v3 = vperm.slane %v2847_v0, %v8133_v6  ;;  %v2857_v5 = vsel %vm346_vm4, %v2856_v50, %v7154_v23  ;;  %v2858_v57 = vrot.slane %v7154_v23, 4  ;;  %v2743_v7 = vperm.slane %v2735_v44, %v8133_v6 }
 0x565   : > { %v2845_v45 = vsel %vm346_vm4, %v2844_v41, %v2687_v43  ;;  %v2733_v35 = vsel %vm346_vm4, %v2732_v22, %v2686_v36  ;;  %v2745_v8 = vsel %vm346_vm4, %v2744_v53, %v7153_v55  ;;  %v2863_v25 = vperm.slane %v2857_v5, %v8133_v6 }
 0x566   : > { %v2851_v51 = vperm.slane %v2845_v45, %v8133_v6  ;;  %v2906_v13 = vrot.slane %v2855_v3, 4  ;;  %v2739_v1 = vperm.slane %v2733_v35, %v8133_v6  ;;  %v2859_v63 = vsel %vm346_vm4, %v7164_v26, %v2858_v57 }
 0x567   : > { %v2746_v48 = vrot.slane %v7153_v55, 4  ;;  %v2751_v33 = vperm.slane %v2745_v8, %v8133_v6  ;;  %v2867_v18 = vperm.slane %v2859_v63, %v8133_v6  ;;  %v2794_v9 = vrot.slane %v2743_v7, 4 }
 0x568   : > { %v2894_v49 = vrot.slane %v2851_v51, 4  ;;  %v2782_v2 = vrot.slane %v2739_v1, 4  ;;  %v7172_v59 = vpop.permute.xlu1 %7171  ;;  %v2892_v34 = vrot.slane %v2863_v25, 4 }
 0x569   : > { %v2747_v39 = vsel %vm346_vm4, %v7163_v27, %v2746_v48  ;;  %v7167_v38 = vpop.permute.xlu0 %7166  ;;  %v2907_v30 = vsel %vm346_vm4, %v2867_v18, %v2906_v13  ;;  %v2780_v40 = vrot.slane %v2751_v33, 4  ;;  %v2904_v42 = vrot.slane %v2867_v18, 4 }
 0x56a   : > { %v2755_v19 = vperm.slane %v2747_v39, %v8133_v6  ;;  %v2895_v56 = vsel %vm346_vm4, %v2863_v25, %v2894_v49  ;;  %v2783_v10 = vsel %vm346_vm4, %v2751_v33, %v2782_v2  ;;  %v7174_v24 = vunpack.i.h.bf16 %v7172_v59 }
 0x56b   : > { %v9246_v15 = vperm.slane %v2907_v30, %v8178_v37  ;;  %v7169_v16 = vunpack.i.h.bf16 %v7167_v38  ;;  %v2893_v20 = vsel %vm346_vm4, %v2892_v34, %v2851_v51  ;;  %v9251_v17 = vperm.slane %v2895_v56, %v8178_v37 }
 0x56c   : > { %v2792_v58 = vrot.slane %v2755_v19, 4  ;;  %v2795_v11 = vsel %vm346_vm4, %v2755_v19, %v2794_v9  ;;  %v2781_v12 = vsel %vm346_vm4, %v2780_v40, %v2739_v1  ;;  %v7168_v28 = vunpack.i.l.bf16 %v7167_v38 }
 0x56d   : > { %v9255_v36 = vsel %vm346_vm4, %v2904_v42, %v2855_v3  ;;  %v9258_v43 = vperm.slane %v2783_v10, %v8178_v37  ;;  %v7173_v31 = vunpack.i.l.bf16 %v7172_v59  ;;  %v2870_v61 = vrot.slane %v7169_v16, 4 }
 0x56e   : > { %v9261_v26 = vperm.slane %v2795_v11, %v8178_v37  ;;  %v2882_v27 = vrot.slane %v7174_v24, 4  ;;  %v2869_v60 = vsel %vm346_vm4, %v2868_v47, %v7169_v16  ;;  %v2758_v62 = vrot.slane %v7168_v28, 4 }
 0x56f   : > { %v2793_v29 = vsel %vm346_vm4, %v2792_v58, %v2743_v7  ;;  %v2871_v46 = vsel %vm346_vm4, %v7179_v14, %v2870_v61  ;;  %v2757_v52 = vsel %vm346_vm4, %v2756_v21, %v7168_v28  ;;  %v2954_v50 = vrot.slane %v9246_v15, 4 }
 0x570   : > { %v2879_v53 = vperm.slane %v2871_v46, %v8133_v6  ;;  %v2759_v23 = vsel %vm346_vm4, %v7178_v32, %v2758_v62  ;;  %v2787_v41 = vperm.slane %v2781_v12, %v8178_v37  ;;  %v2770_v0 = vrot.slane %v7173_v31, 4 }
 0x571   : > { %v7182_v54 = vpop.permute.xlu0 %7181  ;;  %v2875_v22 = vperm.slane %v2869_v60, %v8133_v6  ;;  %v2767_v44 = vperm.slane %v2759_v23, %v8133_v6  ;;  %v2763_v3 = vperm.slane %v2757_v52, %v8133_v6  ;;  %v2842_v45 = vrot.slane %v9261_v26, 4 }
 0x572   : > { %v7184_v55 = vunpack.i.h.bf16 %v7182_v54  ;;  %v7183_v4 = vunpack.i.l.bf16 %v7182_v54  ;;  %v2930_v35 = vrot.slane %v2879_v53, 4  ;;  %v2899_v14 = vperm.slane %v2893_v20, %v8178_v37 }
 0x573   : > { %v2818_v13 = vrot.slane %v2767_v44, 4  ;;  %v2918_v63 = vrot.slane %v2875_v22, 4  ;;  %v2806_v49 = vrot.slane %v2763_v3, 4  ;;  %v2799_v62 = vperm.slane %v2793_v29, %v8178_v37 }
 0x574   : > { %v2880_v5 = vrot.slane %v7184_v55, 4  ;;  %v2883_v57 = vsel %vm346_vm4, %v7184_v55, %v2882_v27  ;;  %v2768_v8 = vrot.slane %v7183_v4, 4  ;;  %v2771_v51 = vsel %vm346_vm4, %v7183_v4, %v2770_v0 }
 0x575   : > { %v2891_v7 = vperm.slane %v2883_v57, %v8133_v6  ;;  %v2779_v25 = vperm.slane %v2771_v51, %v8133_v6  ;;  %v2942_v54 = vrot.slane %v2899_v14, 4 }
 0x576   : > { %v2881_v1 = vsel %vm346_vm4, %v2880_v5, %v7174_v24  ;;  %v2769_v33 = vsel %vm346_vm4, %v2768_v8, %v7173_v31  ;;  %v2830_v31 = vrot.slane %v2787_v41, 4 }
 0x577   : > { %v2887_v48 = vperm.slane %v2881_v1, %v8133_v6  ;;  %v2931_v32 = vsel %vm346_vm4, %v2891_v7, %v2930_v35  ;;  %v2775_v2 = vperm.slane %v2769_v33, %v8133_v6  ;;  %v2819_v18 = vsel %vm346_vm4, %v2779_v25, %v2818_v13 }
 0x578   : > { %v9287_v9 = vperm.slane %v2931_v32, %v8178_v37  ;;  %v2816_v59 = vrot.slane %v2779_v25, 4  ;;  %v2827_v38 = vperm.slane %v2819_v18, %v8178_v37  ;;  %v2928_v30 = vrot.slane %v2891_v7, 4 }
 0x579   : > { %v2916_v39 = vrot.slane %v2887_v48, 4  ;;  %v2919_v34 = vsel %vm346_vm4, %v2887_v48, %v2918_v63  ;;  %v2804_v19 = vrot.slane %v2775_v2, 4  ;;  %v2807_v40 = vsel %vm346_vm4, %v2775_v2, %v2806_v49 }
 0x57a   : > { %v2927_v56 = vperm.slane %v2919_v34, %v8178_v37  ;;  %v2815_v42 = vperm.slane %v2807_v40, %v8178_v37  ;;  %v2843_v21 = vsel %vm346_vm4, %v2827_v38, %v2842_v45  ;;  %v2955_v10 = vsel %vm346_vm4, %v9287_v9, %v2954_v50 }
 0x57b   : > { %v2917_v47 = vsel %vm346_vm4, %v2916_v39, %v2875_v22  ;;  %v2805_v24 = vsel %vm346_vm4, %v2804_v19, %v2763_v3  ;;  %v7185_v58 = vpack.i.bf16 %v2955_v10, %v2843_v21  ;;  %v2817_v20 = vsel %vm346_vm4, %v2816_v59, %v2767_v44 }
 0x57c   : > { %v2944_v11 = vrot.slane %v2927_v56, 4  ;;  %v2923_v16 = vperm.slane %v2917_v47, %v8178_v37  ;;  %v2832_v12 = vrot.slane %v2815_v42, 4  ;;  %v2811_v28 = vperm.slane %v2805_v24, %v8178_v37 }
 0x57d   : > { %v2929_v61 = vsel %vm346_vm4, %v2928_v30, %v2879_v53  ;;  %7186 = vrot.lane.b32.xlu2 %v7185_v58, %s12689_s25  ;;  %v2911_v50 = vperm.slane %v9255_v36, %v8178_v37  ;;  %v2823_v53 = vperm.slane %v2817_v20, %v8178_v37  ;;  %v2838_v3 = vrot.slane %v2799_v62, 4 }
 0x57e   : > { %v2945_v27 = vsel %vm346_vm4, %v2944_v11, %v9251_v17  ;;  %v2940_v60 = vrot.slane %v2923_v16, 4  ;;  %v2833_v46 = vsel %vm346_vm4, %v2832_v12, %v9258_v43  ;;  %v2828_v52 = vrot.slane %v2811_v28, 4 }
 0x57f   : > { %v7200_v23 = vpack.i.bf16 %v2945_v27, %v2833_v46  ;;  %v2831_v22 = vsel %vm346_vm4, %v2811_v28, %v2830_v31  ;;  %v2943_v44 = vsel %vm346_vm4, %v2923_v16, %v2942_v54  ;;  %v2935_v29 = vperm.slane %v2929_v61, %v8178_v37 }
 0x580   : > { %v2941_v55 = vsel %vm346_vm4, %v2940_v60, %v2899_v14  ;;  %v2829_v0 = vsel %vm346_vm4, %v2828_v52, %v2787_v41  ;;  %v2950_v5 = vrot.slane %v2911_v50, 4  ;;  %v7195_v36 = vpack.i.bf16 %v2943_v44, %v2831_v22 }
 0x581   : > { %7201 = vrot.lane.b32.xlu0 %v7200_v23, %s12689_s25  ;;  %v7190_v4 = vpack.i.bf16 %v2941_v55, %v2829_v0  ;;  %v2839_v57 = vsel %vm346_vm4, %v2823_v53, %v2838_v3  ;;  %v2834_v45 = vrot.slane %v9258_v43, 4  ;;  %v2946_v35 = vrot.slane %v9251_v17, 4 }
 0x582   : > { %v2951_v41 = vsel %vm346_vm4, %v2935_v29, %v2950_v5  ;;  %v2836_v7 = vrot.slane %v2823_v53, 4  ;;  %v2948_v8 = vrot.slane %v2935_v29, 4  ;;  %v2840_v63 = vrot.slane %v2827_v38, 4 }
 0x583   : > { %7191 = vrot.lane.b32.xlu1 %v7190_v4, %s12689_s25  ;;  %v2835_v51 = vsel %vm346_vm4, %v2815_v42, %v2834_v45  ;;  %v2947_v13 = vsel %vm346_vm4, %v2927_v56, %v2946_v35  ;;  %v7215_v1 = vpack.i.bf16 %v2951_v41, %v2839_v57  ;;  %v2952_v48 = vrot.slane %v9287_v9, 4 }
 0x584   : > { %v2837_v25 = vsel %vm346_vm4, %v2836_v7, %v2799_v62  ;;  %v2949_v14 = vsel %vm346_vm4, %v2948_v8, %v2911_v50  ;;  %v7205_v43 = vpack.i.bf16 %v2947_v13, %v2835_v51  ;;  %v2841_v33 = vsel %vm346_vm4, %v2840_v63, %v9261_v26 }
 0x585   : > { %7196 = vrot.lane.b32.xlu2 %v7195_v36, %s12689_s25  ;;  %v7210_v17 = vpack.i.bf16 %v2949_v14, %v2837_v25  ;;  %v2953_v32 = vsel %vm346_vm4, %v2952_v48, %v9246_v15 }
 0x586   : > { %v7220_v49 = vpack.i.bf16 %v2953_v32, %v2841_v33 }
 0x589   : > { %7216 = vrot.lane.b32.xlu0 %v7215_v1, %s12689_s25 }
 0x58b   : > { %7206 = vrot.lane.b32.xlu1 %v7205_v43, %s12689_s25 }
 0x58d   : > { %7211 = vrot.lane.b32.xlu2 %v7210_v17, %s12689_s25 }
 0x593   : > { %7221 = vrot.lane.b32.xlu1 %v7220_v49, %s12689_s25 }
 0x5d7   : > { %v7187_v2 = vpop.permute.xlu2 %7186 }
 0x5d8   : > { %v7189_v18 = vunpack.i.h.bf16 %v7187_v2  ;;  %v7188_v39 = vunpack.i.l.bf16 %v7187_v2 }
 0x5da   : > { %v3036_v59 = vsel %vm286_vm0, 0.0, %v7189_v18  ;;  %v3035_v9 = vsel %vm286_vm0, 0.0, %v7188_v39 }
 0x5db   : > { %v3052_v38 = vsel %vm295_vm1, %v3036_v59, 0.0  ;;  %v3051_v34 = vsel %vm295_vm1, %v3035_v9, 0.0 }
 0x5dc   : > { %v3091_v30 = vrot.slane %v3052_v38, 7  ;;  %v3090_v19 = vrot.slane %v3051_v34, 7 }
 0x5de   : > { %v9342_v26 = vsel %vm312_vm2, %v3090_v19, %v3091_v30  ;;  %v9345_v15 = vsel %vm312_vm2, 0.0, %v3090_v19  ;;  %v3132_v31 = vsel %vm312_vm2, %v3091_v30, 0.0 }
 0x5df   : > { %12690 = vst [vmem:[#allocation10_spill] sm:$0xff] %v9342_v26  ;;  %v7197_v40 = vpop.permute.xlu2 %7196  ;;  %v7225_v47 = vpack.i.bf16 %v9342_v26, %v9345_v15  ;;  %v5474_v55 = vrot.slane %v9345_v15, 2  ;;  %v5475_v53 = vrot.slane %v9342_v26, 2  ;;  %v5477_v0 = vrot.slane %v3132_v31, 2 }
 0x5e0   : > { %v7199_v56 = vunpack.i.h.bf16 %v7197_v40  ;;  %v7198_v42 = vunpack.i.l.bf16 %v7197_v40  ;;  %v4302_v29 = vrot.slane %v3132_v31, 1  ;;  %v4300_v3 = vrot.slane %v9342_v26, 1 }
 0x5e1   : > { %7226 = vrot.lane.b32.xlu2 %v7225_v47, %s12691_s7  ;;  %v3169_v5 = vrot.slane %v9345_v15, 4  ;;  %v4299_v57 = vrot.slane %v9345_v15, 1  ;;  %v9385_v41 = vsel %vm1893_vm3, %v5474_v55, %v5475_v53  ;;  %v3281_v8 = vrot.slane %v9342_v26, 4 }
 0x5e2   : > { %v3024_v21 = vsel %vm286_vm0, 0.0, %v7199_v56  ;;  %v3023_v10 = vsel %vm286_vm0, 0.0, %v7198_v42  ;;  %v9396_v13 = vsel %vm1893_vm3, %v5475_v53, %v5477_v0  ;;  %v9412_v63 = vsel %vm1111_vm5, %v4300_v3, %v4302_v29 }
 0x5e3   : > { %v3040_v24 = vsel %vm295_vm1, %v3024_v21, 0.0  ;;  %v3039_v58 = vsel %vm295_vm1, %v3023_v10, 0.0  ;;  %v9418_v49 = vsel %vm1111_vm5, %v4299_v57, %v4300_v3  ;;  %v9423_v59 = vpack.i.bf16 %v9396_v13, %v9385_v41 }
 0x5e4   : > { %v3073_v11 = vrot.slane %v3040_v24, 7  ;;  %v3072_v16 = vrot.slane %v3039_v58, 7 }
 0x5e6   : > { %v9356_v61 = vsel %vm312_vm2, %v3073_v11, 0.0  ;;  %v9359_v27 = vsel %vm312_vm2, %v3072_v16, %v3073_v11  ;;  %v9362_v60 = vsel %vm312_vm2, 0.0, %v3072_v16 }
 0x5e7   : > { %v7212_v20 = vpop.permute.xlu2 %7211  ;;  %v4272_v50 = vrot.slane %v9356_v61, 1  ;;  %v4269_v22 = vrot.slane %v9362_v60, 1  ;;  %v4270_v44 = vrot.slane %v9359_v27, 1  ;;  %v9378_v36 = vpack.i.bf16 %v9359_v27, %v9362_v60 }
 0x5e8   : > { %v7214_v12 = vunpack.i.h.bf16 %v7212_v20  ;;  %v7213_v28 = vunpack.i.l.bf16 %v7212_v20  ;;  %v3147_v25 = vrot.slane %v9362_v60, 4  ;;  %v3259_v48 = vrot.slane %v9359_v27, 4 }
 0x5e9   : > { %7231 = vrot.lane.b32.xlu2 %v7225_v47, %s12692_s11  ;;  %v9388_v35 = vsel %vm1111_vm5, %v4269_v22, %v4270_v44  ;;  %v9391_v7 = vsel %vm1111_vm5, %v4270_v44, %v4272_v50 }
 0x5ea   : > { %v3030_v62 = vsel %vm286_vm0, 0.0, %v7214_v12  ;;  %v3029_v46 = vsel %vm286_vm0, 0.0, %v7213_v28  ;;  %v9400_v1 = vpack.i.bf16 %v9391_v7, %v9388_v35 }
 0x5eb   : > { %v3046_v52 = vsel %vm295_vm1, %v3030_v62, 0.0  ;;  %v3045_v54 = vsel %vm295_vm1, %v3029_v46, 0.0  ;;  %v9448_v62 = vpack.i.bf16 %v9412_v63, %v9418_v49 }
 0x5ec   : > { %v3082_v23 = vrot.slane %v3046_v52, 7  ;;  %v3081_v4 = vrot.slane %v3045_v54, 7  ;;  %12693 = vst [vmem:[#allocation11_spill] sm:$0xff] %v9400_v1 }
 0x5ee   : > { %v9382_v45 = vsel %vm312_vm2, %v3082_v23, 0.0  ;;  %v9404_v14 = vsel %vm312_vm2, %v3081_v4, %v3082_v23  ;;  %v9407_v43 = vsel %vm312_vm2, 0.0, %v3081_v4 }
 0x5ef   : > { %v4287_v17 = vrot.slane %v9382_v45, 1  ;;  %v9427_v38 = vpack.i.bf16 %v9404_v14, %v9407_v43  ;;  %v4284_v30 = vrot.slane %v9407_v43, 1  ;;  %v4285_v19 = vrot.slane %v9404_v14, 1 }
 0x5f0   : > { %v3159_v4 = vrot.slane %v9407_v43, 4 }
 0x5f1   : > { %7241 = vrot.lane.b32.xlu2 %v9378_v36, %s12691_s7  ;;  %v9437_v24 = vsel %vm1111_vm5, %v4284_v30, %v4285_v19  ;;  %v9440_v58 = vsel %vm1111_vm5, %v4285_v19, %v4287_v17 }
 0x5f2   : > { %v9452_v46 = vpack.i.bf16 %v9440_v58, %v9437_v24 }
 0x5f3   : > { %v7202_v33 = vpop.permute.xlu0 %7201 }
 0x5f4   : > { %v7204_v2 = vunpack.i.h.bf16 %v7202_v33  ;;  %v7203_v18 = vunpack.i.l.bf16 %v7202_v33  ;;  %12694 = vst [vmem:[#allocation12_spill] sm:$0xff] %v9452_v46 }
 0x5f5   : > { %v7192_v9 = vpop.permute.xlu1 %7191 }
 0x5f6   : > { %v3026_v40 = vsel %vm286_vm0, 0.0, %v7204_v2  ;;  %v3025_v56 = vsel %vm286_vm0, 0.0, %v7203_v18  ;;  %v7194_v42 = vunpack.i.h.bf16 %v7192_v9  ;;  %v7193_v47 = vunpack.i.l.bf16 %v7192_v9 }
 0x5f7   : > { %v3042_v21 = vsel %vm295_vm1, %v3026_v40, 0.0  ;;  %v3041_v10 = vsel %vm295_vm1, %v3025_v56, 0.0 }
 0x5f8   : > { %v3076_v11 = vrot.slane %v3042_v21, 7  ;;  %v3075_v16 = vrot.slane %v3041_v10, 7  ;;  %v3022_v20 = vsel %vm286_vm0, 0.0, %v7194_v42  ;;  %v3021_v12 = vsel %vm286_vm0, 0.0, %v7193_v47 }
 0x5f9   : > { %v3038_v28 = vsel %vm295_vm1, %v3022_v20, 0.0  ;;  %v3037_v31 = vsel %vm295_vm1, %v3021_v12, 0.0  ;;  %7256 = vrot.lane.b32.xlu2 %v9427_v38, %s12691_s7 }
 0x5fa   : > { %v9455_v52 = vsel %vm312_vm2, %v3075_v16, %v3076_v11  ;;  %v9458_v54 = vsel %vm312_vm2, 0.0, %v3075_v16  ;;  %v3070_v55 = vrot.slane %v3038_v28, 7  ;;  %v3069_v22 = vrot.slane %v3037_v31, 7 }
 0x5fb   : > { %v3133_v23 = vrot.slane %v9458_v54, 4  ;;  %v7217_v53 = vpop.permute.xlu0 %7216  ;;  %v9469_v17 = vpack.i.bf16 %v9455_v52, %v9458_v54  ;;  %v9479_v19 = vsel %vm312_vm2, %v3076_v11, 0.0  ;;  %v3245_v47 = vrot.slane %v9455_v52, 4 }
 0x5fc   : > { %v7219_v44 = vunpack.i.h.bf16 %v7217_v53  ;;  %v7218_v29 = vunpack.i.l.bf16 %v7217_v53  ;;  %v9473_v2 = vsel %vm312_vm2, 0.0, %v3069_v22  ;;  %v9482_v40 = vsel %vm312_vm2, %v3069_v22, %v3070_v55 }
 0x5fd   : > { %v7207_v57 = vpop.permute.xlu1 %7206  ;;  %v3134_v56 = vsel %vm346_vm4, %v3133_v23, %v9473_v2  ;;  %v3135_v42 = vrot.slane %v9473_v2, 4  ;;  %7246 = vrot.lane.b32.xlu0 %v9469_v17, %s12691_s7  ;;  %v9491_v21 = vsel %vm312_vm2, %v3070_v55, 0.0  ;;  %v9501_v23 = vpack.i.bf16 %v9482_v40, %v9473_v2 }
 0x5fe   : > { %v3032_v18 = vsel %vm286_vm0, 0.0, %v7219_v44  ;;  %v3031_v9 = vsel %vm286_vm0, 0.0, %v7218_v29  ;;  %v7209_v28 = vunpack.i.h.bf16 %v7207_v57  ;;  %v7208_v31 = vunpack.i.l.bf16 %v7207_v57 }
 0x5ff   : > { %v3048_v10 = vsel %vm295_vm1, %v3032_v18, 0.0  ;;  %v3047_v11 = vsel %vm295_vm1, %v3031_v9, 0.0  ;;  %v9497_v16 = vsel %vm346_vm4, %v9458_v54, %v3135_v42  ;;  %v4267_v57 = vrot.slane %v9491_v21, 1  ;;  %7236 = vrot.lane.b32.xlu1 %v9501_v23, %s12691_s7 }
 0x600   : > { %12695 = vst [vmem:[#allocation13_spill] sm:$0xff] %v9497_v16  ;;  %v3085_v20 = vrot.slane %v3048_v10, 7  ;;  %v3084_v12 = vrot.slane %v3047_v11, 7  ;;  %v3028_v29 = vsel %vm286_vm0, 0.0, %v7209_v28  ;;  %v9525_v10 = vperm.slane %v3134_v56, %v8133_v6 }
 0x601   : > { %7276 = vrot.lane.b32.xlu2 %v9378_v36, %s12692_s11  ;;  %v3246_v11 = vsel %vm346_vm4, %v3245_v47, %v9482_v40  ;;  %v3027_v39 = vsel %vm286_vm0, 0.0, %v7208_v31 }
 0x602   : > { %v9509_v44 = vsel %vm312_vm2, 0.0, %v3084_v12  ;;  %v9514_v18 = vsel %vm312_vm2, %v3084_v12, %v3085_v20  ;;  %v3044_v12 = vsel %vm295_vm1, %v3028_v29, 0.0  ;;  %v3043_v0 = vsel %vm295_vm1, %v3027_v39, 0.0 }
 0x603   : > { %v3170_v36 = vsel %vm346_vm4, %v3169_v5, %v9509_v44  ;;  %v3171_v9 = vrot.slane %v9509_v44, 4  ;;  %v3079_v5 = vrot.slane %v3044_v12, 7  ;;  %v9538_v56 = vpack.i.bf16 %v9514_v18, %v9509_v44 }
 0x604   : > { %v9542_v29 = vperm.slane %v3246_v11, %v8133_v6  ;;  %v3078_v22 = vrot.slane %v3043_v0, 7  ;;  %v9547_v31 = vsel %vm312_vm2, %v3085_v20, 0.0 }
 0x605   : > { %v7222_v28 = vpop.permute.xlu1 %7221  ;;  %v9532_v55 = vsel %vm346_vm4, %v9345_v15, %v3171_v9  ;;  %7261 = vrot.lane.b32.xlu0 %v9538_v56, %s12691_s7  ;;  %v9563_v20 = vsel %vm312_vm2, %v3079_v5, 0.0  ;;  %v4264_v9 = vrot.slane %v9473_v2, 1 }
 0x606   : > { %12696 = vst [vmem:[#allocation14_spill] sm:$0xff] %v9532_v55  ;;  %v7224_v32 = vunpack.i.h.bf16 %v7222_v28  ;;  %v7223_v42 = vunpack.i.l.bf16 %v7222_v28  ;;  %v9554_v28 = vsel %vm312_vm2, %v3078_v22, %v3079_v5  ;;  %v9557_v11 = vsel %vm312_vm2, 0.0, %v3078_v22 }
 0x607   : > { %12697 = vst [vmem:[#allocation15_spill] sm:$0xff] %v9542_v29  ;;  %v4282_v22 = vrot.slane %v9563_v20, 1  ;;  %v4279_v34 = vrot.slane %v9557_v11, 1  ;;  %v4280_v47 = vrot.slane %v9554_v28, 1 }
 0x608   : > { %v3034_v15 = vsel %vm286_vm0, 0.0, %v7224_v32  ;;  %v3033_v12 = vsel %vm286_vm0, 0.0, %v7223_v42  ;;  %v3145_v42 = vrot.slane %v9557_v11, 4  ;;  %vm3780_vm0 = vcmask 64512  }
 0x609   : > { %v3050_v39 = vsel %vm295_vm1, %v3034_v15, 0.0  ;;  %v3049_v32 = vsel %vm295_vm1, %v3033_v12, 0.0  ;;  %7291 = vrot.lane.b32.xlu2 %v9427_v38, %s12692_s11  ;;  %v3148_v15 = vsel %vm346_vm4, %v9557_v11, %v3147_v25  ;;  %v9574_v12 = vpack.i.bf16 %v9554_v28, %v9557_v11 }
 0x60a   : > { %v3088_v0 = vrot.slane %v3050_v39, 7  ;;  %v3087_v39 = vrot.slane %v3049_v32, 7  ;;  %v9577_v38 = vperm.slane %v3170_v36, %v8133_v6  ;;  %v9581_v5 = vsel %vm346_vm4, %v3145_v42, %v9362_v60 }
 0x60b   : > { %v4265_v25 = vrot.slane %v9482_v40, 1  ;;  %v9589_v32 = vsel %vm346_vm4, %v3281_v8, %v9514_v18  ;;  %7251 = vrot.lane.b32.xlu1 %v9574_v12, %s12691_s7  ;;  %v9627_v30 = vperm.slane %v3148_v15, %v8133_v6  ;;  %v4283_v15 = vsel %vm1111_vm5, %v4280_v47, %v4282_v22 }
 0x60c   : > { %12698 = vst [vmem:[#allocation16_spill] sm:$0xff] %v9577_v38  ;;  %v9593_v51 = vsel %vm312_vm2, %v3088_v0, 0.0  ;;  %v9596_v36 = vsel %vm312_vm2, 0.0, %v3087_v39  ;;  %v9601_v42 = vsel %vm312_vm2, %v3087_v39, %v3088_v0  ;;  %v9616_v0 = vsel %vm346_vm4, %v9554_v28, %v3259_v48 }
 0x60d   : > { %12699 = vst [vmem:[#allocation17_spill] sm:$0xff] %v9589_v32  ;;  %v3157_v50 = vrot.slane %v9596_v36, 4  ;;  %v3160_v8 = vsel %vm346_vm4, %v9596_v36, %v3159_v4  ;;  %7281 = vrot.lane.b32.xlu0 %v9469_v17, %s12692_s11  ;;  %v4266_v4 = vsel %vm1111_vm5, %v4264_v9, %v4265_v25  ;;  %v4297_v33 = vrot.slane %v9593_v51, 1 }
 0x60e   : > { %12700 = vst [vmem:[#allocation18_spill] sm:$0xff] %v9616_v0  ;;  %v9632_v48 = vpack.i.bf16 %v9601_v42, %v9596_v36  ;;  %v4281_v9 = vsel %vm1111_vm5, %v4279_v34, %v4280_v47  ;;  %v4295_v53 = vrot.slane %v9601_v42, 1  ;;  %v4322_v3 = vrot.slane %v4266_v4, 4 }
 0x60f   : > { %v9620_v39 = vsel %vm346_vm4, %v3157_v50, %v9407_v43  ;;  %12702 = vst [vmem:[#allocation20_spill] sm:$0xff] %v9627_v30  ;;  %v4268_v50 = vsel %vm1111_vm5, %v4265_v25, %v4267_v57  ;;  %v4444_v26 = vrot.slane %v4283_v15, 4  ;;  %v4274_v30 = vrot.slane %v9458_v54, 1 }
 0x610   : > { %12701 = vst [vmem:[#allocation19_spill] sm:$0xff] %v9620_v39  ;;  %v9645_v0 = vperm.slane %v3160_v8, %v8133_v6  ;;  %v4434_v55 = vrot.slane %v4268_v50, 4  ;;  %v4294_v16 = vrot.slane %v9596_v36, 1  ;;  %v4275_v57 = vrot.slane %v9455_v52, 1 }
 0x611   : > { %7321 = vrot.lane.b32.xlu2 %v9423_v59, %s12691_s7  ;;  %v12703_v34 = vrot.slane %v9404_v14, 4  ;;  %v4332_v22 = vrot.slane %v4281_v9, 4  ;;  %v4445_v8 = vsel %vm346_vm4, %v4444_v26, %v9391_v7  ;;  %v9659_v17 = vsel %vm1111_vm5, %v4295_v53, %v4297_v33 }
 0x612   : > { %12704 = vst [vmem:[#allocation21_spill] sm:$0xff] %v9659_v17  ;;  %v4276_v46 = vsel %vm1111_vm5, %v4274_v30, %v4275_v57  ;;  %v12705_v38 = vrot.slane %v9479_v19, 1  ;;  %v12706_v32 = vrot.slane %v9391_v7, 4  ;;  %v9668_v37 = vpack.i.bf16 %v4268_v50, %v4266_v4 }
 0x613   : > { %v3272_v47 = vsel %vm346_vm4, %v9601_v42, %v12703_v34  ;;  %7266 = vrot.lane.b32.xlu1 %v9632_v48, %s12691_s7  ;;  %v4320_v39 = vrot.slane %v4276_v46, 4  ;;  %v4323_v1 = vsel %vm346_vm4, %v4276_v46, %v4322_v3  ;;  %v9678_v30 = vsel %vm1111_vm5, %v4294_v16, %v4295_v53 }
 0x614   : > { %v4278_v25 = vsel %vm1111_vm5, %v4275_v57, %v12705_v38  ;;  %v4447_v34 = vsel %vm346_vm4, %v4283_v15, %v12706_v32  ;;  %v9673_v33 = vperm.slane %v3272_v47, %v8133_v6  ;;  %v4456_v38 = vrot.slane %v9659_v17, 4 }
 0x615   : > { %v4432_v29 = vrot.slane %v4278_v25, 4  ;;  %7296 = vrot.lane.b32.xlu0 %v9538_v56, %s12692_s11  ;;  %v4435_v7 = vsel %vm346_vm4, %v4278_v25, %v4434_v55  ;;  %v9685_v3 = vsel %vm346_vm4, %v4320_v39, %v4266_v4  ;;  %v4333_v57 = vsel %vm346_vm4, %v4332_v22, %v9388_v35 }
 0x616   : > { %v9693_v56 = vperm.slane %v4445_v8, %v8133_v6  ;;  %v12707_v16 = vrot.slane %v9388_v35, 4  ;;  %v4289_v53 = vrot.slane %v9509_v44, 1  ;;  %v4290_v47 = vrot.slane %v9514_v18, 1 }
 0x617   : > { %v9688_v32 = vsel %vm346_vm4, %v4432_v29, %v4268_v50  ;;  %v9700_v26 = vpack.i.bf16 %v4283_v15, %v4281_v9  ;;  %v4344_v39 = vrot.slane %v9678_v30, 4  ;;  %v9705_v29 = vpack.i.bf16 %v9659_v17, %v9678_v30 }
 0x618   : > { %v4335_v55 = vsel %vm346_vm4, %v4281_v9, %v12707_v16  ;;  %v9708_v4 = vperm.slane %v4333_v57, %v8133_v6  ;;  %v4291_v50 = vsel %vm1111_vm5, %v4289_v53, %v4290_v47  ;;  %v12708_v35 = vrot.slane %v9547_v31, 1 }
 0x619   : > { %7326 = vrot.lane.b32.xlu2 %v9668_v37, %s12691_s7  ;;  %v9716_v9 = vpack.i.bf16 %v4278_v25, %v4276_v46  ;;  %v9719_v15 = vperm.slane %v4323_v1, %v8133_v6  ;;  %v4457_v16 = vsel %vm346_vm4, %v4456_v38, %v9440_v58  ;;  %v9724_v57 = vperm.slane %v4435_v7, %v8133_v6 }
 0x61a   : > { %v4293_v22 = vsel %vm1111_vm5, %v4290_v47, %v12708_v35  ;;  %v9727_v53 = vperm.slane %v4447_v34, %v8133_v6  ;;  %v4358_v35 = vrot.slane %v4291_v50, 4  ;;  %v4345_v46 = vsel %vm346_vm4, %v4344_v39, %v9437_v24 }
 0x61b   : > { %7271 = vrot.lane.b32.xlu1 %v9501_v23, %s12692_s11  ;;  %12709 = vst [vmem:[#allocation22_spill] sm:$0xff] %v9719_v15  ;;  %v4470_v8 = vrot.slane %v4293_v22, 4  ;;  %v9731_v23 = vperm.slane %v4335_v55, %v8133_v6  ;;  %v9747_v7 = vperm.slane %v4457_v16, %v8133_v6  ;;  %v5454_v38 = vrot.slane %v9557_v11, 2 }
 0x61c   : > { %12710 = vst [vmem:[#allocation23_spill] sm:$0xff] %v9724_v57  ;;  %v9744_v34 = vsel %vm346_vm4, %v9418_v49, %v4358_v35  ;;  %v5455_v55 = vrot.slane %v9554_v28, 2  ;;  %v5444_v39 = vrot.slane %v9362_v60, 2  ;;  %v12714_v25 = vrot.slane %v9418_v49, 4 }
 0x61d   : > { %12711 = vst [vmem:[#allocation24_spill] sm:$0xff] %v9727_v53  ;;  %v9735_v1 = vsel %vm346_vm4, %v9412_v63, %v4470_v8  ;;  %7306 = vrot.lane.b32.xlu0 %v9448_v62, %s12691_s7  ;;  %v12713_v8 = vrot.slane %v9412_v63, 4  ;;  %v5445_v16 = vrot.slane %v9359_v27, 2  ;;  %v5449_v57 = vrot.slane %v9458_v54, 2 }
 0x61e   : > { %12712 = vst [vmem:[#allocation25_spill] sm:$0xff] %v9735_v1  ;;  %v4357_v35 = vsel %vm346_vm4, %v12714_v25, %v4291_v50  ;;  %v5456_v53 = vsel %vm1893_vm3, %v5454_v38, %v5455_v55  ;;  %v12715_v11 = vrot.slane %v9563_v20, 2  ;;  %v5450_v60 = vrot.slane %v9455_v52, 2 }
 0x61f   : > { %v4469_v47 = vsel %vm346_vm4, %v12713_v8, %v4293_v22  ;;  %v5459_v63 = vrot.slane %v9407_v43, 2  ;;  %v5507_v49 = vrot.slane %v5456_v53, 4  ;;  %v5446_v25 = vsel %vm1893_vm3, %v5444_v39, %v5445_v16 }
 0x620   : > { %v9766_v15 = vsel %vm1893_vm3, %v5455_v55, %v12715_v11  ;;  %v5460_v1 = vrot.slane %v9404_v14, 2  ;;  %v9776_v54 = vperm.slane %v4469_v47, %v8133_v6  ;;  %v9778_v20 = vpack.i.bf16 %v4293_v22, %v4291_v50 }
 0x621   : > { %7341 = vrot.lane.b32.xlu2 %v9700_v26, %s12691_s7  ;;  %12716 = vst [vmem:[#allocation26_spill] sm:$0xff] %v9766_v15  ;;  %v5619_v8 = vrot.slane %v9766_v15, 4  ;;  %v12717_v38 = vrot.slane %v9356_v61, 2  ;;  %v5509_v43 = vrot.slane %v5446_v25, 4  ;;  %v9786_v11 = vperm.slane %v4357_v35, %v8133_v6 }
 0x622   : > { %v9800_v47 = vperm.slane %v4345_v46, %v8133_v6  ;;  %v5451_v35 = vsel %vm1893_vm3, %v5449_v57, %v5450_v60  ;;  %v5470_v46 = vrot.slane %v9601_v42, 2  ;;  %v12721_v57 = vrot.slane %v9382_v45, 2 }
 0x623   : > { %7286 = vrot.lane.b32.xlu1 %v9574_v12, %s12692_s11  ;;  %v9783_v55 = vsel %vm1893_vm3, %v5445_v16, %v12717_v38  ;;  %v5508_v12 = vsel %vm346_vm4, %v5507_v49, %v5446_v25  ;;  %v5510_v61 = vsel %vm346_vm4, %v5456_v53, %v5509_v43  ;;  %v9804_v16 = vsel %vm1893_vm3, %v5459_v63, %v5460_v1 }
 0x624   : > { %12718 = vst [vmem:[#allocation27_spill] sm:$0xff] %v9783_v55  ;;  %v5620_v39 = vsel %vm346_vm4, %v5619_v8, %v9783_v55  ;;  %v9791_v17 = vpack.i.bf16 %v9783_v55, %v5446_v25  ;;  %v12720_v49 = vrot.slane %v9479_v19, 2  ;;  %v9817_v38 = vperm.slane %v5508_v12, %v8133_v6 }
 0x625   : > { %7311 = vrot.lane.b32.xlu0 %v9448_v62, %s12692_s11  ;;  %v9809_v8 = vperm.slane %v5620_v39, %v8133_v6  ;;  %v5469_v62 = vrot.slane %v9596_v36, 2  ;;  %v5463_v63 = vsel %vm1893_vm3, %v5460_v1, %v12721_v57  ;;  %v5464_v43 = vrot.slane %v9509_v44, 2 }
 0x626   : > { %v5453_v25 = vsel %vm1893_vm3, %v5450_v60, %v12720_v49  ;;  %v5465_v39 = vrot.slane %v9514_v18, 2  ;;  %v12723_v19 = vrot.slane %v9593_v51, 2  ;;  %v5633_v60 = vrot.slane %v5463_v63, 4 }
 0x627   : > { %12719 = vst [vmem:[#allocation28_spill] sm:$0xff] %v9809_v8  ;;  %v9825_v22 = vsel %vm1893_vm3, %v5469_v62, %v5470_v46  ;;  %v9831_v49 = vpack.i.bf16 %v5463_v63, %v9804_v16  ;;  %v5607_v62 = vrot.slane %v5453_v25, 4 }
 0x628   : > { %12722 = vst [vmem:[#allocation29_spill] sm:$0xff] %v9825_v22  ;;  %v5473_v36 = vsel %vm1893_vm3, %v5470_v46, %v12723_v19  ;;  %v5519_v1 = vrot.slane %v9825_v22, 4  ;;  %v5466_v44 = vsel %vm1893_vm3, %v5464_v43, %v5465_v39  ;;  %v12724_v46 = vrot.slane %v9547_v31, 2 }
 0x629   : > { %7356 = vrot.lane.b32.xlu2 %v9705_v29, %s12691_s7  ;;  %v5631_v12 = vrot.slane %v5473_v36, 4  ;;  %v9834_v45 = vpack.i.bf16 %v5473_v36, %v9825_v22  ;;  %v5634_v51 = vsel %vm346_vm4, %v5473_v36, %v5633_v60  ;;  %v9848_v19 = vpack.i.bf16 %v9766_v15, %v5456_v53 }
 0x62a   : > { %v9845_v57 = vsel %vm1893_vm3, %v5465_v39, %v12724_v46  ;;  %v5520_v43 = vsel %vm346_vm4, %v5519_v1, %v9804_v16  ;;  %v9857_v36 = vpack.i.bf16 %v5453_v25, %v5451_v35  ;;  %v5495_v31 = vrot.slane %v5451_v35, 4 }
 0x62b   : > { %7301 = vrot.lane.b32.xlu1 %v9632_v48, %s12692_s11  ;;  %v5632_v22 = vsel %vm346_vm4, %v5631_v12, %v5463_v63  ;;  %v9855_v48 = vperm.slane %v5510_v61, %v8133_v6  ;;  %v9865_v63 = vpack.i.bf16 %v9845_v57, %v5466_v44  ;;  %v12725_v61 = vrot.slane %v9385_v41, 4 }
 0x62c   : > { %v5533_v1 = vrot.slane %v5466_v44, 4  ;;  %v5439_v46 = vrot.slane %v9473_v2, 2  ;;  %v12726_v53 = vrot.slane %v9396_v13, 4  ;;  %v12727_v60 = vrot.slane %v9491_v21, 2 }
 0x62d   : > { %7316 = vrot.lane.b32.xlu0 %v9423_v59, %s12692_s11  ;;  %v5532_v12 = vsel %vm346_vm4, %v12725_v61, %v5466_v44  ;;  %v5440_v59 = vrot.slane %v9482_v40, 2  ;;  %v3152_v15 = vperm.slane %v9581_v5, %v8133_v6  ;;  %v9894_v21 = vperm.slane %v5634_v51, %v8133_v6 }
 0x62e   : > { %v5644_v50 = vsel %vm346_vm4, %v12726_v53, %v9845_v57  ;;  %v9891_v53 = vperm.slane %v5632_v22, %v8133_v6  ;;  %v9945_v8 = vperm.slane %v5532_v12, %v8133_v6 }
 0x62f   : > { %v5441_v39 = vsel %vm1893_vm3, %v5439_v46, %v5440_v59  ;;  %12729 = vst [vmem:[#allocation31_spill] sm:$0xff] %v9894_v21  ;;  %v9897_v46 = vperm.slane %v5520_v43, %v8133_v6  ;;  %v9911_v51 = vperm.slane %v5644_v50, %v8133_v6  ;;  %v3181_v50 = vrot.slane %v3152_v15, 4  ;;  %v12739_v21 = vld [vmem:[#allocation17_spill] sm:$0xff] }
 0x630   : > { %v5496_v55 = vsel %vm346_vm4, %v5495_v31, %v5441_v39  ;;  %12728 = vst [vmem:[#allocation30_spill] sm:$0xff] %v9891_v53 }
 0x631   : > { %7361 = vrot.lane.b32.xlu2 %v9668_v37, %s12692_s11  ;;  %v5443_v37 = vsel %vm1893_vm3, %v5440_v59, %v12727_v60  ;;  %v5497_v60 = vrot.slane %v5441_v39, 4  ;;  %v12732_v59 = vrot.slane %v9554_v28, 4  ;;  %12733 = vst [vmem:[#allocation33_spill] sm:$0xff] %v9911_v51  ;;  %v12736_v28 = vrot.slane %v9601_v42, 4  ;;  %v12740_v51 = vld [vmem:[#allocation16_spill] sm:$0xff] }
 0x632   : > { %v5608_v44 = vsel %vm346_vm4, %v5607_v62, %v5443_v37  ;;  %v5609_v61 = vrot.slane %v5443_v37, 4  ;;  %v9885_v2 = vpack.i.bf16 %v5443_v37, %v5441_v39  ;;  %v12731_v62 = vrot.slane %v9525_v10, 4  ;;  %v12734_v39 = vld [vmem:[#allocation11_spill] sm:$0xff] }
 0x633   : > { %7336 = vrot.lane.b32.xlu1 %v9716_v9, %s12691_s7  ;;  %v3258_v22 = vsel %vm346_vm4, %v12732_v59, %v9359_v27  ;;  %v5645_v37 = vrot.slane %v9845_v57, 4  ;;  %v9914_v43 = vsel %vm346_vm4, %v5451_v35, %v5497_v60  ;;  %v3270_v27 = vsel %vm346_vm4, %v12736_v28, %v9404_v14  ;;  %v12737_v57 = vld [vmem:[#allocation15_spill] sm:$0xff]  ;;  %v12738_v35 = vld [vmem:[#allocation9_spill] sm:$0xff] }
 0x634   : > { %v9900_v5 = vsel %vm346_vm4, %v5453_v25, %v5609_v61  ;;  %v3184_v31 = vsel %vm346_vm4, %v3152_v15, %v12731_v62  ;;  %v3264_v25 = vperm.slane %v3258_v22, %v8133_v6  ;;  %v12735_v61 = vld [vmem:[#allocation19_spill] sm:$0xff]  ;;  %v3295_v59 = vrot.slane %v12737_v57, 4 }
 0x635   : > { %12730 = vst [vmem:[#allocation32_spill] sm:$0xff] %v9900_v5  ;;  %7331 = vrot.lane.b32.xlu0 %v12734_v39, %s12691_s7  ;;  %v3164_v62 = vperm.slane %v12735_v61, %v8133_v6  ;;  %v3192_v60 = vperm.slane %v3184_v31, %v12738_v35  ;;  %v3276_v22 = vperm.slane %v3270_v27, %v8133_v6  ;;  %v3205_v61 = vrot.slane %v12740_v51, 4 }
 0x636   : > { %v3288_v5 = vperm.slane %v12739_v21, %v8133_v6  ;;  %v3296_v42 = vsel %vm346_vm4, %v3264_v25, %v3295_v59  ;;  %v3182_v14 = vsel %vm346_vm4, %v3181_v50, %v9525_v10  ;;  %v3293_v28 = vrot.slane %v3264_v25, 4 }
 0x637   : > { %v3207_v53 = vrot.slane %v3164_v62, 4  ;;  %v3304_v31 = vperm.slane %v3296_v42, %v12738_v35  ;;  %v3319_v27 = vrot.slane %v3276_v22, 4  ;;  %v3206_v21 = vsel %vm346_vm4, %v3205_v61, %v3164_v62 }
 0x638   : > { %v9948_v59 = vperm.slane %v5608_v44, %v8133_v6  ;;  %v3317_v50 = vrot.slane %v3288_v5, 4  ;;  %v3294_v44 = vsel %vm346_vm4, %v3293_v28, %v12737_v57 }
 0x639   : > { %7376 = vrot.lane.b32.xlu2 %v9700_v26, %s12692_s11  ;;  %v9940_v26 = vsel %vm346_vm4, %v9385_v41, %v5533_v1  ;;  %v3208_v10 = vsel %vm346_vm4, %v12740_v51, %v3207_v53  ;;  %v3235_v1 = vrot.slane %v3192_v60, 4  ;;  %v3320_v25 = vsel %vm346_vm4, %v3288_v5, %v3319_v27  ;;  %v12744_v27 = vld [vmem:[#allocation12_spill] sm:$0xff] }
 0x63a   : > { %12741 = vst [vmem:[#allocation11_spill] sm:$0xff] %v9948_v59  ;;  %v3216_v41 = vperm.slane %v3208_v10, %v12738_v35  ;;  %v3328_v12 = vperm.slane %v3320_v25, %v12738_v35  ;;  %v3347_v61 = vrot.slane %v3304_v31, 4  ;;  %v9962_v53 = vsel %vm346_vm4, %v9396_v13, %v5645_v37 }
 0x63b   : > { %v9936_v15 = vpop.permute.xlu2 %7226  ;;  %7351 = vrot.lane.b32.xlu1 %v9778_v20, %s12691_s7  ;;  %12742 = vst [vmem:[#allocation19_spill] sm:$0xff] %v9962_v53  ;;  %v3318_v42 = vsel %vm346_vm4, %v3317_v50, %v3276_v22  ;;  %v9971_v5 = vperm.slane %v5496_v55, %v8133_v6  ;;  %v12745_v22 = vld [vmem:[#allocation13_spill] sm:$0xff]  ;;  %v9986_v50 = vperm.slane %v3182_v14, %v12738_v35  ;;  %v12752_v13 = vrot.slane %v9645_v0, 4 }
 0x63c   : > { %v9965_v51 = vsel %vm346_vm4, %v3216_v41, %v3235_v1  ;;  %v9974_v10 = vsel %vm346_vm4, %v3328_v12, %v3347_v61  ;;  %v3233_v25 = vrot.slane %v3216_v41, 4  ;;  %v3345_v57 = vrot.slane %v3328_v12, 4  ;;  %v12746_v1 = vld [vmem:[#allocation14_spill] sm:$0xff] }
 0x63d   : > { %12743 = vst [vmem:[#allocation15_spill] sm:$0xff] %v9965_v51  ;;  %7346 = vrot.lane.b32.xlu0 %v12744_v27, %s12691_s7  ;;  %v3144_v28 = vperm.slane %v12745_v22, %v8133_v6  ;;  %v3180_v55 = vperm.slane %v12746_v1, %v8133_v6  ;;  %v3331_v37 = vrot.slane %v9673_v33, 4  ;;  %v10027_v53 = vperm.slane %v3294_v44, %v12738_v35 }
 0x63e   : > { %12747 = vst [vmem:[#allocation9_spill] sm:$0xff] %v9986_v50  ;;  %v9989_v41 = vsel %vm346_vm4, %v3233_v25, %v3192_v60  ;;  %v9992_v12 = vsel %vm346_vm4, %v3345_v57, %v3304_v31  ;;  %v10008_v25 = vperm.slane %v3206_v21, %v12738_v35  ;;  %v12757_v31 = vld [vmem:[#allocation10_spill] sm:$0xff]  ;;  %v4327_v44 = vperm.slane %v9685_v3, %v8133_v6 }
 0x63f   : > { %12748 = vst [vmem:[#allocation17_spill] sm:$0xff] %v9989_v41  ;;  %v3195_v14 = vrot.slane %v3144_v28, 4  ;;  %v3220_v60 = vsel %vm346_vm4, %v3180_v55, %v12752_v13  ;;  %v12756_v13 = vrot.slane %v9514_v18, 4  ;;  %v3217_v18 = vrot.slane %v3180_v55, 4 }
 0x640   : > { %12749 = vst [vmem:[#allocation16_spill] sm:$0xff] %v9992_v12 }
 0x641   : > { %7391 = vrot.lane.b32.xlu2 %v9705_v29, %s12692_s11  ;;  %v12750_v29 = vrot.slane %v9482_v40, 4  ;;  %12753 = vst [vmem:[#allocation13_spill] sm:$0xff] %v10008_v25  ;;  %v10011_v40 = vperm.slane %v3220_v60, %v12738_v35  ;;  %v3284_v21 = vsel %vm346_vm4, %v12757_v31, %v12756_v13  ;;  %v3231_v60 = vrot.slane %v9986_v50, 4 }
 0x642   : > { %12758 = vst [vmem:[#allocation14_spill] sm:$0xff] %v10027_v53 }
 0x643   : > { %v3248_v61 = vsel %vm346_vm4, %v9455_v52, %v12750_v29  ;;  %v9999_v22 = vpop.permute.xlu2 %7231  ;;  %v12754_v52 = vld [vmem:[#allocation18_spill] sm:$0xff]  ;;  %7371 = vrot.lane.b32.xlu1 %v9716_v9, %s12692_s11  ;;  %v12755_v29 = vld [vmem:[#allocation20_spill] sm:$0xff]  ;;  %v3241_v9 = vrot.slane %v10011_v40, 4 }
 0x644   : > { %12751 = vst [vmem:[#allocation12_spill] sm:$0xff] %v9999_v22  ;;  %v3268_v57 = vperm.slane %v12754_v52, %v8133_v6  ;;  %v3196_v1 = vsel %vm346_vm4, %v12755_v29, %v3195_v14  ;;  %v3256_v62 = vperm.slane %v3248_v61, %v8133_v6  ;;  %v3292_v14 = vperm.slane %v3284_v21, %v8133_v6 }
 0x645   : > { %v3204_v52 = vperm.slane %v3196_v1, %v12738_v35  ;;  %v3193_v61 = vrot.slane %v12755_v29, 4  ;;  %7366 = vrot.lane.b32.xlu0 %v12734_v39, %s12692_s11  ;;  %v12759_v1 = vrot.slane %v9800_v47, 4  ;;  %v3218_v21 = vsel %vm346_vm4, %v3217_v18, %v9645_v0 }
 0x646   : > { %v3307_v41 = vrot.slane %v3256_v62, 4  ;;  %v3305_v13 = vrot.slane %v3268_v57, 4  ;;  %v3332_v29 = vsel %vm346_vm4, %v3292_v14, %v3331_v37 }
 0x647   : > { %v10036_v31 = vsel %vm346_vm4, %v3241_v9, %v3204_v52  ;;  %v4395_v50 = vsel %vm346_vm4, %v9786_v11, %v12759_v1  ;;  %v3194_v39 = vsel %vm346_vm4, %v3193_v61, %v3144_v28  ;;  %v10052_v9 = vperm.slane %v3318_v42, %v12738_v35 }
 0x648   : > { %v3308_v55 = vsel %vm346_vm4, %v3268_v57, %v3307_v41  ;;  %v3340_v3 = vperm.slane %v3332_v29, %v12738_v35  ;;  %v3200_v12 = vperm.slane %v3194_v39, %v12738_v35  ;;  %v3224_v1 = vperm.slane %v3218_v21, %v12738_v35 }
 0x649   : > { %7396 = vrot.lane.b32.xlu2 %v9848_v19, %s12692_s11  ;;  %12760 = vst [vmem:[#allocation18_spill] sm:$0xff] %v10052_v9  ;;  %v3343_v41 = vrot.slane %v10027_v53, 4  ;;  %v3306_v37 = vsel %vm346_vm4, %v3305_v13, %v3256_v62  ;;  %v3329_v57 = vrot.slane %v3292_v14, 4  ;;  %v4370_v28 = vrot.slane %v4327_v44, 4 }
 0x64a   : > { %v3316_v61 = vperm.slane %v3308_v55, %v12738_v35  ;;  %v3353_v0 = vrot.slane %v3340_v3, 4  ;;  %v3237_v18 = vrot.slane %v3224_v1, 4  ;;  %v10063_v42 = vperm.slane %v4395_v50, %v12738_v35 }
 0x64b   : > { %v10057_v51 = vpop.permute.xlu2 %7241  ;;  %7386 = vrot.lane.b32.xlu1 %v9778_v20, %s12692_s11  ;;  %v3312_v29 = vperm.slane %v3306_v37, %v12738_v35  ;;  %v3330_v39 = vsel %vm346_vm4, %v3329_v57, %v9673_v33  ;;  %v3239_v21 = vrot.slane %v3200_v12, 4  ;;  %v4371_v62 = vsel %vm346_vm4, %v9708_v4, %v4370_v28 }
 0x64c   : > { %12761 = vst [vmem:[#allocation20_spill] sm:$0xff] %v10057_v51  ;;  %v10074_v14 = vsel %vm346_vm4, %v10008_v25, %v3231_v60  ;;  %v10078_v50 = vsel %vm346_vm4, %v10052_v9, %v3343_v41  ;;  %v10081_v13 = vsel %vm346_vm4, %v3353_v0, %v3316_v61  ;;  %v10084_v20 = vsel %vm346_vm4, %v3237_v18, %v3200_v12 }
 0x64d   : > { %v3336_v55 = vperm.slane %v3330_v39, %v12738_v35  ;;  %v10090_v37 = vsel %vm346_vm4, %v3224_v1, %v3239_v21  ;;  %v3351_v60 = vrot.slane %v3312_v29, 4  ;;  %7381 = vrot.lane.b32.xlu0 %v12744_v27, %s12692_s11  ;;  %v10095_v41 = vperm.slane %v4371_v62, %v12738_v35 }
 0x64e   : > { %12762 = vst [vmem:[#allocation10_spill] sm:$0xff] %v10090_v37  ;;  %v4420_v57 = vrot.slane %v10063_v42, 4  ;;  %v4439_v12 = vperm.slane %v9688_v32, %v8133_v6  ;;  %v12763_v28 = vrot.slane %v9747_v7, 4  ;;  %v3243_v39 = vrot.slane %v3204_v52, 4 }
 0x64f   : > { %v3349_v1 = vrot.slane %v3336_v55, 4  ;;  %v10107_v18 = vsel %vm346_vm4, %v3336_v55, %v3351_v60  ;;  %v12767_v52 = vrot.slane %v9708_v4, 4 }
 0x650   : > { %v4507_v0 = vsel %vm346_vm4, %v9776_v54, %v12763_v28  ;;  %12764 = vst [vmem:[#allocation34_spill] sm:$0xff] %v10107_v18  ;;  %v10116_v32 = vsel %vm346_vm4, %v4420_v57, %v10095_v41  ;;  %v4482_v62 = vrot.slane %v4439_v12, 4  ;;  %v3355_v28 = vrot.slane %v3316_v61, 4  ;;  %v12787_v18 = vld [vmem:[#allocation23_spill] sm:$0xff] }
 0x651   : > { %7411 = vrot.lane.b32.xlu2 %v9857_v36, %s12692_s11  ;;  %v10110_v27 = vperm.slane %v4507_v0, %v12738_v35  ;;  %v10121_v53 = vsel %vm346_vm4, %v3349_v1, %v3312_v29  ;;  %v10126_v60 = vsel %vm346_vm4, %v10011_v40, %v3243_v39  ;;  %v4369_v0 = vsel %vm346_vm4, %v12767_v52, %v4327_v44  ;;  %v12779_v40 = vld [vmem:[#allocation22_spill] sm:$0xff] }
 0x652   : > { %12766 = vst [vmem:[#allocation36_spill] sm:$0xff] %v10126_v60  ;;  %v12768_v57 = vunpack.i.h.bf16 %v9936_v15  ;;  %v12769_v61 = vunpack.i.l.bf16 %v9936_v15  ;;  %v4483_v1 = vsel %vm346_vm4, %v9693_v56, %v4482_v62  ;;  %v10148_v44 = vsel %vm346_vm4, %v3340_v3, %v3355_v28 }
 0x653   : > { %v10118_v33 = vpop.permute.xlu2 %7256  ;;  %v4532_v55 = vrot.slane %v10110_v27, 4  ;;  %7406 = vrot.lane.b32.xlu1 %v9791_v17, %s12692_s11  ;;  %v4491_v4 = vperm.slane %v4483_v1, %v12738_v35  ;;  %12770 = vst [vmem:[#allocation37_spill] sm:$0xff] %v10148_v44  ;;  %v4392_v39 = vrot.slane %v9786_v11, 4 }
 0x654   : > { %12765 = vst [vmem:[#allocation35_spill] sm:$0xff] %v10118_v33  ;;  %v10133_v21 = vrot.slane %v12768_v57, 4  ;;  %v10137_v9 = vrot.slane %v12769_v61, 4  ;;  %v12771_v61 = vrot.slane %v9693_v56, 4  ;;  %v4380_v57 = vrot.slane %v9731_v23, 4 }
 0x655   : > { %v10162_v3 = vsel %vm346_vm4, %v4532_v55, %v4491_v4  ;;  %v4393_v11 = vsel %vm346_vm4, %v4392_v39, %v9800_v47  ;;  %7401 = vrot.lane.b32.xlu0 %v9834_v45, %s12692_s11  ;;  %v4367_v39 = vperm.slane %v9744_v34, %v8133_v6  ;;  %v10184_v56 = vperm.slane %v4369_v0, %v12738_v35  ;;  %v12776_v55 = vld [vmem:[#allocation25_spill] sm:$0xff] }
 0x656   : > { %v4481_v29 = vsel %vm346_vm4, %v12771_v61, %v4439_v12  ;;  %v4504_v12 = vrot.slane %v9776_v54, 4  ;;  %v12772_v61 = vrot.slane %v9437_v24, 4  ;;  %v12775_v54 = vld [vmem:[#allocation21_spill] sm:$0xff]  ;;  %v4479_v28 = vperm.slane %v12776_v55, %v8133_v6 }
 0x657   : > { %12773 = vst [vmem:[#allocation38_spill] sm:$0xff] %v10184_v56  ;;  %v4381_v0 = vsel %vm346_vm4, %v4380_v57, %v12779_v40  ;;  %v4404_v52 = vrot.slane %v4367_v39, 4  ;;  %v4418_v44 = vrot.slane %v10184_v56, 4  ;;  %v4534_v56 = vrot.slane %v4491_v4, 4 }
 0x658   : > { %v4347_v62 = vsel %vm346_vm4, %v9678_v30, %v12772_v61  ;;  %v4505_v24 = vsel %vm346_vm4, %v4504_v12, %v9747_v7  ;;  %v12774_v30 = vrot.slane %v9440_v58, 4  ;;  %v12780_v58 = vunpack.i.l.bf16 %v9999_v22 }
 0x659   : > { %7421 = vrot.lane.b32.xlu2 %v9865_v63, %s12692_s11  ;;  %v4355_v47 = vperm.slane %v4347_v62, %v8133_v6  ;;  %v12777_v62 = vunpack.i.h.bf16 %v9999_v22  ;;  %v4387_v55 = vperm.slane %v4381_v0, %v12738_v35  ;;  %v12785_v22 = vunpack.i.h.bf16 %v10118_v33 }
 0x65a   : > { %v4459_v61 = vsel %vm346_vm4, %v12775_v54, %v12774_v30  ;;  %v10205_v12 = vrot.slane %v12780_v58, 4  ;;  %v12782_v30 = vunpack.i.h.bf16 %v10057_v51  ;;  %v4422_v58 = vrot.slane %v10095_v41, 4 }
 0x65b   : > { %v10196_v1 = vrot.slane %v12777_v62, 4  ;;  %v10198_v34 = vpop.permute.xlu2 %7276  ;;  %v4467_v7 = vperm.slane %v4459_v61, %v8133_v6  ;;  %v12783_v62 = vld [vmem:[#allocation24_spill] sm:$0xff]  ;;  %7416 = vrot.lane.b32.xlu1 %v9831_v49, %s12692_s11  ;;  %v4405_v57 = vsel %vm346_vm4, %v4404_v52, %v4355_v47  ;;  %v4516_v61 = vrot.slane %v4479_v28, 4 }
 0x65c   : > { %12781 = vst [vmem:[#allocation25_spill] sm:$0xff] %v10205_v12  ;;  %v10209_v54 = vrot.slane %v12782_v30, 4  ;;  %v4492_v25 = vrot.slane %v12783_v62, 4  ;;  %v10223_v30 = vrot.slane %v12785_v22, 4  ;;  %v12786_v0 = vunpack.i.l.bf16 %v10118_v33 }
 0x65d   : > { %12778 = vst [vmem:[#allocation21_spill] sm:$0xff] %v10196_v1  ;;  %v12784_v1 = vunpack.i.l.bf16 %v10057_v51  ;;  %v4426_v37 = vrot.slane %v4387_v55, 4  ;;  %v4517_v52 = vsel %vm346_vm4, %v4516_v61, %v4467_v7  ;;  %v10236_v41 = vsel %vm346_vm4, %v10063_v42, %v4422_v58  ;;  %7426 = vrot.lane.b32.xlu0 %v9848_v19, %s12691_s7 }
 0x65e   : > { %v10227_v12 = vrot.slane %v12786_v0, 4  ;;  %v4493_v51 = vsel %vm346_vm4, %v4492_v25, %v12787_v18  ;;  %v4523_v0 = vperm.slane %v4517_v52, %v12738_v35  ;;  %v4406_v61 = vrot.slane %v4355_v47, 4 }
 0x65f   : > { %v10215_v60 = vrot.slane %v12784_v1, 4  ;;  %v4411_v1 = vperm.slane %v4405_v57, %v12738_v35  ;;  %v4499_v22 = vperm.slane %v4493_v51, %v12738_v35  ;;  %v4382_v57 = vrot.slane %v12779_v40, 4 }
 0x660   : > { %v4494_v42 = vrot.slane %v12787_v18, 4  ;;  %v10251_v19 = vsel %vm346_vm4, %v10110_v27, %v4534_v56  ;;  %v4536_v4 = vrot.slane %v4523_v0, 4  ;;  %v4407_v40 = vsel %vm346_vm4, %v4367_v39, %v4406_v61 }
 0x661   : > { %v4424_v33 = vrot.slane %v4411_v1, 4  ;;  %7436 = vrot.lane.b32.xlu2 %v9834_v45, %s12691_s7  ;;  %v10245_v25 = vsel %vm346_vm4, %v4411_v1, %v4426_v37  ;;  %v4538_v58 = vrot.slane %v4499_v22, 4  ;;  %v4383_v37 = vsel %vm346_vm4, %v9731_v23, %v4382_v57  ;;  %v12798_v45 = vld [vmem:[#allocation28_spill] sm:$0xff]  ;;  %v12799_v23 = vld [vmem:[#allocation30_spill] sm:$0xff] }
 0x662   : > { %v4495_v18 = vsel %vm346_vm4, %v12783_v62, %v4494_v42  ;;  %v10266_v27 = vperm.slane %v4393_v11, %v12738_v35  ;;  %v10275_v47 = vsel %vm346_vm4, %v4536_v4, %v4499_v22  ;;  %v4391_v11 = vperm.slane %v4383_v37, %v12738_v35 }
 0x663   : > { %v10254_v51 = vsel %vm346_vm4, %v4424_v33, %v4387_v55  ;;  %v10256_v52 = vpop.permute.xlu2 %7291  ;;  %v10269_v33 = vperm.slane %v4481_v29, %v12738_v35  ;;  %v10272_v56 = vsel %vm346_vm4, %v4523_v0, %v4538_v58  ;;  %7431 = vrot.lane.b32.xlu1 %v9885_v2, %s12692_s11  ;;  %v4415_v29 = vperm.slane %v4407_v40, %v12738_v35 }
 0x664   : > { %12788 = vst [vmem:[#allocation22_spill] sm:$0xff] %v10266_v27  ;;  %v12608_v55 = vunpack.i.h.bf16 %v10198_v34  ;;  %v10287_v62 = vperm.slane %v4505_v24, %v12738_v35  ;;  %v4503_v1 = vperm.slane %v4495_v18, %v12738_v35  ;;  %v4518_v22 = vrot.slane %v4467_v7, 4 }
 0x665   : > { %12789 = vst [vmem:[#allocation24_spill] sm:$0xff] %v10269_v33  ;;  %v4428_v0 = vrot.slane %v4415_v29, 4  ;;  %v4430_v57 = vrot.slane %v4391_v11, 4  ;;  %v5545_v61 = vrot.slane %v9971_v5, 4  ;;  %v12791_v42 = vrot.slane %v9897_v46, 4  ;;  %7441 = vrot.lane.b32.xlu0 %v9791_v17, %s12691_s7 }
 0x666   : > { %12790 = vst [vmem:[#allocation23_spill] sm:$0xff] %v10287_v62  ;;  %v4519_v4 = vsel %vm346_vm4, %v4479_v28, %v4518_v22  ;;  %v4542_v37 = vrot.slane %v4503_v1, 4  ;;  %v10301_v7 = vperm.slane %v9914_v43, %v8133_v6  ;;  %v12792_v43 = vrot.slane %v9804_v16, 4 }
 0x667   : > { %v5570_v58 = vsel %vm346_vm4, %v9945_v8, %v12791_v42  ;;  %v10306_v40 = vsel %vm346_vm4, %v4428_v0, %v4391_v11  ;;  %v4527_v18 = vperm.slane %v4519_v4, %v12738_v35  ;;  %v10310_v42 = vsel %vm346_vm4, %v4415_v29, %v4430_v57 }
 0x668   : > { %v5578_v24 = vperm.slane %v5570_v58, %v12738_v35  ;;  %v5546_v17 = vsel %vm346_vm4, %v9817_v38, %v5545_v61  ;;  %v12793_v58 = vld [vmem:[#allocation29_spill] sm:$0xff]  ;;  %v5555_v61 = vrot.slane %v9855_v48, 4  ;;  %v10330_v4 = vsel %vm346_vm4, %v10266_v27, %v4418_v44 }
 0x669   : > { %7461 = vrot.lane.b32.xlu2 %v9885_v2, %s12691_s7  ;;  %v5554_v28 = vperm.slane %v5546_v17, %v12738_v35  ;;  %v5522_v39 = vsel %vm346_vm4, %v12793_v58, %v12792_v43  ;;  %v5542_v2 = vperm.slane %v9940_v26, %v8133_v6  ;;  %v4540_v0 = vrot.slane %v4527_v18, 4 }
 0x66a   : > { %v5595_v22 = vrot.slane %v5578_v24, 4  ;;  %v10324_v29 = vsel %vm346_vm4, %v4527_v18, %v4542_v37  ;;  %v5530_v57 = vperm.slane %v5522_v39, %v8133_v6  ;;  %v4530_v16 = vrot.slane %v10269_v33, 4 }
 0x66b   : > { %v10321_v11 = vpop.permute.xlu2 %7321  ;;  %7446 = vrot.lane.b32.xlu1 %v9857_v36, %s12691_s7  ;;  %v10341_v37 = vsel %vm346_vm4, %v4540_v0, %v4503_v1  ;;  %v5556_v39 = vsel %vm346_vm4, %v5555_v61, %v10301_v7  ;;  %v5579_v18 = vrot.slane %v5542_v2, 4  ;;  %v12796_v44 = vrot.slane %v9817_v38, 4 }
 0x66c   : > { %12794 = vst [vmem:[#allocation29_spill] sm:$0xff] %v10321_v11  ;;  %v10336_v26 = vsel %vm346_vm4, %v5595_v22, %v5554_v28  ;;  %v10352_v22 = vsel %vm346_vm4, %v10287_v62, %v4530_v16  ;;  %v5562_v1 = vperm.slane %v5556_v39, %v12738_v35  ;;  %v10359_v0 = vrot.slane %v12608_v55, 4 }
 0x66d   : > { %12795 = vst [vmem:[#allocation39_spill] sm:$0xff] %v10336_v26  ;;  %v5544_v43 = vsel %vm346_vm4, %v12796_v44, %v9971_v5  ;;  %v5580_v61 = vsel %vm346_vm4, %v5579_v18, %v5530_v57  ;;  %v5567_v38 = vrot.slane %v9945_v8, 4  ;;  %v5597_v5 = vrot.slane %v5554_v28, 4  ;;  %7451 = vrot.lane.b32.xlu0 %v9831_v49, %s12691_s7  ;;  %v12800_v8 = vld [vmem:[#allocation15_spill] sm:$0xff] }
 0x66e   : > { %v5586_v16 = vperm.slane %v5580_v61, %v12738_v35  ;;  %v5601_v17 = vrot.slane %v5562_v1, 4  ;;  %v12797_v36 = vrot.slane %v9948_v59, 4  ;;  %v5681_v55 = vrot.slane %v12799_v23, 4 }
 0x66f   : > { %v7247_v44 = vpop.permute.xlu0 %7246  ;;  %v12801_v28 = vpack.i.bf16 %v9974_v10, %v12800_v8  ;;  %v5568_v49 = vsel %vm346_vm4, %v5567_v38, %v9897_v46  ;;  %v12805_v8 = vld [vmem:[#allocation33_spill] sm:$0xff]  ;;  %v12829_v59 = vunpack.i.h.bf16 %v9936_v15 }
 0x670   : > { %v5658_v39 = vsel %vm346_vm4, %v12798_v45, %v12797_v36  ;;  %v7249_v18 = vunpack.i.h.bf16 %v7247_v44  ;;  %v7248_v33 = vunpack.i.l.bf16 %v7247_v44  ;;  %v10380_v62 = vsel %vm346_vm4, %v5586_v16, %v5601_v17 }
 0x671   : > { %7476 = vrot.lane.b32.xlu2 %v12801_v28, %s7890_s28  ;;  %12802 = vst [vmem:[#allocation15_spill] sm:$0xff] %v10380_v62  ;;  %v10383_v36 = vsel %vm346_vm4, %v5578_v24, %v5597_v5  ;;  %v10386_v58 = vperm.slane %v5658_v39, %v12738_v35  ;;  %v5682_v46 = vsel %vm346_vm4, %v12805_v8, %v5681_v55  ;;  %v5599_v38 = vrot.slane %v5586_v16, 4  ;;  %v7237_v5 = vpop.permute.xlu1 %7236 }
 0x672   : > { %12803 = vst [vmem:[#allocation40_spill] sm:$0xff] %v10383_v36  ;;  %v3596_v28 = vrot.slane %v7249_v18, 4  ;;  %v3484_v61 = vrot.slane %v7248_v33, 4  ;;  %v10395_v17 = vperm.slane %v5544_v43, %v12738_v35  ;;  %v10398_v24 = vperm.slane %v5682_v46, %v12738_v35 }
 0x673   : > { %12804 = vst [vmem:[#allocation41_spill] sm:$0xff] %v10386_v58  ;;  %v10390_v10 = vpop.permute.xlu2 %7326  ;;  %7456 = vrot.lane.b32.xlu1 %v9865_v63, %s12691_s7  ;;  %v5709_v39 = vrot.slane %v10386_v58, 4  ;;  %v10404_v27 = vsel %vm346_vm4, %v5599_v38, %v5562_v1  ;;  %v5557_v55 = vrot.slane %v10301_v7, 4  ;;  %v5581_v16 = vrot.slane %v5530_v57, 4 }
 0x674   : > { %12806 = vst [vmem:[#allocation42_spill] sm:$0xff] %v10395_v17  ;;  %v7239_v44 = vunpack.i.h.bf16 %v7237_v5  ;;  %v7238_v23 = vunpack.i.l.bf16 %v7237_v5  ;;  %v10409_v8 = vperm.slane %v5568_v49, %v12738_v35  ;;  %v12811_v49 = vpack.i.bf16 %v10078_v50, %v10074_v14 }
 0x675   : > { %12807 = vst [vmem:[#allocation43_spill] sm:$0xff] %v10398_v24  ;;  %v10414_v63 = vsel %vm346_vm4, %v10398_v24, %v5709_v39  ;;  %v5558_v1 = vsel %vm346_vm4, %v9855_v48, %v5557_v55  ;;  %v5582_v38 = vsel %vm346_vm4, %v5542_v2, %v5581_v16  ;;  %v12812_v46 = vunpack.i.l.bf16 %v10198_v34 }
 0x676   : > { %12808 = vst [vmem:[#allocation44_spill] sm:$0xff] %v10404_v27  ;;  %v3598_v7 = vrot.slane %v7239_v44, 4  ;;  %v3485_v57 = vsel %vm346_vm4, %v3484_v61, %v7238_v23  ;;  %v3486_v5 = vrot.slane %v7238_v23, 4  ;;  %v3597_v43 = vsel %vm346_vm4, %v3596_v28, %v7239_v44  ;;  %7466 = vrot.lane.b32.xlu0 %v12811_v49, %s7891_s9  ;;  %v12824_v23 = vld [vmem:[#allocation17_spill] sm:$0xff] }
 0x677   : > { %12809 = vst [vmem:[#allocation45_spill] sm:$0xff] %v10409_v8  ;;  %v10427_v39 = vrot.slane %v12812_v46, 4  ;;  %v12813_v58 = vunpack.i.h.bf16 %v10256_v52  ;;  %v12814_v2 = vpack.i.bf16 %v10081_v13, %v10036_v31  ;;  %v5593_v61 = vrot.slane %v10395_v17, 4  ;;  %v7262_v16 = vpop.permute.xlu0 %7261 }
 0x678   : > { %12810 = vst [vmem:[#allocation46_spill] sm:$0xff] %v10414_v63  ;;  %v12815_v14 = vunpack.i.l.bf16 %v10256_v52  ;;  %v12816_v44 = vunpack.i.h.bf16 %v10321_v11  ;;  %v3599_v55 = vsel %vm346_vm4, %v7249_v18, %v3598_v7  ;;  %v12818_v31 = vunpack.i.l.bf16 %v10321_v11 }
 0x679   : > { %v10431_v48 = vrot.slane %v12813_v58, 4  ;;  %7491 = vrot.lane.b32.xlu2 %v12814_v2, %s7886_s16  ;;  %v3487_v58 = vsel %vm346_vm4, %v7248_v33, %v3486_v5  ;;  %v10455_v46 = vperm.slane %v3485_v57, %v8133_v6  ;;  %v10458_v49 = vperm.slane %v3597_v43, %v8133_v6 }
 0x67a   : > { %v10442_v50 = vrot.slane %v12815_v14, 4  ;;  %v10446_v28 = vrot.slane %v12816_v44, 4  ;;  %v10452_v13 = vrot.slane %v12818_v31, 4  ;;  %v10462_v2 = vsel %vm346_vm4, %v10409_v8, %v5593_v61  ;;  %v12823_v61 = vld [vmem:[#allocation16_spill] sm:$0xff] }
 0x67b   : > { %12820 = vst [vmem:[#allocation49_spill] sm:$0xff] %v10462_v2  ;;  %v12821_v14 = vunpack.i.h.bf16 %v10390_v10  ;;  %v12822_v18 = vunpack.i.l.bf16 %v10390_v10  ;;  %v7264_v5 = vunpack.i.h.bf16 %v7262_v16  ;;  %v7263_v44 = vunpack.i.l.bf16 %v7262_v16  ;;  %v10472_v31 = vpop.permute.xlu2 %7341 }
 0x67c   : > { %12817 = vst [vmem:[#allocation47_spill] sm:$0xff] %v10446_v28  ;;  %v3495_v57 = vperm.slane %v3487_v58, %v8133_v6  ;;  %v10476_v43 = vperm.slane %v3599_v55, %v8133_v6  ;;  %v12825_v17 = vpack.i.bf16 %v12823_v61, %v12824_v23  ;;  %v3534_v55 = vrot.slane %v10455_v46, 4 }
 0x67d   : > { %12819 = vst [vmem:[#allocation48_spill] sm:$0xff] %v10452_v13  ;;  %v10466_v33 = vrot.slane %v12821_v14, 4  ;;  %v10470_v7 = vrot.slane %v12822_v18, 4  ;;  %v10483_v14 = vperm.slane %v5558_v1, %v12738_v35  ;;  %v10486_v18 = vperm.slane %v5582_v38, %v12738_v35  ;;  %v7252_v23 = vpop.permute.xlu1 %7251  ;;  %v12836_v13 = vld [vmem:[#allocation10_spill] sm:$0xff] }
 0x67e   : > { %7471 = vrot.lane.b32.xlu1 %v12825_v17, %s7887_s17  ;;  %v3634_v8 = vrot.slane %v7264_v5, 4  ;;  %v3521_v16 = vsel %vm346_vm4, %v10137_v9, %v7263_v44  ;;  %v3522_v24 = vrot.slane %v7263_v44, 4  ;;  %v3633_v58 = vsel %vm346_vm4, %v10133_v21, %v7264_v5 }
 0x67f   : > { %12826 = vst [vmem:[#allocation16_spill] sm:$0xff] %v10483_v14  ;;  %v3646_v45 = vrot.slane %v10458_v49, 4  ;;  %v12828_v38 = vunpack.i.l.bf16 %v9936_v15  ;;  %v7254_v44 = vunpack.i.h.bf16 %v7252_v23  ;;  %v7253_v14 = vunpack.i.l.bf16 %v7252_v23 }
 0x680   : > { %12827 = vst [vmem:[#allocation17_spill] sm:$0xff] %v10486_v18  ;;  %v3635_v9 = vsel %vm346_vm4, %v12829_v59, %v3634_v8  ;;  %v12830_v21 = vpack.i.bf16 %v10121_v53, %v10084_v20  ;;  %v3546_v5 = vrot.slane %v3495_v57, 4  ;;  %v3658_v17 = vrot.slane %v10476_v43, 4  ;;  %v12841_v18 = vld [vmem:[#allocation36_spill] sm:$0xff] }
 0x681   : > { %v3523_v61 = vsel %vm346_vm4, %v12828_v38, %v3522_v24  ;;  %v10508_v1 = vperm.slane %v3521_v16, %v8133_v6  ;;  %v10511_v11 = vperm.slane %v3633_v58, %v8133_v6  ;;  %v12831_v15 = vpack.i.bf16 %v10162_v3, %v10116_v32  ;;  %v10521_v24 = vpop.permute.xlu0 %7281  ;;  %v12832_v3 = vld [vmem:[#allocation20_spill] sm:$0xff] }
 0x682   : > { %7481 = vrot.lane.b32.xlu0 %v12830_v21, %s7888_s26  ;;  %v3608_v59 = vrot.slane %v7254_v44, 4  ;;  %v3496_v8 = vrot.slane %v7253_v14, 4  ;;  %v3499_v53 = vsel %vm346_vm4, %v7253_v14, %v10215_v60  ;;  %v3611_v20 = vsel %vm346_vm4, %v7254_v44, %v10209_v54 }
 0x683   : > { %7506 = vrot.lane.b32.xlu2 %v12831_v15, %s7887_s17  ;;  %v10524_v16 = vperm.slane %v3523_v61, %v8133_v6  ;;  %v10527_v58 = vperm.slane %v3635_v9, %v8133_v6  ;;  %v3507_v23 = vperm.slane %v3499_v53, %v8133_v6  ;;  %v3619_v32 = vperm.slane %v3611_v20, %v8133_v6  ;;  %v12835_v20 = vld [vmem:[#allocation34_spill] sm:$0xff]  ;;  %v10574_v62 = vpop.permute.xlu2 %7356 }
 0x684   : > { %v12833_v38 = vunpack.i.l.bf16 %v12832_v3  ;;  %v12834_v60 = vunpack.i.h.bf16 %v12832_v3  ;;  %v12837_v27 = vpack.i.bf16 %v12835_v20, %v12836_v13  ;;  %v12624_v14 = vunpack.i.l.bf16 %v10521_v24 }
 0x685   : > { %v3544_v9 = vrot.slane %v3507_v23, 4  ;;  %v3547_v15 = vsel %vm346_vm4, %v3507_v23, %v3546_v5  ;;  %v3656_v3 = vrot.slane %v3619_v32, 4  ;;  %v3568_v5 = vrot.slane %v10524_v16, 4 }
 0x686   : > { %v3497_v21 = vsel %vm346_vm4, %v3496_v8, %v12833_v38  ;;  %v3609_v54 = vsel %vm346_vm4, %v3608_v59, %v12834_v60  ;;  %7486 = vrot.lane.b32.xlu1 %v12837_v27, %s7889_s8  ;;  %v3556_v8 = vrot.slane %v10508_v1, 4  ;;  %v12838_v59 = vunpack.i.h.bf16 %v10472_v31  ;;  %v7267_v27 = vpop.permute.xlu1 %7266 }
 0x687   : > { %v3503_v44 = vperm.slane %v3497_v21, %v8133_v6  ;;  %v3615_v53 = vperm.slane %v3609_v54, %v8133_v6  ;;  %v12839_v60 = vunpack.i.l.bf16 %v10472_v31  ;;  %v3668_v23 = vrot.slane %v10511_v11, 4 }
 0x688   : > { %v10549_v38 = vrot.slane %v12838_v59, 4  ;;  %v3680_v54 = vrot.slane %v10527_v58, 4  ;;  %v10560_v20 = vperm.slane %v3547_v15, %v12738_v35  ;;  %v3659_v59 = vsel %vm346_vm4, %v3619_v32, %v3658_v17 }
 0x689   : > { %v10553_v21 = vrot.slane %v12839_v60, 4  ;;  %v3535_v13 = vsel %vm346_vm4, %v3503_v44, %v3534_v55  ;;  %v3647_v61 = vsel %vm346_vm4, %v3615_v53, %v3646_v45  ;;  %v12840_v60 = vld [vmem:[#allocation37_spill] sm:$0xff]  ;;  %v3532_v63 = vrot.slane %v3503_v44, 4  ;;  %v7297_v32 = vpop.permute.xlu0 %7296 }
 0x68a   : > { %v12842_v28 = vpack.i.bf16 %v12840_v60, %v12841_v18  ;;  %v10570_v36 = vsel %vm346_vm4, %v3544_v9, %v3495_v57  ;;  %v3644_v55 = vrot.slane %v3615_v53, 4  ;;  %v12843_v2 = vunpack.i.h.bf16 %v10521_v24 }
 0x68b   : > { %v12844_v45 = vpack.i.bf16 %v10272_v56, %v10245_v25  ;;  %v10581_v17 = vperm.slane %v3535_v13, %v12738_v35  ;;  %v7269_v57 = vunpack.i.h.bf16 %v7267_v27  ;;  %v7268_v18 = vunpack.i.l.bf16 %v7267_v27  ;;  %v10660_v26 = vpop.permute.xlu2 %7361 }
 0x68c   : > { %7496 = vrot.lane.b32.xlu0 %v12842_v28, %s7892_s10  ;;  %v4027_v15 = vrot.slane %v12843_v2, 4  ;;  %v10585_v28 = vsel %vm346_vm4, %v3656_v3, %v10476_v43  ;;  %v10588_v44 = vperm.slane %v3647_v61, %v12738_v35  ;;  %v10591_v2 = vperm.slane %v3659_v59, %v12738_v35  ;;  %12854 = vst [vmem:[#allocation20_spill] sm:$0xff] %v10660_v26 }
 0x68d   : > { %7521 = vrot.lane.b32.xlu2 %v12844_v45, %s7889_s8  ;;  %v7299_v9 = vunpack.i.h.bf16 %v7297_v32  ;;  %v7298_v53 = vunpack.i.l.bf16 %v7297_v32  ;;  %v3620_v25 = vrot.slane %v7269_v57, 4  ;;  %v3508_v56 = vrot.slane %v7268_v18, 4 }
 0x68e   : > { %v3511_v13 = vsel %vm346_vm4, %v7268_v18, %v10227_v12  ;;  %v3623_v43 = vsel %vm346_vm4, %v7269_v57, %v10223_v30  ;;  %v12623_v61 = vunpack.i.h.bf16 %v10574_v62  ;;  %v12622_v60 = vunpack.i.l.bf16 %v10574_v62  ;;  %v12846_v30 = vld [vmem:[#allocation35_spill] sm:$0xff] }
 0x68f   : > { %v3519_v3 = vperm.slane %v3511_v13, %v8133_v6  ;;  %v3631_v27 = vperm.slane %v3623_v43, %v8133_v6  ;;  %v12845_v59 = vpack.i.bf16 %v10352_v22, %v10330_v4  ;;  %v10607_v45 = vsel %vm346_vm4, %v3532_v63, %v10455_v46  ;;  %v7272_v43 = vpop.permute.xlu1 %7271 }
 0x690   : > { %v10611_v12 = vsel %vm346_vm4, %v3644_v55, %v10458_v49  ;;  %v12847_v57 = vunpack.i.l.bf16 %v12846_v30  ;;  %v12848_v32 = vunpack.i.h.bf16 %v12846_v30  ;;  %v3915_v4 = vrot.slane %v12624_v14, 4  ;;  %v12853_v14 = vld [vmem:[#allocation21_spill] sm:$0xff] }
 0x691   : > { %7501 = vrot.lane.b32.xlu1 %v12845_v59, %s7891_s9  ;;  %v3569_v63 = vsel %vm346_vm4, %v3568_v5, %v3519_v3  ;;  %v3570_v46 = vrot.slane %v3519_v3, 4  ;;  %v3682_v55 = vrot.slane %v3631_v27, 4  ;;  %v4065_v59 = vrot.slane %v7299_v9, 4 }
 0x692   : > { %v3509_v18 = vsel %vm346_vm4, %v3508_v56, %v12847_v57  ;;  %v3621_v13 = vsel %vm346_vm4, %v3620_v25, %v12848_v32  ;;  %v3953_v56 = vrot.slane %v7298_v53, 4  ;;  %v12849_v25 = vpack.i.bf16 %v10251_v19, %v10236_v41  ;;  %v12850_v19 = vld [vmem:[#allocation25_spill] sm:$0xff] }
 0x693   : > { %v10622_v22 = vperm.slane %v3509_v18, %v8133_v6  ;;  %v10626_v49 = vperm.slane %v3621_v13, %v8133_v6  ;;  %v10634_v30 = vrot.slane %v12623_v61, 4  ;;  %v10638_v5 = vrot.slane %v12622_v60, 4  ;;  %v12851_v61 = vld [vmem:[#allocation12_spill] sm:$0xff] }
 0x694   : > { %7511 = vrot.lane.b32.xlu0 %v12849_v25, %s7890_s28  ;;  %v10647_v32 = vperm.slane %v3569_v63, %v12738_v35  ;;  %v3681_v41 = vsel %vm346_vm4, %v3680_v54, %v3631_v27  ;;  %v3952_v13 = vsel %vm346_vm4, %v12850_v19, %v7298_v53  ;;  %v3571_v60 = vsel %vm346_vm4, %v10524_v16, %v3570_v46 }
 0x695   : > { %v10644_v18 = vsel %vm346_vm4, %v3556_v8, %v10622_v22  ;;  %v3558_v25 = vrot.slane %v10622_v22, 4  ;;  %v12852_v3 = vunpack.i.l.bf16 %v12851_v61  ;;  %v4064_v8 = vsel %vm346_vm4, %v12853_v14, %v7299_v9 }
 0x696   : > { %v10664_v54 = vsel %vm346_vm4, %v3668_v23, %v10626_v49  ;;  %v3683_v53 = vsel %vm346_vm4, %v10527_v58, %v3682_v55  ;;  %v12855_v27 = vunpack.i.h.bf16 %v12851_v61  ;;  %v7274_v22 = vunpack.i.h.bf16 %v7272_v43 }
 0x697   : > { %v3954_v57 = vsel %vm346_vm4, %v12852_v3, %v3953_v56  ;;  %v10672_v63 = vperm.slane %v3952_v13, %v8133_v6  ;;  %v10678_v14 = vperm.slane %v4064_v8, %v8133_v6  ;;  %v7273_v9 = vunpack.i.l.bf16 %v7272_v43  ;;  %v7287_v8 = vpop.permute.xlu1 %7286 }
 0x698   : > { %v4066_v16 = vsel %vm346_vm4, %v12855_v27, %v4065_v59  ;;  %v10675_v46 = vperm.slane %v3954_v57, %v8133_v6  ;;  %v12856_v23 = vpack.i.bf16 %v10275_v47, %v10254_v51  ;;  %v4029_v61 = vrot.slane %v7274_v22, 4 }
 0x699   : > { %v10685_v58 = vperm.slane %v4066_v16, %v8133_v6  ;;  %v4028_v55 = vsel %vm346_vm4, %v4027_v15, %v7274_v22  ;;  %v12625_v59 = vunpack.i.h.bf16 %v10660_v26  ;;  %v10690_v56 = vperm.slane %v3571_v60, %v12738_v35  ;;  %v10716_v22 = vpop.permute.xlu0 %7306 }
 0x69a   : > { %7516 = vrot.lane.b32.xlu1 %v12856_v23, %s7888_s26  ;;  %v3670_v3 = vrot.slane %v10626_v49, 4  ;;  %v3916_v43 = vsel %vm346_vm4, %v3915_v4, %v7273_v9  ;;  %v3917_v57 = vrot.slane %v7273_v9, 4  ;;  %v10695_v19 = vperm.slane %v3681_v41, %v12738_v35  ;;  %v10735_v9 = vpop.permute.xlu2 %7376 }
 0x69b   : > { %v10698_v51 = vperm.slane %v3916_v43, %v8133_v6  ;;  %v12857_v47 = vunpack.i.h.bf16 %v10521_v24  ;;  %v4034_v13 = vperm.slane %v4028_v55, %v8133_v6  ;;  %v12858_v60 = vpack.i.bf16 %v10341_v37, %v10306_v40  ;;  %12860 = vst [vmem:[#allocation34_spill] sm:$0xff] %v10735_v9 }
 0x69c   : > { %v10709_v4 = vperm.slane %v3683_v53, %v12738_v35  ;;  %v12859_v27 = vunpack.i.l.bf16 %v10521_v24  ;;  %v10722_v40 = vrot.slane %v12625_v59, 4  ;;  %v12626_v37 = vunpack.i.l.bf16 %v10660_v26 }
 0x69d   : > { %v4030_v15 = vsel %vm346_vm4, %v12857_v47, %v4029_v61  ;;  %7526 = vrot.lane.b32.xlu0 %v12858_v60, %s7886_s16  ;;  %v7289_v55 = vunpack.i.h.bf16 %v7287_v8  ;;  %v7288_v24 = vunpack.i.l.bf16 %v7287_v8  ;;  %v3965_v43 = vrot.slane %v10698_v51, 4 }
 0x69e   : > { %v3918_v16 = vsel %vm346_vm4, %v12859_v27, %v3917_v57  ;;  %v4038_v61 = vperm.slane %v4030_v15, %v8133_v6  ;;  %v4077_v57 = vrot.slane %v4034_v13, 4  ;;  %v12628_v47 = vunpack.i.h.bf16 %v10716_v22 }
 0x69f   : > { %v3926_v53 = vperm.slane %v3918_v16, %v8133_v6  ;;  %v3559_v60 = vsel %vm346_vm4, %v10508_v1, %v3558_v25  ;;  %v4039_v27 = vrot.slane %v7289_v55, 4  ;;  %v3927_v49 = vrot.slane %v7288_v24, 4 }
 0x6a0   : > { %v3930_v59 = vsel %vm346_vm4, %v7288_v24, %v10427_v39  ;;  %v4042_v16 = vsel %vm346_vm4, %v7289_v55, %v10359_v0  ;;  %v12861_v15 = vpack.i.bf16 %v10324_v29, %v10310_v42  ;;  %v12627_v8 = vunpack.i.l.bf16 %v10716_v22 }
 0x6a1   : > { %v3938_v41 = vperm.slane %v3930_v59, %v8133_v6  ;;  %v4050_v1 = vperm.slane %v4042_v16, %v8133_v6  ;;  %v3671_v25 = vsel %vm346_vm4, %v10511_v11, %v3670_v3  ;;  %v3977_v39 = vrot.slane %v3926_v53, 4 }
 0x6a2   : > { %7531 = vrot.lane.b32.xlu1 %v12861_v15, %s7892_s10  ;;  %v12862_v24 = vunpack.i.l.bf16 %v10198_v34  ;;  %v12863_v55 = vunpack.i.h.bf16 %v10198_v34  ;;  %v10753_v42 = vperm.slane %v3559_v60, %v12738_v35  ;;  %v10757_v29 = vrot.slane %v12626_v37, 4 }
 0x6a3   : > { %v3975_v16 = vrot.slane %v3938_v41, 4  ;;  %v4089_v3 = vrot.slane %v4038_v61, 4  ;;  %v3978_v15 = vsel %vm346_vm4, %v3938_v41, %v3977_v39  ;;  %v10763_v34 = vperm.slane %v3671_v25, %v12738_v35 }
 0x6a4   : > { %v3928_v0 = vsel %vm346_vm4, %v3927_v49, %v12862_v24  ;;  %v4040_v23 = vsel %vm346_vm4, %v4039_v27, %v12863_v55  ;;  %v4087_v49 = vrot.slane %v4050_v1, 4  ;;  %v10769_v37 = vrot.slane %v12628_v47, 4 }
 0x6a5   : > { %v3934_v59 = vperm.slane %v3928_v0, %v8133_v6  ;;  %v4046_v11 = vperm.slane %v4040_v23, %v8133_v6  ;;  %v3976_v24 = vsel %vm346_vm4, %v3975_v16, %v3926_v53  ;;  %v10773_v23 = vrot.slane %v12627_v8, 4  ;;  %v10780_v0 = vpop.permute.xlu0 %7311  ;;  %v10813_v8 = vpop.permute.xlu2 %7391 }
 0x6a6   : > { %v12864_v41 = vrot.slane %v10581_v17, 4  ;;  %12865 = vst [vmem:[#allocation10_spill] sm:$0xff] %v10780_v0  ;;  %v10783_v53 = vperm.slane %v3978_v15, %v12738_v35  ;;  %v4088_v16 = vsel %vm346_vm4, %v4087_v49, %v4038_v61  ;;  %v10792_v26 = vperm.slane %v3976_v24, %v12738_v35 }
 0x6a7   : > { %v3963_v27 = vrot.slane %v3934_v59, 4  ;;  %v3966_v60 = vsel %vm346_vm4, %v3934_v59, %v3965_v43  ;;  %v4075_v55 = vrot.slane %v4046_v11, 4  ;;  %v7302_v43 = vpop.permute.xlu1 %7301  ;;  %v4078_v59 = vsel %vm346_vm4, %v4046_v11, %v4077_v57  ;;  %12869 = vst [vmem:[#allocation35_spill] sm:$0xff] %v10813_v8 }
 0x6a8   : > { %v3587_v25 = vsel %vm346_vm4, %v10753_v42, %v12864_v41  ;;  %v10789_v47 = vperm.slane %v3966_v60, %v12738_v35  ;;  %12866 = vst [vmem:[#allocation37_spill] sm:$0xff] %v10792_v26  ;;  %v4090_v41 = vsel %vm346_vm4, %v4050_v1, %v4089_v3  ;;  %v12867_v39 = vrot.slane %v10588_v44, 4 }
 0x6a9   : > { %v10801_v57 = vsel %vm346_vm4, %v3963_v27, %v10698_v51  ;;  %v10804_v61 = vsel %vm346_vm4, %v4075_v55, %v4034_v13  ;;  %v7304_v49 = vunpack.i.h.bf16 %v7302_v43  ;;  %v10807_v60 = vperm.slane %v4078_v59, %v12738_v35 }
 0x6aa   : > { %v3699_v15 = vsel %vm346_vm4, %v10763_v34, %v12867_v39  ;;  %v10810_v24 = vperm.slane %v4088_v16, %v12738_v35  ;;  %v7303_v3 = vunpack.i.l.bf16 %v7302_v43  ;;  %v3592_v27 = vrot.slane %v10690_v56, 4 }
 0x6ab   : > { %v7545_v11 = vpack.i.bf16 %v3699_v15, %v3587_v25  ;;  %v4051_v51 = vrot.slane %v7304_v49, 4  ;;  %v4054_v13 = vsel %vm346_vm4, %v7304_v49, %v10431_v48  ;;  %v3704_v55 = vrot.slane %v10709_v4, 4 }
 0x6ac   : > { %12868 = vst [vmem:[#allocation36_spill] sm:$0xff] %v10810_v24  ;;  %v3939_v39 = vrot.slane %v7303_v3, 4  ;;  %v3942_v59 = vsel %vm346_vm4, %v7303_v3, %v10442_v50  ;;  %v4062_v43 = vperm.slane %v4054_v13, %v8133_v6  ;;  %v10825_v16 = vperm.slane %v4090_v41, %v12738_v35 }
 0x6ad   : > { %7546 = vrot.lane.b32.xlu2 %v7545_v11, %s7890_s28  ;;  %v3950_v15 = vperm.slane %v3942_v59, %v8133_v6  ;;  %v12870_v11 = vunpack.i.h.bf16 %v10256_v52  ;;  %v12871_v1 = vunpack.i.h.bf16 %v10735_v9  ;;  %v12872_v24 = vunpack.i.l.bf16 %v10256_v52 }
 0x6ae   : > { %v12873_v41 = vrot.slane %v10685_v58, 4  ;;  %v12874_v59 = vrot.slane %v10675_v46, 4  ;;  %v3705_v52 = vsel %vm346_vm4, %v3704_v55, %v10591_v2 }
 0x6af   : > { %v4052_v48 = vsel %vm346_vm4, %v4051_v51, %v12870_v11  ;;  %v10834_v25 = vrot.slane %v12871_v1, 4  ;;  %v3940_v50 = vsel %vm346_vm4, %v3939_v39, %v12872_v24  ;;  %v4113_v11 = vrot.slane %v4062_v43, 4 }
 0x6b0   : > { %v10840_v3 = vperm.slane %v4052_v48, %v8133_v6  ;;  %v4112_v13 = vsel %vm346_vm4, %v12873_v41, %v4062_v43  ;;  %v4000_v51 = vsel %vm346_vm4, %v12874_v59, %v3950_v15  ;;  %v3593_v1 = vsel %vm346_vm4, %v3592_v27, %v10560_v20  ;;  %v10867_v59 = vpop.permute.xlu0 %7316 }
 0x6b1   : > { %v12875_v24 = vunpack.i.l.bf16 %v10735_v9  ;;  %v12876_v48 = vunpack.i.h.bf16 %v10780_v0  ;;  %v12878_v41 = vunpack.i.l.bf16 %v10780_v0  ;;  %v10865_v43 = vperm.slane %v3940_v50, %v8133_v6 }
 0x6b2   : > { %v4001_v27 = vrot.slane %v3950_v15, 4  ;;  %v10870_v55 = vperm.slane %v4000_v51, %v12738_v35  ;;  %v12880_v9 = vunpack.i.h.bf16 %v10813_v8  ;;  %v7560_v0 = vpack.i.bf16 %v3705_v52, %v3593_v1  ;;  %v7337_v51 = vpop.permute.xlu1 %7336 }
 0x6b3   : > { %v10854_v39 = vrot.slane %v12875_v24, 4  ;;  %v10858_v49 = vrot.slane %v12876_v48, 4  ;;  %v10862_v26 = vrot.slane %v12878_v41, 4  ;;  %v10873_v24 = vperm.slane %v4112_v13, %v12738_v35 }
 0x6b4   : > { %v10877_v48 = vrot.slane %v12880_v9, 4  ;;  %v12882_v41 = vrot.slane %v10678_v14, 4  ;;  %v10888_v15 = vperm.slane %v10607_v45, %v12738_v35  ;;  %v4114_v13 = vsel %vm346_vm4, %v10685_v58, %v4113_v11 }
 0x6b5   : > { %12877 = vst [vmem:[#allocation25_spill] sm:$0xff] %v10858_v49  ;;  %v10894_v9 = vperm.slane %v10644_v18, %v12738_v35  ;;  %v12887_v45 = vrot.slane %v10672_v63, 4  ;;  %7561 = vrot.lane.b32.xlu2 %v7560_v0, %s7886_s16  ;;  %v3584_v11 = vrot.slane %v10753_v42, 4  ;;  %v3696_v52 = vrot.slane %v10763_v34, 4 }
 0x6b6   : > { %12879 = vst [vmem:[#allocation12_spill] sm:$0xff] %v10862_v26  ;;  %v10883_v26 = vsel %vm346_vm4, %v12882_v41, %v10840_v3  ;;  %v10902_v41 = vperm.slane %v10664_v54, %v12738_v35  ;;  %v3582_v18 = vrot.slane %v10888_v15, 4  ;;  %v7339_v50 = vunpack.i.h.bf16 %v7337_v51 }
 0x6b7   : > { %12881 = vst [vmem:[#allocation21_spill] sm:$0xff] %v10877_v48  ;;  %v10898_v48 = vperm.slane %v10611_v12, %v12738_v35  ;;  %v10908_v1 = vsel %vm346_vm4, %v12887_v45, %v10865_v43  ;;  %v4002_v12 = vsel %vm346_vm4, %v10675_v46, %v4001_v27  ;;  %v3585_v0 = vsel %vm346_vm4, %v3584_v11, %v10581_v17 }
 0x6b8   : > { %12883 = vst [vmem:[#allocation50_spill] sm:$0xff] %v10888_v15  ;;  %v3583_v45 = vsel %vm346_vm4, %v10894_v9, %v3582_v18  ;;  %v7338_v58 = vunpack.i.l.bf16 %v7337_v51  ;;  %v3697_v46 = vsel %vm346_vm4, %v3696_v52, %v10588_v44  ;;  %v4821_v27 = vrot.slane %v7339_v50, 4  ;;  %v7332_v52 = vpop.permute.xlu0 %7331 }
 0x6b9   : > { %12884 = vst [vmem:[#allocation51_spill] sm:$0xff] %v10894_v9  ;;  %v3694_v54 = vrot.slane %v10898_v48, 4  ;;  %v4824_v34 = vsel %vm346_vm4, %v7339_v50, %v10466_v33  ;;  %v7540_v15 = vpack.i.bf16 %v3697_v46, %v3585_v0  ;;  %v10932_v9 = vperm.slane %v4002_v12, %v12738_v35 }
 0x6ba   : > { %12885 = vst [vmem:[#allocation52_spill] sm:$0xff] %v10898_v48  ;;  %v4709_v49 = vrot.slane %v7338_v58, 4  ;;  %v4712_v18 = vsel %vm346_vm4, %v7338_v58, %v10470_v7  ;;  %v10935_v17 = vperm.slane %v4114_v13, %v12738_v35  ;;  %v12888_v44 = vunpack.i.h.bf16 %v10390_v10  ;;  %v7352_v51 = vpop.permute.xlu1 %7351 }
 0x6bb   : > { %12886 = vst [vmem:[#allocation53_spill] sm:$0xff] %v10902_v41  ;;  %v3695_v42 = vsel %vm346_vm4, %v10902_v41, %v3694_v54  ;;  %v10941_v54 = vpop.permute.xlu2 %7396  ;;  %v12889_v33 = vunpack.i.l.bf16 %v10813_v8  ;;  %7541 = vrot.lane.b32.xlu1 %v7540_v15, %s7887_s17  ;;  %v12890_v7 = vunpack.i.l.bf16 %v10390_v10  ;;  %v3551_v12 = vperm.slane %v10570_v36, %v12738_v35 }
 0x6bc   : > { %v7535_v48 = vpack.i.bf16 %v3695_v42, %v3583_v45  ;;  %v4822_v11 = vsel %vm346_vm4, %v4821_v27, %v12888_v44  ;;  %v10958_v42 = vperm.slane %v4712_v18, %v8133_v6  ;;  %v3588_v15 = vrot.slane %v10647_v32, 4 }
 0x6bd   : > { %v10945_v50 = vrot.slane %v12889_v33, 4  ;;  %v4710_v13 = vsel %vm346_vm4, %v4709_v49, %v12890_v7  ;;  %v4828_v58 = vperm.slane %v4822_v11, %v8133_v6  ;;  %v3663_v36 = vperm.slane %v10585_v28, %v12738_v35 }
 0x6be   : > { %7536 = vrot.lane.b32.xlu0 %v7535_v48, %s7891_s9  ;;  %v4716_v0 = vperm.slane %v4710_v13, %v8133_v6  ;;  %v10961_v48 = vperm.slane %v4824_v34, %v8133_v6  ;;  %v3700_v27 = vrot.slane %v10695_v19, 4  ;;  %v7334_v44 = vunpack.i.h.bf16 %v7332_v52 }
 0x6bf   : > { %v4871_v46 = vrot.slane %v4828_v58, 4  ;;  %v7333_v11 = vunpack.i.l.bf16 %v7332_v52  ;;  %v3589_v18 = vsel %vm346_vm4, %v3588_v15, %v3551_v12  ;;  %v3590_v7 = vrot.slane %v3551_v12, 4 }
 0x6c0   : > { %v4759_v33 = vrot.slane %v4716_v0, 4  ;;  %v3702_v34 = vrot.slane %v3663_v36, 4  ;;  %v3701_v13 = vsel %vm346_vm4, %v3700_v27, %v3663_v36  ;;  %v4835_v10 = vrot.slane %v7334_v44, 4 }
 0x6c1   : > { %v4722_v49 = vsel %vm346_vm4, %v10553_v21, %v7333_v11  ;;  %v4723_v45 = vrot.slane %v7333_v11, 4  ;;  %v7550_v41 = vpack.i.bf16 %v3701_v13, %v3589_v18  ;;  %v4834_v8 = vsel %vm346_vm4, %v10549_v38, %v7334_v44 }
 0x6c2   : > { %v4728_v28 = vperm.slane %v4722_v49, %v8133_v6  ;;  %v3591_v52 = vsel %vm346_vm4, %v10647_v32, %v3590_v7  ;;  %v12891_v12 = vunpack.i.l.bf16 %v10472_v31  ;;  %v12892_v36 = vunpack.i.h.bf16 %v10472_v31 }
 0x6c3   : > { %v4840_v21 = vperm.slane %v4834_v8, %v8133_v6  ;;  %v3703_v11 = vsel %vm346_vm4, %v10695_v19, %v3702_v34  ;;  %v4771_v49 = vrot.slane %v10958_v42, 4  ;;  %v7354_v44 = vunpack.i.h.bf16 %v7352_v51 }
 0x6c4   : > { %v4724_v15 = vsel %vm346_vm4, %v12891_v12, %v4723_v45  ;;  %v4836_v27 = vsel %vm346_vm4, %v12892_v36, %v4835_v10  ;;  %v4757_v32 = vrot.slane %v4728_v28, 4  ;;  %v4760_v18 = vsel %vm346_vm4, %v4728_v28, %v4759_v33 }
 0x6c5   : > { %v4732_v38 = vperm.slane %v4724_v15, %v8133_v6  ;;  %v4869_v45 = vrot.slane %v4840_v21, 4  ;;  %v4872_v31 = vsel %vm346_vm4, %v4840_v21, %v4871_v46  ;;  %v7555_v7 = vpack.i.bf16 %v3703_v11, %v3591_v52 }
 0x6c6   : > { %7551 = vrot.lane.b32.xlu0 %v7550_v41, %s7888_s26  ;;  %v12893_v10 = vunpack.i.h.bf16 %v10867_v59  ;;  %v4758_v19 = vsel %vm346_vm4, %v4757_v32, %v4716_v0  ;;  %v4844_v41 = vperm.slane %v4836_v27, %v8133_v6  ;;  %v12894_v13 = vunpack.i.l.bf16 %v10867_v59 }
 0x6c7   : > { %v4772_v34 = vsel %vm346_vm4, %v4732_v38, %v4771_v49  ;;  %v4883_v33 = vrot.slane %v10961_v48, 4  ;;  %v12895_v28 = vunpack.i.h.bf16 %v10941_v54  ;;  %v12896_v52 = vunpack.i.l.bf16 %v10941_v54  ;;  %7556 = vrot.lane.b32.xlu1 %v7555_v7, %s7889_s8 }
 0x6c8   : > { %v10994_v8 = vrot.slane %v12893_v10, 4  ;;  %v11001_v12 = vrot.slane %v12894_v13, 4  ;;  %v11014_v0 = vperm.slane %v4760_v18, %v12738_v35  ;;  %v4769_v36 = vrot.slane %v4732_v38, 4 }
 0x6c9   : > { %v11006_v46 = vrot.slane %v12895_v28, 4  ;;  %v11010_v15 = vrot.slane %v12896_v52, 4  ;;  %v11017_v27 = vperm.slane %v4872_v31, %v12738_v35  ;;  %v4858_v21 = vsel %vm346_vm4, %v10769_v37, %v7354_v44 }
 0x6ca   : > { %v11022_v11 = vperm.slane %v4758_v19, %v12738_v35  ;;  %v11025_v49 = vperm.slane %v4772_v34, %v12738_v35  ;;  %v4870_v32 = vsel %vm346_vm4, %v4869_v45, %v4828_v58  ;;  %v4859_v10 = vrot.slane %v7354_v44, 4 }
 0x6cb   : > { %v4881_v7 = vrot.slane %v4844_v41, 4  ;;  %v7353_v13 = vunpack.i.l.bf16 %v7352_v51  ;;  %v12898_v18 = vrot.slane %v10865_v43, 4  ;;  %v12899_v31 = vrot.slane %v10840_v3, 4 }
 0x6cc   : > { %12897 = vst [vmem:[#allocation54_spill] sm:$0xff] %v11022_v11  ;;  %v4864_v19 = vperm.slane %v4858_v21, %v8133_v6  ;;  %v4017_v28 = vrot.slane %v10789_v47, 4  ;;  %v12900_v51 = vunpack.i.h.bf16 %v10716_v22  ;;  %v4129_v3 = vrot.slane %v10807_v60, 4 }
 0x6cd   : > { %v3990_v38 = vsel %vm346_vm4, %v10672_v63, %v12898_v18  ;;  %v4102_v37 = vsel %vm346_vm4, %v10678_v14, %v12899_v31  ;;  %v4746_v63 = vsel %vm346_vm4, %v10773_v23, %v7353_v13  ;;  %v4747_v44 = vrot.slane %v7353_v13, 4  ;;  %v11055_v18 = vpop.permute.xlu2 %7411 }
 0x6ce   : > { %v3998_v34 = vperm.slane %v3990_v38, %v12738_v35  ;;  %v4110_v58 = vperm.slane %v4102_v37, %v12738_v35  ;;  %v4860_v43 = vsel %vm346_vm4, %v12900_v51, %v4859_v10  ;;  %v11048_v14 = vsel %vm346_vm4, %v4769_v36, %v10958_v42  ;;  %12902 = vst [vmem:[#allocation56_spill] sm:$0xff] %v11055_v18  ;;  %v7347_v10 = vpop.permute.xlu0 %7346 }
 0x6cf   : > { %v11051_v45 = vperm.slane %v4870_v32, %v12738_v35  ;;  %v4884_v52 = vsel %vm346_vm4, %v4844_v41, %v4883_v33  ;;  %v11059_v23 = vsel %vm346_vm4, %v4881_v7, %v10961_v48  ;;  %v12903_v13 = vunpack.i.l.bf16 %v10716_v22 }
 0x6d0   : > { %v4018_v21 = vsel %vm346_vm4, %v3998_v34, %v4017_v28  ;;  %v4130_v42 = vsel %vm346_vm4, %v4110_v58, %v4129_v3  ;;  %v3594_v36 = vrot.slane %v10560_v20, 4  ;;  %v11067_v32 = vperm.slane %v4860_v43, %v8133_v6 }
 0x6d1   : > { %12901 = vst [vmem:[#allocation55_spill] sm:$0xff] %v11051_v45  ;;  %v4748_v38 = vsel %vm346_vm4, %v12903_v13, %v4747_v44  ;;  %v4893_v41 = vrot.slane %v4864_v19, 4  ;;  %v4752_v33 = vperm.slane %v4746_v63, %v8133_v6  ;;  %v7580_v31 = vpack.i.bf16 %v4130_v42, %v4018_v21  ;;  %v7372_v44 = vpop.permute.xlu1 %7371 }
 0x6d2   : > { %v12644_v37 = vunpack.i.h.bf16 %v11055_v18  ;;  %v3595_v48 = vsel %vm346_vm4, %v10690_v56, %v3594_v36  ;;  %v3706_v22 = vrot.slane %v10591_v2, 4  ;;  %v7349_v7 = vunpack.i.h.bf16 %v7347_v10 }
 0x6d3   : > { %v11075_v28 = vperm.slane %v4748_v38, %v8133_v6  ;;  %7581 = vrot.lane.b32.xlu2 %v7580_v31, %s7890_s28  ;;  %v12643_v20 = vunpack.i.l.bf16 %v11055_v18  ;;  %v7348_v51 = vunpack.i.l.bf16 %v7347_v10  ;;  %v4015_v43 = vrot.slane %v3998_v34, 4 }
 0x6d4   : > { %v3707_v63 = vsel %vm346_vm4, %v10709_v4, %v3706_v22  ;;  %v4846_v3 = vsel %vm346_vm4, %v10634_v30, %v7349_v7  ;;  %v4847_v56 = vrot.slane %v7349_v7, 4  ;;  %v4127_v21 = vrot.slane %v4110_v58, 4 }
 0x6d5   : > { %v7565_v2 = vpack.i.bf16 %v3707_v63, %v3595_v48  ;;  %v4852_v13 = vperm.slane %v4846_v3, %v8133_v6  ;;  %v4734_v38 = vsel %vm346_vm4, %v10638_v5, %v7348_v51  ;;  %v4735_v42 = vrot.slane %v7348_v51, 4 }
 0x6d6   : > { %v11087_v36 = vperm.slane %v4884_v52, %v12738_v35  ;;  %v12904_v34 = vunpack.i.h.bf16 %v10574_v62  ;;  %v4740_v4 = vperm.slane %v4734_v38, %v8133_v6  ;;  %v7374_v31 = vunpack.i.h.bf16 %v7372_v44 }
 0x6d7   : > { %7566 = vrot.lane.b32.xlu0 %v7565_v2, %s7892_s10  ;;  %v4894_v58 = vsel %vm346_vm4, %v4893_v41, %v4852_v13  ;;  %v4895_v48 = vrot.slane %v4852_v13, 4  ;;  %v12905_v5 = vunpack.i.l.bf16 %v10574_v62  ;;  %v4905_v22 = vrot.slane %v11067_v32, 4  ;;  %v7422_v2 = vpop.permute.xlu2 %7421 }
 0x6d8   : > { %v4848_v10 = vsel %vm346_vm4, %v12904_v34, %v4847_v56  ;;  %v4781_v7 = vrot.slane %v4752_v33, 4  ;;  %v4016_v51 = vsel %vm346_vm4, %v4015_v43, %v10789_v47  ;;  %v4128_v63 = vsel %vm346_vm4, %v4127_v21, %v10807_v60 }
 0x6d9   : > { %v11095_v30 = vperm.slane %v4848_v10, %v8133_v6  ;;  %v4736_v52 = vsel %vm346_vm4, %v12905_v5, %v4735_v42  ;;  %v4793_v3 = vrot.slane %v11075_v28, 4  ;;  %v11109_v56 = vrot.slane %v12644_v37, 4  ;;  %v7387_v5 = vpop.permute.xlu1 %7386 }
 0x6da   : > { %v11113_v62 = vrot.slane %v12643_v20, 4  ;;  %v4783_v41 = vrot.slane %v4740_v4, 4  ;;  %v4896_v13 = vsel %vm346_vm4, %v4864_v19, %v4895_v48  ;;  %v11117_v38 = vperm.slane %v4894_v58, %v12738_v35 }
 0x6db   : > { %v11120_v47 = vperm.slane %v4736_v52, %v8133_v6  ;;  %v4782_v60 = vsel %vm346_vm4, %v4781_v7, %v4740_v4  ;;  %v11125_v43 = vsel %vm346_vm4, %v4905_v22, %v11095_v30  ;;  %v7575_v21 = vpack.i.bf16 %v4128_v63, %v4016_v51  ;;  %v12908_v7 = vld [vmem:[#allocation20_spill] sm:$0xff] }
 0x6dc   : > { %12906 = vst [vmem:[#allocation57_spill] sm:$0xff] %v11117_v38  ;;  %v5210_v42 = vrot.slane %v7374_v31, 4  ;;  %v7373_v34 = vunpack.i.l.bf16 %v7372_v44  ;;  %v5213_v10 = vsel %vm346_vm4, %v7374_v31, %v10722_v40  ;;  %v4023_v19 = vrot.slane %v10932_v9, 4 }
 0x6dd   : > { %v4135_v58 = vrot.slane %v10935_v17, 4  ;;  %v7424_v48 = vunpack.i.h.bf16 %v7422_v2  ;;  %v4784_v52 = vsel %vm346_vm4, %v4752_v33, %v4783_v41  ;;  %7576 = vrot.lane.b32.xlu1 %v7575_v21, %s7887_s17  ;;  %v11137_v44 = vperm.slane %v4782_v60, %v12738_v35 }
 0x6de   : > { %v5098_v4 = vrot.slane %v7373_v34, 4  ;;  %v5101_v22 = vsel %vm346_vm4, %v7373_v34, %v10757_v29  ;;  %v12909_v40 = vunpack.i.h.bf16 %v12908_v7  ;;  %v4024_v51 = vsel %vm346_vm4, %v4023_v19, %v10783_v53 }
 0x6df   : > { %12907 = vst [vmem:[#allocation58_spill] sm:$0xff] %v11137_v44  ;;  %v4136_v63 = vsel %vm346_vm4, %v4135_v58, %v10825_v16  ;;  %v11147_v33 = vperm.slane %v4896_v13, %v12738_v35  ;;  %v11151_v41 = vsel %vm346_vm4, %v4793_v3, %v11120_v47  ;;  %v11154_v29 = vperm.slane %v5213_v10, %v8133_v6 }
 0x6e0   : > { %v5211_v31 = vsel %vm346_vm4, %v5210_v42, %v12909_v40  ;;  %v7595_v60 = vpack.i.bf16 %v4136_v63, %v4024_v51  ;;  %v11157_v21 = vperm.slane %v4784_v52, %v12738_v35  ;;  %v11161_v34 = vperm.slane %v5101_v22, %v8133_v6  ;;  %v7367_v52 = vpop.permute.xlu0 %7366 }
 0x6e1   : > { %12910 = vst [vmem:[#allocation20_spill] sm:$0xff] %v11154_v29  ;;  %v6423_v19 = vrot.slane %v7424_v48, 4  ;;  %v12911_v13 = vunpack.i.l.bf16 %v12908_v7  ;;  %v5217_v3 = vperm.slane %v5211_v31, %v8133_v6  ;;  %v7423_v10 = vunpack.i.l.bf16 %v7422_v2 }
 0x6e2   : > { %7596 = vrot.lane.b32.xlu2 %v7595_v60, %s7886_s16  ;;  %v11170_v40 = vperm.slane %v10801_v57, %v12738_v35  ;;  %v6422_v51 = vsel %vm346_vm4, %v10994_v8, %v7424_v48  ;;  %v11176_v22 = vperm.slane %v10908_v1, %v12738_v35  ;;  %v11184_v7 = vperm.slane %v10883_v26, %v12738_v35 }
 0x6e3   : > { %v5099_v58 = vsel %vm346_vm4, %v5098_v4, %v12911_v13  ;;  %v11180_v4 = vperm.slane %v10804_v61, %v12738_v35  ;;  %v5272_v2 = vrot.slane %v11154_v29, 4  ;;  %v12916_v57 = vunpack.i.h.bf16 %v10867_v59  ;;  %v12923_v29 = vld [vmem:[#allocation36_spill] sm:$0xff] }
 0x6e4   : > { %12912 = vst [vmem:[#allocation59_spill] sm:$0xff] %v11170_v40  ;;  %v6310_v8 = vsel %vm346_vm4, %v11001_v12, %v7423_v10  ;;  %v6311_v48 = vrot.slane %v7423_v10, 4  ;;  %v5105_v1 = vperm.slane %v5099_v58, %v8133_v6  ;;  %v4013_v63 = vrot.slane %v11170_v40, 4 }
 0x6e5   : > { %12913 = vst [vmem:[#allocation60_spill] sm:$0xff] %v11176_v22  ;;  %v6424_v31 = vsel %vm346_vm4, %v12916_v57, %v6423_v19  ;;  %v4125_v61 = vrot.slane %v11180_v4, 4  ;;  %v7369_v60 = vunpack.i.h.bf16 %v7367_v52  ;;  %v5260_v13 = vrot.slane %v5217_v3, 4 }
 0x6e6   : > { %12914 = vst [vmem:[#allocation61_spill] sm:$0xff] %v11180_v4  ;;  %v11196_v26 = vperm.slane %v6422_v51, %v8133_v6  ;;  %v12917_v20 = vunpack.i.l.bf16 %v10867_v59  ;;  %v7368_v19 = vunpack.i.l.bf16 %v7367_v52  ;;  %v11202_v57 = vperm.slane %v6424_v31, %v8133_v6 }
 0x6e7   : > { %12915 = vst [vmem:[#allocation62_spill] sm:$0xff] %v11184_v7  ;;  %v11205_v12 = vperm.slane %v6310_v8, %v8133_v6  ;;  %v4014_v58 = vsel %vm346_vm4, %v11176_v22, %v4013_v63  ;;  %v4126_v10 = vsel %vm346_vm4, %v11184_v7, %v4125_v61  ;;  %v5223_v59 = vsel %vm346_vm4, %v10834_v25, %v7369_v60  ;;  %v12918_v61 = vld [vmem:[#allocation34_spill] sm:$0xff] }
 0x6e8   : > { %v6312_v37 = vsel %vm346_vm4, %v12917_v20, %v6311_v48  ;;  %v7570_v51 = vpack.i.bf16 %v4126_v10, %v4014_v58  ;;  %v5224_v42 = vrot.slane %v7369_v60, 4  ;;  %v5111_v20 = vsel %vm346_vm4, %v10854_v39, %v7368_v19  ;;  %v12920_v60 = vld [vmem:[#allocation37_spill] sm:$0xff] }
 0x6e9   : > { %v11216_v52 = vperm.slane %v6312_v37, %v8133_v6  ;;  %v5229_v31 = vperm.slane %v5223_v59, %v8133_v6  ;;  %v5112_v8 = vrot.slane %v7368_v19, 4  ;;  %v5117_v48 = vperm.slane %v5111_v20, %v8133_v6 }
 0x6ea   : > { %v5160_v63 = vrot.slane %v11161_v34, 4  ;;  %7571 = vrot.lane.b32.xlu0 %v7570_v51, %s7891_s9  ;;  %v12919_v58 = vunpack.i.h.bf16 %v12918_v61  ;;  %v4021_v10 = vrot.slane %v12920_v60, 4  ;;  %v7389_v4 = vunpack.i.h.bf16 %v7387_v5 }
 0x6eb   : > { %v5258_v37 = vrot.slane %v5229_v31, 4  ;;  %v5261_v59 = vsel %vm346_vm4, %v5229_v31, %v5260_v13  ;;  %v12922_v19 = vunpack.i.l.bf16 %v12918_v61  ;;  %v5148_v40 = vrot.slane %v5105_v1, 4 }
 0x6ec   : > { %v5225_v25 = vsel %vm346_vm4, %v12919_v58, %v5224_v42  ;;  %v5146_v22 = vrot.slane %v5117_v48, 4  ;;  %v4133_v18 = vrot.slane %v12923_v29, 4  ;;  %v11242_v31 = vperm.slane %v5261_v59, %v12738_v35 }
 0x6ed   : > { %v11227_v39 = vperm.slane %v5225_v25, %v8133_v6  ;;  %v5113_v20 = vsel %vm346_vm4, %v12922_v19, %v5112_v8  ;;  %v4022_v25 = vsel %vm346_vm4, %v10870_v55, %v4021_v10  ;;  %v5259_v13 = vsel %vm346_vm4, %v5258_v37, %v5217_v3  ;;  %v12926_v37 = vld [vmem:[#allocation25_spill] sm:$0xff] }
 0x6ee   : > { %12924 = vst [vmem:[#allocation37_spill] sm:$0xff] %v11242_v31  ;;  %v5121_v8 = vperm.slane %v5113_v20, %v8133_v6  ;;  %v5149_v61 = vsel %vm346_vm4, %v5117_v48, %v5148_v40  ;;  %v4134_v10 = vsel %vm346_vm4, %v10873_v24, %v4133_v18  ;;  %v5248_v58 = vrot.slane %v7389_v4, 4  ;;  %v11256_v20 = vpop.permute.xlu2 %7436 }
 0x6ef   : > { %12921 = vst [vmem:[#allocation34_spill] sm:$0xff] %v11227_v39  ;;  %v11249_v7 = vsel %vm346_vm4, %v11227_v39, %v5272_v2  ;;  %v5147_v51 = vsel %vm346_vm4, %v5146_v22, %v5105_v1  ;;  %v7590_v3 = vpack.i.bf16 %v4134_v10, %v4022_v25  ;;  %v5247_v59 = vsel %vm346_vm4, %v12926_v37, %v7389_v4  ;;  %v12928_v2 = vld [vmem:[#allocation10_spill] sm:$0xff]  ;;  %v7382_v22 = vpop.permute.xlu0 %7381  ;;  %v11284_v37 = vpop.permute.xlu1 %7406 }
 0x6f0   : > { %12925 = vst [vmem:[#allocation36_spill] sm:$0xff] %v11249_v7  ;;  %v7388_v42 = vunpack.i.l.bf16 %v7387_v5  ;;  %v11259_v40 = vperm.slane %v5259_v13, %v12738_v35  ;;  %v11262_v48 = vperm.slane %v5149_v61, %v12738_v35  ;;  %v12929_v19 = vunpack.i.h.bf16 %v12928_v2  ;;  %v12931_v5 = vld [vmem:[#allocation12_spill] sm:$0xff] }
 0x6f1   : > { %v4019_v39 = vrot.slane %v10870_v55, 4  ;;  %v5158_v1 = vrot.slane %v5121_v8, 4  ;;  %v11269_v25 = vsel %vm346_vm4, %v5121_v8, %v5160_v63  ;;  %7591 = vrot.lane.b32.xlu1 %v7590_v3, %s7889_s8  ;;  %v11275_v61 = vperm.slane %v5147_v51, %v12738_v35  ;;  %v12934_v55 = vld [vmem:[#allocation21_spill] sm:$0xff] }
 0x6f2   : > { %12927 = vst [vmem:[#allocation25_spill] sm:$0xff] %v11259_v40  ;;  %v5249_v18 = vsel %vm346_vm4, %v12929_v19, %v5248_v58  ;;  %v5135_v4 = vsel %vm346_vm4, %v12931_v5, %v7388_v42  ;;  %v5136_v13 = vrot.slane %v7388_v42, 4  ;;  %v5253_v10 = vperm.slane %v5247_v59, %v8133_v6 }
 0x6f3   : > { %12930 = vst [vmem:[#allocation10_spill] sm:$0xff] %v11269_v25  ;;  %v5257_v19 = vperm.slane %v5249_v18, %v8133_v6  ;;  %v4020_v63 = vsel %vm346_vm4, %v4019_v39, %v12920_v60  ;;  %v4131_v8 = vrot.slane %v10873_v24, 4  ;;  %v7384_v3 = vunpack.i.h.bf16 %v7382_v22 }
 0x6f4   : > { %12932 = vst [vmem:[#allocation12_spill] sm:$0xff] %v11275_v61  ;;  %v12933_v42 = vunpack.i.l.bf16 %v12928_v2  ;;  %v5141_v59 = vperm.slane %v5135_v4, %v8133_v6  ;;  %v7383_v5 = vunpack.i.l.bf16 %v7382_v22  ;;  %v4809_v58 = vrot.slane %v11157_v21, 4  ;;  %v12935_v4 = vld [vmem:[#allocation35_spill] sm:$0xff] }
 0x6f5   : > { %v4132_v18 = vsel %vm346_vm4, %v4131_v8, %v12923_v29  ;;  %v5235_v60 = vsel %vm346_vm4, %v12934_v55, %v7384_v3  ;;  %v5236_v39 = vrot.slane %v7384_v3, 4  ;;  %v4921_v24 = vrot.slane %v11147_v33, 4 }
 0x6f6   : > { %v5137_v51 = vsel %vm346_vm4, %v12933_v42, %v5136_v13  ;;  %v5282_v40 = vrot.slane %v5253_v10, 4  ;;  %v7585_v7 = vpack.i.bf16 %v4132_v18, %v4020_v63  ;;  %v5241_v2 = vperm.slane %v5235_v60, %v8133_v6 }
 0x6f7   : > { %v5123_v13 = vsel %vm346_vm4, %v10945_v50, %v7383_v5  ;;  %v5145_v22 = vperm.slane %v5137_v51, %v8133_v6  ;;  %v12936_v42 = vunpack.i.h.bf16 %v12935_v4  ;;  %v5124_v29 = vrot.slane %v7383_v5, 4 }
 0x6f8   : > { %v5129_v8 = vperm.slane %v5123_v13, %v8133_v6  ;;  %7586 = vrot.lane.b32.xlu0 %v7585_v7, %s7888_s26  ;;  %v5284_v3 = vrot.slane %v5241_v2, 4  ;;  %v4810_v63 = vsel %vm346_vm4, %v4809_v58, %v11014_v0  ;;  %v4922_v50 = vsel %vm346_vm4, %v4921_v24, %v11017_v27 }
 0x6f9   : > { %v5237_v25 = vsel %vm346_vm4, %v12936_v42, %v5236_v39  ;;  %v5294_v18 = vrot.slane %v5257_v19, 4  ;;  %v5170_v51 = vrot.slane %v5141_v59, 4  ;;  %v5283_v60 = vsel %vm346_vm4, %v5282_v40, %v5241_v2 }
 0x6fa   : > { %v5245_v55 = vperm.slane %v5237_v25, %v8133_v6  ;;  %v12937_v39 = vunpack.i.l.bf16 %v12935_v4  ;;  %v11316_v7 = vsel %vm346_vm4, %v5158_v1, %v11161_v34  ;;  %v12938_v25 = vunpack.i.h.bf16 %v11256_v20 }
 0x6fb   : > { %v5172_v42 = vrot.slane %v5129_v8, 4  ;;  %v12939_v24 = vunpack.i.l.bf16 %v11256_v20  ;;  %v5171_v2 = vsel %vm346_vm4, %v5170_v51, %v5129_v8  ;;  %v7610_v4 = vpack.i.bf16 %v4922_v50, %v4810_v63  ;;  %v11342_v63 = vpop.permute.xlu0 %7401 }
 0x6fc   : > { %v5125_v5 = vsel %vm346_vm4, %v12937_v39, %v5124_v29  ;;  %v11320_v13 = vrot.slane %v12938_v25, 4  ;;  %v5295_v40 = vsel %vm346_vm4, %v5294_v18, %v5245_v55  ;;  %v5182_v29 = vrot.slane %v5145_v22, 4  ;;  %v11335_v25 = vpop.permute.xlu2 %7461 }
 0x6fd   : > { %v5133_v58 = vperm.slane %v5125_v5, %v8133_v6  ;;  %v11325_v31 = vrot.slane %v12939_v24, 4  ;;  %v11330_v34 = vsel %vm346_vm4, %v5253_v10, %v5284_v3  ;;  %v11333_v1 = vperm.slane %v5283_v60, %v12738_v35  ;;  %7611 = vrot.lane.b32.xlu2 %v7610_v4, %s7887_s17  ;;  %v7417_v10 = vpop.permute.xlu1 %7416 }
 0x6fe   : > { %v5296_v39 = vrot.slane %v5245_v55, 4  ;;  %v4807_v5 = vrot.slane %v11022_v11, 4  ;;  %v4919_v24 = vrot.slane %v11051_v45, 4  ;;  %v7409_v18 = vunpack.i.h.bf16 %v11284_v37 }
 0x6ff   : > { %12940 = vst [vmem:[#allocation21_spill] sm:$0xff] %v11333_v1  ;;  %v7408_v8 = vunpack.i.l.bf16 %v11284_v37  ;;  %v11345_v3 = vperm.slane %v5295_v40, %v12738_v35  ;;  %v5173_v55 = vsel %vm346_vm4, %v5141_v59, %v5172_v42  ;;  %v11349_v50 = vperm.slane %v5171_v2, %v12738_v35 }
 0x700   : > { %v5184_v51 = vrot.slane %v5133_v58, 4  ;;  %v4808_v60 = vsel %vm346_vm4, %v11137_v44, %v4807_v5  ;;  %v4920_v4 = vsel %vm346_vm4, %v11117_v38, %v4919_v24  ;;  %v6399_v11 = vrot.slane %v7409_v18, 4 }
 0x701   : > { %12941 = vst [vmem:[#allocation35_spill] sm:$0xff] %v11345_v3  ;;  %v6286_v37 = vsel %vm346_vm4, %v11010_v15, %v7408_v8  ;;  %v11358_v45 = vsel %vm346_vm4, %v5257_v19, %v5296_v39  ;;  %v7605_v40 = vpack.i.bf16 %v4920_v4, %v4808_v60  ;;  %v6398_v59 = vsel %vm346_vm4, %v11006_v46, %v7409_v18 }
 0x702   : > { %12942 = vst [vmem:[#allocation63_spill] sm:$0xff] %v11349_v50  ;;  %v12658_v42 = vunpack.i.h.bf16 %v11335_v25  ;;  %v11364_v2 = vperm.slane %v5173_v55, %v12738_v35  ;;  %v11367_v5 = vsel %vm346_vm4, %v5182_v29, %v5133_v58  ;;  %v12659_v24 = vunpack.i.l.bf16 %v11335_v25 }
 0x703   : > { %12943 = vst [vmem:[#allocation64_spill] sm:$0xff] %v11358_v45  ;;  %v4025_v44 = vrot.slane %v10783_v53, 4  ;;  %v11372_v15 = vsel %vm346_vm4, %v5145_v22, %v5184_v51  ;;  %7606 = vrot.lane.b32.xlu1 %v7605_v40, %s7891_s9  ;;  %v6287_v19 = vrot.slane %v7408_v8, 4  ;;  %v11376_v46 = vperm.slane %v6286_v37, %v8133_v6 }
 0x704   : > { %v12944_v39 = vunpack.i.h.bf16 %v10941_v54  ;;  %v11382_v58 = vperm.slane %v6398_v59, %v8133_v6  ;;  %v4137_v53 = vrot.slane %v10825_v16, 4  ;;  %v7404_v22 = vunpack.i.h.bf16 %v11342_v63 }
 0x705   : > { %v4026_v29 = vsel %vm346_vm4, %v10932_v9, %v4025_v44  ;;  %v11390_v8 = vrot.slane %v12658_v42, 4  ;;  %v7403_v55 = vunpack.i.l.bf16 %v11342_v63  ;;  %v4776_v51 = vperm.slane %v11048_v14, %v12738_v35  ;;  %v11407_v42 = vpop.permute.xlu0 %7426 }
 0x706   : > { %v6400_v18 = vsel %vm346_vm4, %v12944_v39, %v6399_v11  ;;  %v4800_v11 = vperm.slane %v11151_v41, %v12738_v35  ;;  %v11399_v60 = vrot.slane %v12659_v24, 4  ;;  %v4138_v16 = vsel %vm346_vm4, %v10935_v17, %v4137_v53  ;;  %v11409_v24 = vpop.permute.xlu1 %7431 }
 0x707   : > { %v6409_v9 = vrot.slane %v7404_v22, 4  ;;  %v4888_v44 = vperm.slane %v11059_v23, %v12738_v35  ;;  %v7600_v4 = vpack.i.bf16 %v4138_v16, %v4026_v29  ;;  %v6297_v37 = vrot.slane %v7403_v55, 4 }
 0x708   : > { %v4815_v63 = vrot.slane %v4776_v51, 4  ;;  %v4912_v14 = vperm.slane %v11125_v43, %v12738_v35  ;;  %v4813_v59 = vrot.slane %v4800_v11, 4  ;;  %v7419_v41 = vunpack.i.h.bf16 %v7417_v10 }
 0x709   : > { %v4927_v40 = vrot.slane %v4888_v44, 4  ;;  %v7418_v39 = vunpack.i.l.bf16 %v7417_v10  ;;  %v12945_v17 = vunpack.i.l.bf16 %v10941_v54  ;;  %v6321_v23 = vrot.slane %v11376_v46, 4  ;;  %7601 = vrot.lane.b32.xlu0 %v7600_v4, %s7892_s10 }
 0x70a   : > { %v4816_v29 = vsel %vm346_vm4, %v4800_v11, %v4815_v63  ;;  %v4925_v16 = vrot.slane %v4912_v14, 4  ;;  %v4814_v38 = vsel %vm346_vm4, %v4813_v59, %v4776_v51  ;;  %v6411_v10 = vrot.slane %v7419_v41, 4 }
 0x70b   : > { %v6288_v53 = vsel %vm346_vm4, %v12945_v17, %v6287_v19  ;;  %v4928_v43 = vsel %vm346_vm4, %v4912_v14, %v4927_v40  ;;  %v6298_v3 = vsel %vm346_vm4, %v6297_v37, %v7418_v39  ;;  %v6299_v54 = vrot.slane %v7418_v39, 4 }
 0x70c   : > { %v7625_v1 = vpack.i.bf16 %v4928_v43, %v4816_v29  ;;  %v4926_v45 = vsel %vm346_vm4, %v4925_v16, %v4888_v44  ;;  %v6304_v19 = vperm.slane %v6298_v3, %v8133_v6  ;;  %v11423_v17 = vperm.slane %v6400_v18, %v8133_v6 }
 0x70d   : > { %v7620_v4 = vpack.i.bf16 %v4926_v45, %v4814_v38  ;;  %v6410_v11 = vsel %vm346_vm4, %v6409_v9, %v7419_v41  ;;  %v6412_v63 = vsel %vm346_vm4, %v7404_v22, %v6411_v10  ;;  %v11428_v14 = vperm.slane %v6288_v53, %v8133_v6  ;;  %v11439_v22 = vpop.permute.xlu2 %7476  ;;  %v12973_v10 = vld [vmem:[#allocation47_spill] sm:$0xff] }
 0x70e   : > { %7626 = vrot.lane.b32.xlu2 %v7625_v1, %s7889_s8  ;;  %v6300_v51 = vsel %vm346_vm4, %v7403_v55, %v6299_v54  ;;  %v6347_v37 = vrot.slane %v6304_v19, 4  ;;  %v6416_v44 = vperm.slane %v6410_v11, %v8133_v6  ;;  %v6433_v3 = vrot.slane %v11382_v58, 4 }
 0x70f   : > { %7621 = vrot.lane.b32.xlu1 %v7620_v4, %s7888_s26  ;;  %v6308_v45 = vperm.slane %v6300_v51, %v8133_v6  ;;  %v12946_v38 = vrot.slane %v11205_v12, 4  ;;  %v4811_v9 = vrot.slane %v11014_v0, 4  ;;  %v6420_v55 = vperm.slane %v6412_v63, %v8133_v6  ;;  %v11471_v63 = vpop.permute.xlu1 %7446 }
 0x710   : > { %v6348_v1 = vsel %vm346_vm4, %v11205_v12, %v6347_v37  ;;  %v12947_v40 = vrot.slane %v11196_v26, 4  ;;  %v6459_v41 = vrot.slane %v6416_v44, 4  ;;  %v6445_v39 = vrot.slane %v11423_v17, 4 }
 0x711   : > { %v6346_v18 = vsel %vm346_vm4, %v12946_v38, %v6304_v19  ;;  %v12948_v53 = vrot.slane %v11216_v52, 4  ;;  %v4812_v16 = vsel %vm346_vm4, %v11157_v21, %v4811_v9  ;;  %v4923_v0 = vrot.slane %v11017_v27, 4  ;;  %v11469_v27 = vpop.permute.xlu0 %7441 }
 0x712   : > { %v6458_v59 = vsel %vm346_vm4, %v12947_v40, %v6416_v44  ;;  %v6333_v12 = vrot.slane %v11428_v14, 4  ;;  %v6359_v43 = vrot.slane %v6308_v45, 4  ;;  %v11459_v19 = vperm.slane %v6346_v18, %v12738_v35 }
 0x713   : > { %v6358_v29 = vsel %vm346_vm4, %v12948_v53, %v6308_v45  ;;  %v11462_v4 = vperm.slane %v6348_v1, %v12738_v35  ;;  %v11465_v11 = vperm.slane %v6458_v59, %v12738_v35  ;;  %v4924_v21 = vsel %vm346_vm4, %v11147_v33, %v4923_v0 }
 0x714   : > { %v11474_v51 = vperm.slane %v6358_v29, %v12738_v35  ;;  %v6460_v37 = vsel %vm346_vm4, %v11196_v26, %v6459_v41  ;;  %v12950_v44 = vrot.slane %v11202_v57, 4  ;;  %v7615_v38 = vpack.i.bf16 %v4924_v21, %v4812_v16  ;;  %v12953_v16 = vld [vmem:[#allocation39_spill] sm:$0xff] }
 0x715   : > { %v6471_v18 = vrot.slane %v6420_v55, 4  ;;  %v5198_v9 = vrot.slane %v11364_v2, 4  ;;  %v12951_v33 = vrot.slane %v11120_v47, 4  ;;  %v12952_v40 = vrot.slane %v11095_v30, 4 }
 0x716   : > { %12949 = vst [vmem:[#allocation65_spill] sm:$0xff] %v11474_v51  ;;  %v6470_v45 = vsel %vm346_vm4, %v12950_v44, %v6420_v55  ;;  %v11492_v26 = vsel %vm346_vm4, %v11216_v52, %v6359_v43  ;;  %7616 = vrot.lane.b32.xlu0 %v7615_v38, %s7890_s28  ;;  %v4819_v41 = vrot.slane %v11025_v49, 4  ;;  %v4931_v30 = vrot.slane %v11087_v36, 4  ;;  %v13004_v51 = vld [vmem:[#allocation28_spill] sm:$0xff] }
 0x717   : > { %v4796_v1 = vsel %vm346_vm4, %v11075_v28, %v12951_v33  ;;  %v4908_v59 = vsel %vm346_vm4, %v11067_v32, %v12952_v40  ;;  %v5199_v28 = vsel %vm346_vm4, %v5198_v9, %v11262_v48  ;;  %v7434_v53 = vunpack.i.h.bf16 %v11409_v24 }
 0x718   : > { %v4804_v55 = vperm.slane %v4796_v1, %v12738_v35  ;;  %v4916_v47 = vperm.slane %v4908_v59, %v12738_v35  ;;  %v7433_v32 = vunpack.i.l.bf16 %v11409_v24  ;;  %v7429_v52 = vunpack.i.h.bf16 %v11407_v42  ;;  %v12955_v59 = vld [vmem:[#allocation56_spill] sm:$0xff] }
 0x719   : > { %v7428_v29 = vunpack.i.l.bf16 %v11407_v42  ;;  %v7645_v0 = vpack.i.bf16 %v12953_v16, %v5199_v28  ;;  %v6386_v44 = vsel %vm346_vm4, %v11109_v56, %v7434_v53  ;;  %v6387_v38 = vrot.slane %v7434_v53, 4 }
 0x71a   : > { %v4820_v43 = vsel %vm346_vm4, %v4804_v55, %v4819_v41  ;;  %v4932_v21 = vsel %vm346_vm4, %v4916_v47, %v4931_v30  ;;  %v6274_v9 = vsel %vm346_vm4, %v11113_v62, %v7433_v32  ;;  %v11513_v33 = vperm.slane %v6460_v37, %v12738_v35  ;;  %v11526_v62 = vpop.permute.xlu2 %7491 }
 0x71b   : > { %7646 = vrot.lane.b32.xlu2 %v7645_v0, %s7887_s17  ;;  %v7635_v24 = vpack.i.bf16 %v4932_v21, %v4820_v43  ;;  %v6392_v42 = vperm.slane %v6386_v44, %v8133_v6  ;;  %v6275_v1 = vrot.slane %v7433_v32, 4  ;;  %v11518_v40 = vperm.slane %v6470_v45, %v12738_v35 }
 0x71c   : > { %v12956_v41 = vunpack.i.h.bf16 %v12955_v59  ;;  %v11524_v28 = vperm.slane %v6274_v9, %v8133_v6  ;;  %v4817_v37 = vrot.slane %v4804_v55, 4  ;;  %v12957_v53 = vunpack.i.l.bf16 %v12955_v59  ;;  %v11540_v55 = vpop.permute.xlu1 %7456 }
 0x71d   : > { %12954 = vst [vmem:[#allocation39_spill] sm:$0xff] %v11518_v40  ;;  %7636 = vrot.lane.b32.xlu1 %v7635_v24, %s7892_s10  ;;  %v6434_v30 = vsel %vm346_vm4, %v6433_v3, %v6392_v42  ;;  %v4929_v45 = vrot.slane %v4916_v47, 4  ;;  %v7444_v16 = vunpack.i.h.bf16 %v11469_v27  ;;  %v11536_v0 = vsel %vm346_vm4, %v11202_v57, %v6471_v18 }
 0x71e   : > { %v6388_v56 = vsel %vm346_vm4, %v12956_v41, %v6387_v38  ;;  %v6276_v32 = vsel %vm346_vm4, %v12957_v53, %v6275_v1  ;;  %v6008_v43 = vrot.slane %v7429_v52, 4  ;;  %v5896_v21 = vrot.slane %v7428_v29, 4  ;;  %v11538_v38 = vpop.permute.xlu0 %7451 }
 0x71f   : > { %v6435_v44 = vrot.slane %v6392_v42, 4  ;;  %v11543_v3 = vperm.slane %v6388_v56, %v8133_v6  ;;  %v11546_v9 = vperm.slane %v6434_v30, %v12738_v35  ;;  %v11551_v57 = vperm.slane %v6276_v32, %v8133_v6 }
 0x720   : > { %v6322_v18 = vsel %vm346_vm4, %v6321_v23, %v11524_v28  ;;  %v6323_v42 = vrot.slane %v11524_v28, 4  ;;  %v4818_v1 = vsel %vm346_vm4, %v4817_v37, %v11025_v49  ;;  %v4930_v59 = vsel %vm346_vm4, %v4929_v45, %v11087_v36 }
 0x721   : > { %v6010_v41 = vrot.slane %v7444_v16, 4  ;;  %v7443_v56 = vunpack.i.l.bf16 %v11469_v27  ;;  %v6009_v30 = vsel %vm346_vm4, %v6008_v43, %v7444_v16  ;;  %v11566_v53 = vsel %vm346_vm4, %v11382_v58, %v6435_v44 }
 0x722   : > { %v7630_v32 = vpack.i.bf16 %v4930_v59, %v4818_v1  ;;  %v11570_v23 = vperm.slane %v11316_v7, %v12738_v35  ;;  %v11574_v49 = vperm.slane %v11367_v5, %v12738_v35  ;;  %v5196_v37 = vrot.slane %v11275_v61, 4 }
 0x723   : > { %v5897_v36 = vsel %vm346_vm4, %v5896_v21, %v7443_v56  ;;  %v5898_v28 = vrot.slane %v7443_v56, 4  ;;  %v6011_v27 = vsel %vm346_vm4, %v7429_v52, %v6010_v41  ;;  %v11583_v58 = vsel %vm346_vm4, %v6445_v39, %v11543_v3  ;;  %v12961_v41 = vld [vmem:[#allocation15_spill] sm:$0xff] }
 0x724   : > { %12958 = vst [vmem:[#allocation56_spill] sm:$0xff] %v11583_v58  ;;  %7631 = vrot.lane.b32.xlu0 %v7630_v32, %s7886_s16  ;;  %v11587_v7 = vperm.slane %v6009_v30, %v8133_v6  ;;  %v6019_v5 = vperm.slane %v6011_v27, %v8133_v6  ;;  %v5204_v45 = vrot.slane %v11570_v23, 4  ;;  %v5197_v52 = vsel %vm346_vm4, %v11349_v50, %v5196_v37  ;;  %v11614_v47 = vpop.permute.xlu1 %7471 }
 0x725   : > { %v5899_v16 = vsel %vm346_vm4, %v7428_v29, %v5898_v28  ;;  %v7449_v43 = vunpack.i.h.bf16 %v11471_v63  ;;  %v7448_v21 = vunpack.i.l.bf16 %v11471_v63  ;;  %v11597_v39 = vperm.slane %v5897_v36, %v8133_v6  ;;  %v12962_v29 = vld [vmem:[#allocation49_spill] sm:$0xff] }
 0x726   : > { %12959 = vst [vmem:[#allocation66_spill] sm:$0xff] %v11587_v7  ;;  %v11600_v44 = vperm.slane %v5899_v16, %v8133_v6  ;;  %v6056_v1 = vrot.slane %v6019_v5, 4  ;;  %v5205_v59 = vsel %vm346_vm4, %v11574_v49, %v5204_v45  ;;  %v7640_v30 = vpack.i.bf16 %v12962_v29, %v5197_v52  ;;  %v11612_v16 = vpop.permute.xlu0 %7466 }
 0x727   : > { %12960 = vst [vmem:[#allocation67_spill] sm:$0xff] %v11597_v39  ;;  %v7660_v56 = vpack.i.bf16 %v12961_v41, %v5205_v59  ;;  %v5996_v32 = vrot.slane %v7449_v43, 4  ;;  %v5999_v28 = vsel %vm346_vm4, %v7449_v43, %v11390_v8  ;;  %v5884_v27 = vrot.slane %v7448_v21, 4 }
 0x728   : > { %v5944_v63 = vrot.slane %v11600_v44, 4  ;;  %v6007_v36 = vperm.slane %v5999_v28, %v8133_v6  ;;  %v5887_v37 = vsel %vm346_vm4, %v7448_v21, %v11399_v60  ;;  %v11618_v52 = vperm.slane %v6322_v18, %v12738_v35  ;;  %7641 = vrot.lane.b32.xlu1 %v7640_v30, %s7891_s9  ;;  %v11626_v60 = vpop.permute.xlu2 %7506 }
 0x729   : > { %7661 = vrot.lane.b32.xlu2 %v7660_v56, %s7889_s8  ;;  %v12963_v8 = vunpack.i.h.bf16 %v11335_v25  ;;  %v5895_v59 = vperm.slane %v5887_v37, %v8133_v6  ;;  %v12965_v29 = vunpack.i.l.bf16 %v11335_v25  ;;  %v11637_v30 = vsel %vm346_vm4, %v11376_v46, %v6323_v42 }
 0x72a   : > { %v6058_v41 = vrot.slane %v6007_v36, 4  ;;  %v6057_v56 = vsel %vm346_vm4, %v6056_v1, %v6007_v36  ;;  %v5932_v25 = vrot.slane %v11597_v39, 4  ;;  %v5200_v1 = vrot.slane %v11262_v48, 4 }
 0x72b   : > { %v5997_v43 = vsel %vm346_vm4, %v5996_v32, %v12963_v8  ;;  %v5885_v18 = vsel %vm346_vm4, %v5884_v27, %v12965_v29  ;;  %v11643_v32 = vsel %vm346_vm4, %v6333_v12, %v11551_v57  ;;  %v5945_v37 = vsel %vm346_vm4, %v5944_v63, %v5895_v59 }
 0x72c   : > { %v11629_v21 = vperm.slane %v5997_v43, %v8133_v6  ;;  %v6044_v27 = vrot.slane %v11587_v7, 4  ;;  %v11653_v42 = vperm.slane %v5885_v18, %v8133_v6  ;;  %v5946_v8 = vrot.slane %v5895_v59, 4  ;;  %v12969_v18 = vld [vmem:[#allocation37_spill] sm:$0xff]  ;;  %v11684_v54 = vpop.permute.xlu1 %7486 }
 0x72d   : > { %v11656_v12 = vperm.slane %v6057_v56, %v12738_v35  ;;  %v11659_v43 = vperm.slane %v5945_v37, %v12738_v35  ;;  %v6059_v29 = vsel %vm346_vm4, %v6019_v5, %v6058_v41  ;;  %v7454_v36 = vunpack.i.h.bf16 %v11538_v38  ;;  %v12970_v41 = vld [vmem:[#allocation40_spill] sm:$0xff] }
 0x72e   : > { %12964 = vst [vmem:[#allocation15_spill] sm:$0xff] %v11629_v21  ;;  %v6045_v63 = vsel %vm346_vm4, %v6044_v27, %v11629_v21  ;;  %v7453_v46 = vunpack.i.l.bf16 %v11538_v38  ;;  %v11669_v59 = vperm.slane %v11330_v34, %v12738_v35  ;;  %v5312_v56 = vrot.slane %v12969_v18, 4  ;;  %v11677_v48 = vpop.permute.xlu0 %7481 }
 0x72f   : > { %12966 = vst [vmem:[#allocation49_spill] sm:$0xff] %v11653_v42  ;;  %v5201_v37 = vsel %vm346_vm4, %v11364_v2, %v5200_v1  ;;  %v5202_v45 = vrot.slane %v11574_v49, 4  ;;  %v7459_v27 = vunpack.i.h.bf16 %v11540_v55  ;;  %v7458_v5 = vunpack.i.l.bf16 %v11540_v55 }
 0x730   : > { %12967 = vst [vmem:[#allocation68_spill] sm:$0xff] %v11656_v12  ;;  %v7650_v28 = vpack.i.bf16 %v12970_v41, %v5201_v37  ;;  %v6021_v38 = vsel %vm346_vm4, %v11320_v13, %v7454_v36  ;;  %v6022_v34 = vrot.slane %v7454_v36, 4  ;;  %v5909_v24 = vsel %vm346_vm4, %v11325_v31, %v7453_v46  ;;  %v12972_v36 = vld [vmem:[#allocation46_spill] sm:$0xff] }
 0x731   : > { %12968 = vst [vmem:[#allocation69_spill] sm:$0xff] %v11659_v43  ;;  %v6027_v2 = vperm.slane %v6021_v38, %v8133_v6  ;;  %v5910_v49 = vrot.slane %v7453_v46, 4  ;;  %v11688_v1 = vperm.slane %v5909_v24, %v8133_v6  ;;  %v5313_v55 = vsel %vm346_vm4, %v11669_v59, %v5312_v56 }
 0x732   : > { %7651 = vrot.lane.b32.xlu0 %v7650_v28, %s7890_s28  ;;  %v12971_v37 = vunpack.i.h.bf16 %v11256_v20  ;;  %v7685_v41 = vpack.i.bf16 %v5313_v55, %v12972_v36  ;;  %v5203_v31 = vsel %vm346_vm4, %v5202_v45, %v11570_v23  ;;  %v6033_v46 = vsel %vm346_vm4, %v12973_v10, %v7459_v27  ;;  %v12975_v23 = vld [vmem:[#allocation44_spill] sm:$0xff] }
 0x733   : > { %v5933_v24 = vsel %vm346_vm4, %v5932_v25, %v11653_v42  ;;  %v5947_v56 = vsel %vm346_vm4, %v11600_v44, %v5946_v8  ;;  %v12974_v38 = vunpack.i.l.bf16 %v11256_v20  ;;  %v5958_v55 = vrot.slane %v11688_v1, 4  ;;  %v12976_v44 = vld [vmem:[#allocation48_spill] sm:$0xff] }
 0x734   : > { %v6023_v13 = vsel %vm346_vm4, %v12971_v37, %v6022_v34  ;;  %7686 = vrot.lane.b32.xlu2 %v7685_v41, %s7890_s28  ;;  %v7655_v45 = vpack.i.bf16 %v12975_v23, %v5203_v31  ;;  %v6034_v10 = vrot.slane %v7459_v27, 4  ;;  %v6039_v37 = vperm.slane %v6033_v46, %v8133_v6  ;;  %v11726_v46 = vpop.permute.xlu2 %7521  ;;  %v11762_v50 = vpop.permute.xlu1 %7501 }
 0x735   : > { %v11706_v28 = vperm.slane %v6023_v13, %v8133_v6  ;;  %v5911_v34 = vsel %vm346_vm4, %v12974_v38, %v5910_v49  ;;  %v6070_v25 = vrot.slane %v6027_v2, 4  ;;  %v5921_v8 = vsel %vm346_vm4, %v12976_v44, %v7458_v5  ;;  %v12977_v49 = vld [vmem:[#allocation29_spill] sm:$0xff]  ;;  %12979 = vst [vmem:[#allocation37_spill] sm:$0xff] %v11726_v46 }
 0x736   : > { %v11716_v36 = vperm.slane %v5911_v34, %v8133_v6  ;;  %v5922_v13 = vrot.slane %v7458_v5, 4  ;;  %7656 = vrot.lane.b32.xlu1 %v7655_v45, %s7888_s26  ;;  %v12978_v38 = vunpack.i.h.bf16 %v12977_v49  ;;  %v6068_v31 = vrot.slane %v6039_v37, 4  ;;  %v11752_v61 = vpop.permute.xlu0 %7496 }
 0x737   : > { %v5927_v27 = vperm.slane %v5921_v8, %v8133_v6  ;;  %v11729_v34 = vperm.slane %v5933_v24, %v12738_v35  ;;  %v11732_v23 = vperm.slane %v6045_v63, %v12738_v35  ;;  %v12980_v45 = vunpack.i.l.bf16 %v12977_v49  ;;  %v12985_v49 = vld [vmem:[#allocation16_spill] sm:$0xff] }
 0x738   : > { %v6035_v41 = vsel %vm346_vm4, %v12978_v38, %v6034_v10  ;;  %v11741_v10 = vperm.slane %v5947_v56, %v12738_v35  ;;  %v11744_v8 = vperm.slane %v6059_v29, %v12738_v35  ;;  %v6082_v38 = vrot.slane %v11706_v28, 4 }
 0x739   : > { %v11735_v5 = vperm.slane %v6035_v41, %v8133_v6  ;;  %v5923_v44 = vsel %vm346_vm4, %v12980_v45, %v5922_v13  ;;  %v5959_v24 = vsel %vm346_vm4, %v5927_v27, %v5958_v55  ;;  %v6071_v20 = vsel %vm346_vm4, %v6039_v37, %v6070_v25  ;;  %v12983_v45 = vld [vmem:[#allocation10_spill] sm:$0xff]  ;;  %v12990_v37 = vld [vmem:[#allocation32_spill] sm:$0xff] }
 0x73a   : > { %12981 = vst [vmem:[#allocation40_spill] sm:$0xff] %v11741_v10  ;;  %v11755_v56 = vperm.slane %v5923_v44, %v8133_v6  ;;  %v5956_v13 = vrot.slane %v5927_v27, 4  ;;  %v11758_v29 = vsel %vm346_vm4, %v6068_v31, %v6027_v2  ;;  %v5169_v55 = vperm.slane %v12983_v45, %v12738_v35  ;;  %v12986_v44 = vld [vmem:[#allocation17_spill] sm:$0xff]  ;;  %v12989_v31 = vld [vmem:[#allocation64_spill] sm:$0xff] }
 0x73b   : > { %12982 = vst [vmem:[#allocation46_spill] sm:$0xff] %v11744_v8  ;;  %v11766_v25 = vperm.slane %v5959_v24, %v12738_v35  ;;  %v5193_v41 = vperm.slane %v11372_v15, %v12738_v35  ;;  %v12987_v63 = vrot.slane %v12986_v44, 4  ;;  %v11775_v2 = vperm.slane %v6071_v20, %v12738_v35  ;;  %v12991_v24 = vld [vmem:[#allocation27_spill] sm:$0xff]  ;;  %v12996_v8 = vld [vmem:[#allocation36_spill] sm:$0xff] }
 0x73c   : > { %v11779_v45 = vperm.slane %v12989_v31, %v12738_v35  ;;  %v11783_v7 = vperm.slane %v12990_v37, %v8133_v6  ;;  %v12992_v21 = vrot.slane %v12991_v24, 4  ;;  %v12994_v20 = vld [vmem:[#allocation19_spill] sm:$0xff]  ;;  %v11799_v10 = vperm.slane %v12996_v8, %v12738_v35 }
 0x73d   : > { %12984 = vst [vmem:[#allocation47_spill] sm:$0xff] %v11766_v25  ;;  %v5604_v27 = vsel %vm346_vm4, %v12987_v63, %v12985_v49  ;;  %v12993_v25 = vld [vmem:[#allocation26_spill] sm:$0xff]  ;;  %v5206_v39 = vrot.slane %v5193_v41, 4  ;;  %v11794_v63 = vperm.slane %v12994_v20, %v8133_v6  ;;  %v5208_v46 = vrot.slane %v5169_v55, 4  ;;  %v12997_v20 = vld [vmem:[#allocation13_spill] sm:$0xff] }
 0x73e   : > { %12988 = vst [vmem:[#allocation44_spill] sm:$0xff] %v11775_v2  ;;  %v5622_v15 = vsel %vm346_vm4, %v12993_v25, %v12992_v21  ;;  %v12995_v2 = vld [vmem:[#allocation31_spill] sm:$0xff]  ;;  %v5318_v37 = vrot.slane %v11779_v45, 4  ;;  %v5669_v24 = vrot.slane %v11783_v7, 4  ;;  %v7469_v40 = vunpack.i.h.bf16 %v11612_v16 }
 0x73f   : > { %v11790_v42 = vperm.slane %v5622_v15, %v8133_v6  ;;  %v5693_v31 = vrot.slane %v12995_v2, 4  ;;  %v5207_v21 = vsel %vm346_vm4, %v5206_v39, %v5169_v55  ;;  %v5605_v15 = vrot.slane %v12985_v49, 4 }
 0x740   : > { %v3229_v6 = vrot.slane %v12997_v20, 4  ;;  %v7665_v12 = vpack.i.bf16 %v5604_v27, %v5207_v21  ;;  %v5319_v58 = vsel %vm346_vm4, %v5318_v37, %v11799_v10  ;;  %v5209_v55 = vsel %vm346_vm4, %v5193_v41, %v5208_v46  ;;  %v11822_v27 = vpop.permute.xlu0 %7511  ;;  %v13000_v37 = vld [vmem:[#allocation9_spill] sm:$0xff] }
 0x741   : > { %v5694_v25 = vsel %vm346_vm4, %v11794_v63, %v5693_v31  ;;  %v5670_v43 = vsel %vm346_vm4, %v11790_v42, %v5669_v24  ;;  %v5606_v49 = vsel %vm346_vm4, %v12986_v44, %v5605_v15  ;;  %v7468_v21 = vunpack.i.l.bf16 %v11612_v16  ;;  %v13001_v16 = vld [vmem:[#allocation14_spill] sm:$0xff] }
 0x742   : > { %v11811_v8 = vperm.slane %v5694_v25, %v12738_v35  ;;  %v11817_v39 = vperm.slane %v5670_v43, %v12738_v35  ;;  %7666 = vrot.lane.b32.xlu0 %v7665_v12, %s7886_s16  ;;  %v7670_v24 = vpack.i.bf16 %v5606_v49, %v5209_v55  ;;  %v12998_v25 = vld [vmem:[#allocation18_spill] sm:$0xff]  ;;  %v11830_v43 = vsel %vm346_vm4, %v11735_v5, %v6082_v38  ;;  %v11844_v49 = vpop.permute.xlu1 %7516 }
 0x743   : > { %v3341_v20 = vrot.slane %v12998_v25, 4  ;;  %12999 = vst [vmem:[#allocation48_spill] sm:$0xff] %v11830_v43  ;;  %v3230_v46 = vsel %vm346_vm4, %v3229_v6, %v13000_v37  ;;  %v7474_v41 = vunpack.i.h.bf16 %v11614_v47  ;;  %v7473_v44 = vunpack.i.l.bf16 %v11614_v47  ;;  %v13002_v37 = vld [vmem:[#allocation25_spill] sm:$0xff]  ;;  %v13003_v43 = vld [vmem:[#allocation11_spill] sm:$0xff] }
 0x744   : > { %v5715_v31 = vrot.slane %v11811_v8, 4  ;;  %v5957_v12 = vsel %vm346_vm4, %v5956_v13, %v11688_v1  ;;  %7671 = vrot.lane.b32.xlu1 %v7670_v24, %s7892_s10  ;;  %v3413_v38 = vsel %vm514_vm6, %v3230_v46, %v7468_v21  ;;  %v5308_v47 = vrot.slane %v13002_v37, 4  ;;  %v13007_v21 = vld [vmem:[#allocation33_spill] sm:$0xff] }
 0x745   : > { %v3342_v55 = vsel %vm346_vm4, %v3341_v20, %v13001_v16  ;;  %v13005_v1 = vrot.slane %v13004_v51, 4  ;;  %v5679_v46 = vrot.slane %v13007_v21, 4  ;;  %v6373_v51 = vrot.slane %v11462_v4, 4  ;;  %v13011_v21 = vld [vmem:[#allocation41_spill] sm:$0xff] }
 0x746   : > { %v5716_v15 = vsel %vm346_vm4, %v5715_v31, %v11817_v39  ;;  %v3420_v25 = vsel %vm514_vm6, %v3342_v55, %v7469_v40  ;;  %v3414_v31 = vsel %vm516_vm7, %v3413_v38, %v7473_v44  ;;  %v6485_v16 = vrot.slane %v11513_v33, 4  ;;  %v13010_v38 = vld [vmem:[#allocation43_spill] sm:$0xff] }
 0x747   : > { %v7700_v6 = vpack.i.bf16 %v5319_v58, %v5716_v15  ;;  %v5656_v13 = vsel %vm346_vm4, %v13005_v1, %v13003_v43  ;;  %v3421_v24 = vsel %vm516_vm7, %v3420_v25, %v7474_v41  ;;  %v13008_v58 = vld [vmem:[#allocation21_spill] sm:$0xff]  ;;  %v11863_v15 = vperm.slane %v11637_v30, %v12738_v35  ;;  %v13009_v41 = vld [vmem:[#allocation30_spill] sm:$0xff] }
 0x748   : > { %v11855_v20 = vperm.slane %v5656_v13, %v12738_v35  ;;  %v5309_v40 = vsel %vm346_vm4, %v13008_v58, %v5308_v47  ;;  %v11868_v43 = vperm.slane %v11566_v53, %v12738_v35  ;;  %v5680_v44 = vsel %vm346_vm4, %v5679_v46, %v13009_v41  ;;  %v11882_v1 = vpop.permute.xlu0 %7526 }
 0x749   : > { %7701 = vrot.lane.b32.xlu2 %v7700_v6, %s7886_s16  ;;  %v5310_v55 = vrot.slane %v11669_v59, 4  ;;  %v5707_v6 = vrot.slane %v13010_v38, 4  ;;  %v11876_v25 = vperm.slane %v5680_v44, %v12738_v35  ;;  %v6374_v47 = vsel %vm346_vm4, %v6373_v51, %v11863_v15 }
 0x74a   : > { %13006 = vst [vmem:[#allocation29_spill] sm:$0xff] %v11855_v20  ;;  %v5705_v30 = vrot.slane %v11855_v20, 4  ;;  %v7484_v53 = vunpack.i.h.bf16 %v11677_v48  ;;  %v6486_v13 = vsel %vm346_vm4, %v6485_v16, %v11868_v43  ;;  %v7483_v41 = vunpack.i.l.bf16 %v11677_v48 }
 0x74b   : > { %v5311_v59 = vsel %vm346_vm4, %v5310_v55, %v12969_v18  ;;  %v5708_v46 = vsel %vm346_vm4, %v5707_v6, %v13011_v21  ;;  %v13012_v37 = vunpack.i.h.bf16 %v11439_v22  ;;  %v13013_v16 = vunpack.i.l.bf16 %v11439_v22 }
 0x74c   : > { %v5706_v51 = vsel %vm346_vm4, %v11876_v25, %v5705_v30  ;;  %v7680_v38 = vpack.i.bf16 %v5311_v59, %v5708_v46  ;;  %v7489_v6 = vunpack.i.h.bf16 %v11684_v54  ;;  %v7715_v48 = vpack.i.bf16 %v6486_v13, %v6374_v47  ;;  %v13014_v59 = vld [vmem:[#allocation20_spill] sm:$0xff]  ;;  %v13015_v46 = vld [vmem:[#allocation34_spill] sm:$0xff] }
 0x74d   : > { %v3422_v58 = vsel %vm518_vm8, %v3421_v24, %v13012_v37  ;;  %v7675_v20 = vpack.i.bf16 %v5309_v40, %v5706_v51  ;;  %v3415_v18 = vsel %vm518_vm8, %v3414_v31, %v13013_v16  ;;  %v7488_v30 = vunpack.i.l.bf16 %v11684_v54  ;;  %v11919_v54 = vpop.permute.xlu1 %7531 }
 0x74e   : > { %v3423_v55 = vsel %vm520_vm9, %v3422_v58, %v7484_v53  ;;  %7681 = vrot.lane.b32.xlu1 %v7680_v38, %s7887_s17  ;;  %v3416_v21 = vsel %vm520_vm9, %v3415_v18, %v7483_v41  ;;  %v13016_v44 = vrot.slane %v13015_v46, 4  ;;  %v13017_v22 = vrot.slane %v11716_v36, 4  ;;  %v13018_v58 = vld [vmem:[#allocation35_spill] sm:$0xff] }
 0x74f   : > { %7676 = vrot.lane.b32.xlu0 %v7675_v20, %s7891_s9  ;;  %v5314_v40 = vrot.slane %v13018_v58, 4  ;;  %v5667_v47 = vrot.slane %v11790_v42, 4  ;;  %v3424_v53 = vsel %vm522_vm10, %v3423_v55, %v7489_v6  ;;  %v5691_v13 = vrot.slane %v11794_v63, 4 }
 0x750   : > { %v5271_v37 = vsel %vm346_vm4, %v13016_v44, %v13014_v59  ;;  %v11913_v31 = vsel %vm346_vm4, %v11755_v56, %v13017_v22  ;;  %v11925_v41 = vperm.slane %v5957_v12, %v12738_v35  ;;  %v5982_v44 = vrot.slane %v11729_v34, 4  ;;  %v11941_v55 = vpop.permute.xlu0 %7536  ;;  %v13019_v59 = vld [vmem:[#allocation22_spill] sm:$0xff] }
 0x751   : > { %v5277_v24 = vperm.slane %v5271_v37, %v12738_v35  ;;  %7716 = vrot.lane.b32.xlu2 %v7715_v48, %s7887_s17  ;;  %v3417_v20 = vsel %vm522_vm10, %v3416_v21, %v7488_v30  ;;  %v5668_v51 = vsel %vm346_vm4, %v5667_v47, %v11783_v7  ;;  %v11933_v42 = vperm.slane %v11758_v29, %v12738_v35  ;;  %v13020_v47 = vld [vmem:[#allocation23_spill] sm:$0xff] }
 0x752   : > { %v6094_v38 = vrot.slane %v11732_v23, 4  ;;  %v5674_v16 = vperm.slane %v5668_v51, %v12738_v35  ;;  %v5692_v63 = vsel %vm346_vm4, %v5691_v13, %v12995_v2  ;;  %v5983_v12 = vsel %vm346_vm4, %v11925_v41, %v5982_v44  ;;  %v13021_v44 = vld [vmem:[#allocation38_spill] sm:$0xff] }
 0x753   : > { %v5316_v18 = vrot.slane %v5277_v24, 4  ;;  %v5315_v6 = vsel %vm346_vm4, %v5314_v40, %v5277_v24  ;;  %v5698_v7 = vperm.slane %v5692_v63, %v12738_v35  ;;  %v7499_v48 = vunpack.i.h.bf16 %v11752_v61 }
 0x754   : > { %v6095_v29 = vsel %vm346_vm4, %v11933_v42, %v6094_v38  ;;  %v5713_v30 = vrot.slane %v5674_v16, 4  ;;  %v7498_v2 = vunpack.i.l.bf16 %v11752_v61  ;;  %v4416_v46 = vrot.slane %v13019_v59, 4  ;;  %v13023_v59 = vld [vmem:[#allocation24_spill] sm:$0xff] }
 0x755   : > { %v5317_v21 = vsel %vm346_vm4, %v13018_v58, %v5316_v18  ;;  %v5711_v37 = vrot.slane %v5698_v7, 4  ;;  %v7730_v22 = vpack.i.bf16 %v6095_v29, %v5983_v12  ;;  %v4528_v13 = vrot.slane %v13020_v47, 4 }
 0x756   : > { %v7504_v24 = vunpack.i.h.bf16 %v11762_v50  ;;  %v5714_v40 = vsel %vm346_vm4, %v5698_v7, %v5713_v30  ;;  %v4417_v51 = vsel %vm346_vm4, %v4416_v46, %v13021_v44  ;;  %v7503_v38 = vunpack.i.l.bf16 %v11762_v50 }
 0x757   : > { %v13022_v58 = vunpack.i.l.bf16 %v11526_v62  ;;  %v5712_v61 = vsel %vm346_vm4, %v5711_v37, %v5674_v16  ;;  %v7695_v18 = vpack.i.bf16 %v5317_v21, %v5714_v40  ;;  %v4529_v12 = vsel %vm346_vm4, %v4528_v13, %v13023_v59  ;;  %v11982_v21 = vpop.permute.xlu1 %7541 }
 0x758   : > { %v13024_v29 = vunpack.i.h.bf16 %v11526_v62  ;;  %v7690_v7 = vpack.i.bf16 %v5315_v6, %v5712_v61  ;;  %v4607_v30 = vsel %vm514_vm6, %v4529_v12, %v7504_v24  ;;  %v5717_v16 = vrot.slane %v11817_v39, 4  ;;  %v11997_v39 = vpop.permute.xlu0 %7551 }
 0x759   : > { %v3418_v63 = vsel %vm524_vm11, %v3417_v20, %v13022_v58  ;;  %7731 = vrot.lane.b32.xlu2 %v7730_v22, %s7891_s9  ;;  %7696 = vrot.lane.b32.xlu1 %v7695_v18, %s7889_s8  ;;  %v5320_v20 = vrot.slane %v11799_v10, 4  ;;  %v13025_v62 = vrot.slane %v11551_v57, 4  ;;  %v11980_v6 = vperm.slane %v11492_v26, %v12738_v35 }
 0x75a   : > { %v3425_v47 = vsel %vm524_vm11, %v3424_v53, %v13024_v29  ;;  %v3419_v50 = vsel %vm526_vm12, %v3418_v63, %v7498_v2  ;;  %7691 = vrot.lane.b32.xlu0 %v7690_v7, %s7888_s26  ;;  %v13026_v10 = vrot.slane %v11543_v3, 4  ;;  %v6371_v26 = vrot.slane %v11618_v52, 4 }
 0x75b   : > { %v3426_v46 = vsel %vm526_vm12, %v3425_v47, %v7499_v48  ;;  %3842 = vmatpush.msrb.mxu0 %v3419_v50  ;;  %v6336_v53 = vsel %vm346_vm4, %v11428_v14, %v13025_v62  ;;  %v11994_v14 = vperm.slane %v11536_v0, %v12738_v35  ;;  %v5321_v2 = vsel %vm346_vm4, %v11779_v45, %v5320_v20  ;;  %v13031_v62 = vld [vmem:[#allocation65_spill] sm:$0xff] }
 0x75c   : > { %3862 = vmatpush.msrb.mxu1 %v3426_v46  ;;  %v11986_v48 = vperm.slane %v6336_v53, %v12738_v35  ;;  %v6448_v57 = vsel %vm346_vm4, %v11423_v17, %v13026_v10  ;;  %v5718_v37 = vsel %vm346_vm4, %v11811_v8, %v5717_v16  ;;  %v6381_v22 = vrot.slane %v11980_v6, 4  ;;  %v12007_v17 = vpop.permute.xlu2 %7546  ;;  %v13032_v10 = vld [vmem:[#allocation56_spill] sm:$0xff] }
 0x75d   : > { %v12005_v3 = vperm.slane %v6448_v57, %v12738_v35  ;;  %v7705_v13 = vpack.i.bf16 %v5321_v2, %v5718_v37  ;;  %v6493_v0 = vrot.slane %v11994_v14, 4  ;;  %v6372_v24 = vsel %vm346_vm4, %v11459_v19, %v6371_v26  ;;  %v13033_v37 = vld [vmem:[#allocation39_spill] sm:$0xff] }
 0x75e   : > { %v6483_v40 = vrot.slane %v11546_v9, 4  ;;  %v13027_v45 = vrot.slane %v11735_v5, 4  ;;  %v4600_v44 = vsel %vm514_vm6, %v4417_v51, %v7503_v38  ;;  %v6382_v58 = vsel %vm346_vm4, %v6381_v22, %v11986_v48 }
 0x75f   : > { %v7514_v63 = vunpack.i.h.bf16 %v11822_v27  ;;  %v13028_v61 = vrot.slane %v11755_v56, 4  ;;  %v6494_v59 = vsel %vm346_vm4, %v6493_v0, %v12005_v3  ;;  %v7549_v51 = vunpack.i.h.bf16 %v12007_v17 }
 0x760   : > { %v6081_v8 = vsel %vm346_vm4, %v13027_v45, %v11706_v28  ;;  %v6484_v5 = vsel %vm346_vm4, %v11465_v11, %v6483_v40  ;;  %v7513_v28 = vunpack.i.l.bf16 %v11822_v27  ;;  %v7745_v38 = vpack.i.bf16 %v6494_v59, %v6382_v58  ;;  %v12057_v26 = vpop.permute.xlu0 %7566  ;;  %v13035_v58 = vld [vmem:[#allocation68_spill] sm:$0xff] }
 0x761   : > { %v5969_v18 = vsel %vm346_vm4, %v13028_v61, %v11716_v36  ;;  %v7710_v12 = vpack.i.bf16 %v6484_v5, %v6372_v24  ;;  %v13029_v29 = vunpack.i.h.bf16 %v11626_v60  ;;  %v13030_v56 = vunpack.i.l.bf16 %v11626_v60 }
 0x762   : > { %v7519_v50 = vunpack.i.h.bf16 %v11844_v49  ;;  %v7518_v46 = vunpack.i.l.bf16 %v11844_v49  ;;  %7746 = vrot.lane.b32.xlu2 %v7745_v38, %s7886_s16  ;;  %v6375_v20 = vrot.slane %v11863_v15, 4  ;;  %v12046_v60 = vperm.slane %v5969_v18, %v12738_v35  ;;  %7706 = vrot.lane.b32.xlu0 %v7705_v13, %s7892_s10  ;;  %v12065_v13 = vpop.permute.xlu1 %7556 }
 0x763   : > { %v4608_v47 = vsel %vm516_vm7, %v4607_v30, %v13029_v29  ;;  %v4601_v36 = vsel %vm516_vm7, %v4600_v44, %v13030_v56  ;;  %7711 = vrot.lane.b32.xlu1 %v7710_v12, %s7891_s9  ;;  %v6487_v30 = vrot.slane %v11868_v43, 4  ;;  %v12050_v16 = vperm.slane %v6081_v8, %v12738_v35  ;;  %v13034_v8 = vld [vmem:[#allocation69_spill] sm:$0xff] }
 0x764   : > { %v4609_v7 = vsel %vm518_vm8, %v4608_v47, %v7514_v63  ;;  %v4602_v27 = vsel %vm518_vm8, %v4601_v36, %v7513_v28  ;;  %v6340_v49 = vperm.slane %v11643_v32, %v12738_v35  ;;  %v6377_v53 = vrot.slane %v13031_v62, 4  ;;  %v13036_v29 = vld [vmem:[#allocation37_spill] sm:$0xff] }
 0x765   : > { %v6452_v57 = vperm.slane %v13032_v10, %v12738_v35  ;;  %v6376_v15 = vsel %vm346_vm4, %v11462_v4, %v6375_v20  ;;  %v6488_v43 = vsel %vm346_vm4, %v11513_v33, %v6487_v30  ;;  %v5988_v2 = vrot.slane %v12046_v60, 4  ;;  %v13040_v30 = vld [vmem:[#allocation46_spill] sm:$0xff] }
 0x766   : > { %v6489_v22 = vrot.slane %v13033_v37, 4  ;;  %v4603_v32 = vsel %vm520_vm9, %v4602_v27, %v7518_v46  ;;  %v4610_v0 = vsel %vm520_vm9, %v4609_v7, %v7519_v50  ;;  %v6100_v24 = vrot.slane %v12050_v16, 4 }
 0x767   : > { %v6378_v40 = vsel %vm346_vm4, %v6377_v53, %v6340_v49  ;;  %v7720_v45 = vpack.i.bf16 %v6488_v43, %v6376_v15  ;;  %v5989_v4 = vsel %vm346_vm4, %v5988_v2, %v13034_v8  ;;  %v7528_v44 = vunpack.i.l.bf16 %v11882_v1  ;;  %v13041_v15 = vld [vmem:[#allocation48_spill] sm:$0xff]  ;;  %v13042_v2 = vld [vmem:[#allocation49_spill] sm:$0xff] }
 0x768   : > { %v6490_v33 = vsel %vm346_vm4, %v6489_v22, %v6452_v57  ;;  %v6101_v63 = vsel %vm346_vm4, %v6100_v24, %v13035_v58  ;;  %v7529_v61 = vunpack.i.h.bf16 %v11882_v1  ;;  %v7534_v18 = vunpack.i.h.bf16 %v11919_v54  ;;  %v13039_v1 = vld [vmem:[#allocation40_spill] sm:$0xff]  ;;  %v13044_v22 = vld [vmem:[#allocation67_spill] sm:$0xff] }
 0x769   : > { %v7533_v59 = vunpack.i.l.bf16 %v11919_v54  ;;  %v7760_v5 = vpack.i.bf16 %v6101_v63, %v5989_v4  ;;  %v7725_v28 = vpack.i.bf16 %v6490_v33, %v6378_v40  ;;  %v6379_v38 = vrot.slane %v6340_v49, 4  ;;  %v12114_v40 = vpop.permute.xlu0 %7571  ;;  %v13046_v33 = vld [vmem:[#allocation15_spill] sm:$0xff]  ;;  %v13048_v63 = vld [vmem:[#allocation66_spill] sm:$0xff] }
 0x76a   : > { %v6491_v12 = vrot.slane %v6452_v57, 4  ;;  %v13037_v47 = vunpack.i.l.bf16 %v13036_v29  ;;  %v13038_v36 = vunpack.i.h.bf16 %v13036_v29  ;;  %v12088_v50 = vperm.slane %v11913_v31, %v12738_v35  ;;  %7721 = vrot.lane.b32.xlu0 %v7720_v45, %s7890_s28  ;;  %v12116_v45 = vpop.permute.xlu2 %7561  ;;  %v13051_v29 = vld [vmem:[#allocation53_spill] sm:$0xff] }
 0x76b   : > { %v5994_v46 = vrot.slane %v13039_v1, 4  ;;  %7761 = vrot.lane.b32.xlu2 %v7760_v5, %s7888_s26  ;;  %7726 = vrot.lane.b32.xlu1 %v7725_v28, %s7888_s26  ;;  %v6380_v54 = vsel %vm346_vm4, %v13031_v62, %v6379_v38  ;;  %v6106_v49 = vrot.slane %v13040_v30, 4  ;;  %v12107_v43 = vperm.slane %v13041_v15, %v12738_v35  ;;  %v13050_v5 = vld [vmem:[#allocation51_spill] sm:$0xff] }
 0x76c   : > { %v4604_v56 = vsel %vm522_vm10, %v4603_v32, %v13037_v47  ;;  %v4611_v7 = vsel %vm522_vm10, %v4610_v0, %v13038_v36  ;;  %v6492_v27 = vsel %vm346_vm4, %v13033_v37, %v6491_v12  ;;  %v13043_v37 = vrot.slane %v13042_v2, 4  ;;  %v13045_v0 = vld [vmem:[#allocation47_spill] sm:$0xff]  ;;  %v12130_v36 = vpop.permute.xlu1 %7576 }
 0x76d   : > { %v4605_v20 = vsel %vm524_vm11, %v4604_v56, %v7528_v44  ;;  %v7735_v31 = vpack.i.bf16 %v6492_v27, %v6380_v54  ;;  %v4612_v10 = vsel %vm524_vm11, %v4611_v7, %v7529_v61  ;;  %v5995_v57 = vsel %vm346_vm4, %v12088_v50, %v5994_v46  ;;  %v13052_v54 = vld [vmem:[#allocation50_spill] sm:$0xff] }
 0x76e   : > { %v4606_v53 = vsel %vm526_vm12, %v4605_v20, %v7533_v59  ;;  %v4613_v62 = vsel %vm526_vm12, %v4612_v10, %v7534_v18  ;;  %v5935_v32 = vsel %vm346_vm4, %v13044_v22, %v13043_v37  ;;  %v5984_v24 = vrot.slane %v13045_v0, 4  ;;  %v13049_v18 = vld [vmem:[#allocation44_spill] sm:$0xff] }
 0x76f   : > { %4634 = vmatpush.msra.mxu0 %v4606_v53  ;;  %4654 = vmatpush.msra.mxu1 %v4613_v62  ;;  %v5943_v4 = vperm.slane %v5935_v32, %v12738_v35  ;;  %v13047_v44 = vrot.slane %v13046_v33, 4  ;;  %v6096_v59 = vrot.slane %v13049_v18, 4  ;;  %v3580_v28 = vrot.slane %v13050_v5, 4  ;;  %v13053_v10 = vld [vmem:[#allocation52_spill] sm:$0xff] }
 0x770   : > { %v6107_v38 = vsel %vm346_vm4, %v12107_v43, %v6106_v49  ;;  %v3692_v47 = vrot.slane %v13051_v29, 4  ;;  %v7539_v56 = vunpack.i.h.bf16 %v11941_v55  ;;  %v7538_v20 = vunpack.i.l.bf16 %v11941_v55 }
 0x771   : > { %v6047_v61 = vsel %vm346_vm4, %v13048_v63, %v13047_v44  ;;  %v7775_v7 = vpack.i.bf16 %v6107_v38, %v5995_v57  ;;  %v5985_v46 = vsel %vm346_vm4, %v5984_v24, %v5943_v4  ;;  %v3581_v27 = vsel %vm346_vm4, %v3580_v28, %v13052_v54 }
 0x772   : > { %v6055_v12 = vperm.slane %v6047_v61, %v12738_v35  ;;  %v3693_v49 = vsel %vm346_vm4, %v3692_v47, %v13053_v10  ;;  %v7544_v62 = vunpack.i.h.bf16 %v11982_v21  ;;  %v7543_v15 = vunpack.i.l.bf16 %v11982_v21  ;;  %7736 = vrot.lane.b32.xlu0 %v7735_v31, %s7889_s8  ;;  %v7582_v5 = vpop.permute.xlu2 %7581  ;;  %v13054_v10 = vld [vmem:[#allocation60_spill] sm:$0xff] }
 0x773   : > { %v3771_v37 = vsel %vm514_vm6, %v3693_v49, %v7539_v56  ;;  %v3764_v57 = vsel %vm514_vm6, %v3581_v27, %v7538_v20  ;;  %v5986_v22 = vrot.slane %v5943_v4, 4  ;;  %7776 = vrot.lane.b32.xlu2 %v7775_v7, %s7892_s10  ;;  %v6383_v33 = vrot.slane %v11986_v48, 4 }
 0x774   : > { %v6097_v53 = vsel %vm346_vm4, %v6096_v59, %v6055_v12  ;;  %v3765_v32 = vsel %vm516_vm7, %v3764_v57, %v7543_v15  ;;  %v3772_v55 = vsel %vm516_vm7, %v3771_v37, %v7544_v62  ;;  %v6098_v24 = vrot.slane %v6055_v12, 4  ;;  %v7592_v7 = vpop.permute.xlu1 %7591 }
 0x775   : > { %v7740_v2 = vpack.i.bf16 %v6097_v53, %v5985_v46  ;;  %v7548_v44 = vunpack.i.l.bf16 %v12007_v17  ;;  %v6495_v21 = vrot.slane %v12005_v3, 4  ;;  %v7554_v63 = vunpack.i.h.bf16 %v11997_v39 }
 0x776   : > { %v7553_v4 = vunpack.i.l.bf16 %v11997_v39  ;;  %v5987_v61 = vsel %vm346_vm4, %v13045_v0, %v5986_v22  ;;  %v6099_v59 = vsel %vm346_vm4, %v13049_v18, %v6098_v24  ;;  %v6384_v48 = vsel %vm346_vm4, %v11980_v6, %v6383_v33  ;;  %v7587_v18 = vpop.permute.xlu0 %7586  ;;  %v13056_v22 = vld [vmem:[#allocation59_spill] sm:$0xff] }
 0x777   : > { %7741 = vrot.lane.b32.xlu1 %v7740_v2, %s7887_s17  ;;  %v6496_v31 = vsel %vm346_vm4, %v11994_v14, %v6495_v21  ;;  %v3766_v28 = vsel %vm518_vm8, %v3765_v32, %v7548_v44  ;;  %v3773_v3 = vsel %vm518_vm8, %v3772_v55, %v7549_v51  ;;  %v7559_v38 = vunpack.i.h.bf16 %v12065_v13  ;;  %v13057_v55 = vld [vmem:[#allocation61_spill] sm:$0xff] }
 0x778   : > { %v3767_v39 = vsel %vm520_vm9, %v3766_v28, %v7553_v4  ;;  %v3774_v0 = vsel %vm520_vm9, %v3773_v3, %v7554_v63  ;;  %v7563_v12 = vunpack.i.l.bf16 %v12116_v45  ;;  %v7750_v29 = vpack.i.bf16 %v6099_v59, %v5987_v61 }
 0x779   : > { %v7558_v6 = vunpack.i.l.bf16 %v12065_v13  ;;  %v5992_v14 = vrot.slane %v12088_v50, 4  ;;  %v7755_v47 = vpack.i.bf16 %v6496_v31, %v6384_v48  ;;  %v5990_v56 = vrot.slane %v13034_v8, 4 }
 0x77a   : > { %v6102_v17 = vrot.slane %v13035_v58, 4  ;;  %v7568_v51 = vunpack.i.l.bf16 %v12057_v26  ;;  %v3775_v54 = vsel %vm522_vm10, %v3774_v0, %v7559_v38  ;;  %v6104_v27 = vrot.slane %v12107_v43, 4  ;;  %7751 = vrot.lane.b32.xlu0 %v7750_v29, %s7890_s28 }
 0x77b   : > { %v3768_v46 = vsel %vm522_vm10, %v3767_v39, %v7558_v6  ;;  %v7569_v20 = vunpack.i.h.bf16 %v12057_v26  ;;  %v7564_v13 = vunpack.i.h.bf16 %v12116_v45  ;;  %v5991_v50 = vsel %vm346_vm4, %v12046_v60, %v5990_v56  ;;  %v13055_v60 = vld [vmem:[#allocation62_spill] sm:$0xff] }
 0x77c   : > { %v7584_v53 = vunpack.i.h.bf16 %v7582_v5  ;;  %v6103_v8 = vsel %vm346_vm4, %v12050_v16, %v6102_v17  ;;  %v5993_v58 = vsel %vm346_vm4, %v5992_v14, %v13039_v1  ;;  %v3769_v43 = vsel %vm524_vm11, %v3768_v46, %v7563_v12  ;;  %v7607_v38 = vpop.permute.xlu1 %7606 }
 0x77d   : > { %v3770_v26 = vsel %vm526_vm12, %v3769_v43, %v7568_v51  ;;  %v3776_v45 = vsel %vm524_vm11, %v3775_v54, %v7564_v13  ;;  %v4011_v49 = vrot.slane %v13054_v10, 4  ;;  %v4123_v62 = vrot.slane %v13055_v60, 4  ;;  %v7053_v10 = vld [vmem:[%s12561_s3 + $0x8] sm:$0xff]  ;;  %v13061_v60 = vld [vmem:[#allocation55_spill] sm:$0xff] }
 0x77e   : > { %v6105_v15 = vsel %vm346_vm4, %v6104_v27, %v13040_v30  ;;  %3799 = vmatpush.msra.mxu2 %v3770_v26  ;;  %v3777_v2 = vsel %vm526_vm12, %v3776_v45, %v7569_v20  ;;  %v7574_v16 = vunpack.i.h.bf16 %v12114_v40  ;;  %v7573_v1 = vunpack.i.l.bf16 %v12114_v40  ;;  %v7597_v30 = vpop.permute.xlu2 %7596  ;;  %v7602_v59 = vpop.permute.xlu0 %7601  ;;  %v13059_v20 = vld [vmem:[#allocation29_spill] sm:$0xff] }
 0x77f   : > { %7756 = vrot.lane.b32.xlu1 %v7755_v47, %s7892_s10  ;;  %v7579_v37 = vunpack.i.h.bf16 %v12130_v36  ;;  %v7578_v57 = vunpack.i.l.bf16 %v12130_v36  ;;  %3819 = vmatpush.msra.mxu3 %v3777_v2  ;;  %v4012_v32 = vsel %vm346_vm4, %v4011_v49, %v13056_v22  ;;  %v4124_v24 = vsel %vm346_vm4, %v4123_v62, %v13057_v55 }
 0x780   : > { %v7583_v33 = vunpack.i.l.bf16 %v7582_v5  ;;  %v4202_v44 = vsel %vm514_vm6, %v4124_v24, %v7574_v16  ;;  %v4195_v21 = vsel %vm514_vm6, %v4012_v32, %v7573_v1  ;;  %v7589_v63 = vunpack.i.h.bf16 %v7587_v18  ;;  %7054 = vmatmul.msk.f32.vlgmr.msra.gmra.mxu2 %vm3780_vm0, %v7053_v10  ;;  %7055 = vmatmul.msk.f32.vlgmr.msra.gmra.mxu3 %vm3780_vm0, %v7053_v10 }
 0x781   : > { %v7765_v4 = vpack.i.bf16 %v6103_v8, %v5991_v50  ;;  %v4203_v40 = vsel %vm516_vm7, %v4202_v44, %v7579_v37  ;;  %v4196_v61 = vsel %vm516_vm7, %v4195_v21, %v7578_v57  ;;  %v7588_v36 = vunpack.i.l.bf16 %v7587_v18 }
 0x782   : > { %v7770_v48 = vpack.i.bf16 %v6105_v15, %v5993_v58  ;;  %v7593_v31 = vunpack.i.l.bf16 %v7592_v7  ;;  %v4197_v28 = vsel %vm518_vm8, %v4196_v61, %v7583_v33  ;;  %v4204_v3 = vsel %vm518_vm8, %v4203_v40, %v7584_v53  ;;  %v13060_v53 = vld [vmem:[#allocation58_spill] sm:$0xff] }
 0x783   : > { %v7598_v5 = vunpack.i.l.bf16 %v7597_v30  ;;  %v4198_v39 = vsel %vm520_vm9, %v4197_v28, %v7588_v36  ;;  %v4205_v0 = vsel %vm520_vm9, %v4204_v3, %v7589_v63  ;;  %7766 = vrot.lane.b32.xlu0 %v7765_v4, %s7889_s8  ;;  %v7594_v12 = vunpack.i.h.bf16 %v7592_v7  ;;  %v13058_v7 = vld [vmem:[#allocation57_spill] sm:$0xff]  ;;  %v13062_v15 = vld [vmem:[#allocation54_spill] sm:$0xff] }
 0x784   : > { %v7604_v29 = vunpack.i.h.bf16 %v7602_v59  ;;  %v7603_v18 = vunpack.i.l.bf16 %v7602_v59  ;;  %v4199_v6 = vsel %vm522_vm10, %v4198_v39, %v7593_v31  ;;  %v7599_v14 = vunpack.i.h.bf16 %v7597_v30  ;;  %v7622_v26 = vpop.permute.xlu1 %7621 }
 0x785   : > { %v4200_v47 = vsel %vm524_vm11, %v4199_v6, %v7598_v5  ;;  %v4206_v56 = vsel %vm522_vm10, %v4205_v0, %v7594_v12  ;;  %v5703_v54 = vrot.slane %v11876_v25, 4  ;;  %v4917_v27 = vrot.slane %v13058_v7, 4 }
 0x786   : > { %v4201_v17 = vsel %vm526_vm12, %v4200_v47, %v7603_v18  ;;  %v4207_v51 = vsel %vm524_vm11, %v4206_v56, %v7599_v14  ;;  %v7612_v50 = vpop.permute.xlu2 %7611  ;;  %v4805_v8 = vrot.slane %v13060_v53, 4  ;;  %v7609_v58 = vunpack.i.h.bf16 %v7607_v38  ;;  %v7058_v18 = vld [vmem:[%s12561_s3 + $0x10] sm:$0xff]  ;;  %v13063_v47 = vld [vmem:[#allocation63_spill] sm:$0xff] }
 0x787   : > { %7771 = vrot.lane.b32.xlu1 %v7770_v48, %s7886_s16  ;;  %4229 = vmatpush.msrb.mxu2 %v4201_v17  ;;  %v4208_v46 = vsel %vm526_vm12, %v4207_v51, %v7604_v29  ;;  %v12223_v13 = vsel %vm346_vm4, %v5703_v54, %v13059_v20  ;;  %v7608_v43 = vunpack.i.l.bf16 %v7607_v38  ;;  %v5980_v25 = vrot.slane %v11925_v41, 4  ;;  %v3427_v29 = vld [vmem:[%s12561_s3] sm:$0xff]  ;;  %v13064_v17 = vld [vmem:[#allocation45_spill] sm:$0xff] }
 0x788   : > { %4249 = vmatpush.msrb.mxu3 %v4208_v46  ;;  %v7617_v45 = vpop.permute.xlu0 %7616  ;;  %v6092_v49 = vrot.slane %v11933_v42, 4  ;;  %v4918_v62 = vsel %vm346_vm4, %v4917_v27, %v13061_v60  ;;  %v4806_v2 = vsel %vm346_vm4, %v4805_v8, %v13062_v15  ;;  %v7614_v22 = vunpack.i.h.bf16 %v7612_v50  ;;  %7056 = vmatmul.msk.f32.vlgmr.msrb.gmra.mxu0 %vm3780_vm0, %v3427_v29  ;;  %v13065_v27 = vld [vmem:[#allocation12_spill] sm:$0xff] }
 0x789   : > { %v4996_v16 = vsel %vm514_vm6, %v4918_v62, %v7609_v58  ;;  %v12240_v1 = vsel %vm346_vm4, %v5980_v25, %v11729_v34  ;;  %v4989_v41 = vsel %vm514_vm6, %v4806_v2, %v7608_v43  ;;  %v7619_v37 = vunpack.i.h.bf16 %v7617_v45  ;;  %7059 = vmatmul.msk.f32.vlgmr.msrb.gmra.mxu2 %vm3780_vm0, %v7058_v18  ;;  %7057 = vmatmul.msk.f32.vlgmr.msrb.gmra.mxu1 %vm3780_vm0, %v3427_v29  ;;  %v13068_v29 = vld [vmem:[#allocation25_spill] sm:$0xff] }
 0x78a   : > { %v7618_v42 = vunpack.i.l.bf16 %v7617_v45  ;;  %v12245_v57 = vsel %vm346_vm4, %v6092_v49, %v11732_v23  ;;  %v7613_v32 = vunpack.i.l.bf16 %v7612_v50  ;;  %v4997_v24 = vsel %vm516_vm7, %v4996_v16, %v7614_v22  ;;  %7060 = vmatmul.msk.f32.vlgmr.msrb.gmra.mxu3 %vm3780_vm0, %v7058_v18  ;;  %v13066_v50 = vld [vmem:[#allocation42_spill] sm:$0xff] }
 0x78b   : > { %v4998_v33 = vsel %vm518_vm8, %v4997_v24, %v7619_v37  ;;  %v7624_v44 = vunpack.i.h.bf16 %v7622_v26  ;;  %v7623_v21 = vunpack.i.l.bf16 %v7622_v26  ;;  %v5194_v56 = vrot.slane %v13063_v47, 4 }
 0x78c   : > { %v4990_v55 = vsel %vm516_vm7, %v4989_v41, %v7613_v32  ;;  %v5591_v51 = vrot.slane %v13064_v17, 4 }
 0x78d   : > { %v4991_v30 = vsel %vm518_vm8, %v4990_v55, %v7618_v42  ;;  %v4999_v63 = vsel %vm520_vm9, %v4998_v33, %v7624_v44  ;;  %v5195_v20 = vsel %vm346_vm4, %v5194_v56, %v13065_v27 }
 0x78e   : > { %v7627_v34 = vpop.permute.xlu2 %7626  ;;  %v4992_v4 = vsel %vm520_vm9, %v4991_v30, %v7623_v21  ;;  %v5592_v53 = vsel %vm346_vm4, %v5591_v51, %v13066_v50 }
 0x78f   : > { %v7637_v40 = vpop.permute.xlu1 %7636  ;;  %v7629_v23 = vunpack.i.h.bf16 %v7627_v34  ;;  %v7628_v61 = vunpack.i.l.bf16 %v7627_v34 }
 0x790   : > { %v7639_v31 = vunpack.i.h.bf16 %v7637_v40  ;;  %v7638_v28 = vunpack.i.l.bf16 %v7637_v40 }
 0x791   : > { %v4993_v3 = vsel %vm522_vm10, %v4992_v4, %v7628_v61  ;;  %v5000_v5 = vsel %vm522_vm10, %v4999_v63, %v7629_v23 }
 0x796   : > { %v7632_v36 = vpop.permute.xlu0 %7631  ;;  %v7647_v6 = vpop.permute.xlu2 %7646 }
 0x797   : > { %v7634_v59 = vunpack.i.h.bf16 %v7632_v36  ;;  %v7633_v48 = vunpack.i.l.bf16 %v7632_v36  ;;  %v7649_v25 = vunpack.i.h.bf16 %v7647_v6  ;;  %v7648_v49 = vunpack.i.l.bf16 %v7647_v6 }
 0x799   : > { %v4994_v39 = vsel %vm524_vm11, %v4993_v3, %v7633_v48  ;;  %v5001_v0 = vsel %vm524_vm11, %v5000_v5, %v7634_v59  ;;  %v7064_v59 = vld [vmem:[%s12561_s3 + $0x20] sm:$0xff]  ;;  %v13067_v3 = vld [vmem:[#allocation21_spill] sm:$0xff] }
 0x79a   : > { %v4995_v38 = vsel %vm526_vm12, %v4994_v39, %v7638_v28  ;;  %v5002_v12 = vsel %vm526_vm12, %v5001_v0, %v7639_v31  ;;  %v7642_v14 = vpop.permute.xlu1 %7641  ;;  %v5306_v5 = vrot.slane %v13067_v3, 4 }
 0x79b   : > { %5023 = vmatpush.msra.mxu2 %v4995_v38  ;;  %5043 = vmatpush.msra.mxu3 %v5002_v12  ;;  %v7644_v46 = vunpack.i.h.bf16 %v7642_v14  ;;  %v7643_v54 = vunpack.i.l.bf16 %v7642_v14  ;;  %v7061_v38 = vld [vmem:[%s12561_s3 + $0x18] sm:$0xff]  ;;  %v7070_v12 = vld [vmem:[%s12561_s3 + $0x30] sm:$0xff] }
 0x79c   : > { %7065 = vmatmul.msk.f32.vlgmr.msra.gmra.mxu2 %vm3780_vm0, %v7064_v59  ;;  %7066 = vmatmul.msk.f32.vlgmr.msra.gmra.mxu3 %vm3780_vm0, %v7064_v59  ;;  %v5307_v18 = vsel %vm346_vm4, %v5306_v5, %v13068_v29 }
 0x79d   : > { %v5775_v58 = vsel %vm514_vm6, %v5592_v53, %v7644_v46  ;;  %v5378_v43 = vsel %vm514_vm6, %v5195_v20, %v7643_v54  ;;  %7062 = vmatmul.msk.f32.vlgmr.msra.gmra.mxu0 %vm3780_vm0, %v7061_v38  ;;  %7063 = vmatmul.msk.f32.vlgmr.msra.gmra.mxu1 %vm3780_vm0, %v7061_v38 }
 0x79e   : > { %v7662_v8 = vpop.permute.xlu2 %7661  ;;  %v5379_v60 = vsel %vm516_vm7, %v5378_v43, %v7648_v49  ;;  %v5776_v62 = vsel %vm516_vm7, %v5775_v58, %v7649_v25 }
 0x79f   : > { %v7664_v22 = vunpack.i.h.bf16 %v7662_v8  ;;  %v7663_v32 = vunpack.i.l.bf16 %v7662_v8 }
 0x7a4   : > { %v7652_v7 = vpop.permute.xlu0 %7651 }
 0x7a5   : > { %v7654_v26 = vunpack.i.h.bf16 %v7652_v7  ;;  %v7653_v45 = vunpack.i.l.bf16 %v7652_v7 }
 0x7a6   : > { %v7687_v30 = vpop.permute.xlu2 %7686 }
 0x7a7   : > { %v5777_v16 = vsel %vm518_vm8, %v5776_v62, %v7654_v26  ;;  %v5380_v41 = vsel %vm518_vm8, %v5379_v60, %v7653_v45  ;;  %v7689_v27 = vunpack.i.h.bf16 %v7687_v30  ;;  %v7688_v20 = vunpack.i.l.bf16 %v7687_v30 }
 0x7a8   : > { %v7657_v10 = vpop.permute.xlu1 %7656 }
 0x7a9   : > { %v7659_v15 = vunpack.i.h.bf16 %v7657_v10  ;;  %v7658_v2 = vunpack.i.l.bf16 %v7657_v10 }
 0x7ab   : > { %v5381_v37 = vsel %vm520_vm9, %v5380_v41, %v7658_v2  ;;  %v5778_v42 = vsel %vm520_vm9, %v5777_v16, %v7659_v15 }
 0x7ac   : > { %v5382_v44 = vsel %vm522_vm10, %v5381_v37, %v7663_v32  ;;  %v5779_v21 = vsel %vm522_vm10, %v5778_v42, %v7664_v22 }
 0x7ae   : > { %v7702_v48 = vpop.permute.xlu2 %7701 }
 0x7af   : > { %v7704_v62 = vunpack.i.h.bf16 %v7702_v48  ;;  %v7703_v15 = vunpack.i.l.bf16 %v7702_v48 }
 0x7b4   : > { %v7667_v55 = vpop.permute.xlu0 %7666 }
 0x7b5   : > { %v7669_v24 = vunpack.i.h.bf16 %v7667_v55  ;;  %v7668_v33 = vunpack.i.l.bf16 %v7667_v55 }
 0x7b6   : > { %v7672_v34 = vpop.permute.xlu1 %7671  ;;  %v7717_v17 = vpop.permute.xlu2 %7716 }
 0x7b7   : > { %v7674_v63 = vunpack.i.h.bf16 %v7672_v34  ;;  %v7673_v4 = vunpack.i.l.bf16 %v7672_v34  ;;  %v5383_v40 = vsel %vm524_vm11, %v5382_v44, %v7668_v33  ;;  %v5780_v23 = vsel %vm524_vm11, %v5779_v21, %v7669_v24  ;;  %v2956_v33 = vld [vmem:[%s12562_s4] sm:$0xff] }
 0x7b8   : > { %6616 = vperm.xlu0 %7780, %v2956_v33  }
 0x7b9   : > { %v5384_v61 = vsel %vm526_vm12, %v5383_v40, %v7673_v4  ;;  %v5781_v36 = vsel %vm526_vm12, %v5780_v23, %v7674_v63  ;;  %v6369_v63 = vrot.slane %v11459_v19, 4  ;;  %v6481_v4 = vrot.slane %v11465_v11, 4 }
 0x7ba   : > { %5412 = vmatpush.msrb.mxu0 %v5384_v61  ;;  %5809 = vmatpush.msrb.mxu2 %v5781_v36 }
 0x7bb   : > { %7071 = vmatmul.msk.f32.vlgmr.msrb.gmra.mxu2 %vm3780_vm0, %v7070_v12  ;;  %v6370_v40 = vsel %vm346_vm4, %v6369_v63, %v11618_v52  ;;  %v6482_v23 = vsel %vm346_vm4, %v6481_v4, %v11546_v9 }
 0x7be   : > { %v12321_v16 = vpop.permute.xlu2 %7731 }
 0x7c0   : > { %v7682_v31 = vpop.permute.xlu1 %7681 }
 0x7c1   : > { %v7677_v28 = vpop.permute.xlu0 %7676  ;;  %v7684_v6 = vunpack.i.h.bf16 %v7682_v31  ;;  %v7683_v14 = vunpack.i.l.bf16 %v7682_v31  ;;  %v7719_v31 = vunpack.i.h.bf16 %v7717_v17 }
 0x7c2   : > { %v7679_v39 = vunpack.i.h.bf16 %v7677_v28  ;;  %v7678_v0 = vunpack.i.l.bf16 %v7677_v28  ;;  %v7718_v28 = vunpack.i.l.bf16 %v7717_v17 }
 0x7c4   : > { %v5385_v47 = vsel %vm514_vm6, %v5307_v18, %v7679_v39  ;;  %v5782_v56 = vsel %vm514_vm6, %v12223_v13, %v7678_v0  ;;  %v7067_v13 = vld [vmem:[%s12561_s3 + $0x28] sm:$0xff] }
 0x7c5   : > { %v5386_v46 = vsel %vm516_vm7, %v5385_v47, %v7684_v6  ;;  %v5783_v54 = vsel %vm516_vm7, %v5782_v56, %v7683_v14  ;;  %7068 = vmatmul.msk.f32.vlgmr.msrb.gmra.mxu0 %vm3780_vm0, %v7067_v13 }
 0x7c6   : > { %v5387_v8 = vsel %vm518_vm8, %v5386_v46, %v7689_v27  ;;  %v5784_v58 = vsel %vm518_vm8, %v5783_v54, %v7688_v20  ;;  %v7747_v34 = vpop.permute.xlu2 %7746  ;;  %v7734_v54 = vunpack.i.h.bf16 %v12321_v16 }
 0x7c7   : > { %v7749_v56 = vunpack.i.h.bf16 %v7747_v34  ;;  %v7748_v17 = vunpack.i.l.bf16 %v7747_v34 }
 0x7cb   : > { %v7697_v51 = vpop.permute.xlu1 %7696 }
 0x7cc   : > { %v7692_v7 = vpop.permute.xlu0 %7691  ;;  %v7699_v43 = vunpack.i.h.bf16 %v7697_v51  ;;  %v7698_v26 = vunpack.i.l.bf16 %v7697_v51 }
 0x7cd   : > { %v7694_v50 = vunpack.i.h.bf16 %v7692_v7  ;;  %v7693_v53 = vunpack.i.l.bf16 %v7692_v7  ;;  %v7733_v7 = vunpack.i.l.bf16 %v12321_v16 }
 0x7ce   : > { %v7762_v29 = vpop.permute.xlu2 %7761 }
 0x7cf   : > { %v5388_v45 = vsel %vm520_vm9, %v5387_v8, %v7694_v50  ;;  %v5785_v10 = vsel %vm520_vm9, %v5784_v58, %v7693_v53 }
 0x7d0   : > { %v5389_v25 = vsel %vm522_vm10, %v5388_v45, %v7699_v43  ;;  %v5786_v49 = vsel %vm522_vm10, %v5785_v10, %v7698_v26  ;;  %v7076_v43 = vld [vmem:[%s12561_s3 + $0x40] sm:$0xff] }
 0x7d1   : > { %v5390_v42 = vsel %vm524_vm11, %v5389_v25, %v7704_v62  ;;  %v5787_v22 = vsel %vm524_vm11, %v5786_v49, %v7703_v15  ;;  %v6171_v25 = vsel %vm514_vm6, %v12245_v57, %v7734_v54  ;;  %v6164_v49 = vsel %vm514_vm6, %v12240_v1, %v7733_v7 }
 0x7d4   : > { %v7707_v2 = vpop.permute.xlu0 %7706 }
 0x7d5   : > { %v7712_v60 = vpop.permute.xlu1 %7711  ;;  %v7709_v41 = vunpack.i.h.bf16 %v7707_v2  ;;  %v7708_v37 = vunpack.i.l.bf16 %v7707_v2 }
 0x7d6   : > { %v7714_v44 = vunpack.i.h.bf16 %v7712_v60  ;;  %v7713_v21 = vunpack.i.l.bf16 %v7712_v60  ;;  %v7777_v15 = vpop.permute.xlu2 %7776 }
 0x7d7   : > { %v5391_v32 = vsel %vm526_vm12, %v5390_v42, %v7709_v41  ;;  %v5788_v55 = vsel %vm526_vm12, %v5787_v22, %v7708_v37  ;;  %v7764_v41 = vunpack.i.h.bf16 %v7762_v29  ;;  %v7763_v37 = vunpack.i.l.bf16 %v7762_v29 }
 0x7d8   : > { %5432 = vmatpush.msrb.mxu1 %v5391_v32  ;;  %5829 = vmatpush.msrb.mxu3 %v5788_v55  ;;  %v6560_v61 = vsel %vm514_vm6, %v6482_v23, %v7714_v44  ;;  %v6553_v36 = vsel %vm514_vm6, %v6370_v40, %v7713_v21  ;;  %v7778_v34 = vunpack.i.l.bf16 %v7777_v15  ;;  %v7073_v40 = vld [vmem:[%s12561_s3 + $0x38] sm:$0xff] }
 0x7d9   : > { %7072 = vmatmul.msk.f32.vlgmr.msrb.gmra.mxu3 %vm3780_vm0, %v7070_v12  ;;  %7069 = vmatmul.msk.f32.vlgmr.msrb.gmra.mxu1 %vm3780_vm0, %v7067_v13  ;;  %v6554_v19 = vsel %vm516_vm7, %v6553_v36, %v7718_v28  ;;  %v6561_v11 = vsel %vm516_vm7, %v6560_v61, %v7719_v31 }
 0x7dc   : > { %v7722_v30 = vpop.permute.xlu0 %7721 }
 0x7dd   : > { %v7727_v24 = vpop.permute.xlu1 %7726  ;;  %v7724_v59 = vunpack.i.h.bf16 %v7722_v30  ;;  %v7723_v48 = vunpack.i.l.bf16 %v7722_v30  ;;  %v7779_v30 = vunpack.i.h.bf16 %v7777_v15 }
 0x7de   : > { %v7729_v39 = vunpack.i.h.bf16 %v7727_v24  ;;  %v7728_v0 = vunpack.i.l.bf16 %v7727_v24 }
 0x7df   : > { %v6562_v52 = vsel %vm518_vm8, %v6561_v11, %v7724_v59  ;;  %v6555_v9 = vsel %vm518_vm8, %v6554_v19, %v7723_v48 }
 0x7e0   : > { %v6556_v18 = vsel %vm520_vm9, %v6555_v9, %v7728_v0  ;;  %v6563_v6 = vsel %vm520_vm9, %v6562_v52, %v7729_v39 }
 0x7e4   : > { %v7737_v3 = vpop.permute.xlu0 %7736 }
 0x7e5   : > { %v7739_v38 = vunpack.i.h.bf16 %v7737_v3  ;;  %v7738_v12 = vunpack.i.l.bf16 %v7737_v3 }
 0x7e7   : > { %v6557_v14 = vsel %vm522_vm10, %v6556_v18, %v7738_v12  ;;  %v6564_v47 = vsel %vm522_vm10, %v6563_v6, %v7739_v38 }
 0x7e8   : > { %v6558_v8 = vsel %vm524_vm11, %v6557_v14, %v7748_v17  ;;  %v6565_v58 = vsel %vm524_vm11, %v6564_v47, %v7749_v56 }
 0x7e9   : > { %v7742_v5 = vpop.permute.xlu1 %7741 }
 0x7ea   : > { %v7744_v50 = vunpack.i.h.bf16 %v7742_v5  ;;  %v7743_v53 = vunpack.i.l.bf16 %v7742_v5 }
 0x7ec   : > { %v7752_v51 = vpop.permute.xlu0 %7751  ;;  %v6172_v60 = vsel %vm516_vm7, %v6171_v25, %v7744_v50  ;;  %v6165_v62 = vsel %vm516_vm7, %v6164_v49, %v7743_v53 }
 0x7ed   : > { %v7754_v26 = vunpack.i.h.bf16 %v7752_v51  ;;  %v7753_v13 = vunpack.i.l.bf16 %v7752_v51 }
 0x7ef   : > { %v6173_v2 = vsel %vm518_vm8, %v6172_v60, %v7754_v26  ;;  %v6166_v16 = vsel %vm518_vm8, %v6165_v62, %v7753_v13 }
 0x7f0   : > { %v6167_v24 = vsel %vm520_vm9, %v6166_v16, %v7763_v37  ;;  %v6174_v33 = vsel %vm520_vm9, %v6173_v2, %v7764_v41 }
 0x7f1   : > { %v7757_v46 = vpop.permute.xlu1 %7756 }
 0x7f2   : > { %v7759_v27 = vunpack.i.h.bf16 %v7757_v46  ;;  %v7758_v20 = vunpack.i.l.bf16 %v7757_v46 }
 0x7f4   : > { %v6559_v45 = vsel %vm526_vm12, %v6558_v8, %v7758_v20  ;;  %v6566_v10 = vsel %vm526_vm12, %v6565_v58, %v7759_v27 }
 0x7f5   : > { %6587 = vmatpush.msra.mxu2 %v6559_v45  ;;  %6607 = vmatpush.msra.mxu3 %v6566_v10  ;;  %v7767_v42 = vpop.permute.xlu0 %7766 }
 0x7f6   : > { %7077 = vmatmul.msk.f32.vlgmr.msra.gmra.mxu2 %vm3780_vm0, %v7076_v43  ;;  %7078 = vmatmul.msk.f32.vlgmr.msra.gmra.mxu3 %vm3780_vm0, %v7076_v43  ;;  %v7769_v22 = vunpack.i.h.bf16 %v7767_v42  ;;  %v7768_v32 = vunpack.i.l.bf16 %v7767_v42 }
 0x7f8   : > { %v6168_v44 = vsel %vm522_vm10, %v6167_v24, %v7768_v32  ;;  %v6175_v21 = vsel %vm522_vm10, %v6174_v33, %v7769_v22 }
 0x7f9   : > { %v7772_v57 = vpop.permute.xlu1 %7771 }
 0x7fa   : > { %v7774_v1 = vunpack.i.h.bf16 %v7772_v57  ;;  %v7773_v55 = vunpack.i.l.bf16 %v7772_v57 }
 0x7fc   : > { %v6169_v63 = vsel %vm524_vm11, %v6168_v44, %v7773_v55  ;;  %v6176_v4 = vsel %vm524_vm11, %v6175_v21, %v7774_v1 }
 0x7fd   : > { %v6170_v23 = vsel %vm526_vm12, %v6169_v63, %v7778_v34  ;;  %v6177_v61 = vsel %vm526_vm12, %v6176_v4, %v7779_v30  ;;  %v13069_v63 = vld [vmem:[#allocation8_spill] sm:$0xff] }
 0x7fe   : > { %6198 = vmatpush.msra.mxu0 %v6170_v23  ;;  %6218 = vmatpush.msra.mxu1 %v6177_v61 }
 0x7ff   : > { %7074 = vmatmul.msk.f32.vlgmr.msra.gmra.mxu0 %vm3780_vm0, %v7073_v40  ;;  %7075 = vmatmul.msk.f32.vlgmr.msra.gmra.mxu1 %vm3780_vm0, %v7073_v40 }
 0x803   : > { %v3801_v36 = vpop.f32.mrf.mxu2  ;;  %v3821_v59 = vpop.f32.mrf.mxu3 }
 0x805   : > { %v3844_v28 = vpop.f32.mrf.mxu0 }
 0x806   : > { %v3864_v48 = vpop.f32.mrf.mxu1  ;;  %v3845_v5 = vadd.f32 %v3844_v28, %v3801_v36 }
 0x807   : > { %v3865_v19 = vadd.f32 %v3864_v48, %v3821_v59 }
 0x80c   : > { %v4231_v31 = vpop.f32.mrf.mxu2 }
 0x80d   : > { %v4251_v3 = vpop.f32.mrf.mxu3  ;;  %v4254_v9 = vadd.f32 %v4231_v31, %v3845_v5 }
 0x80e   : > { %v4255_v38 = vadd.f32 %v4251_v3, %v3865_v19 }
 0x81a   : > { %v4656_v11 = vpop.f32.mrf.mxu1  ;;  %v4636_v0 = vpop.f32.mrf.mxu0 }
 0x81b   : > { %v4659_v12 = vadd.f32 %v4636_v0, %v4254_v9  ;;  %v4660_v29 = vadd.f32 %v4656_v11, %v4255_v38 }
 0x81f   : > { %v5025_v39 = vpop.f32.mrf.mxu2  ;;  %v5045_v52 = vpop.f32.mrf.mxu3 }
 0x820   : > { %v5048_v6 = vadd.f32 %v5025_v39, %v4659_v12  ;;  %v5049_v47 = vadd.f32 %v5045_v52, %v4660_v29 }
 0x82a   : > { %v6617_v58 = vpop.permute.xlu0 %6616 }
 0x83e   : > { %v5811_v14 = vpop.f32.mrf.mxu2 }
 0x842   : > { %v5414_v56 = vpop.f32.mrf.mxu0 }
 0x843   : > { %v5437_v51 = vadd.f32 %v5414_v56, %v5048_v6 }
 0x845   : > { %v5834_v54 = vadd.f32 %v5811_v14, %v5437_v51 }
 0x856   : > { %v5434_v18 = vpop.f32.mrf.mxu1 }
 0x857   : > { %v5438_v46 = vadd.f32 %v5434_v18, %v5049_v47 }
 0x85c   : > { %v5831_v17 = vpop.f32.mrf.mxu3 }
 0x85d   : > { %v5835_v7 = vadd.f32 %v5831_v17, %v5438_v46 }
 0x879   : > { %v6589_v27 = vpop.f32.mrf.mxu2  ;;  %v6609_v43 = vpop.f32.mrf.mxu3 }
 0x87c   : > { %v6200_v20 = vpop.f32.mrf.mxu0  ;;  %v6220_v50 = vpop.f32.mrf.mxu1 }
 0x87d   : > { %v6223_v53 = vadd.f32 %v6200_v20, %v5834_v54  ;;  %v6224_v8 = vadd.f32 %v6220_v50, %v5835_v7 }
 0x87f   : > { %v6612_v26 = vadd.f32 %v6589_v27, %v6223_v53  ;;  %v6613_v45 = vadd.f32 %v6609_v43, %v6224_v8 }
 0x881   : > { %v6619_v13 = vadd.f32 %v6617_v58, %v6612_v26  ;;  %v6620_v49 = vadd.f32 %v6617_v58, %v6613_v45 }
 0x883   : > { %vm6621_vm1 = vcmp.ge.f32.partialorder %v6619_v13, 0.0  ;;  %v6623_v10 = vmul.f32 0.01, %v6619_v13  ;;  %v6624_v60 = vmul.f32 0.01, %v6620_v49  ;;  %vm6622_vm2 = vcmp.ge.f32.partialorder %v6620_v49, 0.0 }
 0x885   : > { %v6625_v25 = vsel %vm6621_vm1, %v6619_v13, %v6623_v10  ;;  %v12383_v62 = vsel %vm6622_vm2, %v6620_v49, %v6624_v60 }
 0x886   : > { %6640 = vrot.lane.b32.xlu0 %v6625_v25, %s7890_s28  ;;  %6631 = vrot.lane.b32.xlu2 %v6625_v25, %s7886_s16  ;;  %v6673_v57 = vrot.slane %v6625_v25, 4  ;;  %v6785_v18 = vrot.slane %v12383_v62, 4 }
 0x887   : > { %6628 = vrot.lane.b32.xlu1 %v6625_v25, %s7892_s10 }
 0x88e   : > { %6637 = vrot.lane.b32.xlu2 %v6625_v25, %s7888_s26  ;;  %6650 = vrot.lane.b32.xlu0 %v12383_v62, %s7892_s10 }
 0x88f   : > { %6634 = vrot.lane.b32.xlu1 %v6625_v25, %s7889_s8 }
 0x896   : > { %6646 = vrot.lane.b32.xlu2 %v6625_v25, %s7891_s9  ;;  %6659 = vrot.lane.b32.xlu0 %v12383_v62, %s7888_s26  ;;  %s7085_s26 = sshll.u32 %s7947_s22, 7 }
 0x897   : > { %6643 = vrot.lane.b32.xlu1 %v6625_v25, %s7887_s17 }
 0x89e   : > { %6656 = vrot.lane.b32.xlu2 %v12383_v62, %s7889_s8  ;;  %6668 = vrot.lane.b32.xlu0 %v12383_v62, %s7891_s9 }
 0x89f   : > { %6653 = vrot.lane.b32.xlu1 %v12383_v62, %s7886_s16  ;;  %s7008_s16 = sshll.u32 %s8012_s12, 7 }
 0x8a6   : > { %6665 = vrot.lane.b32.xlu2 %v12383_v62, %s7887_s17  ;;  %s12445_s17 = scalar_lea.vmem [#allocation5], %s7008_s16 }
 0x8a7   : > { %6662 = vrot.lane.b32.xlu1 %v12383_v62, %s7890_s28  ;;  %s6923_s28 = scalar_lea.hbm %s12563_s5, %s7085_s26  ;;  %s6924_s9 = sshll.u32 %s12445_s17, 4  ;;  %s6925_s9 = int_to_ptr.vmem [resolvable:$true] %s6924_s9 }
 0x8a8   : > { %s6926_s10 = sshll.u32 %s6923_s28, 4  ;;  %s6927_s10 = int_to_ptr.hbm [resolvable:$true] %s6926_s10 }
 0x8a9   : > { %s7825_s25 = sshra.s32 %s6927_s10, 4  ;;  %s7826_s25 = int_to_ptr.hbm [resolvable:$true] %s7825_s25 }
 0x8aa   : > { %s7827_s7 = scalar_lea.hbm %s7826_s25, 128  ;;  %p7832_p0 = scmp.lt.s32.totalorder %s7826_s25, %s12563_s5 }
 0x8ab   : > { %p7828_p6 = scmp.ne.s32.totalorder %s7826_s25, %s7827_s7  ;;  %p7833_p1 = scmp.lt.s32.totalorder %s7831_s15, %s7827_s7 }
 0x8ad   : > { %p7829_p9 = pnand %p7828_p6, %p7976_p11  ;;  %p7834_p3 = por %p7833_p1, %p7832_p0 }
 0x8af   : > { %p7830_p13 = pneg %p7829_p9 }
 0x8b1   : > { %p7835_p4 = pnand %p7834_p3, %p7830_p13 }
 0x8e0   : > { %v6632_v15 = vpop.permute.xlu2 %6631 }
 0x8e1   : > { %v6671_v42 = vrot.slane %v6632_v15, 4  ;;  %v6674_v24 = vsel %vm346_vm4, %v6632_v15, %v6673_v57 }
 0x8e2   : > { %v6682_v61 = vperm.slane %v6674_v24, %v13069_v63 }
 0x8e3   : > { %v6672_v22 = vsel %vm346_vm4, %v6671_v42, %v6625_v25 }
 0x8e4   : > { %v6678_v4 = vperm.slane %v6672_v22, %v13069_v63  ;;  %v6733_v39 = vrot.slane %v6682_v61, 4 }
 0x8e6   : > { %v6721_v5 = vrot.slane %v6678_v4, 4 }
 0x8e8   : > { %v6638_v2 = vpop.permute.xlu2 %6637 }
 0x8e9   : > { %v6697_v9 = vrot.slane %v6638_v2, 4 }
 0x8f0   : > { %v6647_v16 = vpop.permute.xlu2 %6646 }
 0x8f1   : > { %v6707_v33 = vrot.slane %v6647_v16, 4 }
 0x8f8   : > { %v6641_v41 = vpop.permute.xlu0 %6640  ;;  %v6657_v55 = vpop.permute.xlu2 %6656 }
 0x8f9   : > { %v6629_v37 = vpop.permute.xlu1 %6628  ;;  %v6709_v32 = vrot.slane %v6641_v41, 4  ;;  %v6708_v40 = vsel %vm346_vm4, %v6707_v33, %v6641_v41  ;;  %v6795_v0 = vrot.slane %v6657_v55, 4 }
 0x8fa   : > { %v6685_v1 = vrot.slane %v6629_v37, 4  ;;  %v6714_v28 = vperm.slane %v6708_v40, %v13069_v63 }
 0x8fb   : > { %v6710_v36 = vsel %vm346_vm4, %v6647_v16, %v6709_v32 }
 0x8fc   : > { %v6718_v19 = vperm.slane %v6710_v36, %v13069_v63  ;;  %v6743_v6 = vrot.slane %v6714_v28, 4 }
 0x8fe   : > { %v6755_v51 = vrot.slane %v6718_v19, 4 }
 0x900   : > { %v6651_v34 = vpop.permute.xlu0 %6650  ;;  %v6666_v14 = vpop.permute.xlu2 %6665 }
 0x901   : > { %v6635_v30 = vpop.permute.xlu1 %6634  ;;  %v6797_v3 = vrot.slane %v6651_v34, 4  ;;  %v6796_v47 = vsel %vm346_vm4, %v6795_v0, %v6651_v34  ;;  %v6807_v58 = vrot.slane %v6666_v14, 4 }
 0x902   : > { %v6683_v44 = vrot.slane %v6635_v30, 4  ;;  %v6686_v21 = vsel %vm346_vm4, %v6635_v30, %v6685_v1  ;;  %v6802_v43 = vperm.slane %v6796_v47, %v13069_v63 }
 0x903   : > { %v6694_v23 = vperm.slane %v6686_v21, %v13069_v63  ;;  %v6798_v56 = vsel %vm346_vm4, %v6657_v55, %v6797_v3 }
 0x904   : > { %v6684_v59 = vsel %vm346_vm4, %v6683_v44, %v6629_v37  ;;  %v12431_v26 = vperm.slane %v6798_v56, %v13069_v63  ;;  %v6831_v0 = vrot.slane %v6802_v43, 4 }
 0x905   : > { %v6690_v48 = vperm.slane %v6684_v59, %v13069_v63  ;;  %v6731_v31 = vrot.slane %v6694_v23, 4  ;;  %v6734_v46 = vsel %vm346_vm4, %v6694_v23, %v6733_v39 }
 0x906   : > { %v6742_v45 = vperm.slane %v6734_v46, %v12738_v35 }
 0x907   : > { %v6719_v11 = vrot.slane %v6690_v48, 4  ;;  %v6732_v52 = vsel %vm346_vm4, %v6731_v31, %v6682_v61  ;;  %v6722_v12 = vsel %vm346_vm4, %v6690_v48, %v6721_v5 }
 0x908   : > { %v6738_v54 = vperm.slane %v6732_v52, %v12738_v35  ;;  %v6660_v27 = vpop.permute.xlu0 %6659  ;;  %v6730_v50 = vperm.slane %v6722_v12, %v12738_v35  ;;  %v6781_v21 = vrot.slane %v6742_v45, 4 }
 0x909   : > { %v6720_v38 = vsel %vm346_vm4, %v6719_v11, %v6678_v4  ;;  %v6644_v29 = vpop.permute.xlu1 %6643  ;;  %v6809_v49 = vrot.slane %v6660_v27, 4 }
 0x90a   : > { %v6695_v17 = vrot.slane %v6644_v29, 4  ;;  %v6698_v7 = vsel %vm346_vm4, %v6644_v29, %v6697_v9  ;;  %v6726_v20 = vperm.slane %v6720_v38, %v12738_v35  ;;  %v6777_v60 = vrot.slane %v6738_v54, 4 }
 0x90b   : > { %v6706_v8 = vperm.slane %v6698_v7, %v13069_v63  ;;  %v6773_v37 = vrot.slane %v6730_v50, 4  ;;  %v6810_v39 = vsel %vm346_vm4, %v6666_v14, %v6809_v49  ;;  %v6843_v9 = vrot.slane %v12431_v26, 4 }
 0x90c   : > { %v6696_v53 = vsel %vm346_vm4, %v6695_v17, %v6638_v2  ;;  %v6769_v41 = vrot.slane %v6726_v20, 4  ;;  %v6818_v29 = vperm.slane %v6810_v39, %v13069_v63 }
 0x90d   : > { %v6702_v13 = vperm.slane %v6696_v53, %v13069_v63  ;;  %v6756_v10 = vsel %vm346_vm4, %v6755_v51, %v6706_v8  ;;  %v6757_v25 = vrot.slane %v6706_v8, 4 }
 0x90e   : > { %v6762_v16 = vperm.slane %v6756_v10, %v12738_v35 }
 0x90f   : > { %v6744_v15 = vsel %vm346_vm4, %v6743_v6, %v6702_v13  ;;  %v6745_v2 = vrot.slane %v6702_v13, 4  ;;  %v6758_v57 = vsel %vm346_vm4, %v6718_v19, %v6757_v25 }
 0x910   : > { %v6750_v42 = vperm.slane %v6744_v15, %v12738_v35  ;;  %v6766_v32 = vperm.slane %v6758_v57, %v12738_v35  ;;  %v6775_v1 = vrot.slane %v6762_v16, 4  ;;  %v6778_v55 = vsel %vm346_vm4, %v6762_v16, %v6777_v60 }
 0x911   : > { %v6746_v22 = vsel %vm346_vm4, %v6714_v28, %v6745_v2  ;;  %v6654_v24 = vpop.permute.xlu1 %6653  ;;  %6905 = vst.msk [vmem:[%s12445_s17 + $0x50] sm:$0xff] %vm514_vm6, %v6778_v55  ;;  %v6808_v28 = vsel %vm346_vm4, %v6807_v58, %v6660_v27 }
 0x912   : > { %v6754_v33 = vperm.slane %v6746_v22, %v12738_v35  ;;  %v6767_v30 = vrot.slane %v6750_v42, 4  ;;  %v6770_v34 = vsel %vm346_vm4, %v6750_v42, %v6769_v41  ;;  %v6783_v44 = vrot.slane %v6654_v24, 4 }
 0x913   : > { %v6776_v4 = vsel %vm346_vm4, %v6775_v1, %v6738_v54  ;;  %v6779_v40 = vrot.slane %v6766_v32, 4  ;;  %6897 = vst.msk [vmem:[%s12445_s17 + $0x10] sm:$0xff] %vm514_vm6, %v6770_v34  ;;  %v6786_v23 = vsel %vm346_vm4, %v6654_v24, %v6785_v18  ;;  %v6782_v11 = vsel %vm346_vm4, %v6766_v32, %v6781_v21 }
 0x914   : > { %v6768_v61 = vsel %vm346_vm4, %v6767_v30, %v6726_v20  ;;  %v6771_v36 = vrot.slane %v6754_v33, 4  ;;  %v6774_v59 = vsel %vm346_vm4, %v6754_v33, %v6773_v37  ;;  %6903 = vst.msk [vmem:[%s12445_s17 + $0x40] sm:$0xff] %vm514_vm6, %v6776_v4  ;;  %v6784_v48 = vsel %vm346_vm4, %v6783_v44, %v12383_v62  ;;  %v6669_v62 = vpop.permute.xlu0 %6668 }
 0x915   : > { %v6780_v31 = vsel %vm346_vm4, %v6779_v40, %v6742_v45  ;;  %6895 = vst.msk [vmem:[%s12445_s17] sm:$0xff] %vm514_vm6, %v6768_v61  ;;  %v6790_v3 = vperm.slane %v6784_v48, %v13069_v63  ;;  %v6794_v5 = vperm.slane %v6786_v23, %v13069_v63  ;;  %v6814_v38 = vperm.slane %v6808_v28, %v13069_v63 }
 0x916   : > { %v6772_v19 = vsel %vm346_vm4, %v6771_v36, %v6730_v50  ;;  %6901 = vst.msk [vmem:[%s12445_s17 + $0x30] sm:$0xff] %vm514_vm6, %v6774_v59  ;;  %v6819_v14 = vrot.slane %v6669_v62, 4  ;;  %v6869_v50 = vrot.slane %v6818_v29, 4 }
 0x917   : > { %6899 = vst.msk [vmem:[%s12445_s17 + $0x20] sm:$0xff] %vm514_vm6, %v6772_v19  ;;  %v6833_v52 = vrot.slane %v6790_v3, 4  ;;  %v6845_v12 = vrot.slane %v6794_v5, 4  ;;  %v6832_v18 = vsel %vm346_vm4, %v6831_v0, %v6790_v3  ;;  %v6844_v17 = vsel %vm346_vm4, %v6843_v9, %v6794_v5 }
 0x918   : > { %6907 = vst.msk [vmem:[%s12445_s17 + $0x60] sm:$0xff] %vm514_vm6, %v6780_v31  ;;  %v6857_v54 = vrot.slane %v6814_v38, 4  ;;  %v6838_v7 = vperm.slane %v6832_v18, %v12738_v35  ;;  %v6850_v8 = vperm.slane %v6844_v17, %v12738_v35 }
 0x919   : > { %6909 = vst.msk [vmem:[%s12445_s17 + $0x70] sm:$0xff] %vm514_vm6, %v6782_v11  ;;  %v6834_v6 = vsel %vm346_vm4, %v6802_v43, %v6833_v52  ;;  %v6663_v47 = vpop.permute.xlu1 %6662  ;;  %v6846_v27 = vsel %vm346_vm4, %v12431_v26, %v6845_v12 }
 0x91a   : > { %v6842_v56 = vperm.slane %v6834_v6, %v12738_v35  ;;  %v6820_v51 = vsel %vm346_vm4, %v6819_v14, %v6663_v47  ;;  %v6821_v46 = vrot.slane %v6663_v47, 4  ;;  %v6854_v45 = vperm.slane %v6846_v27, %v12738_v35 }
 0x91b   : > { %v6826_v20 = vperm.slane %v6820_v51, %v13069_v63  ;;  %v6881_v26 = vrot.slane %v6838_v7, 4  ;;  %v6889_v37 = vrot.slane %v6850_v8, 4 }
 0x91c   : > { %v6822_v53 = vsel %vm346_vm4, %v6669_v62, %v6821_v46  ;;  %v6885_v10 = vrot.slane %v6842_v56, 4  ;;  %v6893_v24 = vrot.slane %v6854_v45, 4 }
 0x91d   : > { %v6830_v58 = vperm.slane %v6822_v53, %v13069_v63  ;;  %v6855_v43 = vrot.slane %v6826_v20, 4  ;;  %v6858_v13 = vsel %vm346_vm4, %v6826_v20, %v6857_v54 }
 0x91e   : > { %v6866_v25 = vperm.slane %v6858_v13, %v12738_v35 }
 0x91f   : > { %v6856_v49 = vsel %vm346_vm4, %v6855_v43, %v6814_v38  ;;  %v6867_v60 = vrot.slane %v6830_v58, 4  ;;  %v6870_v15 = vsel %vm346_vm4, %v6830_v58, %v6869_v50 }
 0x920   : > { %v6862_v63 = vperm.slane %v6856_v49, %v12738_v35  ;;  %v6878_v2 = vperm.slane %v6870_v15, %v12738_v35  ;;  %v6883_v16 = vrot.slane %v6866_v25, 4  ;;  %v6886_v41 = vsel %vm346_vm4, %v6866_v25, %v6885_v10 }
 0x921   : > { %v6868_v42 = vsel %vm346_vm4, %v6867_v60, %v6818_v29  ;;  %6902 = vst.msk [vmem:[%s12445_s17 + $0x38] sm:$0xff] %vm514_vm6, %v6886_v41 }
 0x922   : > { %v6874_v57 = vperm.slane %v6868_v42, %v12738_v35  ;;  %v6879_v22 = vrot.slane %v6862_v63, 4  ;;  %v6882_v32 = vsel %vm346_vm4, %v6862_v63, %v6881_v26  ;;  %v6884_v1 = vsel %vm346_vm4, %v6883_v16, %v6842_v56 }
 0x923   : > { %v6891_v55 = vrot.slane %v6878_v2, 4  ;;  %6898 = vst.msk [vmem:[%s12445_s17 + $0x18] sm:$0xff] %vm514_vm6, %v6882_v32  ;;  %v6894_v21 = vsel %vm346_vm4, %v6878_v2, %v6893_v24 }
 0x924   : > { %v6880_v33 = vsel %vm346_vm4, %v6879_v22, %v6838_v7  ;;  %v6887_v30 = vrot.slane %v6874_v57, 4  ;;  %v6890_v35 = vsel %vm346_vm4, %v6874_v57, %v6889_v37  ;;  %6900 = vst.msk [vmem:[%s12445_s17 + $0x28] sm:$0xff] %vm514_vm6, %v6884_v1 }
 0x925   : > { %v6892_v34 = vsel %vm346_vm4, %v6891_v55, %v6854_v45  ;;  %6896 = vst.msk [vmem:[%s12445_s17 + $0x8] sm:$0xff] %vm514_vm6, %v6880_v33 }
 0x926   : > { %v6888_v44 = vsel %vm346_vm4, %v6887_v30, %v6850_v8  ;;  %6906 = vst.msk [vmem:[%s12445_s17 + $0x58] sm:$0xff] %vm514_vm6, %v6890_v35 }
 0x927   : > { %6904 = vst.msk [vmem:[%s12445_s17 + $0x48] sm:$0xff] %vm514_vm6, %v6888_v44 }
 0x928   : > { %6908 = vst.msk [vmem:[%s12445_s17 + $0x68] sm:$0xff] %vm514_vm6, %v6892_v34 }
 0x929   : > { %6910 = vst.msk [vmem:[%s12445_s17 + $0x78] sm:$0xff] %vm514_vm6, %v6894_v21 }
 0x92a   : > { %7838 = shalt.err (!%p7835_p4)
}
 0x92b   : > { %s7894_s12 = smov 128   ;;  %s7895_s16 = smov 8  }
 0x92c   : > { %7088 = dma.vmem_to_hbm [thread:$0]  (%p7976_p11), %s6925_s9, 2048, %s6927_s10, %s6912_s29, %s7894_s12, %s7894_s12, %s7895_s16  }
 0x92d PF: > { %s6941_s17 = sand.u32 1, %s7865_s18   ;;  %p13070_p7 = scmp.ge.s32.totalorder %s7877_s21, 2 }
 0x92e   : > { %s6942_s26 = scalar_lea.sflag [#allocation4], %s6941_s17 }
 0x92f   : > { %p7095_p5 = pnand %p13070_p7, %p7980_p12 }
 0x931   : > { %p7096_p8 = pneg %p7095_p5 }
 0x933   : > { %7860 = dma.done.wait (%p7096_p8), %s6942_s26, 2048  }
 0x934   : > { %7862 = vsyncadd (%p7096_p8), %s6942_s26, 4294965248  ;;  %p18_p10 = scmp.ge.s32.totalorder %s7951_s24, 4   ;;  %s13071_s18 = smov %s7869_s19 }
 0x935   : > { %s13072_s19 = smov %s7873_s20  ;;  %s13073_s20 = smov %s7963_s27 }
 0x936   : > { %s13074_s21 = smov %s7951_s24  ;;  %20 = sbr.rel (!%p18_p10) target bundleno = 5 (0x5), region = 101 }
 0x93b   :  { %6948 = vsyncpa [#allocation3], 1 }
 0x93c   :  { %6950 = vsyncpa [#allocation3 + $0x1], 1 }
 0x93d   :  { %6951 = vsyncpa [#allocation4], 1 }
 0x93e   :  { %6953 = vsyncpa [#allocation4 + $0x1], 1 }

</bundles_post_ra>
